<compile_context>
chip_gen: v7x
topology: tpu7x:2x2x1
jax: 0.10.0
libtpu: 0.0.40
codegen_flags: <defaults>
</compile_context>

<pallas_src>
import functools

import jax
import jax.numpy as jnp
from jax import lax
from jax.experimental import pallas as pl
from jax.experimental.pallas import tpu as pltpu

LANE = 128          # TPU lane width: every channel / hidden dim is zero-padded to this
STATE_ROWS = 8      # LSTM state carried as 8 identical sublane rows (one full sublane tile)


# ===================================================================== fused forward kernel
def tcn_lstm_kernel(*refs, meta):
    """Fused TemporalConvNet forward for ONE batch element (grid axis = batch).

    refs layout (inputs, output, scratch — parsed with the static `meta`):
      x (1, L, LANE), h0 (1, 2, LANE), c0 (1, 2, LANE),
      per block: w1 (k*LANE, LANE), b1 (1, LANE), w2, b2, [wd (LANE, LANE), bd], s3, b3,
      LSTM/FC: wih0, whh0, bih0, bhh0, wih1, whh1, bih1, bhh1, wfc1, bfc1, wfc2, bfc2,
      out (1, 8, LANE),
      scratch: pad_scr, xp0_scr, xp1_scr, hseq_scr.
    """
    L = meta["seq_len"]
    k = meta["kernel_size"]
    blocks = meta["blocks"]                      # tuple of (dilation, has_downsample)
    max_pad = (k - 1) * max(d for d, _ in blocks)
    f32 = jnp.float32

    it = iter(refs)
    x_ref, h0_ref, c0_ref = next(it), next(it), next(it)
    blk_refs = []
    for _, has_ds in blocks:
        r = {"w1": next(it), "b1": next(it), "w2": next(it), "b2": next(it)}
        if has_ds:
            r["wd"], r["bd"] = next(it), next(it)
        r["s3"], r["b3"] = next(it), next(it)
        blk_refs.append(r)
    (wih0, whh0, bih0, bhh0, wih1, whh1, bih1, bhh1,
     wfc1, bfc1, wfc2, bfc2) = (next(it) for _ in range(12))
    o_ref = next(it)
    pad_scr, xp0_scr, xp1_scr, hseq_scr = next(it), next(it), next(it), next(it)
    assert next(it, None) is None, "ref parse / arg-list mismatch"

    # ---------------- TCN blocks: causal dilated conv via halo-buffer im2col -------------
    pad_scr[...] = jnp.zeros_like(pad_scr)       # zero the causal halo once

    def causal_cols(inp, d):
        # col[t] = [inp[t - (k-1-j)*d] for j in 0..k-1], zeros before the sequence start.
        pad_scr[max_pad:max_pad + L, :] = inp
        taps = [pad_scr[max_pad - (k - 1 - j) * d: max_pad - (k - 1 - j) * d + L, :]
                for j in range(k)]
        return jnp.concatenate(taps, axis=-1)    # (L, k*LANE)

    h = x_ref[0].astype(f32)                     # (L, LANE) channels-last
    for (d, has_ds), r in zip(blocks, blk_refs):
        # conv1 -> chomp (causal) -> bn1 (folded) -> relu -> dropout(identity)
        col1 = causal_cols(h, d)
        h1 = jnp.maximum(
            jnp.dot(col1, r["w1"][...], preferred_element_type=f32) + r["b1"][...], 0.0)
        # conv2 -> chomp -> bn2 (folded) -> relu -> dropout(identity)
        col2 = causal_cols(h1, d)
        h2 = jnp.maximum(
            jnp.dot(col2, r["w2"][...], preferred_element_type=f32) + r["b2"][...], 0.0)
        # residual branch (1x1 conv only when channel counts differ)
        if has_ds:
            res = jnp.dot(h, r["wd"][...], preferred_element_type=f32) + r["bd"][...]
        else:
            res = h
        # residual add -> bn3 (eval-mode affine) -> relu
        h = jnp.maximum((h2 + res) * r["s3"][...] + r["b3"][...], 0.0)

    feat = h                                     # (L, LANE) = temp_feat.permute(0,2,1)

    # ---------------- 2-layer LSTM (batch_first), input projections hoisted --------------
    def lstm_step(xrow, hprev, cprev, whh, bhh):
        gates = xrow + jnp.dot(hprev, whh, preferred_element_type=f32) + bhh  # (8, 4*LANE)
        i = jax.nn.sigmoid(gates[:, 0 * LANE:1 * LANE])
        f = jax.nn.sigmoid(gates[:, 1 * LANE:2 * LANE])
        g = jnp.tanh(gates[:, 2 * LANE:3 * LANE])
        o = jax.nn.sigmoid(gates[:, 3 * LANE:4 * LANE])
        cnew = f * cprev + i * g
        hnew = o * jnp.tanh(cnew)
        return hnew, cnew

    h0 = h0_ref[0]                               # (2, LANE)
    c0 = c0_ref[0]

    # layer 0: x @ W_ih hoisted out of the recurrence as one (L,LANE)x(LANE,4*LANE) matmul
    xp0_scr[...] = jnp.dot(feat, wih0[...], preferred_element_type=f32) + bih0[...]
    whh0_v, bhh0_v = whh0[...], bhh0[...]
    h_st = jnp.broadcast_to(h0[0:1, :], (STATE_ROWS, LANE))
    c_st = jnp.broadcast_to(c0[0:1, :], (STATE_ROWS, LANE))

    def body0(t, carry):
        hp, cp = carry
        hn, cn = lstm_step(xp0_scr[pl.ds(t, 1), :], hp, cp, whh0_v, bhh0_v)
        hseq_scr[pl.ds(t, 1), :] = hn[0:1, :]
        return hn, cn

    h_st, c_st = lax.fori_loop(0, L, body0, (h_st, c_st), unroll=True)

    # layer 1: its input projection is also hoisted (uses the full layer-0 output sequence)
    xp1_scr[...] = jnp.dot(hseq_scr[...], wih1[...], preferred_element_type=f32) + bih1[...]
    whh1_v, bhh1_v = whh1[...], bhh1[...]
    h_st = jnp.broadcast_to(h0[1:2, :], (STATE_ROWS, LANE))
    c_st = jnp.broadcast_to(c0[1:2, :], (STATE_ROWS, LANE))

    def body1(t, carry):
        hp, cp = carry
        return lstm_step(xp1_scr[pl.ds(t, 1), :], hp, cp, whh1_v, bhh1_v)

    h_st, _ = lax.fori_loop(0, L, body1, (h_st, c_st), unroll=True)

    # ---------------- fc1 -> relu -> fc2 on the last timestep (Output[:, -1, :]) ---------
    z = jnp.maximum(jnp.dot(h_st, wfc1[...], preferred_element_type=f32) + bfc1[...], 0.0)
    out = jnp.dot(z, wfc2[...], preferred_element_type=f32) + bfc2[...]      # (8, LANE)
    o_ref[...] = out.reshape(1, STATE_ROWS, LANE)    # lane-dense store; real value at [0,0]


# ===================================================================== wrapper / pallas_call
def tcn_lstm_forward(x, params, *, meta):
    """x: (B, seq_len, num_inputs) -> (B, 1)  (matches TemporalConvNet.forward)."""
    B, L, cin = x.shape
    assert L == meta["seq_len"]
    k = meta["kernel_size"]
    max_pad = (k - 1) * max(d for d, _ in meta["blocks"])
    pad_rows = ((max_pad + L + 7) // 8) * 8

    xpad = jnp.zeros((B, L, LANE), jnp.float32).at[:, :, :cin].set(x.astype(jnp.float32))

    args = [xpad, params["head"]["h0"], params["head"]["c0"]]
    in_specs = [
        pl.BlockSpec((1, L, LANE), lambda b: (b, 0, 0)),
        pl.BlockSpec((1, 2, LANE), lambda b: (b, 0, 0)),
        pl.BlockSpec((1, 2, LANE), lambda b: (b, 0, 0)),
    ]

    def add_full(a):                                  # replicated full-array operand
        args.append(a)
        in_specs.append(pl.BlockSpec(a.shape, lambda b, _nd=a.ndim: (0,) * _nd))

    for bp, (_, has_ds) in zip(params["blocks"], meta["blocks"]):
        add_full(bp["w1"]); add_full(bp["b1"])
        add_full(bp["w2"]); add_full(bp["b2"])
        if has_ds:                                    # skip unused downsample weights
            add_full(bp["wd"]); add_full(bp["bd"])
        add_full(bp["s3"]); add_full(bp["b3"])
    for name in ("wih0", "whh0", "bih0", "bhh0", "wih1", "whh1", "bih1", "bhh1",
                 "wfc1", "bfc1", "wfc2", "bfc2"):
        add_full(params["head"][name])

    out = pl.pallas_call(
        functools.partial(tcn_lstm_kernel, meta=meta),
        out_shape=jax.ShapeDtypeStruct((B, STATE_ROWS, LANE), jnp.float32),
        grid=(B,),
        in_specs=in_specs,
        out_specs=pl.BlockSpec((1, STATE_ROWS, LANE), lambda b: (b, 0, 0)),
        scratch_shapes=[
            pltpu.VMEM((pad_rows, LANE), jnp.float32),     # zero-halo causal conv buffer
            pltpu.VMEM((L, 4 * LANE), jnp.float32),        # layer-0 hoisted input proj
            pltpu.VMEM((L, 4 * LANE), jnp.float32),        # layer-1 hoisted input proj
            pltpu.VMEM((L, LANE), jnp.float32),            # layer-0 output sequence
        ],
        compiler_params=pltpu.CompilerParams(dimension_semantics=("parallel",)),
    )(*args)
    return out[:, 0, 0:1]                                  # (B, 1)


# ===================================================================== parameters
def init_raw_params(key, cfg, batch):
    """Synthetic parameters with the same shapes / init style as the PyTorch module."""
    num_inputs = cfg["num_inputs"]
    num_channels = cfg["num_channels"]
    k = cfg["kernel_size"]
    H = cfg["hidden_size"]
    keys = iter(jax.random.split(key, 64))

    blocks = []
    for i, cout in enumerate(num_channels):
        cin = num_inputs if i == 0 else num_channels[i - 1]
        blk = {
            # conv weights stored as (k, cin, cout): w[j,c,o] multiplies x[t-(k-1-j)*d, c]
            "w1": 0.01 * jax.random.normal(next(keys), (k, cin, cout), jnp.float32),
            "b1": 0.01 * jax.random.normal(next(keys), (cout,), jnp.float32),
            "w2": 0.01 * jax.random.normal(next(keys), (k, cout, cout), jnp.float32),
            "b2": 0.01 * jax.random.normal(next(keys), (cout,), jnp.float32),
        }
        if cin != cout:
            blk["wd"] = 0.01 * jax.random.normal(next(keys), (cin, cout), jnp.float32)
            blk["bd"] = 0.01 * jax.random.normal(next(keys), (cout,), jnp.float32)
        # eval-mode BatchNorm1d state (mean=0, var=1, gamma=1, beta=0)
        for bn in ("bn1", "bn2", "bn3"):
            blk[bn + "_gamma"] = jnp.ones((cout,), jnp.float32)
            blk[bn + "_beta"] = jnp.zeros((cout,), jnp.float32)
            blk[bn + "_mean"] = jnp.zeros((cout,), jnp.float32)
            blk[bn + "_var"] = jnp.ones((cout,), jnp.float32)
        blocks.append(blk)

    c_last = num_channels[-1]
    u = 1.0 / jnp.sqrt(jnp.float32(H))

    def uni(kk, shape):
        return jax.random.uniform(kk, shape, jnp.float32, -u, u)

    head = {
        "wih0": uni(next(keys), (c_last, 4 * H)), "whh0": uni(next(keys), (H, 4 * H)),
        "bih0": uni(next(keys), (4 * H,)),        "bhh0": uni(next(keys), (4 * H,)),
        "wih1": uni(next(keys), (H, 4 * H)),      "whh1": uni(next(keys), (H, 4 * H)),
        "bih1": uni(next(keys), (4 * H,)),        "bhh1": uni(next(keys), (4 * H,)),
        "wfc1": uni(next(keys), (H, H // 2)),     "bfc1": uni(next(keys), (H // 2,)),
        "wfc2": uni(next(keys), (H // 2, 1)),     "bfc2": uni(next(keys), (1,)),
        "h0": jax.random.normal(next(keys), (2, batch, H), jnp.float32),
        "c0": jax.random.normal(next(keys), (2, batch, H), jnp.float32),
    }
    return {"blocks": blocks, "head": head}


def fold_and_pad_params(raw, cfg, meta):
    """Fold eval-mode BN into conv weights, build im2col weight slabs, pad to 128 lanes."""
    k = cfg["kernel_size"]
    H = cfg["hidden_size"]
    eps = 1e-5

    def bn_affine(blk, name):
        s = blk[name + "_gamma"] / jnp.sqrt(blk[name + "_var"] + eps)
        t = blk[name + "_beta"] - blk[name + "_mean"] * s
        return s, t

    def pad_row(v):
        return jnp.zeros((1, LANE), jnp.float32).at[0, : v.shape[0]].set(v)

    blocks = []
    for blk, (_, has_ds) in zip(raw["blocks"], meta["blocks"]):
        cin = blk["w1"].shape[1]
        cout = blk["w1"].shape[2]
        s1, t1 = bn_affine(blk, "bn1")
        s2, t2 = bn_affine(blk, "bn2")
        s3, t3 = bn_affine(blk, "bn3")

        def im2col_weight(w, s):
            cin_w = w.shape[1]
            wp = jnp.zeros((k * LANE, LANE), jnp.float32)
            for j in range(k):
                wp = wp.at[j * LANE:j * LANE + cin_w, :cout].set(w[j] * s[None, :])
            return wp

        p = {
            "w1": im2col_weight(blk["w1"], s1),
            "b1": pad_row(blk["b1"] * s1 + t1),
            "w2": im2col_weight(blk["w2"], s2),
            "b2": pad_row(blk["b2"] * s2 + t2),
            "s3": pad_row(s3),               # padded lanes get scale 0 -> stay exactly 0
            "b3": pad_row(t3),
        }
        if has_ds:
            p["wd"] = jnp.zeros((LANE, LANE), jnp.float32).at[:cin, :cout].set(blk["wd"])
            p["bd"] = pad_row(blk["bd"])
        blocks.append(p)

    def pad_gate_w(w):                       # (in, 4H) -> (LANE, 4*LANE), gate-aligned
        in_dim = w.shape[0]
        wp = jnp.zeros((LANE, 4 * LANE), jnp.float32)
        for g in range(4):
            wp = wp.at[:in_dim, g * LANE:g * LANE + H].set(w[:, g * H:(g + 1) * H])
        return wp

    def pad_gate_b(b):
        bp = jnp.zeros((1, 4 * LANE), jnp.float32)
        for g in range(4):
            bp = bp.at[0, g * LANE:g * LANE + H].set(b[g * H:(g + 1) * H])
        return bp

    def pad_mat(w):
        r, c = w.shape
        return jnp.zeros((LANE, LANE), jnp.float32).at[:r, :c].set(w)

    def pad_state(s):                        # (layers, B, H) -> (B, layers, LANE)
        nl, b, h = s.shape
        return jnp.zeros((b, nl, LANE), jnp.float32).at[:, :, :h].set(
            jnp.transpose(s, (1, 0, 2)))

    hd = raw["head"]
    head = {
        "wih0": pad_gate_w(hd["wih0"]), "whh0": pad_gate_w(hd["whh0"]),
        "bih0": pad_gate_b(hd["bih0"]), "bhh0": pad_gate_b(hd["bhh0"]),
        "wih1": pad_gate_w(hd["wih1"]), "whh1": pad_gate_w(hd["whh1"]),
        "bih1": pad_gate_b(hd["bih1"]), "bhh1": pad_gate_b(hd["bhh1"]),
        "wfc1": pad_mat(hd["wfc1"]), "bfc1": pad_row(hd["bfc1"]),
        "wfc2": pad_mat(hd["wfc2"]), "bfc2": pad_row(hd["bfc2"]),
        "h0": pad_state(hd["h0"]), "c0": pad_state(hd["c0"]),
    }
    return {"blocks": blocks, "head": head}


# ===================================================================== main
if __name__ == "__main__":
    cfg = dict(seq_len=16, num_direction=1, hidden_size=32, num_layers=2,
               num_inputs=4, num_channels=[8, 16], kernel_size=2)
    B = 2

    # Static (non-traced) per-block metadata: (dilation, has_downsample).
    blocks_meta = []
    for i, cout in enumerate(cfg["num_channels"]):
        cin = cfg["num_inputs"] if i == 0 else cfg["num_channels"][i - 1]
        blocks_meta.append((2 ** i, cin != cout))
    meta = dict(seq_len=cfg["seq_len"], kernel_size=cfg["kernel_size"],
                blocks=tuple(blocks_meta))

    key = jax.random.PRNGKey(0)
    kx, kp = jax.random.split(key)
    x = jax.random.normal(kx, (B, cfg["seq_len"], cfg["num_inputs"]), jnp.float32)

    raw = init_raw_params(kp, cfg, B)
    params = fold_and_pad_params(raw, cfg, meta)

    fwd = jax.jit(functools.partial(tcn_lstm_forward, meta=meta))
    out = jax.block_until_ready(fwd(x, params))

    assert out.shape == (B, 1), out.shape
    assert bool(jnp.all(jnp.isfinite(out)))
    print("KERNEL_OK")
</pallas_src>

<mosaic_0001>
module attributes {stable_mosaic.version = 11 : i64} {
  func.func @tcn_lstm_kernel(%arg0: i32, %arg1: memref<1x16x128xf32, #tpu.memory_space<vmem>>, %arg2: memref<1x2x128xf32, #tpu.memory_space<vmem>>, %arg3: memref<1x2x128xf32, #tpu.memory_space<vmem>>, %arg4: memref<256x128xf32, #tpu.memory_space<vmem>>, %arg5: memref<1x128xf32, #tpu.memory_space<vmem>>, %arg6: memref<256x128xf32, #tpu.memory_space<vmem>>, %arg7: memref<1x128xf32, #tpu.memory_space<vmem>>, %arg8: memref<128x128xf32, #tpu.memory_space<vmem>>, %arg9: memref<1x128xf32, #tpu.memory_space<vmem>>, %arg10: memref<1x128xf32, #tpu.memory_space<vmem>>, %arg11: memref<1x128xf32, #tpu.memory_space<vmem>>, %arg12: memref<256x128xf32, #tpu.memory_space<vmem>>, %arg13: memref<1x128xf32, #tpu.memory_space<vmem>>, %arg14: memref<256x128xf32, #tpu.memory_space<vmem>>, %arg15: memref<1x128xf32, #tpu.memory_space<vmem>>, %arg16: memref<128x128xf32, #tpu.memory_space<vmem>>, %arg17: memref<1x128xf32, #tpu.memory_space<vmem>>, %arg18: memref<1x128xf32, #tpu.memory_space<vmem>>, %arg19: memref<1x128xf32, #tpu.memory_space<vmem>>, %arg20: memref<128x512xf32, #tpu.memory_space<vmem>>, %arg21: memref<128x512xf32, #tpu.memory_space<vmem>>, %arg22: memref<1x512xf32, #tpu.memory_space<vmem>>, %arg23: memref<1x512xf32, #tpu.memory_space<vmem>>, %arg24: memref<128x512xf32, #tpu.memory_space<vmem>>, %arg25: memref<128x512xf32, #tpu.memory_space<vmem>>, %arg26: memref<1x512xf32, #tpu.memory_space<vmem>>, %arg27: memref<1x512xf32, #tpu.memory_space<vmem>>, %arg28: memref<128x128xf32, #tpu.memory_space<vmem>>, %arg29: memref<1x128xf32, #tpu.memory_space<vmem>>, %arg30: memref<128x128xf32, #tpu.memory_space<vmem>>, %arg31: memref<1x128xf32, #tpu.memory_space<vmem>>, %arg32: memref<1x8x128xf32, #tpu.memory_space<vmem>>, %arg33: memref<24x128xf32, #tpu.memory_space<vmem>>, %arg34: memref<16x512xf32, #tpu.memory_space<vmem>>, %arg35: memref<16x512xf32, #tpu.memory_space<vmem>>, %arg36: memref<16x128xf32, #tpu.memory_space<vmem>>) attributes {dimension_semantics = [#tpu.dimension_semantics<parallel>], iteration_bounds = array<i64: 2>, scalar_prefetch = 0 : i64, scratch_operands = 4 : i64, tpu.core_type = #tpu.core_type<tc>, window_params = [{transform_indices = @transform_0, window_bounds = array<i64: 1, 16, 128>}, {transform_indices = @transform_1, window_bounds = array<i64: 1, 2, 128>}, {transform_indices = @transform_2, window_bounds = array<i64: 1, 2, 128>}, {pipeline_mode = #tpu.pipeline_mode<synchronous>, transform_indices = @transform_3, window_bounds = array<i64: 256, 128>}, {pipeline_mode = #tpu.pipeline_mode<synchronous>, transform_indices = @transform_4, window_bounds = array<i64: 1, 128>}, {pipeline_mode = #tpu.pipeline_mode<synchronous>, transform_indices = @transform_5, window_bounds = array<i64: 256, 128>}, {pipeline_mode = #tpu.pipeline_mode<synchronous>, transform_indices = @transform_6, window_bounds = array<i64: 1, 128>}, {pipeline_mode = #tpu.pipeline_mode<synchronous>, transform_indices = @transform_7, window_bounds = array<i64: 128, 128>}, {pipeline_mode = #tpu.pipeline_mode<synchronous>, transform_indices = @transform_8, window_bounds = array<i64: 1, 128>}, {pipeline_mode = #tpu.pipeline_mode<synchronous>, transform_indices = @transform_9, window_bounds = array<i64: 1, 128>}, {pipeline_mode = #tpu.pipeline_mode<synchronous>, transform_indices = @transform_10, window_bounds = array<i64: 1, 128>}, {pipeline_mode = #tpu.pipeline_mode<synchronous>, transform_indices = @transform_11, window_bounds = array<i64: 256, 128>}, {pipeline_mode = #tpu.pipeline_mode<synchronous>, transform_indices = @transform_12, window_bounds = array<i64: 1, 128>}, {pipeline_mode = #tpu.pipeline_mode<synchronous>, transform_indices = @transform_13, window_bounds = array<i64: 256, 128>}, {pipeline_mode = #tpu.pipeline_mode<synchronous>, transform_indices = @transform_14, window_bounds = array<i64: 1, 128>}, {pipeline_mode = #tpu.pipeline_mode<synchronous>, transform_indices = @transform_15, window_bounds = array<i64: 128, 128>}, {pipeline_mode = #tpu.pipeline_mode<synchronous>, transform_indices = @transform_16, window_bounds = array<i64: 1, 128>}, {pipeline_mode = #tpu.pipeline_mode<synchronous>, transform_indices = @transform_17, window_bounds = array<i64: 1, 128>}, {pipeline_mode = #tpu.pipeline_mode<synchronous>, transform_indices = @transform_18, window_bounds = array<i64: 1, 128>}, {pipeline_mode = #tpu.pipeline_mode<synchronous>, transform_indices = @transform_19, window_bounds = array<i64: 128, 512>}, {pipeline_mode = #tpu.pipeline_mode<synchronous>, transform_indices = @transform_20, window_bounds = array<i64: 128, 512>}, {pipeline_mode = #tpu.pipeline_mode<synchronous>, transform_indices = @transform_21, window_bounds = array<i64: 1, 512>}, {pipeline_mode = #tpu.pipeline_mode<synchronous>, transform_indices = @transform_22, window_bounds = array<i64: 1, 512>}, {pipeline_mode = #tpu.pipeline_mode<synchronous>, transform_indices = @transform_23, window_bounds = array<i64: 128, 512>}, {pipeline_mode = #tpu.pipeline_mode<synchronous>, transform_indices = @transform_24, window_bounds = array<i64: 128, 512>}, {pipeline_mode = #tpu.pipeline_mode<synchronous>, transform_indices = @transform_25, window_bounds = array<i64: 1, 512>}, {pipeline_mode = #tpu.pipeline_mode<synchronous>, transform_indices = @transform_26, window_bounds = array<i64: 1, 512>}, {pipeline_mode = #tpu.pipeline_mode<synchronous>, transform_indices = @transform_27, window_bounds = array<i64: 128, 128>}, {pipeline_mode = #tpu.pipeline_mode<synchronous>, transform_indices = @transform_28, window_bounds = array<i64: 1, 128>}, {pipeline_mode = #tpu.pipeline_mode<synchronous>, transform_indices = @transform_29, window_bounds = array<i64: 128, 128>}, {pipeline_mode = #tpu.pipeline_mode<synchronous>, transform_indices = @transform_30, window_bounds = array<i64: 1, 128>}, {transform_indices = @transform_31, window_bounds = array<i64: 1, 8, 128>}]} {
    %cst = arith.constant 0.000000e+00 : f32
    %0 = vector.broadcast %cst : f32 to vector<24x128xf32>
    %c0 = arith.constant 0 : index
    %c0_0 = arith.constant 0 : index
    %1 = vector.load %arg33[%c0, %c0_0] : memref<24x128xf32, #tpu.memory_space<vmem>>, vector<24x128xf32>
    tpu.vector_store %arg33[%c0, %c0_0], %0 {strides = array<i32>} : memref<24x128xf32, #tpu.memory_space<vmem>>, vector<24x128xf32>,
    %c0_1 = arith.constant 0 : index
    %c0_2 = arith.constant 0 : index
    %c0_3 = arith.constant 0 : index
    %2 = vector.load %arg1[%c0_1, %c0_2, %c0_3] : memref<1x16x128xf32, #tpu.memory_space<vmem>>, vector<1x16x128xf32>
    %3 = vector.shape_cast %2 : vector<1x16x128xf32> to vector<16x128xf32>
    %c2 = arith.constant 2 : index
    %c0_4 = arith.constant 0 : index
    %4 = vector.load %arg33[%c2, %c0_4] : memref<24x128xf32, #tpu.memory_space<vmem>>, vector<16x128xf32>
    tpu.vector_store %arg33[%c2, %c0_4], %3 {strides = array<i32>} : memref<24x128xf32, #tpu.memory_space<vmem>>, vector<16x128xf32>,
    %c1 = arith.constant 1 : index
    %c0_5 = arith.constant 0 : index
    %5 = vector.load %arg33[%c1, %c0_5] : memref<24x128xf32, #tpu.memory_space<vmem>>, vector<16x128xf32>
    %c2_6 = arith.constant 2 : index
    %c0_7 = arith.constant 0 : index
    %6 = vector.load %arg33[%c2_6, %c0_7] : memref<24x128xf32, #tpu.memory_space<vmem>>, vector<16x128xf32>
    %7 = tpu.concatenate %5, %6 in 1 : vector<16x128xf32>, vector<16x128xf32> -> vector<16x256xf32>
    %c0_8 = arith.constant 0 : index
    %c0_9 = arith.constant 0 : index
    %8 = vector.load %arg4[%c0_8, %c0_9] : memref<256x128xf32, #tpu.memory_space<vmem>>, vector<256x128xf32>
    %cst_10 = arith.constant dense<0.000000e+00> : vector<16x128xf32>
    %9 = tpu.matmul %7, %8, %cst_10 {dimension_numbers = #tpu.dot_dimension_numbers<[1], [0], [0], [1], [0, 0, 1, 1], [], []>} : vector<16x256xf32>, vector<256x128xf32>, vector<16x128xf32> -> vector<16x128xf32>
    %c0_11 = arith.constant 0 : index
    %c0_12 = arith.constant 0 : index
    %10 = vector.load %arg5[%c0_11, %c0_12] : memref<1x128xf32, #tpu.memory_space<vmem>>, vector<1x128xf32>
    %11 = vector.broadcast %10 : vector<1x128xf32> to vector<16x128xf32>
    %12 = arith.addf %9, %11 : vector<16x128xf32>
    %cst_13 = arith.constant 0.000000e+00 : f32
    %13 = vector.broadcast %cst_13 : f32 to vector<16x128xf32>
    %14 = arith.maximumf %12, %13 : vector<16x128xf32>
    %c2_14 = arith.constant 2 : index
    %c0_15 = arith.constant 0 : index
    %15 = vector.load %arg33[%c2_14, %c0_15] : memref<24x128xf32, #tpu.memory_space<vmem>>, vector<16x128xf32>
    tpu.vector_store %arg33[%c2_14, %c0_15], %14 {strides = array<i32>} : memref<24x128xf32, #tpu.memory_space<vmem>>, vector<16x128xf32>,
    %c1_16 = arith.constant 1 : index
    %c0_17 = arith.constant 0 : index
    %16 = vector.load %arg33[%c1_16, %c0_17] : memref<24x128xf32, #tpu.memory_space<vmem>>, vector<16x128xf32>
    %c2_18 = arith.constant 2 : index
    %c0_19 = arith.constant 0 : index
    %17 = vector.load %arg33[%c2_18, %c0_19] : memref<24x128xf32, #tpu.memory_space<vmem>>, vector<16x128xf32>
    %18 = tpu.concatenate %16, %17 in 1 : vector<16x128xf32>, vector<16x128xf32> -> vector<16x256xf32>
    %c0_20 = arith.constant 0 : index
    %c0_21 = arith.constant 0 : index
    %19 = vector.load %arg6[%c0_20, %c0_21] : memref<256x128xf32, #tpu.memory_space<vmem>>, vector<256x128xf32>
    %cst_22 = arith.constant dense<0.000000e+00> : vector<16x128xf32>
    %20 = tpu.matmul %18, %19, %cst_22 {dimension_numbers = #tpu.dot_dimension_numbers<[1], [0], [0], [1], [0, 0, 1, 1], [], []>} : vector<16x256xf32>, vector<256x128xf32>, vector<16x128xf32> -> vector<16x128xf32>
    %c0_23 = arith.constant 0 : index
    %c0_24 = arith.constant 0 : index
    %21 = vector.load %arg7[%c0_23, %c0_24] : memref<1x128xf32, #tpu.memory_space<vmem>>, vector<1x128xf32>
    %22 = vector.broadcast %21 : vector<1x128xf32> to vector<16x128xf32>
    %23 = arith.addf %20, %22 : vector<16x128xf32>
    %cst_25 = arith.constant 0.000000e+00 : f32
    %24 = vector.broadcast %cst_25 : f32 to vector<16x128xf32>
    %25 = arith.maximumf %23, %24 : vector<16x128xf32>
    %c0_26 = arith.constant 0 : index
    %c0_27 = arith.constant 0 : index
    %26 = vector.load %arg8[%c0_26, %c0_27] : memref<128x128xf32, #tpu.memory_space<vmem>>, vector<128x128xf32>
    %cst_28 = arith.constant dense<0.000000e+00> : vector<16x128xf32>
    %27 = tpu.matmul %3, %26, %cst_28 {dimension_numbers = #tpu.dot_dimension_numbers<[1], [0], [0], [1], [0, 0, 1, 1], [], []>} : vector<16x128xf32>, vector<128x128xf32>, vector<16x128xf32> -> vector<16x128xf32>
    %c0_29 = arith.constant 0 : index
    %c0_30 = arith.constant 0 : index
    %28 = vector.load %arg9[%c0_29, %c0_30] : memref<1x128xf32, #tpu.memory_space<vmem>>, vector<1x128xf32>
    %29 = vector.broadcast %28 : vector<1x128xf32> to vector<16x128xf32>
    %30 = arith.addf %27, %29 : vector<16x128xf32>
    %31 = arith.addf %25, %30 : vector<16x128xf32>
    %c0_31 = arith.constant 0 : index
    %c0_32 = arith.constant 0 : index
    %32 = vector.load %arg10[%c0_31, %c0_32] : memref<1x128xf32, #tpu.memory_space<vmem>>, vector<1x128xf32>
    %33 = vector.broadcast %32 : vector<1x128xf32> to vector<16x128xf32>
    %34 = arith.mulf %31, %33 : vector<16x128xf32>
    %c0_33 = arith.constant 0 : index
    %c0_34 = arith.constant 0 : index
    %35 = vector.load %arg11[%c0_33, %c0_34] : memref<1x128xf32, #tpu.memory_space<vmem>>, vector<1x128xf32>
    %36 = vector.broadcast %35 : vector<1x128xf32> to vector<16x128xf32>
    %37 = arith.addf %34, %36 : vector<16x128xf32>
    %cst_35 = arith.constant 0.000000e+00 : f32
    %38 = vector.broadcast %cst_35 : f32 to vector<16x128xf32>
    %39 = arith.maximumf %37, %38 : vector<16x128xf32>
    %c2_36 = arith.constant 2 : index
    %c0_37 = arith.constant 0 : index
    %40 = vector.load %arg33[%c2_36, %c0_37] : memref<24x128xf32, #tpu.memory_space<vmem>>, vector<16x128xf32>
    tpu.vector_store %arg33[%c2_36, %c0_37], %39 {strides = array<i32>} : memref<24x128xf32, #tpu.memory_space<vmem>>, vector<16x128xf32>,
    %c0_38 = arith.constant 0 : index
    %c0_39 = arith.constant 0 : index
    %41 = vector.load %arg33[%c0_38, %c0_39] : memref<24x128xf32, #tpu.memory_space<vmem>>, vector<16x128xf32>
    %c2_40 = arith.constant 2 : index
    %c0_41 = arith.constant 0 : index
    %42 = vector.load %arg33[%c2_40, %c0_41] : memref<24x128xf32, #tpu.memory_space<vmem>>, vector<16x128xf32>
    %43 = tpu.concatenate %41, %42 in 1 : vector<16x128xf32>, vector<16x128xf32> -> vector<16x256xf32>
    %c0_42 = arith.constant 0 : index
    %c0_43 = arith.constant 0 : index
    %44 = vector.load %arg12[%c0_42, %c0_43] : memref<256x128xf32, #tpu.memory_space<vmem>>, vector<256x128xf32>
    %cst_44 = arith.constant dense<0.000000e+00> : vector<16x128xf32>
    %45 = tpu.matmul %43, %44, %cst_44 {dimension_numbers = #tpu.dot_dimension_numbers<[1], [0], [0], [1], [0, 0, 1, 1], [], []>} : vector<16x256xf32>, vector<256x128xf32>, vector<16x128xf32> -> vector<16x128xf32>
    %c0_45 = arith.constant 0 : index
    %c0_46 = arith.constant 0 : index
    %46 = vector.load %arg13[%c0_45, %c0_46] : memref<1x128xf32, #tpu.memory_space<vmem>>, vector<1x128xf32>
    %47 = vector.broadcast %46 : vector<1x128xf32> to vector<16x128xf32>
    %48 = arith.addf %45, %47 : vector<16x128xf32>
    %cst_47 = arith.constant 0.000000e+00 : f32
    %49 = vector.broadcast %cst_47 : f32 to vector<16x128xf32>
    %50 = arith.maximumf %48, %49 : vector<16x128xf32>
    %c2_48 = arith.constant 2 : index
    %c0_49 = arith.constant 0 : index
    %51 = vector.load %arg33[%c2_48, %c0_49] : memref<24x128xf32, #tpu.memory_space<vmem>>, vector<16x128xf32>
    tpu.vector_store %arg33[%c2_48, %c0_49], %50 {strides = array<i32>} : memref<24x128xf32, #tpu.memory_space<vmem>>, vector<16x128xf32>,
    %c0_50 = arith.constant 0 : index
    %c0_51 = arith.constant 0 : index
    %52 = vector.load %arg33[%c0_50, %c0_51] : memref<24x128xf32, #tpu.memory_space<vmem>>, vector<16x128xf32>
    %c2_52 = arith.constant 2 : index
    %c0_53 = arith.constant 0 : index
    %53 = vector.load %arg33[%c2_52, %c0_53] : memref<24x128xf32, #tpu.memory_space<vmem>>, vector<16x128xf32>
    %54 = tpu.concatenate %52, %53 in 1 : vector<16x128xf32>, vector<16x128xf32> -> vector<16x256xf32>
    %c0_54 = arith.constant 0 : index
    %c0_55 = arith.constant 0 : index
    %55 = vector.load %arg14[%c0_54, %c0_55] : memref<256x128xf32, #tpu.memory_space<vmem>>, vector<256x128xf32>
    %cst_56 = arith.constant dense<0.000000e+00> : vector<16x128xf32>
    %56 = tpu.matmul %54, %55, %cst_56 {dimension_numbers = #tpu.dot_dimension_numbers<[1], [0], [0], [1], [0, 0, 1, 1], [], []>} : vector<16x256xf32>, vector<256x128xf32>, vector<16x128xf32> -> vector<16x128xf32>
    %c0_57 = arith.constant 0 : index
    %c0_58 = arith.constant 0 : index
    %57 = vector.load %arg15[%c0_57, %c0_58] : memref<1x128xf32, #tpu.memory_space<vmem>>, vector<1x128xf32>
    %58 = vector.broadcast %57 : vector<1x128xf32> to vector<16x128xf32>
    %59 = arith.addf %56, %58 : vector<16x128xf32>
    %cst_59 = arith.constant 0.000000e+00 : f32
    %60 = vector.broadcast %cst_59 : f32 to vector<16x128xf32>
    %61 = arith.maximumf %59, %60 : vector<16x128xf32>
    %c0_60 = arith.constant 0 : index
    %c0_61 = arith.constant 0 : index
    %62 = vector.load %arg16[%c0_60, %c0_61] : memref<128x128xf32, #tpu.memory_space<vmem>>, vector<128x128xf32>
    %cst_62 = arith.constant dense<0.000000e+00> : vector<16x128xf32>
    %63 = tpu.matmul %39, %62, %cst_62 {dimension_numbers = #tpu.dot_dimension_numbers<[1], [0], [0], [1], [0, 0, 1, 1], [], []>} : vector<16x128xf32>, vector<128x128xf32>, vector<16x128xf32> -> vector<16x128xf32>
    %c0_63 = arith.constant 0 : index
    %c0_64 = arith.constant 0 : index
    %64 = vector.load %arg17[%c0_63, %c0_64] : memref<1x128xf32, #tpu.memory_space<vmem>>, vector<1x128xf32>
    %65 = vector.broadcast %64 : vector<1x128xf32> to vector<16x128xf32>
    %66 = arith.addf %63, %65 : vector<16x128xf32>
    %67 = arith.addf %61, %66 : vector<16x128xf32>
    %c0_65 = arith.constant 0 : index
    %c0_66 = arith.constant 0 : index
    %68 = vector.load %arg18[%c0_65, %c0_66] : memref<1x128xf32, #tpu.memory_space<vmem>>, vector<1x128xf32>
    %69 = vector.broadcast %68 : vector<1x128xf32> to vector<16x128xf32>
    %70 = arith.mulf %67, %69 : vector<16x128xf32>
    %c0_67 = arith.constant 0 : index
    %c0_68 = arith.constant 0 : index
    %71 = vector.load %arg19[%c0_67, %c0_68] : memref<1x128xf32, #tpu.memory_space<vmem>>, vector<1x128xf32>
    %72 = vector.broadcast %71 : vector<1x128xf32> to vector<16x128xf32>
    %73 = arith.addf %70, %72 : vector<16x128xf32>
    %cst_69 = arith.constant 0.000000e+00 : f32
    %74 = vector.broadcast %cst_69 : f32 to vector<16x128xf32>
    %75 = arith.maximumf %73, %74 : vector<16x128xf32>
    %c0_70 = arith.constant 0 : index
    %c0_71 = arith.constant 0 : index
    %c0_72 = arith.constant 0 : index
    %76 = vector.load %arg2[%c0_70, %c0_71, %c0_72] : memref<1x2x128xf32, #tpu.memory_space<vmem>>, vector<1x2x128xf32>
    %77 = vector.shape_cast %76 : vector<1x2x128xf32> to vector<2x128xf32>
    %c0_73 = arith.constant 0 : index
    %c0_74 = arith.constant 0 : index
    %c0_75 = arith.constant 0 : index
    %78 = vector.load %arg3[%c0_73, %c0_74, %c0_75] : memref<1x2x128xf32, #tpu.memory_space<vmem>>, vector<1x2x128xf32>
    %79 = vector.shape_cast %78 : vector<1x2x128xf32> to vector<2x128xf32>
    %c0_76 = arith.constant 0 : index
    %c0_77 = arith.constant 0 : index
    %80 = vector.load %arg20[%c0_76, %c0_77] : memref<128x512xf32, #tpu.memory_space<vmem>>, vector<128x512xf32>
    %cst_78 = arith.constant dense<0.000000e+00> : vector<16x512xf32>
    %81 = tpu.matmul %75, %80, %cst_78 {dimension_numbers = #tpu.dot_dimension_numbers<[1], [0], [0], [1], [0, 0, 1, 1], [], []>} : vector<16x128xf32>, vector<128x512xf32>, vector<16x512xf32> -> vector<16x512xf32>
    %c0_79 = arith.constant 0 : index
    %c0_80 = arith.constant 0 : index
    %82 = vector.load %arg22[%c0_79, %c0_80] : memref<1x512xf32, #tpu.memory_space<vmem>>, vector<1x512xf32>
    %83 = vector.broadcast %82 : vector<1x512xf32> to vector<16x512xf32>
    %84 = arith.addf %81, %83 : vector<16x512xf32>
    %c0_81 = arith.constant 0 : index
    %c0_82 = arith.constant 0 : index
    %85 = vector.load %arg34[%c0_81, %c0_82] : memref<16x512xf32, #tpu.memory_space<vmem>>, vector<16x512xf32>
    tpu.vector_store %arg34[%c0_81, %c0_82], %84 {strides = array<i32>} : memref<16x512xf32, #tpu.memory_space<vmem>>, vector<16x512xf32>,
    %c0_83 = arith.constant 0 : index
    %c0_84 = arith.constant 0 : index
    %86 = vector.load %arg21[%c0_83, %c0_84] : memref<128x512xf32, #tpu.memory_space<vmem>>, vector<128x512xf32>
    %c0_85 = arith.constant 0 : index
    %c0_86 = arith.constant 0 : index
    %87 = vector.load %arg23[%c0_85, %c0_86] : memref<1x512xf32, #tpu.memory_space<vmem>>, vector<1x512xf32>
    %88 = vector.extract_strided_slice %77 {offsets = [0, 0], sizes = [1, 128], strides = [1, 1]} : vector<2x128xf32> to vector<1x128xf32>
    %89 = vector.shape_cast %88 : vector<1x128xf32> to vector<1x128xf32>
    %90 = vector.broadcast %89 : vector<1x128xf32> to vector<8x128xf32>
    %91 = vector.extract_strided_slice %79 {offsets = [0, 0], sizes = [1, 128], strides = [1, 1]} : vector<2x128xf32> to vector<1x128xf32>
    %92 = vector.shape_cast %91 : vector<1x128xf32> to vector<1x128xf32>
    %93 = vector.broadcast %92 : vector<1x128xf32> to vector<8x128xf32>
    %c0_i32 = arith.constant 0 : i32
    %94 = arith.index_cast %c0_i32 : i32 to index
    %c0_87 = arith.constant 0 : index
    %95 = vector.load %arg34[%94, %c0_87] : memref<16x512xf32, #tpu.memory_space<vmem>>, vector<1x512xf32>
    %cst_88 = arith.constant dense<0.000000e+00> : vector<8x512xf32>
    %96 = tpu.matmul %90, %86, %cst_88 {dimension_numbers = #tpu.dot_dimension_numbers<[1], [0], [0], [1], [0, 0, 1, 1], [], []>} : vector<8x128xf32>, vector<128x512xf32>, vector<8x512xf32> -> vector<8x512xf32>
    %97 = vector.broadcast %95 : vector<1x512xf32> to vector<8x512xf32>
    %98 = arith.addf %97, %96 : vector<8x512xf32>
    %99 = vector.broadcast %87 : vector<1x512xf32> to vector<8x512xf32>
    %100 = arith.addf %98, %99 : vector<8x512xf32>
    %101 = vector.extract_strided_slice %100 {offsets = [0, 0], sizes = [8, 128], strides = [1, 1]} : vector<8x512xf32> to vector<8x128xf32>
    %102 = arith.negf %101 : vector<8x128xf32>
    %103 = math.exp %102 : vector<8x128xf32>
    %cst_89 = arith.constant 1.000000e+00 : f32
    %104 = vector.broadcast %cst_89 : f32 to vector<8x128xf32>
    %105 = arith.addf %104, %103 : vector<8x128xf32>
    %106 = arith.divf %104, %105 : vector<8x128xf32>
    %107 = vector.extract_strided_slice %100 {offsets = [0, 128], sizes = [8, 128], strides = [1, 1]} : vector<8x512xf32> to vector<8x128xf32>
    %108 = arith.negf %107 : vector<8x128xf32>
    %109 = math.exp %108 : vector<8x128xf32>
    %cst_90 = arith.constant 1.000000e+00 : f32
    %110 = vector.broadcast %cst_90 : f32 to vector<8x128xf32>
    %111 = arith.addf %110, %109 : vector<8x128xf32>
    %112 = arith.divf %110, %111 : vector<8x128xf32>
    %113 = vector.extract_strided_slice %100 {offsets = [0, 256], sizes = [8, 128], strides = [1, 1]} : vector<8x512xf32> to vector<8x128xf32>
    %114 = math.tanh %113 : vector<8x128xf32>
    %115 = vector.extract_strided_slice %100 {offsets = [0, 384], sizes = [8, 128], strides = [1, 1]} : vector<8x512xf32> to vector<8x128xf32>
    %116 = arith.negf %115 : vector<8x128xf32>
    %117 = math.exp %116 : vector<8x128xf32>
    %cst_91 = arith.constant 1.000000e+00 : f32
    %118 = vector.broadcast %cst_91 : f32 to vector<8x128xf32>
    %119 = arith.addf %118, %117 : vector<8x128xf32>
    %120 = arith.divf %118, %119 : vector<8x128xf32>
    %121 = arith.mulf %112, %93 : vector<8x128xf32>
    %122 = arith.mulf %106, %114 : vector<8x128xf32>
    %123 = arith.addf %121, %122 : vector<8x128xf32>
    %124 = math.tanh %123 : vector<8x128xf32>
    %125 = arith.mulf %120, %124 : vector<8x128xf32>
    %126 = vector.extract_strided_slice %125 {offsets = [0, 0], sizes = [1, 128], strides = [1, 1]} : vector<8x128xf32> to vector<1x128xf32>
    %127 = arith.index_cast %c0_i32 : i32 to index
    %c0_92 = arith.constant 0 : index
    %128 = vector.load %arg36[%127, %c0_92] : memref<16x128xf32, #tpu.memory_space<vmem>>, vector<1x128xf32>
    tpu.vector_store %arg36[%127, %c0_92], %126 {strides = array<i32>} : memref<16x128xf32, #tpu.memory_space<vmem>>, vector<1x128xf32>,
    %c1_i32 = arith.constant 1 : i32
    %129 = arith.index_cast %c1_i32 : i32 to index
    %c0_93 = arith.constant 0 : index
    %130 = vector.load %arg34[%129, %c0_93] : memref<16x512xf32, #tpu.memory_space<vmem>>, vector<1x512xf32>
    %cst_94 = arith.constant dense<0.000000e+00> : vector<8x512xf32>
    %131 = tpu.matmul %125, %86, %cst_94 {dimension_numbers = #tpu.dot_dimension_numbers<[1], [0], [0], [1], [0, 0, 1, 1], [], []>} : vector<8x128xf32>, vector<128x512xf32>, vector<8x512xf32> -> vector<8x512xf32>
    %132 = vector.broadcast %130 : vector<1x512xf32> to vector<8x512xf32>
    %133 = arith.addf %132, %131 : vector<8x512xf32>
    %134 = vector.broadcast %87 : vector<1x512xf32> to vector<8x512xf32>
    %135 = arith.addf %133, %134 : vector<8x512xf32>
    %136 = vector.extract_strided_slice %135 {offsets = [0, 0], sizes = [8, 128], strides = [1, 1]} : vector<8x512xf32> to vector<8x128xf32>
    %137 = arith.negf %136 : vector<8x128xf32>
    %138 = math.exp %137 : vector<8x128xf32>
    %cst_95 = arith.constant 1.000000e+00 : f32
    %139 = vector.broadcast %cst_95 : f32 to vector<8x128xf32>
    %140 = arith.addf %139, %138 : vector<8x128xf32>
    %141 = arith.divf %139, %140 : vector<8x128xf32>
    %142 = vector.extract_strided_slice %135 {offsets = [0, 128], sizes = [8, 128], strides = [1, 1]} : vector<8x512xf32> to vector<8x128xf32>
    %143 = arith.negf %142 : vector<8x128xf32>
    %144 = math.exp %143 : vector<8x128xf32>
    %cst_96 = arith.constant 1.000000e+00 : f32
    %145 = vector.broadcast %cst_96 : f32 to vector<8x128xf32>
    %146 = arith.addf %145, %144 : vector<8x128xf32>
    %147 = arith.divf %145, %146 : vector<8x128xf32>
    %148 = vector.extract_strided_slice %135 {offsets = [0, 256], sizes = [8, 128], strides = [1, 1]} : vector<8x512xf32> to vector<8x128xf32>
    %149 = math.tanh %148 : vector<8x128xf32>
    %150 = vector.extract_strided_slice %135 {offsets = [0, 384], sizes = [8, 128], strides = [1, 1]} : vector<8x512xf32> to vector<8x128xf32>
    %151 = arith.negf %150 : vector<8x128xf32>
    %152 = math.exp %151 : vector<8x128xf32>
    %cst_97 = arith.constant 1.000000e+00 : f32
    %153 = vector.broadcast %cst_97 : f32 to vector<8x128xf32>
    %154 = arith.addf %153, %152 : vector<8x128xf32>
    %155 = arith.divf %153, %154 : vector<8x128xf32>
    %156 = arith.mulf %147, %123 : vector<8x128xf32>
    %157 = arith.mulf %141, %149 : vector<8x128xf32>
    %158 = arith.addf %156, %157 : vector<8x128xf32>
    %159 = math.tanh %158 : vector<8x128xf32>
    %160 = arith.mulf %155, %159 : vector<8x128xf32>
    %161 = vector.extract_strided_slice %160 {offsets = [0, 0], sizes = [1, 128], strides = [1, 1]} : vector<8x128xf32> to vector<1x128xf32>
    %162 = arith.index_cast %c1_i32 : i32 to index
    %c0_98 = arith.constant 0 : index
    %163 = vector.load %arg36[%162, %c0_98] : memref<16x128xf32, #tpu.memory_space<vmem>>, vector<1x128xf32>
    tpu.vector_store %arg36[%162, %c0_98], %161 {strides = array<i32>} : memref<16x128xf32, #tpu.memory_space<vmem>>, vector<1x128xf32>,
    %c2_i32 = arith.constant 2 : i32
    %164 = arith.index_cast %c2_i32 : i32 to index
    %c0_99 = arith.constant 0 : index
    %165 = vector.load %arg34[%164, %c0_99] : memref<16x512xf32, #tpu.memory_space<vmem>>, vector<1x512xf32>
    %cst_100 = arith.constant dense<0.000000e+00> : vector<8x512xf32>
    %166 = tpu.matmul %160, %86, %cst_100 {dimension_numbers = #tpu.dot_dimension_numbers<[1], [0], [0], [1], [0, 0, 1, 1], [], []>} : vector<8x128xf32>, vector<128x512xf32>, vector<8x512xf32> -> vector<8x512xf32>
    %167 = vector.broadcast %165 : vector<1x512xf32> to vector<8x512xf32>
    %168 = arith.addf %167, %166 : vector<8x512xf32>
    %169 = vector.broadcast %87 : vector<1x512xf32> to vector<8x512xf32>
    %170 = arith.addf %168, %169 : vector<8x512xf32>
    %171 = vector.extract_strided_slice %170 {offsets = [0, 0], sizes = [8, 128], strides = [1, 1]} : vector<8x512xf32> to vector<8x128xf32>
    %172 = arith.negf %171 : vector<8x128xf32>
    %173 = math.exp %172 : vector<8x128xf32>
    %cst_101 = arith.constant 1.000000e+00 : f32
    %174 = vector.broadcast %cst_101 : f32 to vector<8x128xf32>
    %175 = arith.addf %174, %173 : vector<8x128xf32>
    %176 = arith.divf %174, %175 : vector<8x128xf32>
    %177 = vector.extract_strided_slice %170 {offsets = [0, 128], sizes = [8, 128], strides = [1, 1]} : vector<8x512xf32> to vector<8x128xf32>
    %178 = arith.negf %177 : vector<8x128xf32>
    %179 = math.exp %178 : vector<8x128xf32>
    %cst_102 = arith.constant 1.000000e+00 : f32
    %180 = vector.broadcast %cst_102 : f32 to vector<8x128xf32>
    %181 = arith.addf %180, %179 : vector<8x128xf32>
    %182 = arith.divf %180, %181 : vector<8x128xf32>
    %183 = vector.extract_strided_slice %170 {offsets = [0, 256], sizes = [8, 128], strides = [1, 1]} : vector<8x512xf32> to vector<8x128xf32>
    %184 = math.tanh %183 : vector<8x128xf32>
    %185 = vector.extract_strided_slice %170 {offsets = [0, 384], sizes = [8, 128], strides = [1, 1]} : vector<8x512xf32> to vector<8x128xf32>
    %186 = arith.negf %185 : vector<8x128xf32>
    %187 = math.exp %186 : vector<8x128xf32>
    %cst_103 = arith.constant 1.000000e+00 : f32
    %188 = vector.broadcast %cst_103 : f32 to vector<8x128xf32>
    %189 = arith.addf %188, %187 : vector<8x128xf32>
    %190 = arith.divf %188, %189 : vector<8x128xf32>
    %191 = arith.mulf %182, %158 : vector<8x128xf32>
    %192 = arith.mulf %176, %184 : vector<8x128xf32>
    %193 = arith.addf %191, %192 : vector<8x128xf32>
    %194 = math.tanh %193 : vector<8x128xf32>
    %195 = arith.mulf %190, %194 : vector<8x128xf32>
    %196 = vector.extract_strided_slice %195 {offsets = [0, 0], sizes = [1, 128], strides = [1, 1]} : vector<8x128xf32> to vector<1x128xf32>
    %197 = arith.index_cast %c2_i32 : i32 to index
    %c0_104 = arith.constant 0 : index
    %198 = vector.load %arg36[%197, %c0_104] : memref<16x128xf32, #tpu.memory_space<vmem>>, vector<1x128xf32>
    tpu.vector_store %arg36[%197, %c0_104], %196 {strides = array<i32>} : memref<16x128xf32, #tpu.memory_space<vmem>>, vector<1x128xf32>,
    %c3_i32 = arith.constant 3 : i32
    %199 = arith.index_cast %c3_i32 : i32 to index
    %c0_105 = arith.constant 0 : index
    %200 = vector.load %arg34[%199, %c0_105] : memref<16x512xf32, #tpu.memory_space<vmem>>, vector<1x512xf32>
    %cst_106 = arith.constant dense<0.000000e+00> : vector<8x512xf32>
    %201 = tpu.matmul %195, %86, %cst_106 {dimension_numbers = #tpu.dot_dimension_numbers<[1], [0], [0], [1], [0, 0, 1, 1], [], []>} : vector<8x128xf32>, vector<128x512xf32>, vector<8x512xf32> -> vector<8x512xf32>
    %202 = vector.broadcast %200 : vector<1x512xf32> to vector<8x512xf32>
    %203 = arith.addf %202, %201 : vector<8x512xf32>
    %204 = vector.broadcast %87 : vector<1x512xf32> to vector<8x512xf32>
    %205 = arith.addf %203, %204 : vector<8x512xf32>
    %206 = vector.extract_strided_slice %205 {offsets = [0, 0], sizes = [8, 128], strides = [1, 1]} : vector<8x512xf32> to vector<8x128xf32>
    %207 = arith.negf %206 : vector<8x128xf32>
    %208 = math.exp %207 : vector<8x128xf32>
    %cst_107 = arith.constant 1.000000e+00 : f32
    %209 = vector.broadcast %cst_107 : f32 to vector<8x128xf32>
    %210 = arith.addf %209, %208 : vector<8x128xf32>
    %211 = arith.divf %209, %210 : vector<8x128xf32>
    %212 = vector.extract_strided_slice %205 {offsets = [0, 128], sizes = [8, 128], strides = [1, 1]} : vector<8x512xf32> to vector<8x128xf32>
    %213 = arith.negf %212 : vector<8x128xf32>
    %214 = math.exp %213 : vector<8x128xf32>
    %cst_108 = arith.constant 1.000000e+00 : f32
    %215 = vector.broadcast %cst_108 : f32 to vector<8x128xf32>
    %216 = arith.addf %215, %214 : vector<8x128xf32>
    %217 = arith.divf %215, %216 : vector<8x128xf32>
    %218 = vector.extract_strided_slice %205 {offsets = [0, 256], sizes = [8, 128], strides = [1, 1]} : vector<8x512xf32> to vector<8x128xf32>
    %219 = math.tanh %218 : vector<8x128xf32>
    %220 = vector.extract_strided_slice %205 {offsets = [0, 384], sizes = [8, 128], strides = [1, 1]} : vector<8x512xf32> to vector<8x128xf32>
    %221 = arith.negf %220 : vector<8x128xf32>
    %222 = math.exp %221 : vector<8x128xf32>
    %cst_109 = arith.constant 1.000000e+00 : f32
    %223 = vector.broadcast %cst_109 : f32 to vector<8x128xf32>
    %224 = arith.addf %223, %222 : vector<8x128xf32>
    %225 = arith.divf %223, %224 : vector<8x128xf32>
    %226 = arith.mulf %217, %193 : vector<8x128xf32>
    %227 = arith.mulf %211, %219 : vector<8x128xf32>
    %228 = arith.addf %226, %227 : vector<8x128xf32>
    %229 = math.tanh %228 : vector<8x128xf32>
    %230 = arith.mulf %225, %229 : vector<8x128xf32>
    %231 = vector.extract_strided_slice %230 {offsets = [0, 0], sizes = [1, 128], strides = [1, 1]} : vector<8x128xf32> to vector<1x128xf32>
    %232 = arith.index_cast %c3_i32 : i32 to index
    %c0_110 = arith.constant 0 : index
    %233 = vector.load %arg36[%232, %c0_110] : memref<16x128xf32, #tpu.memory_space<vmem>>, vector<1x128xf32>
    tpu.vector_store %arg36[%232, %c0_110], %231 {strides = array<i32>} : memref<16x128xf32, #tpu.memory_space<vmem>>, vector<1x128xf32>,
    %c4_i32 = arith.constant 4 : i32
    %234 = arith.index_cast %c4_i32 : i32 to index
    %c0_111 = arith.constant 0 : index
    %235 = vector.load %arg34[%234, %c0_111] : memref<16x512xf32, #tpu.memory_space<vmem>>, vector<1x512xf32>
    %cst_112 = arith.constant dense<0.000000e+00> : vector<8x512xf32>
    %236 = tpu.matmul %230, %86, %cst_112 {dimension_numbers = #tpu.dot_dimension_numbers<[1], [0], [0], [1], [0, 0, 1, 1], [], []>} : vector<8x128xf32>, vector<128x512xf32>, vector<8x512xf32> -> vector<8x512xf32>
    %237 = vector.broadcast %235 : vector<1x512xf32> to vector<8x512xf32>
    %238 = arith.addf %237, %236 : vector<8x512xf32>
    %239 = vector.broadcast %87 : vector<1x512xf32> to vector<8x512xf32>
    %240 = arith.addf %238, %239 : vector<8x512xf32>
    %241 = vector.extract_strided_slice %240 {offsets = [0, 0], sizes = [8, 128], strides = [1, 1]} : vector<8x512xf32> to vector<8x128xf32>
    %242 = arith.negf %241 : vector<8x128xf32>
    %243 = math.exp %242 : vector<8x128xf32>
    %cst_113 = arith.constant 1.000000e+00 : f32
    %244 = vector.broadcast %cst_113 : f32 to vector<8x128xf32>
    %245 = arith.addf %244, %243 : vector<8x128xf32>
    %246 = arith.divf %244, %245 : vector<8x128xf32>
    %247 = vector.extract_strided_slice %240 {offsets = [0, 128], sizes = [8, 128], strides = [1, 1]} : vector<8x512xf32> to vector<8x128xf32>
    %248 = arith.negf %247 : vector<8x128xf32>
    %249 = math.exp %248 : vector<8x128xf32>
    %cst_114 = arith.constant 1.000000e+00 : f32
    %250 = vector.broadcast %cst_114 : f32 to vector<8x128xf32>
    %251 = arith.addf %250, %249 : vector<8x128xf32>
    %252 = arith.divf %250, %251 : vector<8x128xf32>
    %253 = vector.extract_strided_slice %240 {offsets = [0, 256], sizes = [8, 128], strides = [1, 1]} : vector<8x512xf32> to vector<8x128xf32>
    %254 = math.tanh %253 : vector<8x128xf32>
    %255 = vector.extract_strided_slice %240 {offsets = [0, 384], sizes = [8, 128], strides = [1, 1]} : vector<8x512xf32> to vector<8x128xf32>
    %256 = arith.negf %255 : vector<8x128xf32>
    %257 = math.exp %256 : vector<8x128xf32>
    %cst_115 = arith.constant 1.000000e+00 : f32
    %258 = vector.broadcast %cst_115 : f32 to vector<8x128xf32>
    %259 = arith.addf %258, %257 : vector<8x128xf32>
    %260 = arith.divf %258, %259 : vector<8x128xf32>
    %261 = arith.mulf %252, %228 : vector<8x128xf32>
    %262 = arith.mulf %246, %254 : vector<8x128xf32>
    %263 = arith.addf %261, %262 : vector<8x128xf32>
    %264 = math.tanh %263 : vector<8x128xf32>
    %265 = arith.mulf %260, %264 : vector<8x128xf32>
    %266 = vector.extract_strided_slice %265 {offsets = [0, 0], sizes = [1, 128], strides = [1, 1]} : vector<8x128xf32> to vector<1x128xf32>
    %267 = arith.index_cast %c4_i32 : i32 to index
    %c0_116 = arith.constant 0 : index
    %268 = vector.load %arg36[%267, %c0_116] : memref<16x128xf32, #tpu.memory_space<vmem>>, vector<1x128xf32>
    tpu.vector_store %arg36[%267, %c0_116], %266 {strides = array<i32>} : memref<16x128xf32, #tpu.memory_space<vmem>>, vector<1x128xf32>,
    %c5_i32 = arith.constant 5 : i32
    %269 = arith.index_cast %c5_i32 : i32 to index
    %c0_117 = arith.constant 0 : index
    %270 = vector.load %arg34[%269, %c0_117] : memref<16x512xf32, #tpu.memory_space<vmem>>, vector<1x512xf32>
    %cst_118 = arith.constant dense<0.000000e+00> : vector<8x512xf32>
    %271 = tpu.matmul %265, %86, %cst_118 {dimension_numbers = #tpu.dot_dimension_numbers<[1], [0], [0], [1], [0, 0, 1, 1], [], []>} : vector<8x128xf32>, vector<128x512xf32>, vector<8x512xf32> -> vector<8x512xf32>
    %272 = vector.broadcast %270 : vector<1x512xf32> to vector<8x512xf32>
    %273 = arith.addf %272, %271 : vector<8x512xf32>
    %274 = vector.broadcast %87 : vector<1x512xf32> to vector<8x512xf32>
    %275 = arith.addf %273, %274 : vector<8x512xf32>
    %276 = vector.extract_strided_slice %275 {offsets = [0, 0], sizes = [8, 128], strides = [1, 1]} : vector<8x512xf32> to vector<8x128xf32>
    %277 = arith.negf %276 : vector<8x128xf32>
    %278 = math.exp %277 : vector<8x128xf32>
    %cst_119 = arith.constant 1.000000e+00 : f32
    %279 = vector.broadcast %cst_119 : f32 to vector<8x128xf32>
    %280 = arith.addf %279, %278 : vector<8x128xf32>
    %281 = arith.divf %279, %280 : vector<8x128xf32>
    %282 = vector.extract_strided_slice %275 {offsets = [0, 128], sizes = [8, 128], strides = [1, 1]} : vector<8x512xf32> to vector<8x128xf32>
    %283 = arith.negf %282 : vector<8x128xf32>
    %284 = math.exp %283 : vector<8x128xf32>
    %cst_120 = arith.constant 1.000000e+00 : f32
    %285 = vector.broadcast %cst_120 : f32 to vector<8x128xf32>
    %286 = arith.addf %285, %284 : vector<8x128xf32>
    %287 = arith.divf %285, %286 : vector<8x128xf32>
    %288 = vector.extract_strided_slice %275 {offsets = [0, 256], sizes = [8, 128], strides = [1, 1]} : vector<8x512xf32> to vector<8x128xf32>
    %289 = math.tanh %288 : vector<8x128xf32>
    %290 = vector.extract_strided_slice %275 {offsets = [0, 384], sizes = [8, 128], strides = [1, 1]} : vector<8x512xf32> to vector<8x128xf32>
    %291 = arith.negf %290 : vector<8x128xf32>
    %292 = math.exp %291 : vector<8x128xf32>
    %cst_121 = arith.constant 1.000000e+00 : f32
    %293 = vector.broadcast %cst_121 : f32 to vector<8x128xf32>
    %294 = arith.addf %293, %292 : vector<8x128xf32>
    %295 = arith.divf %293, %294 : vector<8x128xf32>
    %296 = arith.mulf %287, %263 : vector<8x128xf32>
    %297 = arith.mulf %281, %289 : vector<8x128xf32>
    %298 = arith.addf %296, %297 : vector<8x128xf32>
    %299 = math.tanh %298 : vector<8x128xf32>
    %300 = arith.mulf %295, %299 : vector<8x128xf32>
    %301 = vector.extract_strided_slice %300 {offsets = [0, 0], sizes = [1, 128], strides = [1, 1]} : vector<8x128xf32> to vector<1x128xf32>
    %302 = arith.index_cast %c5_i32 : i32 to index
    %c0_122 = arith.constant 0 : index
    %303 = vector.load %arg36[%302, %c0_122] : memref<16x128xf32, #tpu.memory_space<vmem>>, vector<1x128xf32>
    tpu.vector_store %arg36[%302, %c0_122], %301 {strides = array<i32>} : memref<16x128xf32, #tpu.memory_space<vmem>>, vector<1x128xf32>,
    %c6_i32 = arith.constant 6 : i32
    %304 = arith.index_cast %c6_i32 : i32 to index
    %c0_123 = arith.constant 0 : index
    %305 = vector.load %arg34[%304, %c0_123] : memref<16x512xf32, #tpu.memory_space<vmem>>, vector<1x512xf32>
    %cst_124 = arith.constant dense<0.000000e+00> : vector<8x512xf32>
    %306 = tpu.matmul %300, %86, %cst_124 {dimension_numbers = #tpu.dot_dimension_numbers<[1], [0], [0], [1], [0, 0, 1, 1], [], []>} : vector<8x128xf32>, vector<128x512xf32>, vector<8x512xf32> -> vector<8x512xf32>
    %307 = vector.broadcast %305 : vector<1x512xf32> to vector<8x512xf32>
    %308 = arith.addf %307, %306 : vector<8x512xf32>
    %309 = vector.broadcast %87 : vector<1x512xf32> to vector<8x512xf32>
    %310 = arith.addf %308, %309 : vector<8x512xf32>
    %311 = vector.extract_strided_slice %310 {offsets = [0, 0], sizes = [8, 128], strides = [1, 1]} : vector<8x512xf32> to vector<8x128xf32>
    %312 = arith.negf %311 : vector<8x128xf32>
    %313 = math.exp %312 : vector<8x128xf32>
    %cst_125 = arith.constant 1.000000e+00 : f32
    %314 = vector.broadcast %cst_125 : f32 to vector<8x128xf32>
    %315 = arith.addf %314, %313 : vector<8x128xf32>
    %316 = arith.divf %314, %315 : vector<8x128xf32>
    %317 = vector.extract_strided_slice %310 {offsets = [0, 128], sizes = [8, 128], strides = [1, 1]} : vector<8x512xf32> to vector<8x128xf32>
    %318 = arith.negf %317 : vector<8x128xf32>
    %319 = math.exp %318 : vector<8x128xf32>
    %cst_126 = arith.constant 1.000000e+00 : f32
    %320 = vector.broadcast %cst_126 : f32 to vector<8x128xf32>
    %321 = arith.addf %320, %319 : vector<8x128xf32>
    %322 = arith.divf %320, %321 : vector<8x128xf32>
    %323 = vector.extract_strided_slice %310 {offsets = [0, 256], sizes = [8, 128], strides = [1, 1]} : vector<8x512xf32> to vector<8x128xf32>
    %324 = math.tanh %323 : vector<8x128xf32>
    %325 = vector.extract_strided_slice %310 {offsets = [0, 384], sizes = [8, 128], strides = [1, 1]} : vector<8x512xf32> to vector<8x128xf32>
    %326 = arith.negf %325 : vector<8x128xf32>
    %327 = math.exp %326 : vector<8x128xf32>
    %cst_127 = arith.constant 1.000000e+00 : f32
    %328 = vector.broadcast %cst_127 : f32 to vector<8x128xf32>
    %329 = arith.addf %328, %327 : vector<8x128xf32>
    %330 = arith.divf %328, %329 : vector<8x128xf32>
    %331 = arith.mulf %322, %298 : vector<8x128xf32>
    %332 = arith.mulf %316, %324 : vector<8x128xf32>
    %333 = arith.addf %331, %332 : vector<8x128xf32>
    %334 = math.tanh %333 : vector<8x128xf32>
    %335 = arith.mulf %330, %334 : vector<8x128xf32>
    %336 = vector.extract_strided_slice %335 {offsets = [0, 0], sizes = [1, 128], strides = [1, 1]} : vector<8x128xf32> to vector<1x128xf32>
    %337 = arith.index_cast %c6_i32 : i32 to index
    %c0_128 = arith.constant 0 : index
    %338 = vector.load %arg36[%337, %c0_128] : memref<16x128xf32, #tpu.memory_space<vmem>>, vector<1x128xf32>
    tpu.vector_store %arg36[%337, %c0_128], %336 {strides = array<i32>} : memref<16x128xf32, #tpu.memory_space<vmem>>, vector<1x128xf32>,
    %c7_i32 = arith.constant 7 : i32
    %339 = arith.index_cast %c7_i32 : i32 to index
    %c0_129 = arith.constant 0 : index
    %340 = vector.load %arg34[%339, %c0_129] : memref<16x512xf32, #tpu.memory_space<vmem>>, vector<1x512xf32>
    %cst_130 = arith.constant dense<0.000000e+00> : vector<8x512xf32>
    %341 = tpu.matmul %335, %86, %cst_130 {dimension_numbers = #tpu.dot_dimension_numbers<[1], [0], [0], [1], [0, 0, 1, 1], [], []>} : vector<8x128xf32>, vector<128x512xf32>, vector<8x512xf32> -> vector<8x512xf32>
    %342 = vector.broadcast %340 : vector<1x512xf32> to vector<8x512xf32>
    %343 = arith.addf %342, %341 : vector<8x512xf32>
    %344 = vector.broadcast %87 : vector<1x512xf32> to vector<8x512xf32>
    %345 = arith.addf %343, %344 : vector<8x512xf32>
    %346 = vector.extract_strided_slice %345 {offsets = [0, 0], sizes = [8, 128], strides = [1, 1]} : vector<8x512xf32> to vector<8x128xf32>
    %347 = arith.negf %346 : vector<8x128xf32>
    %348 = math.exp %347 : vector<8x128xf32>
    %cst_131 = arith.constant 1.000000e+00 : f32
    %349 = vector.broadcast %cst_131 : f32 to vector<8x128xf32>
    %350 = arith.addf %349, %348 : vector<8x128xf32>
    %351 = arith.divf %349, %350 : vector<8x128xf32>
    %352 = vector.extract_strided_slice %345 {offsets = [0, 128], sizes = [8, 128], strides = [1, 1]} : vector<8x512xf32> to vector<8x128xf32>
    %353 = arith.negf %352 : vector<8x128xf32>
    %354 = math.exp %353 : vector<8x128xf32>
    %cst_132 = arith.constant 1.000000e+00 : f32
    %355 = vector.broadcast %cst_132 : f32 to vector<8x128xf32>
    %356 = arith.addf %355, %354 : vector<8x128xf32>
    %357 = arith.divf %355, %356 : vector<8x128xf32>
    %358 = vector.extract_strided_slice %345 {offsets = [0, 256], sizes = [8, 128], strides = [1, 1]} : vector<8x512xf32> to vector<8x128xf32>
    %359 = math.tanh %358 : vector<8x128xf32>
    %360 = vector.extract_strided_slice %345 {offsets = [0, 384], sizes = [8, 128], strides = [1, 1]} : vector<8x512xf32> to vector<8x128xf32>
    %361 = arith.negf %360 : vector<8x128xf32>
    %362 = math.exp %361 : vector<8x128xf32>
    %cst_133 = arith.constant 1.000000e+00 : f32
    %363 = vector.broadcast %cst_133 : f32 to vector<8x128xf32>
    %364 = arith.addf %363, %362 : vector<8x128xf32>
    %365 = arith.divf %363, %364 : vector<8x128xf32>
    %366 = arith.mulf %357, %333 : vector<8x128xf32>
    %367 = arith.mulf %351, %359 : vector<8x128xf32>
    %368 = arith.addf %366, %367 : vector<8x128xf32>
    %369 = math.tanh %368 : vector<8x128xf32>
    %370 = arith.mulf %365, %369 : vector<8x128xf32>
    %371 = vector.extract_strided_slice %370 {offsets = [0, 0], sizes = [1, 128], strides = [1, 1]} : vector<8x128xf32> to vector<1x128xf32>
    %372 = arith.index_cast %c7_i32 : i32 to index
    %c0_134 = arith.constant 0 : index
    %373 = vector.load %arg36[%372, %c0_134] : memref<16x128xf32, #tpu.memory_space<vmem>>, vector<1x128xf32>
    tpu.vector_store %arg36[%372, %c0_134], %371 {strides = array<i32>} : memref<16x128xf32, #tpu.memory_space<vmem>>, vector<1x128xf32>,
    %c8_i32 = arith.constant 8 : i32
    %374 = arith.index_cast %c8_i32 : i32 to index
    %c0_135 = arith.constant 0 : index
    %375 = vector.load %arg34[%374, %c0_135] : memref<16x512xf32, #tpu.memory_space<vmem>>, vector<1x512xf32>
    %cst_136 = arith.constant dense<0.000000e+00> : vector<8x512xf32>
    %376 = tpu.matmul %370, %86, %cst_136 {dimension_numbers = #tpu.dot_dimension_numbers<[1], [0], [0], [1], [0, 0, 1, 1], [], []>} : vector<8x128xf32>, vector<128x512xf32>, vector<8x512xf32> -> vector<8x512xf32>
    %377 = vector.broadcast %375 : vector<1x512xf32> to vector<8x512xf32>
    %378 = arith.addf %377, %376 : vector<8x512xf32>
    %379 = vector.broadcast %87 : vector<1x512xf32> to vector<8x512xf32>
    %380 = arith.addf %378, %379 : vector<8x512xf32>
    %381 = vector.extract_strided_slice %380 {offsets = [0, 0], sizes = [8, 128], strides = [1, 1]} : vector<8x512xf32> to vector<8x128xf32>
    %382 = arith.negf %381 : vector<8x128xf32>
    %383 = math.exp %382 : vector<8x128xf32>
    %cst_137 = arith.constant 1.000000e+00 : f32
    %384 = vector.broadcast %cst_137 : f32 to vector<8x128xf32>
    %385 = arith.addf %384, %383 : vector<8x128xf32>
    %386 = arith.divf %384, %385 : vector<8x128xf32>
    %387 = vector.extract_strided_slice %380 {offsets = [0, 128], sizes = [8, 128], strides = [1, 1]} : vector<8x512xf32> to vector<8x128xf32>
    %388 = arith.negf %387 : vector<8x128xf32>
    %389 = math.exp %388 : vector<8x128xf32>
    %cst_138 = arith.constant 1.000000e+00 : f32
    %390 = vector.broadcast %cst_138 : f32 to vector<8x128xf32>
    %391 = arith.addf %390, %389 : vector<8x128xf32>
    %392 = arith.divf %390, %391 : vector<8x128xf32>
    %393 = vector.extract_strided_slice %380 {offsets = [0, 256], sizes = [8, 128], strides = [1, 1]} : vector<8x512xf32> to vector<8x128xf32>
    %394 = math.tanh %393 : vector<8x128xf32>
    %395 = vector.extract_strided_slice %380 {offsets = [0, 384], sizes = [8, 128], strides = [1, 1]} : vector<8x512xf32> to vector<8x128xf32>
    %396 = arith.negf %395 : vector<8x128xf32>
    %397 = math.exp %396 : vector<8x128xf32>
    %cst_139 = arith.constant 1.000000e+00 : f32
    %398 = vector.broadcast %cst_139 : f32 to vector<8x128xf32>
    %399 = arith.addf %398, %397 : vector<8x128xf32>
    %400 = arith.divf %398, %399 : vector<8x128xf32>
    %401 = arith.mulf %392, %368 : vector<8x128xf32>
    %402 = arith.mulf %386, %394 : vector<8x128xf32>
    %403 = arith.addf %401, %402 : vector<8x128xf32>
    %404 = math.tanh %403 : vector<8x128xf32>
    %405 = arith.mulf %400, %404 : vector<8x128xf32>
    %406 = vector.extract_strided_slice %405 {offsets = [0, 0], sizes = [1, 128], strides = [1, 1]} : vector<8x128xf32> to vector<1x128xf32>
    %407 = arith.index_cast %c8_i32 : i32 to index
    %c0_140 = arith.constant 0 : index
    %408 = vector.load %arg36[%407, %c0_140] : memref<16x128xf32, #tpu.memory_space<vmem>>, vector<1x128xf32>
    tpu.vector_store %arg36[%407, %c0_140], %406 {strides = array<i32>} : memref<16x128xf32, #tpu.memory_space<vmem>>, vector<1x128xf32>,
    %c9_i32 = arith.constant 9 : i32
    %409 = arith.index_cast %c9_i32 : i32 to index
    %c0_141 = arith.constant 0 : index
    %410 = vector.load %arg34[%409, %c0_141] : memref<16x512xf32, #tpu.memory_space<vmem>>, vector<1x512xf32>
    %cst_142 = arith.constant dense<0.000000e+00> : vector<8x512xf32>
    %411 = tpu.matmul %405, %86, %cst_142 {dimension_numbers = #tpu.dot_dimension_numbers<[1], [0], [0], [1], [0, 0, 1, 1], [], []>} : vector<8x128xf32>, vector<128x512xf32>, vector<8x512xf32> -> vector<8x512xf32>
    %412 = vector.broadcast %410 : vector<1x512xf32> to vector<8x512xf32>
    %413 = arith.addf %412, %411 : vector<8x512xf32>
    %414 = vector.broadcast %87 : vector<1x512xf32> to vector<8x512xf32>
    %415 = arith.addf %413, %414 : vector<8x512xf32>
    %416 = vector.extract_strided_slice %415 {offsets = [0, 0], sizes = [8, 128], strides = [1, 1]} : vector<8x512xf32> to vector<8x128xf32>
    %417 = arith.negf %416 : vector<8x128xf32>
    %418 = math.exp %417 : vector<8x128xf32>
    %cst_143 = arith.constant 1.000000e+00 : f32
    %419 = vector.broadcast %cst_143 : f32 to vector<8x128xf32>
    %420 = arith.addf %419, %418 : vector<8x128xf32>
    %421 = arith.divf %419, %420 : vector<8x128xf32>
    %422 = vector.extract_strided_slice %415 {offsets = [0, 128], sizes = [8, 128], strides = [1, 1]} : vector<8x512xf32> to vector<8x128xf32>
    %423 = arith.negf %422 : vector<8x128xf32>
    %424 = math.exp %423 : vector<8x128xf32>
    %cst_144 = arith.constant 1.000000e+00 : f32
    %425 = vector.broadcast %cst_144 : f32 to vector<8x128xf32>
    %426 = arith.addf %425, %424 : vector<8x128xf32>
    %427 = arith.divf %425, %426 : vector<8x128xf32>
    %428 = vector.extract_strided_slice %415 {offsets = [0, 256], sizes = [8, 128], strides = [1, 1]} : vector<8x512xf32> to vector<8x128xf32>
    %429 = math.tanh %428 : vector<8x128xf32>
    %430 = vector.extract_strided_slice %415 {offsets = [0, 384], sizes = [8, 128], strides = [1, 1]} : vector<8x512xf32> to vector<8x128xf32>
    %431 = arith.negf %430 : vector<8x128xf32>
    %432 = math.exp %431 : vector<8x128xf32>
    %cst_145 = arith.constant 1.000000e+00 : f32
    %433 = vector.broadcast %cst_145 : f32 to vector<8x128xf32>
    %434 = arith.addf %433, %432 : vector<8x128xf32>
    %435 = arith.divf %433, %434 : vector<8x128xf32>
    %436 = arith.mulf %427, %403 : vector<8x128xf32>
    %437 = arith.mulf %421, %429 : vector<8x128xf32>
    %438 = arith.addf %436, %437 : vector<8x128xf32>
    %439 = math.tanh %438 : vector<8x128xf32>
    %440 = arith.mulf %435, %439 : vector<8x128xf32>
    %441 = vector.extract_strided_slice %440 {offsets = [0, 0], sizes = [1, 128], strides = [1, 1]} : vector<8x128xf32> to vector<1x128xf32>
    %442 = arith.index_cast %c9_i32 : i32 to index
    %c0_146 = arith.constant 0 : index
    %443 = vector.load %arg36[%442, %c0_146] : memref<16x128xf32, #tpu.memory_space<vmem>>, vector<1x128xf32>
    tpu.vector_store %arg36[%442, %c0_146], %441 {strides = array<i32>} : memref<16x128xf32, #tpu.memory_space<vmem>>, vector<1x128xf32>,
    %c10_i32 = arith.constant 10 : i32
    %444 = arith.index_cast %c10_i32 : i32 to index
    %c0_147 = arith.constant 0 : index
    %445 = vector.load %arg34[%444, %c0_147] : memref<16x512xf32, #tpu.memory_space<vmem>>, vector<1x512xf32>
    %cst_148 = arith.constant dense<0.000000e+00> : vector<8x512xf32>
    %446 = tpu.matmul %440, %86, %cst_148 {dimension_numbers = #tpu.dot_dimension_numbers<[1], [0], [0], [1], [0, 0, 1, 1], [], []>} : vector<8x128xf32>, vector<128x512xf32>, vector<8x512xf32> -> vector<8x512xf32>
    %447 = vector.broadcast %445 : vector<1x512xf32> to vector<8x512xf32>
    %448 = arith.addf %447, %446 : vector<8x512xf32>
    %449 = vector.broadcast %87 : vector<1x512xf32> to vector<8x512xf32>
    %450 = arith.addf %448, %449 : vector<8x512xf32>
    %451 = vector.extract_strided_slice %450 {offsets = [0, 0], sizes = [8, 128], strides = [1, 1]} : vector<8x512xf32> to vector<8x128xf32>
    %452 = arith.negf %451 : vector<8x128xf32>
    %453 = math.exp %452 : vector<8x128xf32>
    %cst_149 = arith.constant 1.000000e+00 : f32
    %454 = vector.broadcast %cst_149 : f32 to vector<8x128xf32>
    %455 = arith.addf %454, %453 : vector<8x128xf32>
    %456 = arith.divf %454, %455 : vector<8x128xf32>
    %457 = vector.extract_strided_slice %450 {offsets = [0, 128], sizes = [8, 128], strides = [1, 1]} : vector<8x512xf32> to vector<8x128xf32>
    %458 = arith.negf %457 : vector<8x128xf32>
    %459 = math.exp %458 : vector<8x128xf32>
    %cst_150 = arith.constant 1.000000e+00 : f32
    %460 = vector.broadcast %cst_150 : f32 to vector<8x128xf32>
    %461 = arith.addf %460, %459 : vector<8x128xf32>
    %462 = arith.divf %460, %461 : vector<8x128xf32>
    %463 = vector.extract_strided_slice %450 {offsets = [0, 256], sizes = [8, 128], strides = [1, 1]} : vector<8x512xf32> to vector<8x128xf32>
    %464 = math.tanh %463 : vector<8x128xf32>
    %465 = vector.extract_strided_slice %450 {offsets = [0, 384], sizes = [8, 128], strides = [1, 1]} : vector<8x512xf32> to vector<8x128xf32>
    %466 = arith.negf %465 : vector<8x128xf32>
    %467 = math.exp %466 : vector<8x128xf32>
    %cst_151 = arith.constant 1.000000e+00 : f32
    %468 = vector.broadcast %cst_151 : f32 to vector<8x128xf32>
    %469 = arith.addf %468, %467 : vector<8x128xf32>
    %470 = arith.divf %468, %469 : vector<8x128xf32>
    %471 = arith.mulf %462, %438 : vector<8x128xf32>
    %472 = arith.mulf %456, %464 : vector<8x128xf32>
    %473 = arith.addf %471, %472 : vector<8x128xf32>
    %474 = math.tanh %473 : vector<8x128xf32>
    %475 = arith.mulf %470, %474 : vector<8x128xf32>
    %476 = vector.extract_strided_slice %475 {offsets = [0, 0], sizes = [1, 128], strides = [1, 1]} : vector<8x128xf32> to vector<1x128xf32>
    %477 = arith.index_cast %c10_i32 : i32 to index
    %c0_152 = arith.constant 0 : index
    %478 = vector.load %arg36[%477, %c0_152] : memref<16x128xf32, #tpu.memory_space<vmem>>, vector<1x128xf32>
    tpu.vector_store %arg36[%477, %c0_152], %476 {strides = array<i32>} : memref<16x128xf32, #tpu.memory_space<vmem>>, vector<1x128xf32>,
    %c11_i32 = arith.constant 11 : i32
    %479 = arith.index_cast %c11_i32 : i32 to index
    %c0_153 = arith.constant 0 : index
    %480 = vector.load %arg34[%479, %c0_153] : memref<16x512xf32, #tpu.memory_space<vmem>>, vector<1x512xf32>
    %cst_154 = arith.constant dense<0.000000e+00> : vector<8x512xf32>
    %481 = tpu.matmul %475, %86, %cst_154 {dimension_numbers = #tpu.dot_dimension_numbers<[1], [0], [0], [1], [0, 0, 1, 1], [], []>} : vector<8x128xf32>, vector<128x512xf32>, vector<8x512xf32> -> vector<8x512xf32>
    %482 = vector.broadcast %480 : vector<1x512xf32> to vector<8x512xf32>
    %483 = arith.addf %482, %481 : vector<8x512xf32>
    %484 = vector.broadcast %87 : vector<1x512xf32> to vector<8x512xf32>
    %485 = arith.addf %483, %484 : vector<8x512xf32>
    %486 = vector.extract_strided_slice %485 {offsets = [0, 0], sizes = [8, 128], strides = [1, 1]} : vector<8x512xf32> to vector<8x128xf32>
    %487 = arith.negf %486 : vector<8x128xf32>
    %488 = math.exp %487 : vector<8x128xf32>
    %cst_155 = arith.constant 1.000000e+00 : f32
    %489 = vector.broadcast %cst_155 : f32 to vector<8x128xf32>
    %490 = arith.addf %489, %488 : vector<8x128xf32>
    %491 = arith.divf %489, %490 : vector<8x128xf32>
    %492 = vector.extract_strided_slice %485 {offsets = [0, 128], sizes = [8, 128], strides = [1, 1]} : vector<8x512xf32> to vector<8x128xf32>
    %493 = arith.negf %492 : vector<8x128xf32>
    %494 = math.exp %493 : vector<8x128xf32>
    %cst_156 = arith.constant 1.000000e+00 : f32
    %495 = vector.broadcast %cst_156 : f32 to vector<8x128xf32>
    %496 = arith.addf %495, %494 : vector<8x128xf32>
    %497 = arith.divf %495, %496 : vector<8x128xf32>
    %498 = vector.extract_strided_slice %485 {offsets = [0, 256], sizes = [8, 128], strides = [1, 1]} : vector<8x512xf32> to vector<8x128xf32>
    %499 = math.tanh %498 : vector<8x128xf32>
    %500 = vector.extract_strided_slice %485 {offsets = [0, 384], sizes = [8, 128], strides = [1, 1]} : vector<8x512xf32> to vector<8x128xf32>
    %501 = arith.negf %500 : vector<8x128xf32>
    %502 = math.exp %501 : vector<8x128xf32>
    %cst_157 = arith.constant 1.000000e+00 : f32
    %503 = vector.broadcast %cst_157 : f32 to vector<8x128xf32>
    %504 = arith.addf %503, %502 : vector<8x128xf32>
    %505 = arith.divf %503, %504 : vector<8x128xf32>
    %506 = arith.mulf %497, %473 : vector<8x128xf32>
    %507 = arith.mulf %491, %499 : vector<8x128xf32>
    %508 = arith.addf %506, %507 : vector<8x128xf32>
    %509 = math.tanh %508 : vector<8x128xf32>
    %510 = arith.mulf %505, %509 : vector<8x128xf32>
    %511 = vector.extract_strided_slice %510 {offsets = [0, 0], sizes = [1, 128], strides = [1, 1]} : vector<8x128xf32> to vector<1x128xf32>
    %512 = arith.index_cast %c11_i32 : i32 to index
    %c0_158 = arith.constant 0 : index
    %513 = vector.load %arg36[%512, %c0_158] : memref<16x128xf32, #tpu.memory_space<vmem>>, vector<1x128xf32>
    tpu.vector_store %arg36[%512, %c0_158], %511 {strides = array<i32>} : memref<16x128xf32, #tpu.memory_space<vmem>>, vector<1x128xf32>,
    %c12_i32 = arith.constant 12 : i32
    %514 = arith.index_cast %c12_i32 : i32 to index
    %c0_159 = arith.constant 0 : index
    %515 = vector.load %arg34[%514, %c0_159] : memref<16x512xf32, #tpu.memory_space<vmem>>, vector<1x512xf32>
    %cst_160 = arith.constant dense<0.000000e+00> : vector<8x512xf32>
    %516 = tpu.matmul %510, %86, %cst_160 {dimension_numbers = #tpu.dot_dimension_numbers<[1], [0], [0], [1], [0, 0, 1, 1], [], []>} : vector<8x128xf32>, vector<128x512xf32>, vector<8x512xf32> -> vector<8x512xf32>
    %517 = vector.broadcast %515 : vector<1x512xf32> to vector<8x512xf32>
    %518 = arith.addf %517, %516 : vector<8x512xf32>
    %519 = vector.broadcast %87 : vector<1x512xf32> to vector<8x512xf32>
    %520 = arith.addf %518, %519 : vector<8x512xf32>
    %521 = vector.extract_strided_slice %520 {offsets = [0, 0], sizes = [8, 128], strides = [1, 1]} : vector<8x512xf32> to vector<8x128xf32>
    %522 = arith.negf %521 : vector<8x128xf32>
    %523 = math.exp %522 : vector<8x128xf32>
    %cst_161 = arith.constant 1.000000e+00 : f32
    %524 = vector.broadcast %cst_161 : f32 to vector<8x128xf32>
    %525 = arith.addf %524, %523 : vector<8x128xf32>
    %526 = arith.divf %524, %525 : vector<8x128xf32>
    %527 = vector.extract_strided_slice %520 {offsets = [0, 128], sizes = [8, 128], strides = [1, 1]} : vector<8x512xf32> to vector<8x128xf32>
    %528 = arith.negf %527 : vector<8x128xf32>
    %529 = math.exp %528 : vector<8x128xf32>
    %cst_162 = arith.constant 1.000000e+00 : f32
    %530 = vector.broadcast %cst_162 : f32 to vector<8x128xf32>
    %531 = arith.addf %530, %529 : vector<8x128xf32>
    %532 = arith.divf %530, %531 : vector<8x128xf32>
    %533 = vector.extract_strided_slice %520 {offsets = [0, 256], sizes = [8, 128], strides = [1, 1]} : vector<8x512xf32> to vector<8x128xf32>
    %534 = math.tanh %533 : vector<8x128xf32>
    %535 = vector.extract_strided_slice %520 {offsets = [0, 384], sizes = [8, 128], strides = [1, 1]} : vector<8x512xf32> to vector<8x128xf32>
    %536 = arith.negf %535 : vector<8x128xf32>
    %537 = math.exp %536 : vector<8x128xf32>
    %cst_163 = arith.constant 1.000000e+00 : f32
    %538 = vector.broadcast %cst_163 : f32 to vector<8x128xf32>
    %539 = arith.addf %538, %537 : vector<8x128xf32>
    %540 = arith.divf %538, %539 : vector<8x128xf32>
    %541 = arith.mulf %532, %508 : vector<8x128xf32>
    %542 = arith.mulf %526, %534 : vector<8x128xf32>
    %543 = arith.addf %541, %542 : vector<8x128xf32>
    %544 = math.tanh %543 : vector<8x128xf32>
    %545 = arith.mulf %540, %544 : vector<8x128xf32>
    %546 = vector.extract_strided_slice %545 {offsets = [0, 0], sizes = [1, 128], strides = [1, 1]} : vector<8x128xf32> to vector<1x128xf32>
    %547 = arith.index_cast %c12_i32 : i32 to index
    %c0_164 = arith.constant 0 : index
    %548 = vector.load %arg36[%547, %c0_164] : memref<16x128xf32, #tpu.memory_space<vmem>>, vector<1x128xf32>
    tpu.vector_store %arg36[%547, %c0_164], %546 {strides = array<i32>} : memref<16x128xf32, #tpu.memory_space<vmem>>, vector<1x128xf32>,
    %c13_i32 = arith.constant 13 : i32
    %549 = arith.index_cast %c13_i32 : i32 to index
    %c0_165 = arith.constant 0 : index
    %550 = vector.load %arg34[%549, %c0_165] : memref<16x512xf32, #tpu.memory_space<vmem>>, vector<1x512xf32>
    %cst_166 = arith.constant dense<0.000000e+00> : vector<8x512xf32>
    %551 = tpu.matmul %545, %86, %cst_166 {dimension_numbers = #tpu.dot_dimension_numbers<[1], [0], [0], [1], [0, 0, 1, 1], [], []>} : vector<8x128xf32>, vector<128x512xf32>, vector<8x512xf32> -> vector<8x512xf32>
    %552 = vector.broadcast %550 : vector<1x512xf32> to vector<8x512xf32>
    %553 = arith.addf %552, %551 : vector<8x512xf32>
    %554 = vector.broadcast %87 : vector<1x512xf32> to vector<8x512xf32>
    %555 = arith.addf %553, %554 : vector<8x512xf32>
    %556 = vector.extract_strided_slice %555 {offsets = [0, 0], sizes = [8, 128], strides = [1, 1]} : vector<8x512xf32> to vector<8x128xf32>
    %557 = arith.negf %556 : vector<8x128xf32>
    %558 = math.exp %557 : vector<8x128xf32>
    %cst_167 = arith.constant 1.000000e+00 : f32
    %559 = vector.broadcast %cst_167 : f32 to vector<8x128xf32>
    %560 = arith.addf %559, %558 : vector<8x128xf32>
    %561 = arith.divf %559, %560 : vector<8x128xf32>
    %562 = vector.extract_strided_slice %555 {offsets = [0, 128], sizes = [8, 128], strides = [1, 1]} : vector<8x512xf32> to vector<8x128xf32>
    %563 = arith.negf %562 : vector<8x128xf32>
    %564 = math.exp %563 : vector<8x128xf32>
    %cst_168 = arith.constant 1.000000e+00 : f32
    %565 = vector.broadcast %cst_168 : f32 to vector<8x128xf32>
    %566 = arith.addf %565, %564 : vector<8x128xf32>
    %567 = arith.divf %565, %566 : vector<8x128xf32>
    %568 = vector.extract_strided_slice %555 {offsets = [0, 256], sizes = [8, 128], strides = [1, 1]} : vector<8x512xf32> to vector<8x128xf32>
    %569 = math.tanh %568 : vector<8x128xf32>
    %570 = vector.extract_strided_slice %555 {offsets = [0, 384], sizes = [8, 128], strides = [1, 1]} : vector<8x512xf32> to vector<8x128xf32>
    %571 = arith.negf %570 : vector<8x128xf32>
    %572 = math.exp %571 : vector<8x128xf32>
    %cst_169 = arith.constant 1.000000e+00 : f32
    %573 = vector.broadcast %cst_169 : f32 to vector<8x128xf32>
    %574 = arith.addf %573, %572 : vector<8x128xf32>
    %575 = arith.divf %573, %574 : vector<8x128xf32>
    %576 = arith.mulf %567, %543 : vector<8x128xf32>
    %577 = arith.mulf %561, %569 : vector<8x128xf32>
    %578 = arith.addf %576, %577 : vector<8x128xf32>
    %579 = math.tanh %578 : vector<8x128xf32>
    %580 = arith.mulf %575, %579 : vector<8x128xf32>
    %581 = vector.extract_strided_slice %580 {offsets = [0, 0], sizes = [1, 128], strides = [1, 1]} : vector<8x128xf32> to vector<1x128xf32>
    %582 = arith.index_cast %c13_i32 : i32 to index
    %c0_170 = arith.constant 0 : index
    %583 = vector.load %arg36[%582, %c0_170] : memref<16x128xf32, #tpu.memory_space<vmem>>, vector<1x128xf32>
    tpu.vector_store %arg36[%582, %c0_170], %581 {strides = array<i32>} : memref<16x128xf32, #tpu.memory_space<vmem>>, vector<1x128xf32>,
    %c14_i32 = arith.constant 14 : i32
    %584 = arith.index_cast %c14_i32 : i32 to index
    %c0_171 = arith.constant 0 : index
    %585 = vector.load %arg34[%584, %c0_171] : memref<16x512xf32, #tpu.memory_space<vmem>>, vector<1x512xf32>
    %cst_172 = arith.constant dense<0.000000e+00> : vector<8x512xf32>
    %586 = tpu.matmul %580, %86, %cst_172 {dimension_numbers = #tpu.dot_dimension_numbers<[1], [0], [0], [1], [0, 0, 1, 1], [], []>} : vector<8x128xf32>, vector<128x512xf32>, vector<8x512xf32> -> vector<8x512xf32>
    %587 = vector.broadcast %585 : vector<1x512xf32> to vector<8x512xf32>
    %588 = arith.addf %587, %586 : vector<8x512xf32>
    %589 = vector.broadcast %87 : vector<1x512xf32> to vector<8x512xf32>
    %590 = arith.addf %588, %589 : vector<8x512xf32>
    %591 = vector.extract_strided_slice %590 {offsets = [0, 0], sizes = [8, 128], strides = [1, 1]} : vector<8x512xf32> to vector<8x128xf32>
    %592 = arith.negf %591 : vector<8x128xf32>
    %593 = math.exp %592 : vector<8x128xf32>
    %cst_173 = arith.constant 1.000000e+00 : f32
    %594 = vector.broadcast %cst_173 : f32 to vector<8x128xf32>
    %595 = arith.addf %594, %593 : vector<8x128xf32>
    %596 = arith.divf %594, %595 : vector<8x128xf32>
    %597 = vector.extract_strided_slice %590 {offsets = [0, 128], sizes = [8, 128], strides = [1, 1]} : vector<8x512xf32> to vector<8x128xf32>
    %598 = arith.negf %597 : vector<8x128xf32>
    %599 = math.exp %598 : vector<8x128xf32>
    %cst_174 = arith.constant 1.000000e+00 : f32
    %600 = vector.broadcast %cst_174 : f32 to vector<8x128xf32>
    %601 = arith.addf %600, %599 : vector<8x128xf32>
    %602 = arith.divf %600, %601 : vector<8x128xf32>
    %603 = vector.extract_strided_slice %590 {offsets = [0, 256], sizes = [8, 128], strides = [1, 1]} : vector<8x512xf32> to vector<8x128xf32>
    %604 = math.tanh %603 : vector<8x128xf32>
    %605 = vector.extract_strided_slice %590 {offsets = [0, 384], sizes = [8, 128], strides = [1, 1]} : vector<8x512xf32> to vector<8x128xf32>
    %606 = arith.negf %605 : vector<8x128xf32>
    %607 = math.exp %606 : vector<8x128xf32>
    %cst_175 = arith.constant 1.000000e+00 : f32
    %608 = vector.broadcast %cst_175 : f32 to vector<8x128xf32>
    %609 = arith.addf %608, %607 : vector<8x128xf32>
    %610 = arith.divf %608, %609 : vector<8x128xf32>
    %611 = arith.mulf %602, %578 : vector<8x128xf32>
    %612 = arith.mulf %596, %604 : vector<8x128xf32>
    %613 = arith.addf %611, %612 : vector<8x128xf32>
    %614 = math.tanh %613 : vector<8x128xf32>
    %615 = arith.mulf %610, %614 : vector<8x128xf32>
    %616 = vector.extract_strided_slice %615 {offsets = [0, 0], sizes = [1, 128], strides = [1, 1]} : vector<8x128xf32> to vector<1x128xf32>
    %617 = arith.index_cast %c14_i32 : i32 to index
    %c0_176 = arith.constant 0 : index
    %618 = vector.load %arg36[%617, %c0_176] : memref<16x128xf32, #tpu.memory_space<vmem>>, vector<1x128xf32>
    tpu.vector_store %arg36[%617, %c0_176], %616 {strides = array<i32>} : memref<16x128xf32, #tpu.memory_space<vmem>>, vector<1x128xf32>,
    %c15_i32 = arith.constant 15 : i32
    %619 = arith.index_cast %c15_i32 : i32 to index
    %c0_177 = arith.constant 0 : index
    %620 = vector.load %arg34[%619, %c0_177] : memref<16x512xf32, #tpu.memory_space<vmem>>, vector<1x512xf32>
    %cst_178 = arith.constant dense<0.000000e+00> : vector<8x512xf32>
    %621 = tpu.matmul %615, %86, %cst_178 {dimension_numbers = #tpu.dot_dimension_numbers<[1], [0], [0], [1], [0, 0, 1, 1], [], []>} : vector<8x128xf32>, vector<128x512xf32>, vector<8x512xf32> -> vector<8x512xf32>
    %622 = vector.broadcast %620 : vector<1x512xf32> to vector<8x512xf32>
    %623 = arith.addf %622, %621 : vector<8x512xf32>
    %624 = vector.broadcast %87 : vector<1x512xf32> to vector<8x512xf32>
    %625 = arith.addf %623, %624 : vector<8x512xf32>
    %626 = vector.extract_strided_slice %625 {offsets = [0, 0], sizes = [8, 128], strides = [1, 1]} : vector<8x512xf32> to vector<8x128xf32>
    %627 = arith.negf %626 : vector<8x128xf32>
    %628 = math.exp %627 : vector<8x128xf32>
    %cst_179 = arith.constant 1.000000e+00 : f32
    %629 = vector.broadcast %cst_179 : f32 to vector<8x128xf32>
    %630 = arith.addf %629, %628 : vector<8x128xf32>
    %631 = arith.divf %629, %630 : vector<8x128xf32>
    %632 = vector.extract_strided_slice %625 {offsets = [0, 128], sizes = [8, 128], strides = [1, 1]} : vector<8x512xf32> to vector<8x128xf32>
    %633 = arith.negf %632 : vector<8x128xf32>
    %634 = math.exp %633 : vector<8x128xf32>
    %cst_180 = arith.constant 1.000000e+00 : f32
    %635 = vector.broadcast %cst_180 : f32 to vector<8x128xf32>
    %636 = arith.addf %635, %634 : vector<8x128xf32>
    %637 = arith.divf %635, %636 : vector<8x128xf32>
    %638 = vector.extract_strided_slice %625 {offsets = [0, 256], sizes = [8, 128], strides = [1, 1]} : vector<8x512xf32> to vector<8x128xf32>
    %639 = math.tanh %638 : vector<8x128xf32>
    %640 = vector.extract_strided_slice %625 {offsets = [0, 384], sizes = [8, 128], strides = [1, 1]} : vector<8x512xf32> to vector<8x128xf32>
    %641 = arith.negf %640 : vector<8x128xf32>
    %642 = math.exp %641 : vector<8x128xf32>
    %cst_181 = arith.constant 1.000000e+00 : f32
    %643 = vector.broadcast %cst_181 : f32 to vector<8x128xf32>
    %644 = arith.addf %643, %642 : vector<8x128xf32>
    %645 = arith.divf %643, %644 : vector<8x128xf32>
    %646 = arith.mulf %637, %613 : vector<8x128xf32>
    %647 = arith.mulf %631, %639 : vector<8x128xf32>
    %648 = arith.addf %646, %647 : vector<8x128xf32>
    %649 = math.tanh %648 : vector<8x128xf32>
    %650 = arith.mulf %645, %649 : vector<8x128xf32>
    %651 = vector.extract_strided_slice %650 {offsets = [0, 0], sizes = [1, 128], strides = [1, 1]} : vector<8x128xf32> to vector<1x128xf32>
    %652 = arith.index_cast %c15_i32 : i32 to index
    %c0_182 = arith.constant 0 : index
    %653 = vector.load %arg36[%652, %c0_182] : memref<16x128xf32, #tpu.memory_space<vmem>>, vector<1x128xf32>
    tpu.vector_store %arg36[%652, %c0_182], %651 {strides = array<i32>} : memref<16x128xf32, #tpu.memory_space<vmem>>, vector<1x128xf32>,
    %c16_i32 = arith.constant 16 : i32
    %c0_183 = arith.constant 0 : index
    %c0_184 = arith.constant 0 : index
    %654 = vector.load %arg36[%c0_183, %c0_184] : memref<16x128xf32, #tpu.memory_space<vmem>>, vector<16x128xf32>
    %c0_185 = arith.constant 0 : index
    %c0_186 = arith.constant 0 : index
    %655 = vector.load %arg24[%c0_185, %c0_186] : memref<128x512xf32, #tpu.memory_space<vmem>>, vector<128x512xf32>
    %cst_187 = arith.constant dense<0.000000e+00> : vector<16x512xf32>
    %656 = tpu.matmul %654, %655, %cst_187 {dimension_numbers = #tpu.dot_dimension_numbers<[1], [0], [0], [1], [0, 0, 1, 1], [], []>} : vector<16x128xf32>, vector<128x512xf32>, vector<16x512xf32> -> vector<16x512xf32>
    %c0_188 = arith.constant 0 : index
    %c0_189 = arith.constant 0 : index
    %657 = vector.load %arg26[%c0_188, %c0_189] : memref<1x512xf32, #tpu.memory_space<vmem>>, vector<1x512xf32>
    %658 = vector.broadcast %657 : vector<1x512xf32> to vector<16x512xf32>
    %659 = arith.addf %656, %658 : vector<16x512xf32>
    %c0_190 = arith.constant 0 : index
    %c0_191 = arith.constant 0 : index
    %660 = vector.load %arg35[%c0_190, %c0_191] : memref<16x512xf32, #tpu.memory_space<vmem>>, vector<16x512xf32>
    tpu.vector_store %arg35[%c0_190, %c0_191], %659 {strides = array<i32>} : memref<16x512xf32, #tpu.memory_space<vmem>>, vector<16x512xf32>,
    %c0_192 = arith.constant 0 : index
    %c0_193 = arith.constant 0 : index
    %661 = vector.load %arg25[%c0_192, %c0_193] : memref<128x512xf32, #tpu.memory_space<vmem>>, vector<128x512xf32>
    %c0_194 = arith.constant 0 : index
    %c0_195 = arith.constant 0 : index
    %662 = vector.load %arg27[%c0_194, %c0_195] : memref<1x512xf32, #tpu.memory_space<vmem>>, vector<1x512xf32>
    %663 = vector.extract_strided_slice %77 {offsets = [1, 0], sizes = [1, 128], strides = [1, 1]} : vector<2x128xf32> to vector<1x128xf32>
    %664 = vector.shape_cast %663 : vector<1x128xf32> to vector<1x128xf32>
    %665 = vector.broadcast %664 : vector<1x128xf32> to vector<8x128xf32>
    %666 = vector.extract_strided_slice %79 {offsets = [1, 0], sizes = [1, 128], strides = [1, 1]} : vector<2x128xf32> to vector<1x128xf32>
    %667 = vector.shape_cast %666 : vector<1x128xf32> to vector<1x128xf32>
    %668 = vector.broadcast %667 : vector<1x128xf32> to vector<8x128xf32>
    %c0_i32_196 = arith.constant 0 : i32
    %669 = arith.index_cast %c0_i32_196 : i32 to index
    %c0_197 = arith.constant 0 : index
    %670 = vector.load %arg35[%669, %c0_197] : memref<16x512xf32, #tpu.memory_space<vmem>>, vector<1x512xf32>
    %cst_198 = arith.constant dense<0.000000e+00> : vector<8x512xf32>
    %671 = tpu.matmul %665, %661, %cst_198 {dimension_numbers = #tpu.dot_dimension_numbers<[1], [0], [0], [1], [0, 0, 1, 1], [], []>} : vector<8x128xf32>, vector<128x512xf32>, vector<8x512xf32> -> vector<8x512xf32>
    %672 = vector.broadcast %670 : vector<1x512xf32> to vector<8x512xf32>
    %673 = arith.addf %672, %671 : vector<8x512xf32>
    %674 = vector.broadcast %662 : vector<1x512xf32> to vector<8x512xf32>
    %675 = arith.addf %673, %674 : vector<8x512xf32>
    %676 = vector.extract_strided_slice %675 {offsets = [0, 0], sizes = [8, 128], strides = [1, 1]} : vector<8x512xf32> to vector<8x128xf32>
    %677 = arith.negf %676 : vector<8x128xf32>
    %678 = math.exp %677 : vector<8x128xf32>
    %cst_199 = arith.constant 1.000000e+00 : f32
    %679 = vector.broadcast %cst_199 : f32 to vector<8x128xf32>
    %680 = arith.addf %679, %678 : vector<8x128xf32>
    %681 = arith.divf %679, %680 : vector<8x128xf32>
    %682 = vector.extract_strided_slice %675 {offsets = [0, 128], sizes = [8, 128], strides = [1, 1]} : vector<8x512xf32> to vector<8x128xf32>
    %683 = arith.negf %682 : vector<8x128xf32>
    %684 = math.exp %683 : vector<8x128xf32>
    %cst_200 = arith.constant 1.000000e+00 : f32
    %685 = vector.broadcast %cst_200 : f32 to vector<8x128xf32>
    %686 = arith.addf %685, %684 : vector<8x128xf32>
    %687 = arith.divf %685, %686 : vector<8x128xf32>
    %688 = vector.extract_strided_slice %675 {offsets = [0, 256], sizes = [8, 128], strides = [1, 1]} : vector<8x512xf32> to vector<8x128xf32>
    %689 = math.tanh %688 : vector<8x128xf32>
    %690 = vector.extract_strided_slice %675 {offsets = [0, 384], sizes = [8, 128], strides = [1, 1]} : vector<8x512xf32> to vector<8x128xf32>
    %691 = arith.negf %690 : vector<8x128xf32>
    %692 = math.exp %691 : vector<8x128xf32>
    %cst_201 = arith.constant 1.000000e+00 : f32
    %693 = vector.broadcast %cst_201 : f32 to vector<8x128xf32>
    %694 = arith.addf %693, %692 : vector<8x128xf32>
    %695 = arith.divf %693, %694 : vector<8x128xf32>
    %696 = arith.mulf %687, %668 : vector<8x128xf32>
    %697 = arith.mulf %681, %689 : vector<8x128xf32>
    %698 = arith.addf %696, %697 : vector<8x128xf32>
    %699 = math.tanh %698 : vector<8x128xf32>
    %700 = arith.mulf %695, %699 : vector<8x128xf32>
    %c1_i32_202 = arith.constant 1 : i32
    %701 = arith.index_cast %c1_i32_202 : i32 to index
    %c0_203 = arith.constant 0 : index
    %702 = vector.load %arg35[%701, %c0_203] : memref<16x512xf32, #tpu.memory_space<vmem>>, vector<1x512xf32>
    %cst_204 = arith.constant dense<0.000000e+00> : vector<8x512xf32>
    %703 = tpu.matmul %700, %661, %cst_204 {dimension_numbers = #tpu.dot_dimension_numbers<[1], [0], [0], [1], [0, 0, 1, 1], [], []>} : vector<8x128xf32>, vector<128x512xf32>, vector<8x512xf32> -> vector<8x512xf32>
    %704 = vector.broadcast %702 : vector<1x512xf32> to vector<8x512xf32>
    %705 = arith.addf %704, %703 : vector<8x512xf32>
    %706 = vector.broadcast %662 : vector<1x512xf32> to vector<8x512xf32>
    %707 = arith.addf %705, %706 : vector<8x512xf32>
    %708 = vector.extract_strided_slice %707 {offsets = [0, 0], sizes = [8, 128], strides = [1, 1]} : vector<8x512xf32> to vector<8x128xf32>
    %709 = arith.negf %708 : vector<8x128xf32>
    %710 = math.exp %709 : vector<8x128xf32>
    %cst_205 = arith.constant 1.000000e+00 : f32
    %711 = vector.broadcast %cst_205 : f32 to vector<8x128xf32>
    %712 = arith.addf %711, %710 : vector<8x128xf32>
    %713 = arith.divf %711, %712 : vector<8x128xf32>
    %714 = vector.extract_strided_slice %707 {offsets = [0, 128], sizes = [8, 128], strides = [1, 1]} : vector<8x512xf32> to vector<8x128xf32>
    %715 = arith.negf %714 : vector<8x128xf32>
    %716 = math.exp %715 : vector<8x128xf32>
    %cst_206 = arith.constant 1.000000e+00 : f32
    %717 = vector.broadcast %cst_206 : f32 to vector<8x128xf32>
    %718 = arith.addf %717, %716 : vector<8x128xf32>
    %719 = arith.divf %717, %718 : vector<8x128xf32>
    %720 = vector.extract_strided_slice %707 {offsets = [0, 256], sizes = [8, 128], strides = [1, 1]} : vector<8x512xf32> to vector<8x128xf32>
    %721 = math.tanh %720 : vector<8x128xf32>
    %722 = vector.extract_strided_slice %707 {offsets = [0, 384], sizes = [8, 128], strides = [1, 1]} : vector<8x512xf32> to vector<8x128xf32>
    %723 = arith.negf %722 : vector<8x128xf32>
    %724 = math.exp %723 : vector<8x128xf32>
    %cst_207 = arith.constant 1.000000e+00 : f32
    %725 = vector.broadcast %cst_207 : f32 to vector<8x128xf32>
    %726 = arith.addf %725, %724 : vector<8x128xf32>
    %727 = arith.divf %725, %726 : vector<8x128xf32>
    %728 = arith.mulf %719, %698 : vector<8x128xf32>
    %729 = arith.mulf %713, %721 : vector<8x128xf32>
    %730 = arith.addf %728, %729 : vector<8x128xf32>
    %731 = math.tanh %730 : vector<8x128xf32>
    %732 = arith.mulf %727, %731 : vector<8x128xf32>
    %c2_i32_208 = arith.constant 2 : i32
    %733 = arith.index_cast %c2_i32_208 : i32 to index
    %c0_209 = arith.constant 0 : index
    %734 = vector.load %arg35[%733, %c0_209] : memref<16x512xf32, #tpu.memory_space<vmem>>, vector<1x512xf32>
    %cst_210 = arith.constant dense<0.000000e+00> : vector<8x512xf32>
    %735 = tpu.matmul %732, %661, %cst_210 {dimension_numbers = #tpu.dot_dimension_numbers<[1], [0], [0], [1], [0, 0, 1, 1], [], []>} : vector<8x128xf32>, vector<128x512xf32>, vector<8x512xf32> -> vector<8x512xf32>
    %736 = vector.broadcast %734 : vector<1x512xf32> to vector<8x512xf32>
    %737 = arith.addf %736, %735 : vector<8x512xf32>
    %738 = vector.broadcast %662 : vector<1x512xf32> to vector<8x512xf32>
    %739 = arith.addf %737, %738 : vector<8x512xf32>
    %740 = vector.extract_strided_slice %739 {offsets = [0, 0], sizes = [8, 128], strides = [1, 1]} : vector<8x512xf32> to vector<8x128xf32>
    %741 = arith.negf %740 : vector<8x128xf32>
    %742 = math.exp %741 : vector<8x128xf32>
    %cst_211 = arith.constant 1.000000e+00 : f32
    %743 = vector.broadcast %cst_211 : f32 to vector<8x128xf32>
    %744 = arith.addf %743, %742 : vector<8x128xf32>
    %745 = arith.divf %743, %744 : vector<8x128xf32>
    %746 = vector.extract_strided_slice %739 {offsets = [0, 128], sizes = [8, 128], strides = [1, 1]} : vector<8x512xf32> to vector<8x128xf32>
    %747 = arith.negf %746 : vector<8x128xf32>
    %748 = math.exp %747 : vector<8x128xf32>
    %cst_212 = arith.constant 1.000000e+00 : f32
    %749 = vector.broadcast %cst_212 : f32 to vector<8x128xf32>
    %750 = arith.addf %749, %748 : vector<8x128xf32>
    %751 = arith.divf %749, %750 : vector<8x128xf32>
    %752 = vector.extract_strided_slice %739 {offsets = [0, 256], sizes = [8, 128], strides = [1, 1]} : vector<8x512xf32> to vector<8x128xf32>
    %753 = math.tanh %752 : vector<8x128xf32>
    %754 = vector.extract_strided_slice %739 {offsets = [0, 384], sizes = [8, 128], strides = [1, 1]} : vector<8x512xf32> to vector<8x128xf32>
    %755 = arith.negf %754 : vector<8x128xf32>
    %756 = math.exp %755 : vector<8x128xf32>
    %cst_213 = arith.constant 1.000000e+00 : f32
    %757 = vector.broadcast %cst_213 : f32 to vector<8x128xf32>
    %758 = arith.addf %757, %756 : vector<8x128xf32>
    %759 = arith.divf %757, %758 : vector<8x128xf32>
    %760 = arith.mulf %751, %730 : vector<8x128xf32>
    %761 = arith.mulf %745, %753 : vector<8x128xf32>
    %762 = arith.addf %760, %761 : vector<8x128xf32>
    %763 = math.tanh %762 : vector<8x128xf32>
    %764 = arith.mulf %759, %763 : vector<8x128xf32>
    %c3_i32_214 = arith.constant 3 : i32
    %765 = arith.index_cast %c3_i32_214 : i32 to index
    %c0_215 = arith.constant 0 : index
    %766 = vector.load %arg35[%765, %c0_215] : memref<16x512xf32, #tpu.memory_space<vmem>>, vector<1x512xf32>
    %cst_216 = arith.constant dense<0.000000e+00> : vector<8x512xf32>
    %767 = tpu.matmul %764, %661, %cst_216 {dimension_numbers = #tpu.dot_dimension_numbers<[1], [0], [0], [1], [0, 0, 1, 1], [], []>} : vector<8x128xf32>, vector<128x512xf32>, vector<8x512xf32> -> vector<8x512xf32>
    %768 = vector.broadcast %766 : vector<1x512xf32> to vector<8x512xf32>
    %769 = arith.addf %768, %767 : vector<8x512xf32>
    %770 = vector.broadcast %662 : vector<1x512xf32> to vector<8x512xf32>
    %771 = arith.addf %769, %770 : vector<8x512xf32>
    %772 = vector.extract_strided_slice %771 {offsets = [0, 0], sizes = [8, 128], strides = [1, 1]} : vector<8x512xf32> to vector<8x128xf32>
    %773 = arith.negf %772 : vector<8x128xf32>
    %774 = math.exp %773 : vector<8x128xf32>
    %cst_217 = arith.constant 1.000000e+00 : f32
    %775 = vector.broadcast %cst_217 : f32 to vector<8x128xf32>
    %776 = arith.addf %775, %774 : vector<8x128xf32>
    %777 = arith.divf %775, %776 : vector<8x128xf32>
    %778 = vector.extract_strided_slice %771 {offsets = [0, 128], sizes = [8, 128], strides = [1, 1]} : vector<8x512xf32> to vector<8x128xf32>
    %779 = arith.negf %778 : vector<8x128xf32>
    %780 = math.exp %779 : vector<8x128xf32>
    %cst_218 = arith.constant 1.000000e+00 : f32
    %781 = vector.broadcast %cst_218 : f32 to vector<8x128xf32>
    %782 = arith.addf %781, %780 : vector<8x128xf32>
    %783 = arith.divf %781, %782 : vector<8x128xf32>
    %784 = vector.extract_strided_slice %771 {offsets = [0, 256], sizes = [8, 128], strides = [1, 1]} : vector<8x512xf32> to vector<8x128xf32>
    %785 = math.tanh %784 : vector<8x128xf32>
    %786 = vector.extract_strided_slice %771 {offsets = [0, 384], sizes = [8, 128], strides = [1, 1]} : vector<8x512xf32> to vector<8x128xf32>
    %787 = arith.negf %786 : vector<8x128xf32>
    %788 = math.exp %787 : vector<8x128xf32>
    %cst_219 = arith.constant 1.000000e+00 : f32
    %789 = vector.broadcast %cst_219 : f32 to vector<8x128xf32>
    %790 = arith.addf %789, %788 : vector<8x128xf32>
    %791 = arith.divf %789, %790 : vector<8x128xf32>
    %792 = arith.mulf %783, %762 : vector<8x128xf32>
    %793 = arith.mulf %777, %785 : vector<8x128xf32>
    %794 = arith.addf %792, %793 : vector<8x128xf32>
    %795 = math.tanh %794 : vector<8x128xf32>
    %796 = arith.mulf %791, %795 : vector<8x128xf32>
    %c4_i32_220 = arith.constant 4 : i32
    %797 = arith.index_cast %c4_i32_220 : i32 to index
    %c0_221 = arith.constant 0 : index
    %798 = vector.load %arg35[%797, %c0_221] : memref<16x512xf32, #tpu.memory_space<vmem>>, vector<1x512xf32>
    %cst_222 = arith.constant dense<0.000000e+00> : vector<8x512xf32>
    %799 = tpu.matmul %796, %661, %cst_222 {dimension_numbers = #tpu.dot_dimension_numbers<[1], [0], [0], [1], [0, 0, 1, 1], [], []>} : vector<8x128xf32>, vector<128x512xf32>, vector<8x512xf32> -> vector<8x512xf32>
    %800 = vector.broadcast %798 : vector<1x512xf32> to vector<8x512xf32>
    %801 = arith.addf %800, %799 : vector<8x512xf32>
    %802 = vector.broadcast %662 : vector<1x512xf32> to vector<8x512xf32>
    %803 = arith.addf %801, %802 : vector<8x512xf32>
    %804 = vector.extract_strided_slice %803 {offsets = [0, 0], sizes = [8, 128], strides = [1, 1]} : vector<8x512xf32> to vector<8x128xf32>
    %805 = arith.negf %804 : vector<8x128xf32>
    %806 = math.exp %805 : vector<8x128xf32>
    %cst_223 = arith.constant 1.000000e+00 : f32
    %807 = vector.broadcast %cst_223 : f32 to vector<8x128xf32>
    %808 = arith.addf %807, %806 : vector<8x128xf32>
    %809 = arith.divf %807, %808 : vector<8x128xf32>
    %810 = vector.extract_strided_slice %803 {offsets = [0, 128], sizes = [8, 128], strides = [1, 1]} : vector<8x512xf32> to vector<8x128xf32>
    %811 = arith.negf %810 : vector<8x128xf32>
    %812 = math.exp %811 : vector<8x128xf32>
    %cst_224 = arith.constant 1.000000e+00 : f32
    %813 = vector.broadcast %cst_224 : f32 to vector<8x128xf32>
    %814 = arith.addf %813, %812 : vector<8x128xf32>
    %815 = arith.divf %813, %814 : vector<8x128xf32>
    %816 = vector.extract_strided_slice %803 {offsets = [0, 256], sizes = [8, 128], strides = [1, 1]} : vector<8x512xf32> to vector<8x128xf32>
    %817 = math.tanh %816 : vector<8x128xf32>
    %818 = vector.extract_strided_slice %803 {offsets = [0, 384], sizes = [8, 128], strides = [1, 1]} : vector<8x512xf32> to vector<8x128xf32>
    %819 = arith.negf %818 : vector<8x128xf32>
    %820 = math.exp %819 : vector<8x128xf32>
    %cst_225 = arith.constant 1.000000e+00 : f32
    %821 = vector.broadcast %cst_225 : f32 to vector<8x128xf32>
    %822 = arith.addf %821, %820 : vector<8x128xf32>
    %823 = arith.divf %821, %822 : vector<8x128xf32>
    %824 = arith.mulf %815, %794 : vector<8x128xf32>
    %825 = arith.mulf %809, %817 : vector<8x128xf32>
    %826 = arith.addf %824, %825 : vector<8x128xf32>
    %827 = math.tanh %826 : vector<8x128xf32>
    %828 = arith.mulf %823, %827 : vector<8x128xf32>
    %c5_i32_226 = arith.constant 5 : i32
    %829 = arith.index_cast %c5_i32_226 : i32 to index
    %c0_227 = arith.constant 0 : index
    %830 = vector.load %arg35[%829, %c0_227] : memref<16x512xf32, #tpu.memory_space<vmem>>, vector<1x512xf32>
    %cst_228 = arith.constant dense<0.000000e+00> : vector<8x512xf32>
    %831 = tpu.matmul %828, %661, %cst_228 {dimension_numbers = #tpu.dot_dimension_numbers<[1], [0], [0], [1], [0, 0, 1, 1], [], []>} : vector<8x128xf32>, vector<128x512xf32>, vector<8x512xf32> -> vector<8x512xf32>
    %832 = vector.broadcast %830 : vector<1x512xf32> to vector<8x512xf32>
    %833 = arith.addf %832, %831 : vector<8x512xf32>
    %834 = vector.broadcast %662 : vector<1x512xf32> to vector<8x512xf32>
    %835 = arith.addf %833, %834 : vector<8x512xf32>
    %836 = vector.extract_strided_slice %835 {offsets = [0, 0], sizes = [8, 128], strides = [1, 1]} : vector<8x512xf32> to vector<8x128xf32>
    %837 = arith.negf %836 : vector<8x128xf32>
    %838 = math.exp %837 : vector<8x128xf32>
    %cst_229 = arith.constant 1.000000e+00 : f32
    %839 = vector.broadcast %cst_229 : f32 to vector<8x128xf32>
    %840 = arith.addf %839, %838 : vector<8x128xf32>
    %841 = arith.divf %839, %840 : vector<8x128xf32>
    %842 = vector.extract_strided_slice %835 {offsets = [0, 128], sizes = [8, 128], strides = [1, 1]} : vector<8x512xf32> to vector<8x128xf32>
    %843 = arith.negf %842 : vector<8x128xf32>
    %844 = math.exp %843 : vector<8x128xf32>
    %cst_230 = arith.constant 1.000000e+00 : f32
    %845 = vector.broadcast %cst_230 : f32 to vector<8x128xf32>
    %846 = arith.addf %845, %844 : vector<8x128xf32>
    %847 = arith.divf %845, %846 : vector<8x128xf32>
    %848 = vector.extract_strided_slice %835 {offsets = [0, 256], sizes = [8, 128], strides = [1, 1]} : vector<8x512xf32> to vector<8x128xf32>
    %849 = math.tanh %848 : vector<8x128xf32>
    %850 = vector.extract_strided_slice %835 {offsets = [0, 384], sizes = [8, 128], strides = [1, 1]} : vector<8x512xf32> to vector<8x128xf32>
    %851 = arith.negf %850 : vector<8x128xf32>
    %852 = math.exp %851 : vector<8x128xf32>
    %cst_231 = arith.constant 1.000000e+00 : f32
    %853 = vector.broadcast %cst_231 : f32 to vector<8x128xf32>
    %854 = arith.addf %853, %852 : vector<8x128xf32>
    %855 = arith.divf %853, %854 : vector<8x128xf32>
    %856 = arith.mulf %847, %826 : vector<8x128xf32>
    %857 = arith.mulf %841, %849 : vector<8x128xf32>
    %858 = arith.addf %856, %857 : vector<8x128xf32>
    %859 = math.tanh %858 : vector<8x128xf32>
    %860 = arith.mulf %855, %859 : vector<8x128xf32>
    %c6_i32_232 = arith.constant 6 : i32
    %861 = arith.index_cast %c6_i32_232 : i32 to index
    %c0_233 = arith.constant 0 : index
    %862 = vector.load %arg35[%861, %c0_233] : memref<16x512xf32, #tpu.memory_space<vmem>>, vector<1x512xf32>
    %cst_234 = arith.constant dense<0.000000e+00> : vector<8x512xf32>
    %863 = tpu.matmul %860, %661, %cst_234 {dimension_numbers = #tpu.dot_dimension_numbers<[1], [0], [0], [1], [0, 0, 1, 1], [], []>} : vector<8x128xf32>, vector<128x512xf32>, vector<8x512xf32> -> vector<8x512xf32>
    %864 = vector.broadcast %862 : vector<1x512xf32> to vector<8x512xf32>
    %865 = arith.addf %864, %863 : vector<8x512xf32>
    %866 = vector.broadcast %662 : vector<1x512xf32> to vector<8x512xf32>
    %867 = arith.addf %865, %866 : vector<8x512xf32>
    %868 = vector.extract_strided_slice %867 {offsets = [0, 0], sizes = [8, 128], strides = [1, 1]} : vector<8x512xf32> to vector<8x128xf32>
    %869 = arith.negf %868 : vector<8x128xf32>
    %870 = math.exp %869 : vector<8x128xf32>
    %cst_235 = arith.constant 1.000000e+00 : f32
    %871 = vector.broadcast %cst_235 : f32 to vector<8x128xf32>
    %872 = arith.addf %871, %870 : vector<8x128xf32>
    %873 = arith.divf %871, %872 : vector<8x128xf32>
    %874 = vector.extract_strided_slice %867 {offsets = [0, 128], sizes = [8, 128], strides = [1, 1]} : vector<8x512xf32> to vector<8x128xf32>
    %875 = arith.negf %874 : vector<8x128xf32>
    %876 = math.exp %875 : vector<8x128xf32>
    %cst_236 = arith.constant 1.000000e+00 : f32
    %877 = vector.broadcast %cst_236 : f32 to vector<8x128xf32>
    %878 = arith.addf %877, %876 : vector<8x128xf32>
    %879 = arith.divf %877, %878 : vector<8x128xf32>
    %880 = vector.extract_strided_slice %867 {offsets = [0, 256], sizes = [8, 128], strides = [1, 1]} : vector<8x512xf32> to vector<8x128xf32>
    %881 = math.tanh %880 : vector<8x128xf32>
    %882 = vector.extract_strided_slice %867 {offsets = [0, 384], sizes = [8, 128], strides = [1, 1]} : vector<8x512xf32> to vector<8x128xf32>
    %883 = arith.negf %882 : vector<8x128xf32>
    %884 = math.exp %883 : vector<8x128xf32>
    %cst_237 = arith.constant 1.000000e+00 : f32
    %885 = vector.broadcast %cst_237 : f32 to vector<8x128xf32>
    %886 = arith.addf %885, %884 : vector<8x128xf32>
    %887 = arith.divf %885, %886 : vector<8x128xf32>
    %888 = arith.mulf %879, %858 : vector<8x128xf32>
    %889 = arith.mulf %873, %881 : vector<8x128xf32>
    %890 = arith.addf %888, %889 : vector<8x128xf32>
    %891 = math.tanh %890 : vector<8x128xf32>
    %892 = arith.mulf %887, %891 : vector<8x128xf32>
    %c7_i32_238 = arith.constant 7 : i32
    %893 = arith.index_cast %c7_i32_238 : i32 to index
    %c0_239 = arith.constant 0 : index
    %894 = vector.load %arg35[%893, %c0_239] : memref<16x512xf32, #tpu.memory_space<vmem>>, vector<1x512xf32>
    %cst_240 = arith.constant dense<0.000000e+00> : vector<8x512xf32>
    %895 = tpu.matmul %892, %661, %cst_240 {dimension_numbers = #tpu.dot_dimension_numbers<[1], [0], [0], [1], [0, 0, 1, 1], [], []>} : vector<8x128xf32>, vector<128x512xf32>, vector<8x512xf32> -> vector<8x512xf32>
    %896 = vector.broadcast %894 : vector<1x512xf32> to vector<8x512xf32>
    %897 = arith.addf %896, %895 : vector<8x512xf32>
    %898 = vector.broadcast %662 : vector<1x512xf32> to vector<8x512xf32>
    %899 = arith.addf %897, %898 : vector<8x512xf32>
    %900 = vector.extract_strided_slice %899 {offsets = [0, 0], sizes = [8, 128], strides = [1, 1]} : vector<8x512xf32> to vector<8x128xf32>
    %901 = arith.negf %900 : vector<8x128xf32>
    %902 = math.exp %901 : vector<8x128xf32>
    %cst_241 = arith.constant 1.000000e+00 : f32
    %903 = vector.broadcast %cst_241 : f32 to vector<8x128xf32>
    %904 = arith.addf %903, %902 : vector<8x128xf32>
    %905 = arith.divf %903, %904 : vector<8x128xf32>
    %906 = vector.extract_strided_slice %899 {offsets = [0, 128], sizes = [8, 128], strides = [1, 1]} : vector<8x512xf32> to vector<8x128xf32>
    %907 = arith.negf %906 : vector<8x128xf32>
    %908 = math.exp %907 : vector<8x128xf32>
    %cst_242 = arith.constant 1.000000e+00 : f32
    %909 = vector.broadcast %cst_242 : f32 to vector<8x128xf32>
    %910 = arith.addf %909, %908 : vector<8x128xf32>
    %911 = arith.divf %909, %910 : vector<8x128xf32>
    %912 = vector.extract_strided_slice %899 {offsets = [0, 256], sizes = [8, 128], strides = [1, 1]} : vector<8x512xf32> to vector<8x128xf32>
    %913 = math.tanh %912 : vector<8x128xf32>
    %914 = vector.extract_strided_slice %899 {offsets = [0, 384], sizes = [8, 128], strides = [1, 1]} : vector<8x512xf32> to vector<8x128xf32>
    %915 = arith.negf %914 : vector<8x128xf32>
    %916 = math.exp %915 : vector<8x128xf32>
    %cst_243 = arith.constant 1.000000e+00 : f32
    %917 = vector.broadcast %cst_243 : f32 to vector<8x128xf32>
    %918 = arith.addf %917, %916 : vector<8x128xf32>
    %919 = arith.divf %917, %918 : vector<8x128xf32>
    %920 = arith.mulf %911, %890 : vector<8x128xf32>
    %921 = arith.mulf %905, %913 : vector<8x128xf32>
    %922 = arith.addf %920, %921 : vector<8x128xf32>
    %923 = math.tanh %922 : vector<8x128xf32>
    %924 = arith.mulf %919, %923 : vector<8x128xf32>
    %c8_i32_244 = arith.constant 8 : i32
    %925 = arith.index_cast %c8_i32_244 : i32 to index
    %c0_245 = arith.constant 0 : index
    %926 = vector.load %arg35[%925, %c0_245] : memref<16x512xf32, #tpu.memory_space<vmem>>, vector<1x512xf32>
    %cst_246 = arith.constant dense<0.000000e+00> : vector<8x512xf32>
    %927 = tpu.matmul %924, %661, %cst_246 {dimension_numbers = #tpu.dot_dimension_numbers<[1], [0], [0], [1], [0, 0, 1, 1], [], []>} : vector<8x128xf32>, vector<128x512xf32>, vector<8x512xf32> -> vector<8x512xf32>
    %928 = vector.broadcast %926 : vector<1x512xf32> to vector<8x512xf32>
    %929 = arith.addf %928, %927 : vector<8x512xf32>
    %930 = vector.broadcast %662 : vector<1x512xf32> to vector<8x512xf32>
    %931 = arith.addf %929, %930 : vector<8x512xf32>
    %932 = vector.extract_strided_slice %931 {offsets = [0, 0], sizes = [8, 128], strides = [1, 1]} : vector<8x512xf32> to vector<8x128xf32>
    %933 = arith.negf %932 : vector<8x128xf32>
    %934 = math.exp %933 : vector<8x128xf32>
    %cst_247 = arith.constant 1.000000e+00 : f32
    %935 = vector.broadcast %cst_247 : f32 to vector<8x128xf32>
    %936 = arith.addf %935, %934 : vector<8x128xf32>
    %937 = arith.divf %935, %936 : vector<8x128xf32>
    %938 = vector.extract_strided_slice %931 {offsets = [0, 128], sizes = [8, 128], strides = [1, 1]} : vector<8x512xf32> to vector<8x128xf32>
    %939 = arith.negf %938 : vector<8x128xf32>
    %940 = math.exp %939 : vector<8x128xf32>
    %cst_248 = arith.constant 1.000000e+00 : f32
    %941 = vector.broadcast %cst_248 : f32 to vector<8x128xf32>
    %942 = arith.addf %941, %940 : vector<8x128xf32>
    %943 = arith.divf %941, %942 : vector<8x128xf32>
    %944 = vector.extract_strided_slice %931 {offsets = [0, 256], sizes = [8, 128], strides = [1, 1]} : vector<8x512xf32> to vector<8x128xf32>
    %945 = math.tanh %944 : vector<8x128xf32>
    %946 = vector.extract_strided_slice %931 {offsets = [0, 384], sizes = [8, 128], strides = [1, 1]} : vector<8x512xf32> to vector<8x128xf32>
    %947 = arith.negf %946 : vector<8x128xf32>
    %948 = math.exp %947 : vector<8x128xf32>
    %cst_249 = arith.constant 1.000000e+00 : f32
    %949 = vector.broadcast %cst_249 : f32 to vector<8x128xf32>
    %950 = arith.addf %949, %948 : vector<8x128xf32>
    %951 = arith.divf %949, %950 : vector<8x128xf32>
    %952 = arith.mulf %943, %922 : vector<8x128xf32>
    %953 = arith.mulf %937, %945 : vector<8x128xf32>
    %954 = arith.addf %952, %953 : vector<8x128xf32>
    %955 = math.tanh %954 : vector<8x128xf32>
    %956 = arith.mulf %951, %955 : vector<8x128xf32>
    %c9_i32_250 = arith.constant 9 : i32
    %957 = arith.index_cast %c9_i32_250 : i32 to index
    %c0_251 = arith.constant 0 : index
    %958 = vector.load %arg35[%957, %c0_251] : memref<16x512xf32, #tpu.memory_space<vmem>>, vector<1x512xf32>
    %cst_252 = arith.constant dense<0.000000e+00> : vector<8x512xf32>
    %959 = tpu.matmul %956, %661, %cst_252 {dimension_numbers = #tpu.dot_dimension_numbers<[1], [0], [0], [1], [0, 0, 1, 1], [], []>} : vector<8x128xf32>, vector<128x512xf32>, vector<8x512xf32> -> vector<8x512xf32>
    %960 = vector.broadcast %958 : vector<1x512xf32> to vector<8x512xf32>
    %961 = arith.addf %960, %959 : vector<8x512xf32>
    %962 = vector.broadcast %662 : vector<1x512xf32> to vector<8x512xf32>
    %963 = arith.addf %961, %962 : vector<8x512xf32>
    %964 = vector.extract_strided_slice %963 {offsets = [0, 0], sizes = [8, 128], strides = [1, 1]} : vector<8x512xf32> to vector<8x128xf32>
    %965 = arith.negf %964 : vector<8x128xf32>
    %966 = math.exp %965 : vector<8x128xf32>
    %cst_253 = arith.constant 1.000000e+00 : f32
    %967 = vector.broadcast %cst_253 : f32 to vector<8x128xf32>
    %968 = arith.addf %967, %966 : vector<8x128xf32>
    %969 = arith.divf %967, %968 : vector<8x128xf32>
    %970 = vector.extract_strided_slice %963 {offsets = [0, 128], sizes = [8, 128], strides = [1, 1]} : vector<8x512xf32> to vector<8x128xf32>
    %971 = arith.negf %970 : vector<8x128xf32>
    %972 = math.exp %971 : vector<8x128xf32>
    %cst_254 = arith.constant 1.000000e+00 : f32
    %973 = vector.broadcast %cst_254 : f32 to vector<8x128xf32>
    %974 = arith.addf %973, %972 : vector<8x128xf32>
    %975 = arith.divf %973, %974 : vector<8x128xf32>
    %976 = vector.extract_strided_slice %963 {offsets = [0, 256], sizes = [8, 128], strides = [1, 1]} : vector<8x512xf32> to vector<8x128xf32>
    %977 = math.tanh %976 : vector<8x128xf32>
    %978 = vector.extract_strided_slice %963 {offsets = [0, 384], sizes = [8, 128], strides = [1, 1]} : vector<8x512xf32> to vector<8x128xf32>
    %979 = arith.negf %978 : vector<8x128xf32>
    %980 = math.exp %979 : vector<8x128xf32>
    %cst_255 = arith.constant 1.000000e+00 : f32
    %981 = vector.broadcast %cst_255 : f32 to vector<8x128xf32>
    %982 = arith.addf %981, %980 : vector<8x128xf32>
    %983 = arith.divf %981, %982 : vector<8x128xf32>
    %984 = arith.mulf %975, %954 : vector<8x128xf32>
    %985 = arith.mulf %969, %977 : vector<8x128xf32>
    %986 = arith.addf %984, %985 : vector<8x128xf32>
    %987 = math.tanh %986 : vector<8x128xf32>
    %988 = arith.mulf %983, %987 : vector<8x128xf32>
    %c10_i32_256 = arith.constant 10 : i32
    %989 = arith.index_cast %c10_i32_256 : i32 to index
    %c0_257 = arith.constant 0 : index
    %990 = vector.load %arg35[%989, %c0_257] : memref<16x512xf32, #tpu.memory_space<vmem>>, vector<1x512xf32>
    %cst_258 = arith.constant dense<0.000000e+00> : vector<8x512xf32>
    %991 = tpu.matmul %988, %661, %cst_258 {dimension_numbers = #tpu.dot_dimension_numbers<[1], [0], [0], [1], [0, 0, 1, 1], [], []>} : vector<8x128xf32>, vector<128x512xf32>, vector<8x512xf32> -> vector<8x512xf32>
    %992 = vector.broadcast %990 : vector<1x512xf32> to vector<8x512xf32>
    %993 = arith.addf %992, %991 : vector<8x512xf32>
    %994 = vector.broadcast %662 : vector<1x512xf32> to vector<8x512xf32>
    %995 = arith.addf %993, %994 : vector<8x512xf32>
    %996 = vector.extract_strided_slice %995 {offsets = [0, 0], sizes = [8, 128], strides = [1, 1]} : vector<8x512xf32> to vector<8x128xf32>
    %997 = arith.negf %996 : vector<8x128xf32>
    %998 = math.exp %997 : vector<8x128xf32>
    %cst_259 = arith.constant 1.000000e+00 : f32
    %999 = vector.broadcast %cst_259 : f32 to vector<8x128xf32>
    %1000 = arith.addf %999, %998 : vector<8x128xf32>
    %1001 = arith.divf %999, %1000 : vector<8x128xf32>
    %1002 = vector.extract_strided_slice %995 {offsets = [0, 128], sizes = [8, 128], strides = [1, 1]} : vector<8x512xf32> to vector<8x128xf32>
    %1003 = arith.negf %1002 : vector<8x128xf32>
    %1004 = math.exp %1003 : vector<8x128xf32>
    %cst_260 = arith.constant 1.000000e+00 : f32
    %1005 = vector.broadcast %cst_260 : f32 to vector<8x128xf32>
    %1006 = arith.addf %1005, %1004 : vector<8x128xf32>
    %1007 = arith.divf %1005, %1006 : vector<8x128xf32>
    %1008 = vector.extract_strided_slice %995 {offsets = [0, 256], sizes = [8, 128], strides = [1, 1]} : vector<8x512xf32> to vector<8x128xf32>
    %1009 = math.tanh %1008 : vector<8x128xf32>
    %1010 = vector.extract_strided_slice %995 {offsets = [0, 384], sizes = [8, 128], strides = [1, 1]} : vector<8x512xf32> to vector<8x128xf32>
    %1011 = arith.negf %1010 : vector<8x128xf32>
    %1012 = math.exp %1011 : vector<8x128xf32>
    %cst_261 = arith.constant 1.000000e+00 : f32
    %1013 = vector.broadcast %cst_261 : f32 to vector<8x128xf32>
    %1014 = arith.addf %1013, %1012 : vector<8x128xf32>
    %1015 = arith.divf %1013, %1014 : vector<8x128xf32>
    %1016 = arith.mulf %1007, %986 : vector<8x128xf32>
    %1017 = arith.mulf %1001, %1009 : vector<8x128xf32>
    %1018 = arith.addf %1016, %1017 : vector<8x128xf32>
    %1019 = math.tanh %1018 : vector<8x128xf32>
    %1020 = arith.mulf %1015, %1019 : vector<8x128xf32>
    %c11_i32_262 = arith.constant 11 : i32
    %1021 = arith.index_cast %c11_i32_262 : i32 to index
    %c0_263 = arith.constant 0 : index
    %1022 = vector.load %arg35[%1021, %c0_263] : memref<16x512xf32, #tpu.memory_space<vmem>>, vector<1x512xf32>
    %cst_264 = arith.constant dense<0.000000e+00> : vector<8x512xf32>
    %1023 = tpu.matmul %1020, %661, %cst_264 {dimension_numbers = #tpu.dot_dimension_numbers<[1], [0], [0], [1], [0, 0, 1, 1], [], []>} : vector<8x128xf32>, vector<128x512xf32>, vector<8x512xf32> -> vector<8x512xf32>
    %1024 = vector.broadcast %1022 : vector<1x512xf32> to vector<8x512xf32>
    %1025 = arith.addf %1024, %1023 : vector<8x512xf32>
    %1026 = vector.broadcast %662 : vector<1x512xf32> to vector<8x512xf32>
    %1027 = arith.addf %1025, %1026 : vector<8x512xf32>
    %1028 = vector.extract_strided_slice %1027 {offsets = [0, 0], sizes = [8, 128], strides = [1, 1]} : vector<8x512xf32> to vector<8x128xf32>
    %1029 = arith.negf %1028 : vector<8x128xf32>
    %1030 = math.exp %1029 : vector<8x128xf32>
    %cst_265 = arith.constant 1.000000e+00 : f32
    %1031 = vector.broadcast %cst_265 : f32 to vector<8x128xf32>
    %1032 = arith.addf %1031, %1030 : vector<8x128xf32>
    %1033 = arith.divf %1031, %1032 : vector<8x128xf32>
    %1034 = vector.extract_strided_slice %1027 {offsets = [0, 128], sizes = [8, 128], strides = [1, 1]} : vector<8x512xf32> to vector<8x128xf32>
    %1035 = arith.negf %1034 : vector<8x128xf32>
    %1036 = math.exp %1035 : vector<8x128xf32>
    %cst_266 = arith.constant 1.000000e+00 : f32
    %1037 = vector.broadcast %cst_266 : f32 to vector<8x128xf32>
    %1038 = arith.addf %1037, %1036 : vector<8x128xf32>
    %1039 = arith.divf %1037, %1038 : vector<8x128xf32>
    %1040 = vector.extract_strided_slice %1027 {offsets = [0, 256], sizes = [8, 128], strides = [1, 1]} : vector<8x512xf32> to vector<8x128xf32>
    %1041 = math.tanh %1040 : vector<8x128xf32>
    %1042 = vector.extract_strided_slice %1027 {offsets = [0, 384], sizes = [8, 128], strides = [1, 1]} : vector<8x512xf32> to vector<8x128xf32>
    %1043 = arith.negf %1042 : vector<8x128xf32>
    %1044 = math.exp %1043 : vector<8x128xf32>
    %cst_267 = arith.constant 1.000000e+00 : f32
    %1045 = vector.broadcast %cst_267 : f32 to vector<8x128xf32>
    %1046 = arith.addf %1045, %1044 : vector<8x128xf32>
    %1047 = arith.divf %1045, %1046 : vector<8x128xf32>
    %1048 = arith.mulf %1039, %1018 : vector<8x128xf32>
    %1049 = arith.mulf %1033, %1041 : vector<8x128xf32>
    %1050 = arith.addf %1048, %1049 : vector<8x128xf32>
    %1051 = math.tanh %1050 : vector<8x128xf32>
    %1052 = arith.mulf %1047, %1051 : vector<8x128xf32>
    %c12_i32_268 = arith.constant 12 : i32
    %1053 = arith.index_cast %c12_i32_268 : i32 to index
    %c0_269 = arith.constant 0 : index
    %1054 = vector.load %arg35[%1053, %c0_269] : memref<16x512xf32, #tpu.memory_space<vmem>>, vector<1x512xf32>
    %cst_270 = arith.constant dense<0.000000e+00> : vector<8x512xf32>
    %1055 = tpu.matmul %1052, %661, %cst_270 {dimension_numbers = #tpu.dot_dimension_numbers<[1], [0], [0], [1], [0, 0, 1, 1], [], []>} : vector<8x128xf32>, vector<128x512xf32>, vector<8x512xf32> -> vector<8x512xf32>
    %1056 = vector.broadcast %1054 : vector<1x512xf32> to vector<8x512xf32>
    %1057 = arith.addf %1056, %1055 : vector<8x512xf32>
    %1058 = vector.broadcast %662 : vector<1x512xf32> to vector<8x512xf32>
    %1059 = arith.addf %1057, %1058 : vector<8x512xf32>
    %1060 = vector.extract_strided_slice %1059 {offsets = [0, 0], sizes = [8, 128], strides = [1, 1]} : vector<8x512xf32> to vector<8x128xf32>
    %1061 = arith.negf %1060 : vector<8x128xf32>
    %1062 = math.exp %1061 : vector<8x128xf32>
    %cst_271 = arith.constant 1.000000e+00 : f32
    %1063 = vector.broadcast %cst_271 : f32 to vector<8x128xf32>
    %1064 = arith.addf %1063, %1062 : vector<8x128xf32>
    %1065 = arith.divf %1063, %1064 : vector<8x128xf32>
    %1066 = vector.extract_strided_slice %1059 {offsets = [0, 128], sizes = [8, 128], strides = [1, 1]} : vector<8x512xf32> to vector<8x128xf32>
    %1067 = arith.negf %1066 : vector<8x128xf32>
    %1068 = math.exp %1067 : vector<8x128xf32>
    %cst_272 = arith.constant 1.000000e+00 : f32
    %1069 = vector.broadcast %cst_272 : f32 to vector<8x128xf32>
    %1070 = arith.addf %1069, %1068 : vector<8x128xf32>
    %1071 = arith.divf %1069, %1070 : vector<8x128xf32>
    %1072 = vector.extract_strided_slice %1059 {offsets = [0, 256], sizes = [8, 128], strides = [1, 1]} : vector<8x512xf32> to vector<8x128xf32>
    %1073 = math.tanh %1072 : vector<8x128xf32>
    %1074 = vector.extract_strided_slice %1059 {offsets = [0, 384], sizes = [8, 128], strides = [1, 1]} : vector<8x512xf32> to vector<8x128xf32>
    %1075 = arith.negf %1074 : vector<8x128xf32>
    %1076 = math.exp %1075 : vector<8x128xf32>
    %cst_273 = arith.constant 1.000000e+00 : f32
    %1077 = vector.broadcast %cst_273 : f32 to vector<8x128xf32>
    %1078 = arith.addf %1077, %1076 : vector<8x128xf32>
    %1079 = arith.divf %1077, %1078 : vector<8x128xf32>
    %1080 = arith.mulf %1071, %1050 : vector<8x128xf32>
    %1081 = arith.mulf %1065, %1073 : vector<8x128xf32>
    %1082 = arith.addf %1080, %1081 : vector<8x128xf32>
    %1083 = math.tanh %1082 : vector<8x128xf32>
    %1084 = arith.mulf %1079, %1083 : vector<8x128xf32>
    %c13_i32_274 = arith.constant 13 : i32
    %1085 = arith.index_cast %c13_i32_274 : i32 to index
    %c0_275 = arith.constant 0 : index
    %1086 = vector.load %arg35[%1085, %c0_275] : memref<16x512xf32, #tpu.memory_space<vmem>>, vector<1x512xf32>
    %cst_276 = arith.constant dense<0.000000e+00> : vector<8x512xf32>
    %1087 = tpu.matmul %1084, %661, %cst_276 {dimension_numbers = #tpu.dot_dimension_numbers<[1], [0], [0], [1], [0, 0, 1, 1], [], []>} : vector<8x128xf32>, vector<128x512xf32>, vector<8x512xf32> -> vector<8x512xf32>
    %1088 = vector.broadcast %1086 : vector<1x512xf32> to vector<8x512xf32>
    %1089 = arith.addf %1088, %1087 : vector<8x512xf32>
    %1090 = vector.broadcast %662 : vector<1x512xf32> to vector<8x512xf32>
    %1091 = arith.addf %1089, %1090 : vector<8x512xf32>
    %1092 = vector.extract_strided_slice %1091 {offsets = [0, 0], sizes = [8, 128], strides = [1, 1]} : vector<8x512xf32> to vector<8x128xf32>
    %1093 = arith.negf %1092 : vector<8x128xf32>
    %1094 = math.exp %1093 : vector<8x128xf32>
    %cst_277 = arith.constant 1.000000e+00 : f32
    %1095 = vector.broadcast %cst_277 : f32 to vector<8x128xf32>
    %1096 = arith.addf %1095, %1094 : vector<8x128xf32>
    %1097 = arith.divf %1095, %1096 : vector<8x128xf32>
    %1098 = vector.extract_strided_slice %1091 {offsets = [0, 128], sizes = [8, 128], strides = [1, 1]} : vector<8x512xf32> to vector<8x128xf32>
    %1099 = arith.negf %1098 : vector<8x128xf32>
    %1100 = math.exp %1099 : vector<8x128xf32>
    %cst_278 = arith.constant 1.000000e+00 : f32
    %1101 = vector.broadcast %cst_278 : f32 to vector<8x128xf32>
    %1102 = arith.addf %1101, %1100 : vector<8x128xf32>
    %1103 = arith.divf %1101, %1102 : vector<8x128xf32>
    %1104 = vector.extract_strided_slice %1091 {offsets = [0, 256], sizes = [8, 128], strides = [1, 1]} : vector<8x512xf32> to vector<8x128xf32>
    %1105 = math.tanh %1104 : vector<8x128xf32>
    %1106 = vector.extract_strided_slice %1091 {offsets = [0, 384], sizes = [8, 128], strides = [1, 1]} : vector<8x512xf32> to vector<8x128xf32>
    %1107 = arith.negf %1106 : vector<8x128xf32>
    %1108 = math.exp %1107 : vector<8x128xf32>
    %cst_279 = arith.constant 1.000000e+00 : f32
    %1109 = vector.broadcast %cst_279 : f32 to vector<8x128xf32>
    %1110 = arith.addf %1109, %1108 : vector<8x128xf32>
    %1111 = arith.divf %1109, %1110 : vector<8x128xf32>
    %1112 = arith.mulf %1103, %1082 : vector<8x128xf32>
    %1113 = arith.mulf %1097, %1105 : vector<8x128xf32>
    %1114 = arith.addf %1112, %1113 : vector<8x128xf32>
    %1115 = math.tanh %1114 : vector<8x128xf32>
    %1116 = arith.mulf %1111, %1115 : vector<8x128xf32>
    %c14_i32_280 = arith.constant 14 : i32
    %1117 = arith.index_cast %c14_i32_280 : i32 to index
    %c0_281 = arith.constant 0 : index
    %1118 = vector.load %arg35[%1117, %c0_281] : memref<16x512xf32, #tpu.memory_space<vmem>>, vector<1x512xf32>
    %cst_282 = arith.constant dense<0.000000e+00> : vector<8x512xf32>
    %1119 = tpu.matmul %1116, %661, %cst_282 {dimension_numbers = #tpu.dot_dimension_numbers<[1], [0], [0], [1], [0, 0, 1, 1], [], []>} : vector<8x128xf32>, vector<128x512xf32>, vector<8x512xf32> -> vector<8x512xf32>
    %1120 = vector.broadcast %1118 : vector<1x512xf32> to vector<8x512xf32>
    %1121 = arith.addf %1120, %1119 : vector<8x512xf32>
    %1122 = vector.broadcast %662 : vector<1x512xf32> to vector<8x512xf32>
    %1123 = arith.addf %1121, %1122 : vector<8x512xf32>
    %1124 = vector.extract_strided_slice %1123 {offsets = [0, 0], sizes = [8, 128], strides = [1, 1]} : vector<8x512xf32> to vector<8x128xf32>
    %1125 = arith.negf %1124 : vector<8x128xf32>
    %1126 = math.exp %1125 : vector<8x128xf32>
    %cst_283 = arith.constant 1.000000e+00 : f32
    %1127 = vector.broadcast %cst_283 : f32 to vector<8x128xf32>
    %1128 = arith.addf %1127, %1126 : vector<8x128xf32>
    %1129 = arith.divf %1127, %1128 : vector<8x128xf32>
    %1130 = vector.extract_strided_slice %1123 {offsets = [0, 128], sizes = [8, 128], strides = [1, 1]} : vector<8x512xf32> to vector<8x128xf32>
    %1131 = arith.negf %1130 : vector<8x128xf32>
    %1132 = math.exp %1131 : vector<8x128xf32>
    %cst_284 = arith.constant 1.000000e+00 : f32
    %1133 = vector.broadcast %cst_284 : f32 to vector<8x128xf32>
    %1134 = arith.addf %1133, %1132 : vector<8x128xf32>
    %1135 = arith.divf %1133, %1134 : vector<8x128xf32>
    %1136 = vector.extract_strided_slice %1123 {offsets = [0, 256], sizes = [8, 128], strides = [1, 1]} : vector<8x512xf32> to vector<8x128xf32>
    %1137 = math.tanh %1136 : vector<8x128xf32>
    %1138 = vector.extract_strided_slice %1123 {offsets = [0, 384], sizes = [8, 128], strides = [1, 1]} : vector<8x512xf32> to vector<8x128xf32>
    %1139 = arith.negf %1138 : vector<8x128xf32>
    %1140 = math.exp %1139 : vector<8x128xf32>
    %cst_285 = arith.constant 1.000000e+00 : f32
    %1141 = vector.broadcast %cst_285 : f32 to vector<8x128xf32>
    %1142 = arith.addf %1141, %1140 : vector<8x128xf32>
    %1143 = arith.divf %1141, %1142 : vector<8x128xf32>
    %1144 = arith.mulf %1135, %1114 : vector<8x128xf32>
    %1145 = arith.mulf %1129, %1137 : vector<8x128xf32>
    %1146 = arith.addf %1144, %1145 : vector<8x128xf32>
    %1147 = math.tanh %1146 : vector<8x128xf32>
    %1148 = arith.mulf %1143, %1147 : vector<8x128xf32>
    %c15_i32_286 = arith.constant 15 : i32
    %1149 = arith.index_cast %c15_i32_286 : i32 to index
    %c0_287 = arith.constant 0 : index
    %1150 = vector.load %arg35[%1149, %c0_287] : memref<16x512xf32, #tpu.memory_space<vmem>>, vector<1x512xf32>
    %cst_288 = arith.constant dense<0.000000e+00> : vector<8x512xf32>
    %1151 = tpu.matmul %1148, %661, %cst_288 {dimension_numbers = #tpu.dot_dimension_numbers<[1], [0], [0], [1], [0, 0, 1, 1], [], []>} : vector<8x128xf32>, vector<128x512xf32>, vector<8x512xf32> -> vector<8x512xf32>
    %1152 = vector.broadcast %1150 : vector<1x512xf32> to vector<8x512xf32>
    %1153 = arith.addf %1152, %1151 : vector<8x512xf32>
    %1154 = vector.broadcast %662 : vector<1x512xf32> to vector<8x512xf32>
    %1155 = arith.addf %1153, %1154 : vector<8x512xf32>
    %1156 = vector.extract_strided_slice %1155 {offsets = [0, 0], sizes = [8, 128], strides = [1, 1]} : vector<8x512xf32> to vector<8x128xf32>
    %1157 = arith.negf %1156 : vector<8x128xf32>
    %1158 = math.exp %1157 : vector<8x128xf32>
    %cst_289 = arith.constant 1.000000e+00 : f32
    %1159 = vector.broadcast %cst_289 : f32 to vector<8x128xf32>
    %1160 = arith.addf %1159, %1158 : vector<8x128xf32>
    %1161 = arith.divf %1159, %1160 : vector<8x128xf32>
    %1162 = vector.extract_strided_slice %1155 {offsets = [0, 128], sizes = [8, 128], strides = [1, 1]} : vector<8x512xf32> to vector<8x128xf32>
    %1163 = arith.negf %1162 : vector<8x128xf32>
    %1164 = math.exp %1163 : vector<8x128xf32>
    %cst_290 = arith.constant 1.000000e+00 : f32
    %1165 = vector.broadcast %cst_290 : f32 to vector<8x128xf32>
    %1166 = arith.addf %1165, %1164 : vector<8x128xf32>
    %1167 = arith.divf %1165, %1166 : vector<8x128xf32>
    %1168 = vector.extract_strided_slice %1155 {offsets = [0, 256], sizes = [8, 128], strides = [1, 1]} : vector<8x512xf32> to vector<8x128xf32>
    %1169 = math.tanh %1168 : vector<8x128xf32>
    %1170 = vector.extract_strided_slice %1155 {offsets = [0, 384], sizes = [8, 128], strides = [1, 1]} : vector<8x512xf32> to vector<8x128xf32>
    %1171 = arith.negf %1170 : vector<8x128xf32>
    %1172 = math.exp %1171 : vector<8x128xf32>
    %cst_291 = arith.constant 1.000000e+00 : f32
    %1173 = vector.broadcast %cst_291 : f32 to vector<8x128xf32>
    %1174 = arith.addf %1173, %1172 : vector<8x128xf32>
    %1175 = arith.divf %1173, %1174 : vector<8x128xf32>
    %1176 = arith.mulf %1167, %1146 : vector<8x128xf32>
    %1177 = arith.mulf %1161, %1169 : vector<8x128xf32>
    %1178 = arith.addf %1176, %1177 : vector<8x128xf32>
    %1179 = math.tanh %1178 : vector<8x128xf32>
    %1180 = arith.mulf %1175, %1179 : vector<8x128xf32>
    %c16_i32_292 = arith.constant 16 : i32
    %c0_293 = arith.constant 0 : index
    %c0_294 = arith.constant 0 : index
    %1181 = vector.load %arg28[%c0_293, %c0_294] : memref<128x128xf32, #tpu.memory_space<vmem>>, vector<128x128xf32>
    %cst_295 = arith.constant dense<0.000000e+00> : vector<8x128xf32>
    %1182 = tpu.matmul %1180, %1181, %cst_295 {dimension_numbers = #tpu.dot_dimension_numbers<[1], [0], [0], [1], [0, 0, 1, 1], [], []>} : vector<8x128xf32>, vector<128x128xf32>, vector<8x128xf32> -> vector<8x128xf32>
    %c0_296 = arith.constant 0 : index
    %c0_297 = arith.constant 0 : index
    %1183 = vector.load %arg29[%c0_296, %c0_297] : memref<1x128xf32, #tpu.memory_space<vmem>>, vector<1x128xf32>
    %1184 = vector.broadcast %1183 : vector<1x128xf32> to vector<8x128xf32>
    %1185 = arith.addf %1182, %1184 : vector<8x128xf32>
    %cst_298 = arith.constant 0.000000e+00 : f32
    %1186 = vector.broadcast %cst_298 : f32 to vector<8x128xf32>
    %1187 = arith.maximumf %1185, %1186 : vector<8x128xf32>
    %c0_299 = arith.constant 0 : index
    %c0_300 = arith.constant 0 : index
    %1188 = vector.load %arg30[%c0_299, %c0_300] : memref<128x128xf32, #tpu.memory_space<vmem>>, vector<128x128xf32>
    %cst_301 = arith.constant dense<0.000000e+00> : vector<8x128xf32>
    %1189 = tpu.matmul %1187, %1188, %cst_301 {dimension_numbers = #tpu.dot_dimension_numbers<[1], [0], [0], [1], [0, 0, 1, 1], [], []>} : vector<8x128xf32>, vector<128x128xf32>, vector<8x128xf32> -> vector<8x128xf32>
    %c0_302 = arith.constant 0 : index
    %c0_303 = arith.constant 0 : index
    %1190 = vector.load %arg31[%c0_302, %c0_303] : memref<1x128xf32, #tpu.memory_space<vmem>>, vector<1x128xf32>
    %1191 = vector.broadcast %1190 : vector<1x128xf32> to vector<8x128xf32>
    %1192 = arith.addf %1189, %1191 : vector<8x128xf32>
    %1193 = vector.shape_cast %1192 : vector<8x128xf32> to vector<1x8x128xf32>
    %c0_304 = arith.constant 0 : index
    %c0_305 = arith.constant 0 : index
    %c0_306 = arith.constant 0 : index
    %1194 = vector.load %arg32[%c0_304, %c0_305, %c0_306] : memref<1x8x128xf32, #tpu.memory_space<vmem>>, vector<1x8x128xf32>
    tpu.vector_store %arg32[%c0_304, %c0_305, %c0_306], %1193 {strides = array<i32>} : memref<1x8x128xf32, #tpu.memory_space<vmem>>, vector<1x8x128xf32>,
    return
  }
  func.func @transform_0(%arg0: i32) -> (i32, i32, i32) {
    %c0_i32 = arith.constant 0 : i32
    %c0_i32_0 = arith.constant 0 : i32
    %c0_i32_1 = arith.constant 0 : i32
    return %arg0, %c0_i32, %c0_i32_0 : i32, i32, i32
  }
  func.func @transform_1(%arg0: i32) -> (i32, i32, i32) {
    %c0_i32 = arith.constant 0 : i32
    %c0_i32_0 = arith.constant 0 : i32
    %c0_i32_1 = arith.constant 0 : i32
    return %arg0, %c0_i32, %c0_i32_0 : i32, i32, i32
  }
  func.func @transform_2(%arg0: i32) -> (i32, i32, i32) {
    %c0_i32 = arith.constant 0 : i32
    %c0_i32_0 = arith.constant 0 : i32
    %c0_i32_1 = arith.constant 0 : i32
    return %arg0, %c0_i32, %c0_i32_0 : i32, i32, i32
  }
  func.func @transform_3(%arg0: i32) -> (i32, i32) {
    %c0_i32 = arith.constant 0 : i32
    %c0_i32_0 = arith.constant 0 : i32
    %c0_i32_1 = arith.constant 0 : i32
    return %c0_i32, %c0_i32_0 : i32, i32
  }
  func.func @transform_4(%arg0: i32) -> (i32, i32) {
    %c0_i32 = arith.constant 0 : i32
    %c0_i32_0 = arith.constant 0 : i32
    %c0_i32_1 = arith.constant 0 : i32
    return %c0_i32, %c0_i32_0 : i32, i32
  }
  func.func @transform_5(%arg0: i32) -> (i32, i32) {
    %c0_i32 = arith.constant 0 : i32
    %c0_i32_0 = arith.constant 0 : i32
    %c0_i32_1 = arith.constant 0 : i32
    return %c0_i32, %c0_i32_0 : i32, i32
  }
  func.func @transform_6(%arg0: i32) -> (i32, i32) {
    %c0_i32 = arith.constant 0 : i32
    %c0_i32_0 = arith.constant 0 : i32
    %c0_i32_1 = arith.constant 0 : i32
    return %c0_i32, %c0_i32_0 : i32, i32
  }
  func.func @transform_7(%arg0: i32) -> (i32, i32) {
    %c0_i32 = arith.constant 0 : i32
    %c0_i32_0 = arith.constant 0 : i32
    %c0_i32_1 = arith.constant 0 : i32
    return %c0_i32, %c0_i32_0 : i32, i32
  }
  func.func @transform_8(%arg0: i32) -> (i32, i32) {
    %c0_i32 = arith.constant 0 : i32
    %c0_i32_0 = arith.constant 0 : i32
    %c0_i32_1 = arith.constant 0 : i32
    return %c0_i32, %c0_i32_0 : i32, i32
  }
  func.func @transform_9(%arg0: i32) -> (i32, i32) {
    %c0_i32 = arith.constant 0 : i32
    %c0_i32_0 = arith.constant 0 : i32
    %c0_i32_1 = arith.constant 0 : i32
    return %c0_i32, %c0_i32_0 : i32, i32
  }
  func.func @transform_10(%arg0: i32) -> (i32, i32) {
    %c0_i32 = arith.constant 0 : i32
    %c0_i32_0 = arith.constant 0 : i32
    %c0_i32_1 = arith.constant 0 : i32
    return %c0_i32, %c0_i32_0 : i32, i32
  }
  func.func @transform_11(%arg0: i32) -> (i32, i32) {
    %c0_i32 = arith.constant 0 : i32
    %c0_i32_0 = arith.constant 0 : i32
    %c0_i32_1 = arith.constant 0 : i32
    return %c0_i32, %c0_i32_0 : i32, i32
  }
  func.func @transform_12(%arg0: i32) -> (i32, i32) {
    %c0_i32 = arith.constant 0 : i32
    %c0_i32_0 = arith.constant 0 : i32
    %c0_i32_1 = arith.constant 0 : i32
    return %c0_i32, %c0_i32_0 : i32, i32
  }
  func.func @transform_13(%arg0: i32) -> (i32, i32) {
    %c0_i32 = arith.constant 0 : i32
    %c0_i32_0 = arith.constant 0 : i32
    %c0_i32_1 = arith.constant 0 : i32
    return %c0_i32, %c0_i32_0 : i32, i32
  }
  func.func @transform_14(%arg0: i32) -> (i32, i32) {
    %c0_i32 = arith.constant 0 : i32
    %c0_i32_0 = arith.constant 0 : i32
    %c0_i32_1 = arith.constant 0 : i32
    return %c0_i32, %c0_i32_0 : i32, i32
  }
  func.func @transform_15(%arg0: i32) -> (i32, i32) {
    %c0_i32 = arith.constant 0 : i32
    %c0_i32_0 = arith.constant 0 : i32
    %c0_i32_1 = arith.constant 0 : i32
    return %c0_i32, %c0_i32_0 : i32, i32
  }
  func.func @transform_16(%arg0: i32) -> (i32, i32) {
    %c0_i32 = arith.constant 0 : i32
    %c0_i32_0 = arith.constant 0 : i32
    %c0_i32_1 = arith.constant 0 : i32
    return %c0_i32, %c0_i32_0 : i32, i32
  }
  func.func @transform_17(%arg0: i32) -> (i32, i32) {
    %c0_i32 = arith.constant 0 : i32
    %c0_i32_0 = arith.constant 0 : i32
    %c0_i32_1 = arith.constant 0 : i32
    return %c0_i32, %c0_i32_0 : i32, i32
  }
  func.func @transform_18(%arg0: i32) -> (i32, i32) {
    %c0_i32 = arith.constant 0 : i32
    %c0_i32_0 = arith.constant 0 : i32
    %c0_i32_1 = arith.constant 0 : i32
    return %c0_i32, %c0_i32_0 : i32, i32
  }
  func.func @transform_19(%arg0: i32) -> (i32, i32) {
    %c0_i32 = arith.constant 0 : i32
    %c0_i32_0 = arith.constant 0 : i32
    %c0_i32_1 = arith.constant 0 : i32
    return %c0_i32, %c0_i32_0 : i32, i32
  }
  func.func @transform_20(%arg0: i32) -> (i32, i32) {
    %c0_i32 = arith.constant 0 : i32
    %c0_i32_0 = arith.constant 0 : i32
    %c0_i32_1 = arith.constant 0 : i32
    return %c0_i32, %c0_i32_0 : i32, i32
  }
  func.func @transform_21(%arg0: i32) -> (i32, i32) {
    %c0_i32 = arith.constant 0 : i32
    %c0_i32_0 = arith.constant 0 : i32
    %c0_i32_1 = arith.constant 0 : i32
    return %c0_i32, %c0_i32_0 : i32, i32
  }
  func.func @transform_22(%arg0: i32) -> (i32, i32) {
    %c0_i32 = arith.constant 0 : i32
    %c0_i32_0 = arith.constant 0 : i32
    %c0_i32_1 = arith.constant 0 : i32
    return %c0_i32, %c0_i32_0 : i32, i32
  }
  func.func @transform_23(%arg0: i32) -> (i32, i32) {
    %c0_i32 = arith.constant 0 : i32
    %c0_i32_0 = arith.constant 0 : i32
    %c0_i32_1 = arith.constant 0 : i32
    return %c0_i32, %c0_i32_0 : i32, i32
  }
  func.func @transform_24(%arg0: i32) -> (i32, i32) {
    %c0_i32 = arith.constant 0 : i32
    %c0_i32_0 = arith.constant 0 : i32
    %c0_i32_1 = arith.constant 0 : i32
    return %c0_i32, %c0_i32_0 : i32, i32
  }
  func.func @transform_25(%arg0: i32) -> (i32, i32) {
    %c0_i32 = arith.constant 0 : i32
    %c0_i32_0 = arith.constant 0 : i32
    %c0_i32_1 = arith.constant 0 : i32
    return %c0_i32, %c0_i32_0 : i32, i32
  }
  func.func @transform_26(%arg0: i32) -> (i32, i32) {
    %c0_i32 = arith.constant 0 : i32
    %c0_i32_0 = arith.constant 0 : i32
    %c0_i32_1 = arith.constant 0 : i32
    return %c0_i32, %c0_i32_0 : i32, i32
  }
  func.func @transform_27(%arg0: i32) -> (i32, i32) {
    %c0_i32 = arith.constant 0 : i32
    %c0_i32_0 = arith.constant 0 : i32
    %c0_i32_1 = arith.constant 0 : i32
    return %c0_i32, %c0_i32_0 : i32, i32
  }
  func.func @transform_28(%arg0: i32) -> (i32, i32) {
    %c0_i32 = arith.constant 0 : i32
    %c0_i32_0 = arith.constant 0 : i32
    %c0_i32_1 = arith.constant 0 : i32
    return %c0_i32, %c0_i32_0 : i32, i32
  }
  func.func @transform_29(%arg0: i32) -> (i32, i32) {
    %c0_i32 = arith.constant 0 : i32
    %c0_i32_0 = arith.constant 0 : i32
    %c0_i32_1 = arith.constant 0 : i32
    return %c0_i32, %c0_i32_0 : i32, i32
  }
  func.func @transform_30(%arg0: i32) -> (i32, i32) {
    %c0_i32 = arith.constant 0 : i32
    %c0_i32_0 = arith.constant 0 : i32
    %c0_i32_1 = arith.constant 0 : i32
    return %c0_i32, %c0_i32_0 : i32, i32
  }
  func.func @transform_31(%arg0: i32) -> (i32, i32, i32) {
    %c0_i32 = arith.constant 0 : i32
    %c0_i32_0 = arith.constant 0 : i32
    %c0_i32_1 = arith.constant 0 : i32
    return %arg0, %c0_i32, %c0_i32_0 : i32, i32, i32
  }
}

</mosaic_0001>

<bundles_post_ra>
// kernel: tcn_lstm_forward.1
= control target key start
LH: loop header
LB: loop body
LE: loop exit
PB: predicated region body
PF: predicated region fallthrough
CT: control target
= control target key end

     0   :  { %s13737_s6 = smov 1   ;;  %s13738_s10 = smov 2   ;;  %s16086_s0 = inlined_call_operand.smem [shape: u32[32], index: -1, kind: input, shape index: {}] }
   0x1   :  { %s13802_s5 = sld [smem:[%s16086_s0]]   ;;  %s13739_s14 = smov 3  }
   0x2   :  { %s13807_s9 = sld [smem:[%s16086_s0 + %s13737_s6]]   ;;  %s13740_s18 = smov 4  }
   0x3   :  { %s13812_s13 = sld [smem:[%s16086_s0 + %s13738_s10]]   ;;  %s13741_s22 = smov 5  }
   0x4   :  { %s13817_s17 = sld [smem:[%s16086_s0 + %s13739_s14]]   ;;  %s13742_s26 = smov 6  }
   0x5   :  { %s13822_s21 = sld [smem:[%s16086_s0 + %s13740_s18]]   ;;  %s13743_s30 = smov 7  }
   0x6   :  { %s13827_s25 = sld [smem:[%s16086_s0 + %s13741_s22]]   ;;  %s13744_s4 = smov 8  }
   0x7   :  { %16109 = sst [smem:[#allocation45_spill]] %s13802_s5  ;;  %s13745_s10 = smov 9  }
   0x8   :  { %16110 = sst [smem:[#allocation46_spill]] %s13807_s9  ;;  %s13746_s15 = smov 10  }
   0x9   :  { %16111 = sst [smem:[#allocation47_spill]] %s13812_s13  ;;  %s13747_s20 = smov 11  }
   0xa   :  { %s13832_s29 = sld [smem:[%s16086_s0 + %s13742_s26]]   ;;  %s13748_s26 = smov 12  }
   0xb   :  { %16112 = sst [smem:[#allocation48_spill]] %s13822_s21  ;;  %s13749_s1 = smov 13  }
   0xc   :  { %s13837_s3 = sld [smem:[%s16086_s0 + %s13743_s30]]   ;;  %s13750_s7 = smov 14  }
   0xd   :  { %s13842_s8 = sld [smem:[%s16086_s0 + %s13744_s4]]   ;;  %s13752_s22 = smov 16  }
   0xe   :  { %s13847_s14 = sld [smem:[%s16086_s0 + %s13745_s10]]   ;;  %s13753_s28 = smov 17  }
   0xf   :  { %s13852_s19 = sld [smem:[%s16086_s0 + %s13746_s15]]   ;;  %s13751_s15 = smov 15  }
  0x10   :  { %16113 = sst [smem:[#allocation49_spill]] %s13832_s29 }
  0x11   :  { %s13857_s24 = sld [smem:[%s16086_s0 + %s13747_s20]]  }
  0x12   :  { %16114 = sst [smem:[#allocation50_spill]] %s13837_s3 }
  0x13   :  { %16115 = sst [smem:[#allocation51_spill]] %s13842_s8 }
  0x14   :  { %s13862_s30 = sld [smem:[%s16086_s0 + %s13748_s26]]  }
  0x15   :  { %s13867_s6 = sld [smem:[%s16086_s0 + %s13749_s1]]  }
  0x16   :  { %s13872_s12 = sld [smem:[%s16086_s0 + %s13750_s7]]   ;;  %s13754_s7 = smov 18  }
  0x17   :  { %s13877_s20 = sld [smem:[%s16086_s0 + %s13751_s15]]   ;;  %s13755_s15 = smov 19  }
  0x18   :  { %s13882_s27 = sld [smem:[%s16086_s0 + %s13752_s22]]   ;;  %s13756_s22 = smov 20  }
  0x19   :  { %s13887_s4 = sld [smem:[%s16086_s0 + %s13753_s28]]   ;;  %s13757_s28 = smov 21  }
  0x1a   :  { %s13892_s13 = sld [smem:[%s16086_s0 + %s13754_s7]]   ;;  %s13758_s7 = smov 22  }
  0x1b   :  { %16116 = sst [smem:[#allocation52_spill]] %s13867_s6 }
  0x1c   :  { %s13897_s9 = sld [smem:[%s16086_s0 + %s13755_s15]]   ;;  %s13759_s15 = smov 23  }
  0x1d   :  { %s13902_s29 = sld [smem:[%s16086_s0 + %s13756_s22]]   ;;  %s13760_s22 = smov 24  }
  0x1e   :  { %16117 = sst [smem:[#allocation53_spill]] %s13882_s27 }
  0x1f   :  { %16118 = sst [smem:[#allocation54_spill]] %s13887_s4 }
  0x20   :  { %16119 = sst [smem:[#allocation55_spill]] %s13892_s13 }
  0x21   :  { %s13907_s21 = sld [smem:[%s16086_s0 + %s13757_s28]]   ;;  %s13761_s28 = smov 25  }
  0x22   :  { %16120 = sst [smem:[#allocation56_spill]] %s13897_s9 }
  0x23   :  { %16121 = sst [smem:[#allocation57_spill]] %s13902_s29 }
  0x24   :  { %s13912_s3 = sld [smem:[%s16086_s0 + %s13758_s7]]   ;;  %s13762_s7 = smov 26  }
  0x25   :  { %s13917_s5 = sld [smem:[%s16086_s0 + %s13759_s15]]   ;;  %s13763_s15 = smov 27  }
  0x26   :  { %s13922_s29 = sld [smem:[%s16086_s0 + %s13760_s22]]   ;;  %s13764_s22 = smov 28  }
  0x27   :  { %16122 = sst [smem:[#allocation58_spill]] %s13907_s21 }
  0x28   :  { %s13927_s21 = sld [smem:[%s16086_s0 + %s13761_s28]]   ;;  %s13765_s28 = smov 29  }
  0x29   :  { %s13937_s13 = sld [smem:[%s16086_s0 + %s13763_s15]]   ;;  %s13767_s15 = smov 31  }
  0x2a   :  { %16123 = sst [smem:[#allocation59_spill]] %s13912_s3 }
  0x2b   :  { %16124 = sst [smem:[#allocation60_spill]] %s13917_s5 }
  0x2c   :  { %16125 = sst [smem:[#allocation61_spill]] %s13922_s29 }
  0x2d   :  { %s13932_s3 = sld [smem:[%s16086_s0 + %s13762_s7]]   ;;  %s13766_s7 = smov 30  }
  0x2e   :  { %16126 = sst [smem:[#allocation62_spill]] %s13927_s21 }
  0x2f   :  { %s13942_s29 = sld [smem:[%s16086_s0 + %s13764_s22]]  }
  0x30   :  { %s13947_s21 = sld [smem:[%s16086_s0 + %s13765_s28]]  }
  0x31   :  { %s13957_s27 = sld [smem:[%s16086_s0 + %s13767_s15]]  }
  0x33   :  { %16127 = sst [smem:[#allocation63_spill]] %s13932_s3 }
  0x34   :  { %s13952_s3 = sld [smem:[%s16086_s0 + %s13766_s7]]  }
  0x35   :  { %68 = vsyncpa [#allocation7], 0 }
  0x36   :  { %69 = vsyncpa [#allocation9], 0 }
  0x37   :  { %70 = vsyncpa [#allocation12], 0 }
  0x38   :  { %71 = vsyncpa [#allocation15], 0 }
  0x39   :  { %72 = vsyncpa [#allocation18], 0 }
  0x3a   :  { %73 = vsyncpa [#allocation21], 0 }
  0x3b   :  { %74 = vsyncpa [#allocation24], 0 }
  0x3c   :  { %75 = vsyncpa [#allocation27], 0 }
  0x3d   :  { %76 = vsyncpa [#allocation30], 0 }
  0x3e   :  { %77 = vsyncpa [#allocation33], 0  ;;  %s13959_s22 = smov 0  }
  0x3f LB: > { %s16128_s9 = sld [smem:[#allocation56_spill]]  ;;  %s16129_s8 = sld [smem:[#allocation51_spill]]  ;;  %s13735_s22 = sphi %s13959_s22, %s83_s22  }
  0x40   : > { %s16130_s6 = sld [smem:[#allocation52_spill]]  ;;  %s16132_s4 = sld [smem:[#allocation54_spill]] }
  0x41   : > { %s16131_s5 = sld [smem:[#allocation60_spill]]  ;;  %16133 = sst [smem:[#allocation64_spill]] %s13735_s22 }
  0x42   : > { %s13965_s0 = sadd.s32 4294967295, %s13735_s22   ;;  %p9471_p0 = scmp.ge.s32.totalorder %s13735_s22, 1 }
  0x43   : > { %p780_p1 = scmp.lt.s32.totalorder %s13735_s22, 3  ;;  %p16092_p2 = scmp.eq.s32.totalorder %s13965_s0, 0 }
  0x44   : > { %s13768_s26 = smov [#allocation8]   ;;  %s13769_s1 = smov [#allocation11]  }
  0x45   : > { %p13970_p3 = pnand %p9471_p0, %p780_p1  ;;  %s808_s28 = sshll.u32 %s13768_s26, 4  ;;  %s13974_s28 = int_to_ptr.vmem [resolvable:$true] %s808_s28 }
  0x46   : > { %s839_s2 = sshll.u32 %s13769_s1, 4  ;;  %s13770_s10 = smov [#allocation14]   ;;  %s13978_s2 = int_to_ptr.vmem [resolvable:$true] %s839_s2 }
  0x47   : > { %s16134_s23 = scalar_select %p13970_p3, 1, 0 }
  0x48   : > { %p12482_p4 = pneg %p13970_p3  ;;  %s860_s11 = sshll.u32 %s13770_s10, 4  ;;  %s13986_s11 = int_to_ptr.vmem [resolvable:$true] %s860_s11 }
  0x49   : > { %s13771_s15 = smov [#allocation17]   ;;  %s13157_s18 = scalar_lea.hbm %s13827_s25, 4096 }
  0x4a   : > { %p13982_p5 = pnand %p16092_p2, %p12482_p4  ;;  %s13988_s16 = sshll.u32 %s13771_s15, 4  ;;  %s885_s16 = int_to_ptr.vmem [resolvable:$true] %s13988_s16 }
  0x4b   : > { %p13158_p6 = scmp.ne.s32.totalorder %s13827_s25, %s13157_s18  ;;  %p13164_p10 = scmp.lt.u32.totalorder %s13157_s18, %s13827_s25 }
  0x4c   : > { %p13994_p7 = pneg %p13982_p5 }
  0x4e   : > { %p13160_p8 = pnand %p13994_p7, %p13158_p6 }
  0x50   : > { %p13161_p9 = pneg %p13160_p8 }
  0x52   : > { %p13166_p11 = pnand %p13164_p10, %p13161_p9 }
  0x54   : > { %13169 = shalt.err (!%p13166_p11)
}
  0x55   : > { %s13170_s1 = scalar_lea.vmem %s13974_s28, 4096  ;;  %p13178_p1 = scmp.lt.s32.totalorder %s13974_s28, %s13974_s28 }
  0x56   : > { %p13171_p12 = scmp.ne.s32.totalorder %s13974_s28, %s13170_s1  ;;  %p13179_p4 = scmp.lt.s32.totalorder %s13170_s1, %s13170_s1 }
  0x58   : > { %p13173_p13 = pnand %p13171_p12, %p13994_p7  ;;  %p13180_p2 = por %p13179_p4, %p13178_p1 }
  0x5a   : > { %p13174_p0 = pneg %p13173_p13 }
  0x5c   : > { %p13181_p3 = pnand %p13180_p2, %p13174_p0 }
  0x5e   : > { %13184 = shalt.err (!%p13181_p3)
}
  0x5f   : > { %s16095_s10 = smov 128   ;;  %s16097_s15 = smov 8  }
  0x60   : > { %12488 = dma.hbm_to_vmem [thread:$0]  (!%p13982_p5), %s13827_s25, 4096, %s13974_s28, [#allocation9], %s16095_s10, %s16095_s10, %s16097_s15  }
  0x61   : > { %s13185_s18 = scalar_lea.hbm %s13847_s14, 16 }
  0x62   : > { %p13186_p6 = scmp.ne.s32.totalorder %s13847_s14, %s13185_s18  ;;  %p13192_p3 = scmp.lt.u32.totalorder %s13185_s18, %s13847_s14 }
  0x64   : > { %p13188_p8 = pnand %p13186_p6, %p13994_p7 }
  0x66   : > { %p13189_p2 = pneg %p13188_p8 }
  0x68   : > { %p13194_p9 = pnand %p13192_p3, %p13189_p2 }
  0x6a   : > { %13197 = shalt.err (!%p13194_p9)
}
  0x6b   : > { %s13198_s1 = scalar_lea.vmem %s13978_s2, 16  ;;  %s13205_s22 = scalar_lea.vmem %s13978_s2, 32 }
  0x6c   : > { %p13199_p10 = scmp.ne.s32.totalorder %s13978_s2, %s13198_s1  ;;  %p13206_p13 = scmp.lt.s32.totalorder %s13978_s2, %s13978_s2 }
  0x6d   : > { %p13207_p0 = scmp.lt.s32.totalorder %s13205_s22, %s13198_s1 }
  0x6e   : > { %p13201_p11 = pnand %p13199_p10, %p13994_p7 }
  0x6f   : > { %p13208_p1 = por %p13207_p0, %p13206_p13 }
  0x70   : > { %p13202_p12 = pneg %p13201_p11 }
  0x72   : > { %p13209_p4 = pnand %p13208_p1, %p13202_p12 }
  0x74   : > { %13212 = shalt.err (!%p13209_p4)
}
  0x75   : > { %12494 = dma.hbm_to_vmem [thread:$0]  (!%p13982_p5), %s13847_s14, 16, %s13978_s2, [#allocation12]  }
  0x76   : > { %s13213_s28 = scalar_lea.hbm %s13857_s24, 4096 }
  0x77   : > { %p13214_p6 = scmp.ne.s32.totalorder %s13857_s24, %s13213_s28  ;;  %p13220_p3 = scmp.lt.u32.totalorder %s13213_s28, %s13857_s24 }
  0x79   : > { %p13216_p8 = pnand %p13214_p6, %p13994_p7 }
  0x7b   : > { %p13217_p2 = pneg %p13216_p8 }
  0x7d   : > { %p13222_p9 = pnand %p13220_p3, %p13217_p2 }
  0x7f   : > { %13225 = shalt.err (!%p13222_p9)
}
  0x80   : > { %s13226_s22 = scalar_lea.vmem %s13986_s11, 4096  ;;  %p13234_p13 = scmp.lt.s32.totalorder %s13986_s11, %s13986_s11 }
  0x81   : > { %p13227_p10 = scmp.ne.s32.totalorder %s13986_s11, %s13226_s22  ;;  %p13235_p0 = scmp.lt.s32.totalorder %s13226_s22, %s13226_s22 }
  0x83   : > { %p13229_p11 = pnand %p13227_p10, %p13994_p7  ;;  %p13236_p1 = por %p13235_p0, %p13234_p13 }
  0x85   : > { %p13230_p12 = pneg %p13229_p11 }
  0x87   : > { %p13237_p4 = pnand %p13236_p1, %p13230_p12 }
  0x89   : > { %13240 = shalt.err (!%p13237_p4)
}
  0x8a   : > { %12500 = dma.hbm_to_vmem [thread:$0]  (!%p13982_p5), %s13857_s24, 4096, %s13986_s11, [#allocation15], %s16095_s10, %s16095_s10, %s16097_s15  }
  0x8b   : > { %s13241_s2 = scalar_lea.hbm %s16130_s6, 4096 }
  0x8c   : > { %p13242_p6 = scmp.ne.s32.totalorder %s16130_s6, %s13241_s2  ;;  %p13248_p3 = scmp.lt.u32.totalorder %s13241_s2, %s16130_s6 }
  0x8e   : > { %p13244_p8 = pnand %p13242_p6, %p13994_p7 }
  0x90   : > { %p13245_p2 = pneg %p13244_p8 }
  0x92   : > { %p13250_p9 = pnand %p13248_p3, %p13245_p2 }
  0x94   : > { %13253 = shalt.err (!%p13250_p9)
}
  0x95   : > { %s13254_s18 = scalar_lea.vmem %s885_s16, 4096  ;;  %p13262_p13 = scmp.lt.s32.totalorder %s885_s16, %s885_s16 }
  0x96   : > { %p13255_p10 = scmp.ne.s32.totalorder %s885_s16, %s13254_s18  ;;  %p13263_p0 = scmp.lt.s32.totalorder %s13254_s18, %s13254_s18 }
  0x98   : > { %p13257_p11 = pnand %p13255_p10, %p13994_p7  ;;  %p13264_p1 = por %p13263_p0, %p13262_p13 }
  0x9a   : > { %p13258_p12 = pneg %p13257_p11 }
  0x9c   : > { %p13265_p4 = pnand %p13264_p1, %p13258_p12 }
  0x9e   : > { %13268 = shalt.err (!%p13265_p4)
}
  0x9f   : > { %12506 = dma.hbm_to_vmem [thread:$0]  (!%p13982_p5), %s16130_s6, 4096, %s885_s16, [#allocation18], %s16095_s10, %s16095_s10, %s16097_s15  }
  0xa0   : > { %s13774_s11 = smov [#allocation20]   ;;  %s13775_s28 = smov [#allocation23]  }
  0xa1   : > { %s908_s1 = sshll.u32 %s13774_s11, 4  ;;  %s933_s22 = sshll.u32 %s13775_s28, 4  ;;  %s909_s1 = int_to_ptr.vmem [resolvable:$true] %s908_s1  ;;  %s934_s22 = int_to_ptr.vmem [resolvable:$true] %s933_s22 }
  0xa2   : > { %s13269_s2 = scalar_lea.hbm %s13877_s20, 2048 }
  0xa3   : > { %p13270_p6 = scmp.ne.s32.totalorder %s13877_s20, %s13269_s2  ;;  %p13276_p3 = scmp.lt.u32.totalorder %s13269_s2, %s13877_s20 }
  0xa5   : > { %p13272_p8 = pnand %p13270_p6, %p13994_p7 }
  0xa7   : > { %p13273_p2 = pneg %p13272_p8 }
  0xa9   : > { %p13278_p9 = pnand %p13276_p3, %p13273_p2 }
  0xab   : > { %13281 = shalt.err (!%p13278_p9)
}
  0xac   : > { %s13282_s18 = scalar_lea.vmem %s909_s1, 2048  ;;  %p13290_p13 = scmp.lt.s32.totalorder %s909_s1, %s909_s1 }
  0xad   : > { %p13283_p10 = scmp.ne.s32.totalorder %s909_s1, %s13282_s18  ;;  %p13291_p0 = scmp.lt.s32.totalorder %s13282_s18, %s13282_s18 }
  0xaf   : > { %p13285_p11 = pnand %p13283_p10, %p13994_p7  ;;  %p13292_p1 = por %p13291_p0, %p13290_p13 }
  0xb1   : > { %p13286_p12 = pneg %p13285_p11 }
  0xb3   : > { %p13293_p4 = pnand %p13292_p1, %p13286_p12 }
  0xb5   : > { %13296 = shalt.err (!%p13293_p4)
}
  0xb6   : > { %12512 = dma.hbm_to_vmem [thread:$0]  (!%p13982_p5), %s13877_s20, 2048, %s909_s1, [#allocation21], %s16095_s10, %s16095_s10, %s16097_s15  }
  0xb7   : > { %s13297_s16 = scalar_lea.hbm %s16132_s4, 16 }
  0xb8   : > { %p13298_p6 = scmp.ne.s32.totalorder %s16132_s4, %s13297_s16  ;;  %p13304_p3 = scmp.lt.u32.totalorder %s13297_s16, %s16132_s4 }
  0xba   : > { %p13300_p8 = pnand %p13298_p6, %p13994_p7 }
  0xbc   : > { %p13301_p2 = pneg %p13300_p8 }
  0xbe   : > { %p13306_p9 = pnand %p13304_p3, %p13301_p2 }
  0xc0   : > { %13309 = shalt.err (!%p13306_p9)
}
  0xc1   : > { %s13310_s11 = scalar_lea.vmem %s934_s22, 16  ;;  %s13317_s28 = scalar_lea.vmem %s934_s22, 32 }
  0xc2   : > { %p13311_p10 = scmp.ne.s32.totalorder %s934_s22, %s13310_s11  ;;  %p13318_p13 = scmp.lt.s32.totalorder %s934_s22, %s934_s22 }
  0xc3   : > { %p13319_p0 = scmp.lt.s32.totalorder %s13317_s28, %s13310_s11 }
  0xc4   : > { %p13313_p11 = pnand %p13311_p10, %p13994_p7 }
  0xc5   : > { %p13320_p1 = por %p13319_p0, %p13318_p13 }
  0xc6   : > { %p13314_p12 = pneg %p13313_p11 }
  0xc8   : > { %p13321_p4 = pnand %p13320_p1, %p13314_p12 }
  0xca   : > { %13324 = shalt.err (!%p13321_p4)
}
  0xcb   : > { %12518 = dma.hbm_to_vmem [thread:$0]  (!%p13982_p5), %s16132_s4, 16, %s934_s22, [#allocation24]  }
  0xcc   : > { %s13776_s1 = smov [#allocation26]   ;;  %s13325_s18 = scalar_lea.hbm %s16128_s9, 8192 }
  0xcd   : > { %s954_s2 = sshll.u32 %s13776_s1, 4  ;;  %p13326_p6 = scmp.ne.s32.totalorder %s16128_s9, %s13325_s18  ;;  %s955_s2 = int_to_ptr.vmem [resolvable:$true] %s954_s2 }
  0xce   : > { %p13332_p3 = scmp.lt.u32.totalorder %s13325_s18, %s16128_s9 }
  0xcf   : > { %p13328_p8 = pnand %p13326_p6, %p13994_p7 }
  0xd1   : > { %p13329_p2 = pneg %p13328_p8 }
  0xd3   : > { %p13334_p9 = pnand %p13332_p3, %p13329_p2 }
  0xd5   : > { %13337 = shalt.err (!%p13334_p9)
}
  0xd6   : > { %s13338_s16 = scalar_lea.vmem %s955_s2, 8192  ;;  %p13346_p13 = scmp.lt.s32.totalorder %s955_s2, %s955_s2 }
  0xd7   : > { %p13339_p10 = scmp.ne.s32.totalorder %s955_s2, %s13338_s16  ;;  %p13347_p0 = scmp.lt.s32.totalorder %s13338_s16, %s13338_s16 }
  0xd9   : > { %p13341_p11 = pnand %p13339_p10, %p13994_p7  ;;  %p13348_p1 = por %p13347_p0, %p13346_p13 }
  0xdb   : > { %p13342_p12 = pneg %p13341_p11 }
  0xdd   : > { %p13349_p4 = pnand %p13348_p1, %p13342_p12 }
  0xdf   : > { %13352 = shalt.err (!%p13349_p4)
}
  0xe0   : > { %s16099_s22 = smov 512   ;;  %s16101_s11 = smov 32  }
  0xe1   : > { %12524 = dma.hbm_to_vmem [thread:$0]  (!%p13982_p5), %s16128_s9, 8192, %s955_s2, [#allocation27], %s16099_s22, %s16099_s22, %s16101_s11  }
  0xe2   : > { %s13779_s28 = smov [#allocation29]   ;;  %s13780_s18 = smov [#allocation32]  }
  0xe3   : > { %s986_s1 = sshll.u32 %s13779_s28, 4  ;;  %s1018_s16 = sshll.u32 %s13780_s18, 4  ;;  %s987_s1 = int_to_ptr.vmem [resolvable:$true] %s986_s1  ;;  %s14098_s16 = int_to_ptr.vmem [resolvable:$true] %s1018_s16 }
  0xe4   : > { %s13353_s10 = scalar_lea.hbm %s16131_s5, 8192 }
  0xe5   : > { %p13354_p6 = scmp.ne.s32.totalorder %s16131_s5, %s13353_s10  ;;  %p13360_p3 = scmp.lt.u32.totalorder %s13353_s10, %s16131_s5 }
  0xe7   : > { %p13356_p8 = pnand %p13354_p6, %p13994_p7 }
  0xe9   : > { %p13357_p2 = pneg %p13356_p8 }
  0xeb   : > { %p13362_p9 = pnand %p13360_p3, %p13357_p2 }
  0xed   : > { %13365 = shalt.err (!%p13362_p9)
}
  0xee   : > { %s13366_s15 = scalar_lea.vmem %s987_s1, 8192  ;;  %p13374_p13 = scmp.lt.s32.totalorder %s987_s1, %s987_s1 }
  0xef   : > { %p13367_p10 = scmp.ne.s32.totalorder %s987_s1, %s13366_s15  ;;  %p13375_p0 = scmp.lt.s32.totalorder %s13366_s15, %s13366_s15 }
  0xf1   : > { %p13369_p11 = pnand %p13367_p10, %p13994_p7  ;;  %p13376_p1 = por %p13375_p0, %p13374_p13 }
  0xf3   : > { %p13370_p12 = pneg %p13369_p11 }
  0xf5   : > { %p13377_p4 = pnand %p13376_p1, %p13370_p12 }
  0xf7   : > { %13380 = shalt.err (!%p13377_p4)
}
  0xf8   : > { %12530 = dma.hbm_to_vmem [thread:$0]  (!%p13982_p5), %s16131_s5, 8192, %s987_s1, [#allocation30], %s16099_s22, %s16099_s22, %s16101_s11  }
  0xf9   : > { %s13381_s10 = scalar_lea.hbm %s13937_s13, 2048 }
  0xfa   : > { %p13382_p6 = scmp.ne.s32.totalorder %s13937_s13, %s13381_s10  ;;  %p13388_p3 = scmp.lt.u32.totalorder %s13381_s10, %s13937_s13 }
  0xfc   : > { %p13384_p8 = pnand %p13382_p6, %p13994_p7 }
  0xfe   : > { %p13385_p2 = pneg %p13384_p8 }
 0x100   : > { %p13390_p9 = pnand %p13388_p3, %p13385_p2 }
 0x102   : > { %13393 = shalt.err (!%p13390_p9)
}
 0x103   : > { %s13394_s15 = scalar_lea.vmem %s14098_s16, 2048  ;;  %p13402_p13 = scmp.lt.s32.totalorder %s14098_s16, %s14098_s16 }
 0x104   : > { %p13395_p10 = scmp.ne.s32.totalorder %s14098_s16, %s13394_s15  ;;  %p13403_p0 = scmp.lt.s32.totalorder %s13394_s15, %s13394_s15 }
 0x106   : > { %p13397_p11 = pnand %p13395_p10, %p13994_p7  ;;  %p13404_p1 = por %p13403_p0, %p13402_p13 }
 0x108   : > { %p13398_p12 = pneg %p13397_p11 }
 0x10a   : > { %p13405_p4 = pnand %p13404_p1, %p13398_p12 }
 0x10c   : > { %13408 = shalt.err (!%p13405_p4)
}
 0x10d   : > { %s16137_s2 = smov 8   ;;  %s16138_s28 = smov 128  }
 0x10e   : > { %12536 = dma.hbm_to_vmem [thread:$0]  (!%p13982_p5), %s13937_s13, 2048, %s14098_s16, [#allocation33], %s16138_s28, %s16138_s28, %s16137_s2  }
 0x10f   : > { %s13781_s1 = smov [#allocation6]   ;;  %s13782_s10 = smov [#allocation10]  }
 0x110   : > { %s792_s18 = sshll.u32 %s13781_s1, 4  ;;  %s828_s22 = sshll.u32 %s13782_s10, 4  ;;  %s793_s18 = int_to_ptr.vmem [resolvable:$true] %s792_s18  ;;  %s14131_s22 = int_to_ptr.vmem [resolvable:$true] %s828_s22 }
 0x111   : > { %s13409_s15 = scalar_lea.hbm %s13817_s17, 4096 }
 0x112   : > { %p13410_p6 = scmp.ne.s32.totalorder %s13817_s17, %s13409_s15  ;;  %p13416_p3 = scmp.lt.u32.totalorder %s13409_s15, %s13817_s17 }
 0x114   : > { %p13412_p8 = pnand %p13410_p6, %p13994_p7 }
 0x116   : > { %p13413_p2 = pneg %p13412_p8 }
 0x118   : > { %p13418_p9 = pnand %p13416_p3, %p13413_p2 }
 0x11a   : > { %13421 = shalt.err (!%p13418_p9)
}
 0x11b   : > { %s13422_s11 = scalar_lea.vmem %s793_s18, 4096  ;;  %p13430_p13 = scmp.lt.s32.totalorder %s793_s18, %s793_s18 }
 0x11c   : > { %p13423_p10 = scmp.ne.s32.totalorder %s793_s18, %s13422_s11  ;;  %p13431_p0 = scmp.lt.s32.totalorder %s13422_s11, %s13422_s11 }
 0x11e   : > { %p13425_p11 = pnand %p13423_p10, %p13994_p7  ;;  %p13432_p1 = por %p13431_p0, %p13430_p13 }
 0x120   : > { %p13426_p12 = pneg %p13425_p11 }
 0x122   : > { %p13433_p4 = pnand %p13432_p1, %p13426_p12 }
 0x124   : > { %13436 = shalt.err (!%p13433_p4)
}
 0x125   : > { %12485 = dma.hbm_to_vmem [thread:$0]  (!%p13982_p5), %s13817_s17, 4096, %s793_s18, [#allocation7], %s16138_s28, %s16138_s28, %s16137_s2  }
 0x126   : > { %s13437_s16 = scalar_lea.hbm %s16129_s8, 16 }
 0x127   : > { %p13438_p6 = scmp.ne.s32.totalorder %s16129_s8, %s13437_s16  ;;  %p13444_p3 = scmp.lt.u32.totalorder %s13437_s16, %s16129_s8 }
 0x129   : > { %p13440_p8 = pnand %p13438_p6, %p13994_p7 }
 0x12b   : > { %p13441_p2 = pneg %p13440_p8 }
 0x12d   : > { %p13446_p9 = pnand %p13444_p3, %p13441_p2 }
 0x12f   : > { %13449 = shalt.err (!%p13446_p9)
}
 0x130   : > { %s13450_s11 = scalar_lea.vmem %s14131_s22, 16  ;;  %s13457_s1 = scalar_lea.vmem %s14131_s22, 32 }
 0x131   : > { %p13451_p10 = scmp.ne.s32.totalorder %s14131_s22, %s13450_s11  ;;  %p13458_p13 = scmp.lt.s32.totalorder %s14131_s22, %s14131_s22 }
 0x132   : > { %p13459_p0 = scmp.lt.s32.totalorder %s13457_s1, %s13450_s11 }
 0x133   : > { %p13453_p11 = pnand %p13451_p10, %p13994_p7 }
 0x134   : > { %p13460_p1 = por %p13459_p0, %p13458_p13 }
 0x135   : > { %p13454_p12 = pneg %p13453_p11 }
 0x137   : > { %p13461_p4 = pnand %p13460_p1, %p13454_p12 }
 0x139   : > { %13464 = shalt.err (!%p13461_p4)
}
 0x13a   : > { %12491 = dma.hbm_to_vmem [thread:$0]  (!%p13982_p5), %s16129_s8, 16, %s14131_s22, [#allocation9]  }
 0x13b   : > { %s13783_s18 = smov [#allocation13]   ;;  %s13784_s15 = smov [#allocation16]  }
 0x13c   : > { %s850_s10 = sshll.u32 %s13783_s18, 4  ;;  %s874_s16 = sshll.u32 %s13784_s15, 4  ;;  %s851_s10 = int_to_ptr.vmem [resolvable:$true] %s850_s10  ;;  %s14162_s16 = int_to_ptr.vmem [resolvable:$true] %s874_s16 }
 0x13d   : > { %s13465_s11 = scalar_lea.hbm %s13852_s19, 16 }
 0x13e   : > { %p13466_p6 = scmp.ne.s32.totalorder %s13852_s19, %s13465_s11  ;;  %p13472_p3 = scmp.lt.u32.totalorder %s13465_s11, %s13852_s19 }
 0x140   : > { %p13468_p8 = pnand %p13466_p6, %p13994_p7 }
 0x142   : > { %p13469_p2 = pneg %p13468_p8 }
 0x144   : > { %p13474_p9 = pnand %p13472_p3, %p13469_p2 }
 0x146   : > { %13477 = shalt.err (!%p13474_p9)
}
 0x147   : > { %s13478_s1 = scalar_lea.vmem %s851_s10, 16  ;;  %s13485_s22 = scalar_lea.vmem %s851_s10, 32 }
 0x148   : > { %p13479_p10 = scmp.ne.s32.totalorder %s851_s10, %s13478_s1  ;;  %p13486_p13 = scmp.lt.s32.totalorder %s851_s10, %s851_s10 }
 0x149   : > { %p13487_p0 = scmp.lt.s32.totalorder %s13485_s22, %s13478_s1 }
 0x14a   : > { %p13481_p11 = pnand %p13479_p10, %p13994_p7 }
 0x14b   : > { %p13488_p1 = por %p13487_p0, %p13486_p13 }
 0x14c   : > { %p13482_p12 = pneg %p13481_p11 }
 0x14e   : > { %p13489_p4 = pnand %p13488_p1, %p13482_p12 }
 0x150   : > { %13492 = shalt.err (!%p13489_p4)
}
 0x151   : > { %12497 = dma.hbm_to_vmem [thread:$0]  (!%p13982_p5), %s13852_s19, 16, %s851_s10, [#allocation12]  }
 0x152   : > { %s13493_s18 = scalar_lea.hbm %s13862_s30, 16 }
 0x153   : > { %p13494_p6 = scmp.ne.s32.totalorder %s13862_s30, %s13493_s18  ;;  %p13500_p3 = scmp.lt.u32.totalorder %s13493_s18, %s13862_s30 }
 0x155   : > { %p13496_p8 = pnand %p13494_p6, %p13994_p7 }
 0x157   : > { %p13497_p2 = pneg %p13496_p8 }
 0x159   : > { %p13502_p9 = pnand %p13500_p3, %p13497_p2 }
 0x15b   : > { %13505 = shalt.err (!%p13502_p9)
}
 0x15c   : > { %s13506_s15 = scalar_lea.vmem %s14162_s16, 16  ;;  %s13513_s11 = scalar_lea.vmem %s14162_s16, 32 }
 0x15d   : > { %p13507_p10 = scmp.ne.s32.totalorder %s14162_s16, %s13506_s15  ;;  %p13514_p13 = scmp.lt.s32.totalorder %s14162_s16, %s14162_s16 }
 0x15e   : > { %p13515_p0 = scmp.lt.s32.totalorder %s13513_s11, %s13506_s15 }
 0x15f   : > { %p13509_p11 = pnand %p13507_p10, %p13994_p7 }
 0x160   : > { %p13516_p1 = por %p13515_p0, %p13514_p13 }
 0x161   : > { %p13510_p12 = pneg %p13509_p11 }
 0x163   : > { %p13517_p4 = pnand %p13516_p1, %p13510_p12 }
 0x165   : > { %13520 = shalt.err (!%p13517_p4)
}
 0x166   : > { %12503 = dma.hbm_to_vmem [thread:$0]  (!%p13982_p5), %s13862_s30, 16, %s14162_s16, [#allocation15]  }
 0x167   : > { %s13785_s10 = smov [#allocation19]   ;;  %s13786_s22 = smov [#allocation22]  }
 0x168   : > { %s898_s1 = sshll.u32 %s13785_s10, 4  ;;  %s922_s18 = sshll.u32 %s13786_s22, 4  ;;  %s899_s1 = int_to_ptr.vmem [resolvable:$true] %s898_s1  ;;  %s14190_s18 = int_to_ptr.vmem [resolvable:$true] %s922_s18 }
 0x169   : > { %s13521_s15 = scalar_lea.hbm %s13872_s12, 16 }
 0x16a   : > { %p13522_p6 = scmp.ne.s32.totalorder %s13872_s12, %s13521_s15  ;;  %p13528_p3 = scmp.lt.u32.totalorder %s13521_s15, %s13872_s12 }
 0x16c   : > { %p13524_p8 = pnand %p13522_p6, %p13994_p7 }
 0x16e   : > { %p13525_p2 = pneg %p13524_p8 }
 0x170   : > { %p13530_p9 = pnand %p13528_p3, %p13525_p2 }
 0x172   : > { %13533 = shalt.err (!%p13530_p9)
}
 0x173   : > { %s13534_s11 = scalar_lea.vmem %s899_s1, 16  ;;  %s13541_s16 = scalar_lea.vmem %s899_s1, 32 }
 0x174   : > { %p13535_p10 = scmp.ne.s32.totalorder %s899_s1, %s13534_s11  ;;  %p13542_p13 = scmp.lt.s32.totalorder %s899_s1, %s899_s1 }
 0x175   : > { %p13543_p0 = scmp.lt.s32.totalorder %s13541_s16, %s13534_s11 }
 0x176   : > { %p13537_p11 = pnand %p13535_p10, %p13994_p7 }
 0x177   : > { %p13544_p1 = por %p13543_p0, %p13542_p13 }
 0x178   : > { %p13538_p12 = pneg %p13537_p11 }
 0x17a   : > { %p13545_p4 = pnand %p13544_p1, %p13538_p12 }
 0x17c   : > { %13548 = shalt.err (!%p13545_p4)
}
 0x17d   : > { %s16139_s10 = sld [smem:[#allocation53_spill]] }
 0x17e   : > { %12509 = dma.hbm_to_vmem [thread:$0]  (!%p13982_p5), %s13872_s12, 16, %s899_s1, [#allocation18]  }
 0x183   : > { %s13549_s22 = scalar_lea.hbm %s16139_s10, 16 }
 0x184   : > { %p13550_p6 = scmp.ne.s32.totalorder %s16139_s10, %s13549_s22  ;;  %p13556_p3 = scmp.lt.u32.totalorder %s13549_s22, %s16139_s10 }
 0x186   : > { %p13552_p8 = pnand %p13550_p6, %p13994_p7 }
 0x188   : > { %p13553_p2 = pneg %p13552_p8 }
 0x18a   : > { %p13558_p9 = pnand %p13556_p3, %p13553_p2 }
 0x18c   : > { %13561 = shalt.err (!%p13558_p9)
}
 0x18d   : > { %s13562_s15 = scalar_lea.vmem %s14190_s18, 16  ;;  %s13569_s11 = scalar_lea.vmem %s14190_s18, 32 }
 0x18e   : > { %p13563_p10 = scmp.ne.s32.totalorder %s14190_s18, %s13562_s15  ;;  %p13570_p13 = scmp.lt.s32.totalorder %s14190_s18, %s14190_s18 }
 0x18f   : > { %p13571_p0 = scmp.lt.s32.totalorder %s13569_s11, %s13562_s15 }
 0x190   : > { %p13565_p11 = pnand %p13563_p10, %p13994_p7 }
 0x191   : > { %p13572_p1 = por %p13571_p0, %p13570_p13 }
 0x192   : > { %p13566_p12 = pneg %p13565_p11 }
 0x194   : > { %p13573_p4 = pnand %p13572_p1, %p13566_p12 }
 0x196   : > { %13576 = shalt.err (!%p13573_p4)
}
 0x197   : > { %s16140_s1 = sld [smem:[#allocation55_spill]]  ;;  %s13787_s16 = smov [#allocation25]  }
 0x198   : > { %12515 = dma.hbm_to_vmem [thread:$0]  (!%p13982_p5), %s16139_s10, 16, %s14190_s18, [#allocation21]  }
 0x199   : > { %s944_s22 = sshll.u32 %s13787_s16, 4  ;;  %s13788_s4 = smov [#allocation28]   ;;  %s945_s22 = int_to_ptr.vmem [resolvable:$true] %s944_s22 }
 0x19a   : > { %s967_s5 = sshll.u32 %s13788_s4, 4  ;;  %s14218_s5 = int_to_ptr.vmem [resolvable:$true] %s967_s5 }
 0x19d   : > { %s13577_s15 = scalar_lea.hbm %s16140_s1, 16 }
 0x19e   : > { %p13578_p6 = scmp.ne.s32.totalorder %s16140_s1, %s13577_s15  ;;  %p13584_p3 = scmp.lt.u32.totalorder %s13577_s15, %s16140_s1 }
 0x1a0   : > { %p13580_p8 = pnand %p13578_p6, %p13994_p7 }
 0x1a2   : > { %p13581_p2 = pneg %p13580_p8 }
 0x1a4   : > { %p13586_p9 = pnand %p13584_p3, %p13581_p2 }
 0x1a6   : > { %13589 = shalt.err (!%p13586_p9)
}
 0x1a7   : > { %s13590_s11 = scalar_lea.vmem %s945_s22, 16  ;;  %s13597_s18 = scalar_lea.vmem %s945_s22, 32 }
 0x1a8   : > { %p13591_p10 = scmp.ne.s32.totalorder %s945_s22, %s13590_s11  ;;  %p13598_p13 = scmp.lt.s32.totalorder %s945_s22, %s945_s22 }
 0x1a9   : > { %p13599_p0 = scmp.lt.s32.totalorder %s13597_s18, %s13590_s11 }
 0x1aa   : > { %p13593_p11 = pnand %p13591_p10, %p13994_p7 }
 0x1ab   : > { %p13600_p1 = por %p13599_p0, %p13598_p13 }
 0x1ac   : > { %p13594_p12 = pneg %p13593_p11 }
 0x1ae   : > { %p13601_p4 = pnand %p13600_p1, %p13594_p12 }
 0x1b0   : > { %13604 = shalt.err (!%p13601_p4)
}
 0x1b1   : > { %s16141_s4 = sld [smem:[#allocation57_spill]] }
 0x1b2   : > { %12521 = dma.hbm_to_vmem [thread:$0]  (!%p13982_p5), %s16140_s1, 16, %s945_s22, [#allocation24]  }
 0x1b7   : > { %s13605_s16 = scalar_lea.hbm %s16141_s4, 8192 }
 0x1b8   : > { %p13606_p6 = scmp.ne.s32.totalorder %s16141_s4, %s13605_s16  ;;  %p13612_p3 = scmp.lt.u32.totalorder %s13605_s16, %s16141_s4 }
 0x1ba   : > { %p13608_p8 = pnand %p13606_p6, %p13994_p7 }
 0x1bc   : > { %p13609_p2 = pneg %p13608_p8 }
 0x1be   : > { %p13614_p9 = pnand %p13612_p3, %p13609_p2 }
 0x1c0   : > { %13617 = shalt.err (!%p13614_p9)
}
 0x1c1   : > { %s13618_s15 = scalar_lea.vmem %s14218_s5, 8192  ;;  %p13626_p13 = scmp.lt.s32.totalorder %s14218_s5, %s14218_s5 }
 0x1c2   : > { %p13619_p10 = scmp.ne.s32.totalorder %s14218_s5, %s13618_s15  ;;  %p13627_p0 = scmp.lt.s32.totalorder %s13618_s15, %s13618_s15 }
 0x1c4   : > { %p13621_p11 = pnand %p13619_p10, %p13994_p7  ;;  %p13628_p1 = por %p13627_p0, %p13626_p13 }
 0x1c6   : > { %p13622_p12 = pneg %p13621_p11 }
 0x1c8   : > { %p13629_p4 = pnand %p13628_p1, %p13622_p12 }
 0x1ca   : > { %13632 = shalt.err (!%p13629_p4)
}
 0x1cb   : > { %s16142_s22 = smov 32   ;;  %s16143_s11 = smov 512  }
 0x1cc   : > { %s16144_s18 = sld [smem:[#allocation61_spill]]  ;;  %s13789_s16 = smov [#allocation31]  }
 0x1cd   : > { %12527 = dma.hbm_to_vmem [thread:$0]  (!%p13982_p5), %s16141_s4, 8192, %s14218_s5, [#allocation27], %s16143_s11, %s16143_s11, %s16142_s22  }
 0x1ce   : > { %s999_s1 = sshll.u32 %s13789_s16, 4  ;;  %s13790_s6 = smov [#allocation34]   ;;  %s1000_s1 = int_to_ptr.vmem [resolvable:$true] %s999_s1 }
 0x1cf   : > { %s1034_s8 = sshll.u32 %s13790_s6, 4  ;;  %s14248_s8 = int_to_ptr.vmem [resolvable:$true] %s1034_s8 }
 0x1d2   : > { %s13633_s15 = scalar_lea.hbm %s16144_s18, 8192 }
 0x1d3   : > { %p13634_p6 = scmp.ne.s32.totalorder %s16144_s18, %s13633_s15  ;;  %p13640_p3 = scmp.lt.u32.totalorder %s13633_s15, %s16144_s18 }
 0x1d5   : > { %p13636_p8 = pnand %p13634_p6, %p13994_p7 }
 0x1d7   : > { %p13637_p2 = pneg %p13636_p8 }
 0x1d9   : > { %p13642_p9 = pnand %p13640_p3, %p13637_p2 }
 0x1db   : > { %13645 = shalt.err (!%p13642_p9)
}
 0x1dc   : > { %s13646_s9 = scalar_lea.vmem %s1000_s1, 8192  ;;  %p13654_p13 = scmp.lt.s32.totalorder %s1000_s1, %s1000_s1 }
 0x1dd   : > { %p13647_p10 = scmp.ne.s32.totalorder %s1000_s1, %s13646_s9  ;;  %p13655_p0 = scmp.lt.s32.totalorder %s13646_s9, %s13646_s9 }
 0x1df   : > { %p13649_p11 = pnand %p13647_p10, %p13994_p7  ;;  %p13656_p1 = por %p13655_p0, %p13654_p13 }
 0x1e1   : > { %p13650_p12 = pneg %p13649_p11 }
 0x1e3   : > { %p13657_p4 = pnand %p13656_p1, %p13650_p12 }
 0x1e5   : > { %13660 = shalt.err (!%p13657_p4)
}
 0x1e6   : > { %12533 = dma.hbm_to_vmem [thread:$0]  (!%p13982_p5), %s16144_s18, 8192, %s1000_s1, [#allocation30], %s16143_s11, %s16143_s11, %s16142_s22  }
 0x1e7   : > { %s13661_s5 = scalar_lea.hbm %s13947_s21, 2048 }
 0x1e8   : > { %p13662_p6 = scmp.ne.s32.totalorder %s13947_s21, %s13661_s5  ;;  %p13668_p3 = scmp.lt.u32.totalorder %s13661_s5, %s13947_s21 }
 0x1ea   : > { %p13664_p8 = pnand %p13662_p6, %p13994_p7 }
 0x1ec   : > { %p13665_p2 = pneg %p13664_p8 }
 0x1ee   : > { %p13670_p9 = pnand %p13668_p3, %p13665_p2 }
 0x1f0   : > { %13673 = shalt.err (!%p13670_p9)
}
 0x1f1   : > { %s13674_s9 = scalar_lea.vmem %s14248_s8, 2048  ;;  %p13682_p13 = scmp.lt.s32.totalorder %s14248_s8, %s14248_s8 }
 0x1f2   : > { %p13675_p10 = scmp.ne.s32.totalorder %s14248_s8, %s13674_s9  ;;  %p13683_p0 = scmp.lt.s32.totalorder %s13674_s9, %s13674_s9 }
 0x1f4   : > { %p13677_p11 = pnand %p13675_p10, %p13994_p7  ;;  %p13684_p1 = por %p13683_p0, %p13682_p13 }
 0x1f6   : > { %p13678_p12 = pneg %p13677_p11 }
 0x1f8   : > { %p13685_p4 = pnand %p13684_p1, %p13678_p12 }
 0x1fa   : > { %13688 = shalt.err (!%p13685_p4)
}
 0x1fb   : > { %12539 = dma.hbm_to_vmem [thread:$0]  (!%p13982_p5), %s13947_s21, 2048, %s14248_s8, [#allocation33], %s16138_s28, %s16138_s28, %s16137_s2  }
 0x1fc   : > { %p16145_p6 = scmp.ne.s32.totalorder %s16134_s23, 0 }
 0x1fd   : > { %p16146_p7 = scmp.eq.s32.totalorder (!%p16145_p6), %s13965_s0, 0 }
 0x1fe   : > { %1075 = sbr.rel (%p16145_p6) target bundleno = 10291 (0x2833), region = 144 }
 0x205   : > { %13694 = dma.done.wait (%p16146_p7), [#allocation7], 4096   ;;  %p16147_p8 = pmov %p16146_p7 }
 0x206   : > { %p16148_p2 = pmov %p16146_p7 }
 0x207   : > { %13696 = vsyncadd (%p16147_p8), [#allocation7], 4294963200 }
 0x208   : > { %13698 = dma.done.wait (%p16148_p2), [#allocation9], 4112   ;;  %p16149_p3 = pmov %p16148_p2 }
 0x209   : > { %p16150_p9 = pmov %p16148_p2 }
 0x20a   : > { %13700 = vsyncadd (%p16149_p3), [#allocation9], 4294963184 }
 0x20b   : > { %13702 = dma.done.wait (%p16150_p9), [#allocation12], 32   ;;  %p16151_p5 = pmov %p16148_p2 }
 0x20c   : > { %p16152_p10 = pmov %p16148_p2 }
 0x20d   : > { %13704 = vsyncadd (%p16151_p5), [#allocation12], 4294967264 }
 0x20e   : > { %13706 = dma.done.wait (%p16152_p10), [#allocation15], 4112   ;;  %p16153_p11 = pmov %p16148_p2 }
 0x20f   : > { %p16154_p12 = pmov %p16148_p2 }
 0x210   : > { %13708 = vsyncadd (%p16153_p11), [#allocation15], 4294963184 }
 0x211   : > { %13710 = dma.done.wait (%p16154_p12), [#allocation18], 4112   ;;  %p16155_p13 = pmov %p16148_p2 }
 0x212   : > { %p16156_p0 = pmov %p16148_p2 }
 0x213   : > { %13712 = vsyncadd (%p16155_p13), [#allocation18], 4294963184 }
 0x214   : > { %13714 = dma.done.wait (%p16156_p0), [#allocation21], 2064   ;;  %p16157_p1 = pmov %p16156_p0 }
 0x215   : > { %p16158_p4 = pmov %p16156_p0 }
 0x216   : > { %13716 = vsyncadd (%p16157_p1), [#allocation21], 4294965232 }
 0x217   : > { %13718 = dma.done.wait (%p16158_p4), [#allocation24], 32   ;;  %p16159_p6 = pmov %p16156_p0 }
 0x218   : > { %p16160_p7 = pmov %p16156_p0 }
 0x219   : > { %13720 = vsyncadd (%p16159_p6), [#allocation24], 4294967264 }
 0x21a   : > { %13722 = dma.done.wait (%p16160_p7), [#allocation27], 16384   ;;  %p16161_p8 = pmov %p16156_p0 }
 0x21b   : > { %p16162_p2 = pmov %p16156_p0 }
 0x21c   : > { %13724 = vsyncadd (%p16161_p8), [#allocation27], 4294950912 }
 0x21d   : > { %13726 = dma.done.wait (%p16162_p2), [#allocation30], 16384   ;;  %p16163_p3 = pmov %p16156_p0 }
 0x21e   : > { %p16164_p9 = pmov %p16156_p0 }
 0x21f   : > { %13728 = vsyncadd (%p16163_p3), [#allocation30], 4294950912 }
 0x220   : > { %13730 = dma.done.wait (%p16164_p9), [#allocation33], 4096   ;;  %p16165_p5 = pmov %p16156_p0 }
 0x221   : > { %v13791_v0 = vmov 0.0   ;;  %p1234_p10 = scmp.lt.s32.totalorder %s13965_s0, 1  ;;  %v1278_v1 = vld [vmem:[#allocation6 + $0x80] sm:$0xff]  ;;  %v1279_v2 = vld [vmem:[#allocation6 + $0x88] sm:$0xff]  ;;  %v1280_v6 = vld [vmem:[#allocation6 + $0x90] sm:$0xff]  ;;  %s16166_s8 = sld [smem:[#allocation45_spill]] }
 0x222   : > { %13732 = vsyncadd (%p16165_p5), [#allocation33], 4294963200  ;;  %1251 = vst [vmem:[#allocation2] sm:$0xff] %v13791_v0  ;;  %v1262_v3 = vld [vmem:[#allocation6] sm:$0xff]  ;;  %v9990_v4 = vpack.c.bf16 %v1279_v2, %v1278_v1  ;;  %v1263_v5 = vld [vmem:[#allocation6 + $0x8] sm:$0xff]  ;;  %s16167_s7 = sld [smem:[#allocation50_spill]] }
 0x223   : > { %1252 = vst [vmem:[#allocation2 + $0x8] sm:$0xff] %v13791_v0  ;;  %1253 = vst [vmem:[#allocation2 + $0x10] sm:$0xff] %v13791_v0  ;;  %s16178_s0 = smov (!%p1234_p10, %s13965_s0), 1  ;;  %v1281_v7 = vld [vmem:[#allocation6 + $0x98] sm:$0xff]  ;;  %v9992_v8 = vpack.c.bf16 %v1263_v5, %v1262_v3  ;;  %v1264_v10 = vld [vmem:[#allocation6 + $0x10] sm:$0xff]  ;;  %s16168_s26 = sld [smem:[#allocation48_spill]] }
 0x224   : > { %v9994_v9 = vpack.c.bf16 %v1281_v7, %v1280_v6  ;;  %v1265_v11 = vld [vmem:[#allocation6 + $0x18] sm:$0xff]  ;;  %v1282_v12 = vld [vmem:[#allocation6 + $0xa0] sm:$0xff]  ;;  %9991 = vmatprep.subr.bf16.mxu0 %v9990_v4  ;;  %v1283_v13 = vld [vmem:[#allocation6 + $0xa8] sm:$0xff]  ;;  %s9627_s6 = sshll.u32 %s16178_s0, 4  ;;  %s16169_s2 = sld [smem:[#allocation49_spill]]  ;;  %vm13793_vm0 = vmmov 0  }
 0x225   : > { %9993 = vmatpush3.bf16.msra.mxu0 %v9992_v8  ;;  %v9996_v14 = vpack.c.bf16 %v1265_v11, %v1264_v10  ;;  %v9998_v15 = vpack.c.bf16 %v1283_v13, %v1282_v12  ;;  %v1266_v16 = vld [vmem:[#allocation6 + $0x20] sm:$0xff]  ;;  %v1267_v17 = vld [vmem:[#allocation6 + $0x28] sm:$0xff]  ;;  %v1284_v18 = vld [vmem:[#allocation6 + $0xb0] sm:$0xff]  ;;  %s16170_s28 = sld [smem:[#allocation46_spill]]  ;;  %s9514_s1 = sshll.u32 %s16178_s0, 1 }
 0x226   : > { %9995 = vmatprep.subr.bf16.mxu0 %v9994_v9  ;;  %v1285_v19 = vld [vmem:[#allocation6 + $0xb8] sm:$0xff]  ;;  %v10000_v20 = vpack.c.bf16 %v1267_v17, %v1266_v16  ;;  %v1268_v22 = vld [vmem:[#allocation6 + $0x30] sm:$0xff]  ;;  %v1286_v24 = vld [vmem:[#allocation6 + $0xc0] sm:$0xff]  ;;  %s16171_s11 = sld [smem:[#allocation58_spill]]  ;;  %s16172_s16 = sld [smem:[#allocation59_spill]] }
 0x227   : > { %s1238_s23 = scalar_lea.vmem %s16166_s8, %s9627_s6  ;;  %v10002_v21 = vpack.c.bf16 %v1285_v19, %v1284_v18  ;;  %v1269_v23 = vld [vmem:[#allocation6 + $0x38] sm:$0xff]  ;;  %v1287_v25 = vld [vmem:[#allocation6 + $0xc8] sm:$0xff]  ;;  %v1270_v27 = vld [vmem:[#allocation6 + $0x40] sm:$0xff]  ;;  %s16173_s15 = sld [smem:[#allocation47_spill]] }
 0x228   : > { %v14332_v26 = vld [vmem:[%s1238_s23] sm:$0xff]  ;;  %v14336_v28 = vld [vmem:[%s1238_s23 + $0x8] sm:$0xff]  ;;  %v1401_v30 = vld [vmem:[#allocation8 + $0x88] sm:$0xff]  ;;  %v10004_v31 = vpack.c.bf16 %v1269_v23, %v1268_v22  ;;  %v10006_v36 = vpack.c.bf16 %v1287_v25, %v1286_v24  ;;  %s16174_s9 = sld [smem:[#allocation62_spill]]  ;;  %s16175_s8 = sld [smem:[#allocation63_spill]] }
 0x229   : > { %9997 = vmatpush3.bf16.msra.mxu0 %v9996_v14  ;;  %1256 = vst [vmem:[#allocation2 + $0x2] sm:$0xff] %v14332_v26  ;;  %1365 = vmatprep.mubr.f32.mxu0 %v14332_v26  ;;  %v1400_v29 = vld [vmem:[#allocation8 + $0x80] sm:$0xff]  ;;  %v1271_v32 = vld [vmem:[#allocation6 + $0x48] sm:$0xff]  ;;  %1257 = vst [vmem:[#allocation2 + $0xa] sm:$0xff] %v14336_v28  ;;  %s9516_s6 = sshll.u32 %s16178_s0, 3 }
 0x22a   : > { %9999 = vmatprep.subr.bf16.mxu0 %v9998_v15  ;;  %v10022_v33 = vpack.c.bf16 %v1401_v30, %v1400_v29  ;;  %v1384_v34 = vld [vmem:[#allocation8] sm:$0xff]  ;;  %v1385_v35 = vld [vmem:[#allocation8 + $0x8] sm:$0xff]  ;;  %v1288_v37 = vld [vmem:[#allocation6 + $0xd0] sm:$0xff]  ;;  %v10008_v48 = vpack.c.bf16 %v1271_v32, %v1270_v27  ;;  %s1250_s23 = scalar_lea.vmem %s13957_s27, %s9516_s6 }
 0x22b   : > { %v10024_v38 = vpack.c.bf16 %v1385_v35, %v1384_v34  ;;  %v1402_v39 = vld [vmem:[#allocation8 + $0x90] sm:$0xff]  ;;  %v1403_v40 = vld [vmem:[#allocation8 + $0x98] sm:$0xff]  ;;  %v1404_v46 = vld [vmem:[#allocation8 + $0xa0] sm:$0xff]  ;;  %s14474_s22 = scalar_lea.vmem %s16170_s28, %s9514_s1 }
 0x22c   : > { %v1289_v41 = vld [vmem:[#allocation6 + $0xd8] sm:$0xff]  ;;  %10023 = vmatprep.subr.bf16.mxu1 %v10022_v33  ;;  %v10026_v42 = vpack.c.bf16 %v1403_v40, %v1402_v39  ;;  %v1386_v43 = vld [vmem:[#allocation8 + $0x10] sm:$0xff]  ;;  %v1405_v47 = vld [vmem:[#allocation8 + $0xa8] sm:$0xff] }
 0x22d   : > { %10001 = vmatpush3.bf16.msra.mxu0 %v10000_v20  ;;  %v1387_v44 = vld [vmem:[#allocation8 + $0x18] sm:$0xff]  ;;  %10025 = vmatpush3.bf16.msra.mxu1 %v10024_v38  ;;  %v1272_v49 = vld [vmem:[#allocation6 + $0x50] sm:$0xff]  ;;  %v10030_v50 = vpack.c.bf16 %v1405_v47, %v1404_v46  ;;  %v1388_v51 = vld [vmem:[#allocation8 + $0x20] sm:$0xff]  ;;  %v10010_v53 = vpack.c.bf16 %v1289_v41, %v1288_v37  ;;  %s14565_s5 = scalar_lea.vmem %s16173_s15, %s9514_s1 }
 0x22e   : > { %10003 = vmatprep.subr.bf16.mxu0 %v10002_v21  ;;  %v10028_v45 = vpack.c.bf16 %v1387_v44, %v1386_v43  ;;  %10027 = vmatprep.subr.bf16.mxu1 %v10026_v42  ;;  %v1389_v52 = vld [vmem:[#allocation8 + $0x28] sm:$0xff]  ;;  %v1273_v54 = vld [vmem:[#allocation6 + $0x58] sm:$0xff]  ;;  %v1406_v55 = vld [vmem:[#allocation8 + $0xb0] sm:$0xff] }
 0x22f   : > { %v1407_v56 = vld [vmem:[#allocation8 + $0xb8] sm:$0xff]  ;;  %v1290_v57 = vld [vmem:[#allocation6 + $0xe0] sm:$0xff]  ;;  %v1291_v58 = vld [vmem:[#allocation6 + $0xe8] sm:$0xff]  ;;  %v10032_v59 = vpack.c.bf16 %v1389_v52, %v1388_v51  ;;  %v10012_v60 = vpack.c.bf16 %v1273_v54, %v1272_v49 }
 0x230   : > { %v10034_v61 = vpack.c.bf16 %v1407_v56, %v1406_v55  ;;  %v1390_v62 = vld [vmem:[#allocation8 + $0x30] sm:$0xff]  ;;  %v1391_v63 = vld [vmem:[#allocation8 + $0x38] sm:$0xff]  ;;  %v10014_v1 = vpack.c.bf16 %v1291_v58, %v1290_v57  ;;  %v1274_v2 = vld [vmem:[#allocation6 + $0x60] sm:$0xff] }
 0x231   : > { %10005 = vmatpush3.bf16.msra.mxu0 %v10004_v31  ;;  %10029 = vmatpush3.bf16.msra.mxu1 %v10028_v45  ;;  %v1275_v3 = vld [vmem:[#allocation6 + $0x68] sm:$0xff]  ;;  %v1292_v4 = vld [vmem:[#allocation6 + $0xf0] sm:$0xff]  ;;  %v1293_v5 = vld [vmem:[#allocation6 + $0xf8] sm:$0xff]  ;;  %v10036_v6 = vpack.c.bf16 %v1391_v63, %v1390_v62 }
 0x232   : > { %10007 = vmatprep.subr.bf16.mxu0 %v10006_v36  ;;  %10031 = vmatprep.subr.bf16.mxu1 %v10030_v50  ;;  %v10016_v7 = vpack.c.bf16 %v1275_v3, %v1274_v2  ;;  %v10018_v8 = vpack.c.bf16 %v1293_v5, %v1292_v4  ;;  %v1276_v9 = vld [vmem:[#allocation6 + $0x70] sm:$0xff]  ;;  %v1277_v10 = vld [vmem:[#allocation6 + $0x78] sm:$0xff]  ;;  %v1501_v12 = vld [vmem:[%s16167_s7 + $0x8] sm:$0xff] }
 0x233   : > { %v1500_v11 = vld [vmem:[%s16167_s7] sm:$0xff]  ;;  %v10020_v13 = vpack.c.bf16 %v1277_v10, %v1276_v9  ;;  %v1502_v15 = vld [vmem:[%s16167_s7 + $0x10] sm:$0xff]  ;;  %v1503_v16 = vld [vmem:[%s16167_s7 + $0x18] sm:$0xff] }
 0x234   : > { %v10054_v14 = vpack.c.bf16 %v1501_v12, %v1500_v11  ;;  %v1258_v17 = vld [vmem:[#allocation2 + $0x1] sm:$0xff]  ;;  %v10058_v18 = vpack.c.bf16 %v1503_v16, %v1502_v15  ;;  %v1259_v21 = vld [vmem:[#allocation2 + $0x9] sm:$0xff]  ;;  %v1507_v24 = vld [vmem:[%s16167_s7 + $0x38] sm:$0xff] }
 0x235   : > { %10009 = vmatpush3.bf16.msra.mxu0 %v10008_v48  ;;  %10033 = vmatpush3.bf16.msra.mxu1 %v10032_v59  ;;  %v1504_v19 = vld [vmem:[%s16167_s7 + $0x20] sm:$0xff]  ;;  %v1505_v20 = vld [vmem:[%s16167_s7 + $0x28] sm:$0xff]  ;;  %v1506_v23 = vld [vmem:[%s16167_s7 + $0x30] sm:$0xff] }
 0x236   : > { %10011 = vmatprep.subr.bf16.mxu0 %v10010_v53  ;;  %10035 = vmatprep.subr.bf16.mxu1 %v10034_v61  ;;  %v10062_v22 = vpack.c.bf16 %v1505_v20, %v1504_v19  ;;  %v10066_v25 = vpack.c.bf16 %v1507_v24, %v1506_v23  ;;  %v1408_v27 = vld [vmem:[#allocation8 + $0xc0] sm:$0xff]  ;;  %v1409_v29 = vld [vmem:[#allocation8 + $0xc8] sm:$0xff]  ;;  %v1508_v34 = vld [vmem:[%s16167_s7 + $0x40] sm:$0xff] }
 0x237   : > { %v10038_v30 = vpack.c.bf16 %v1409_v29, %v1408_v27  ;;  %v1392_v31 = vld [vmem:[#allocation8 + $0x40] sm:$0xff]  ;;  %v1393_v32 = vld [vmem:[#allocation8 + $0x48] sm:$0xff]  ;;  %v1410_v36 = vld [vmem:[#allocation8 + $0xd0] sm:$0xff] }
 0x238   : > { %v10040_v33 = vpack.c.bf16 %v1393_v32, %v1392_v31  ;;  %v1509_v35 = vld [vmem:[%s16167_s7 + $0x48] sm:$0xff]  ;;  %v1411_v37 = vld [vmem:[#allocation8 + $0xd8] sm:$0xff]  ;;  %v1394_v39 = vld [vmem:[#allocation8 + $0x50] sm:$0xff] }
 0x239   : > { %10013 = vmatpush3.bf16.msra.mxu0 %v10012_v60  ;;  %10037 = vmatpush3.bf16.msra.mxu1 %v10036_v6  ;;  %v10042_v38 = vpack.c.bf16 %v1411_v37, %v1410_v36  ;;  %v1395_v40 = vld [vmem:[#allocation8 + $0x58] sm:$0xff]  ;;  %v1510_v42 = vld [vmem:[%s16167_s7 + $0x50] sm:$0xff]  ;;  %v1511_v43 = vld [vmem:[%s16167_s7 + $0x58] sm:$0xff] }
 0x23a   : > { %10015 = vmatprep.subr.bf16.mxu0 %v10014_v1  ;;  %10039 = vmatprep.subr.bf16.mxu1 %v10038_v30  ;;  %v10044_v41 = vpack.c.bf16 %v1395_v40, %v1394_v39  ;;  %v10074_v44 = vpack.c.bf16 %v1511_v43, %v1510_v42  ;;  %v1412_v45 = vld [vmem:[#allocation8 + $0xe0] sm:$0xff]  ;;  %v1413_v46 = vld [vmem:[#allocation8 + $0xe8] sm:$0xff]  ;;  %v1512_v51 = vld [vmem:[%s16167_s7 + $0x60] sm:$0xff] }
 0x23b   : > { %v10046_v47 = vpack.c.bf16 %v1413_v46, %v1412_v45  ;;  %v1396_v48 = vld [vmem:[#allocation8 + $0x60] sm:$0xff]  ;;  %v1397_v49 = vld [vmem:[#allocation8 + $0x68] sm:$0xff]  ;;  %v1414_v54 = vld [vmem:[#allocation8 + $0xf0] sm:$0xff] }
 0x23c   : > { %v10048_v50 = vpack.c.bf16 %v1397_v49, %v1396_v48  ;;  %v1513_v52 = vld [vmem:[%s16167_s7 + $0x68] sm:$0xff]  ;;  %v1415_v55 = vld [vmem:[#allocation8 + $0xf8] sm:$0xff]  ;;  %v1398_v57 = vld [vmem:[#allocation8 + $0x70] sm:$0xff] }
 0x23d   : > { %10017 = vmatpush3.bf16.msra.mxu0 %v10016_v7  ;;  %10041 = vmatpush3.bf16.msra.mxu1 %v10040_v33  ;;  %v10078_v53 = vpack.c.bf16 %v1513_v52, %v1512_v51  ;;  %v10050_v56 = vpack.c.bf16 %v1415_v55, %v1414_v54  ;;  %v1399_v58 = vld [vmem:[#allocation8 + $0x78] sm:$0xff]  ;;  %v1514_v60 = vld [vmem:[%s16167_s7 + $0x70] sm:$0xff]  ;;  %v1515_v61 = vld [vmem:[%s16167_s7 + $0x78] sm:$0xff] }
 0x23e   : > { %10019 = vmatprep.subr.bf16.mxu0 %v10018_v8  ;;  %10043 = vmatprep.subr.bf16.mxu1 %v10042_v38  ;;  %v10052_v59 = vpack.c.bf16 %v1399_v58, %v1398_v57  ;;  %v10082_v62 = vpack.c.bf16 %v1515_v61, %v1514_v60  ;;  %v1642_v63 = vld [vmem:[#allocation14 + $0x80] sm:$0xff]  ;;  %v1643_v1 = vld [vmem:[#allocation14 + $0x88] sm:$0xff]  ;;  %v9517_v4 = vld [vmem:[%s16168_s26] ss:$0 sm:$0xff] }
 0x23f   : > { %v10086_v2 = vpack.c.bf16 %v1643_v1, %v1642_v63  ;;  %v1627_v15 = vld [vmem:[#allocation14 + $0x8] sm:$0xff]  ;;  %v1645_v16 = vld [vmem:[#allocation14 + $0x98] sm:$0xff]  ;;  %v1628_v19 = vld [vmem:[#allocation14 + $0x10] sm:$0xff] }
 0x240   : > { %v1629_v20 = vld [vmem:[#allocation14 + $0x18] sm:$0xff]  ;;  %v1646_v24 = vld [vmem:[#allocation14 + $0xa0] sm:$0xff]  ;;  %v1631_v30 = vld [vmem:[#allocation14 + $0x28] sm:$0xff] }
 0x241   : > { %10021 = vmatpush3.bf16.msra.mxu0 %v10020_v13  ;;  %10045 = vmatpush3.bf16.msra.mxu1 %v10044_v41  ;;  %v1630_v29 = vld [vmem:[#allocation14 + $0x20] sm:$0xff]  ;;  %v1648_v32 = vld [vmem:[#allocation14 + $0xb0] sm:$0xff]  ;;  %v1649_v33 = vld [vmem:[#allocation14 + $0xb8] sm:$0xff] }
 0x242   : > { %10055 = vmatprep.subr.bf16.mxu0 %v10054_v14  ;;  %10047 = vmatprep.subr.bf16.mxu1 %v10046_v47  ;;  %v10096_v31 = vpack.c.bf16 %v1631_v30, %v1630_v29  ;;  %v1650_v39 = vld [vmem:[#allocation14 + $0xc0] sm:$0xff]  ;;  %v1651_v40 = vld [vmem:[#allocation14 + $0xc8] sm:$0xff]  ;;  %v1652_v45 = vld [vmem:[#allocation14 + $0xd0] sm:$0xff] }
 0x243   : > { %v10102_v41 = vpack.c.bf16 %v1651_v40, %v1650_v39  ;;  %v1634_v42 = vld [vmem:[#allocation14 + $0x40] sm:$0xff]  ;;  %v1635_v43 = vld [vmem:[#allocation14 + $0x48] sm:$0xff]  ;;  %v1653_v46 = vld [vmem:[#allocation14 + $0xd8] sm:$0xff] }
 0x244   : > { %1366 = vmatmul.mubr.f32.vlgmr.msra.gmra.mrb[0].mxu0 %v1258_v17  ;;  %v10106_v47 = vpack.c.bf16 %v1653_v46, %v1652_v45  ;;  %v1636_v48 = vld [vmem:[#allocation14 + $0x50] sm:$0xff]  ;;  %v1637_v49 = vld [vmem:[#allocation14 + $0x58] sm:$0xff]  ;;  %v1654_v51 = vld [vmem:[#allocation14 + $0xe0] sm:$0xff] }
 0x245   : > { %1370 = vmatprep.mubr.f32.mxu0 %v14336_v28  ;;  %10057 = vmatpush3.bf16.msra.mxu0 %v10054_v14  ;;  %v1626_v14 = vld [vmem:[#allocation14] sm:$0xff]  ;;  %v1655_v52 = vld [vmem:[#allocation14 + $0xe8] sm:$0xff]  ;;  %v1656_v57 = vld [vmem:[#allocation14 + $0xf0] sm:$0xff] }
 0x246   : > { %10059 = vmatprep.subr.bf16.mxu0 %v10058_v18  ;;  %10049 = vmatpush3.bf16.msra.mxu1 %v10048_v50  ;;  %v10088_v17 = vpack.c.bf16 %v1627_v15, %v1626_v14  ;;  %v10108_v50 = vpack.c.bf16 %v1637_v49, %v1636_v48  ;;  %v1638_v54 = vld [vmem:[#allocation14 + $0x60] sm:$0xff]  ;;  %v1639_v55 = vld [vmem:[#allocation14 + $0x68] sm:$0xff]  ;;  %v1657_v58 = vld [vmem:[#allocation14 + $0xf8] sm:$0xff] }
 0x247   : > { %10051 = vmatprep.subr.bf16.mxu1 %v10050_v56  ;;  %v10112_v56 = vpack.c.bf16 %v1639_v55, %v1638_v54  ;;  %v1640_v60 = vld [vmem:[#allocation14 + $0x70] sm:$0xff]  ;;  %v1641_v61 = vld [vmem:[#allocation14 + $0x78] sm:$0xff]  ;;  %v1864_v63 = vld [vmem:[#allocation20] sm:$0xff] }
 0x248   : > { %1371 = vmatmul.mubr.f32.gmra.mrb[2].mxu0 %v1259_v21  ;;  %v1865_v1 = vld [vmem:[#allocation20 + $0x8] sm:$0xff]  ;;  %v1768_v14 = vld [vmem:[#allocation17 + $0xa0] sm:$0xff]  ;;  %v9520_v40 = vld [vmem:[#allocation11] ss:$0 sm:$0xff] }
 0x249   : > { %10061 = vmatpush3.bf16.msra.mxu0 %v10058_v18  ;;  %9882 = vmatprep.mubr.f32.mxu0 %v14332_v26  ;;  %v10070_v26 = vpack.c.bf16 %v1509_v35, %v1508_v34  ;;  %v10098_v34 = vpack.c.bf16 %v1649_v33, %v1648_v32  ;;  %v1632_v35 = vld [vmem:[#allocation14 + $0x30] sm:$0xff] }
 0x24a   : > { %10063 = vmatprep.subr.bf16.mxu0 %v10062_v22  ;;  %10053 = vmatpush3.bf16.msra.mxu1 %v10052_v59  ;;  %v10114_v59 = vpack.c.bf16 %v1657_v58, %v1656_v57  ;;  %v1769_v15 = vld [vmem:[#allocation17 + $0xa8] sm:$0xff]  ;;  %v9518_v29 = vld [vmem:[%s16169_s2] ss:$0 sm:$0xff] }
 0x24b   : > { %10087 = vmatprep.subr.bf16.mxu1 %v10086_v2  ;;  %v14363_v2 = vpack.c.bf16 %v1865_v1, %v1864_v63  ;;  %v1869_v57 = vld [vmem:[#allocation20 + $0x28] sm:$0xff] }
 0x24c   : > { %v1873_v63 = vld [vmem:[#allocation20 + $0x48] sm:$0xff] }
 0x24d   : > { %10065 = vmatpush3.bf16.msra.mxu0 %v10062_v22  ;;  %v10092_v22 = vpack.c.bf16 %v1629_v20, %v1628_v19  ;;  %v1770_v19 = vld [vmem:[#allocation17 + $0xb0] sm:$0xff]  ;;  %v1771_v20 = vld [vmem:[#allocation17 + $0xb8] sm:$0xff] }
 0x24e   : > { %10067 = vmatprep.subr.bf16.mxu0 %v10066_v25 }
 0x251   : > { %10069 = vmatpush3.bf16.msra.mxu0 %v10066_v25  ;;  %v1647_v25 = vld [vmem:[#allocation14 + $0xa8] sm:$0xff] }
 0x252   : > { %10071 = vmatprep.subr.bf16.mxu0 %v10070_v26  ;;  %v10094_v27 = vpack.c.bf16 %v1647_v25, %v1646_v24  ;;  %v1755_v24 = vld [vmem:[#allocation17 + $0x38] sm:$0xff] }
 0x255   : > { %10073 = vmatpush3.bf16.msra.mxu0 %v10070_v26  ;;  %v1633_v26 = vld [vmem:[#allocation14 + $0x38] sm:$0xff] }
 0x256   : > { %10075 = vmatprep.subr.bf16.mxu0 %v10074_v44  ;;  %v10100_v36 = vpack.c.bf16 %v1633_v26, %v1632_v35 }
 0x259   : > { %10077 = vmatpush3.bf16.msra.mxu0 %v10074_v44  ;;  %v10104_v44 = vpack.c.bf16 %v1635_v43, %v1634_v42  ;;  %v9521_v43 = vld [vmem:[#allocation13] ss:$0 sm:$0xff] }
 0x25a   : > { %10079 = vmatprep.subr.bf16.mxu0 %v10078_v53 }
 0x25d   : > { %10081 = vmatpush3.bf16.msra.mxu0 %v10078_v53  ;;  %v10110_v53 = vpack.c.bf16 %v1655_v52, %v1654_v51 }
 0x25e   : > { %10083 = vmatprep.subr.bf16.mxu0 %v10082_v62 }
 0x261   : > { %10085 = vmatpush3.bf16.msra.mxu0 %v10082_v62  ;;  %v10116_v62 = vpack.c.bf16 %v1641_v61, %v1640_v60  ;;  %v1871_v60 = vld [vmem:[#allocation20 + $0x38] sm:$0xff] }
 0x264   : > { %9883 = vmatmul.mubr.f32.vlgmr.msra.gmra.mrb[4].mxu0 %v14336_v28  ;;  %v1644_v28 = vld [vmem:[#allocation14 + $0x90] sm:$0xff] }
 0x265   : > { %v10090_v18 = vpack.c.bf16 %v1645_v16, %v1644_v28  ;;  %v10126_v16 = vpack.c.bf16 %v1769_v15, %v1768_v14  ;;  %v1756_v14 = vld [vmem:[#allocation17 + $0x40] sm:$0xff]  ;;  %v1757_v15 = vld [vmem:[#allocation17 + $0x48] sm:$0xff] }
 0x317   : > { %v9660_v3 = vpop.f32.mrb[0].mxu0 }
 0x318   : > { %v9661_v5 = vpop.f32.mrb[1].mxu0 }
 0x319   : > { %v9662_v6 = vadd.f32 %v9661_v5, %v9660_v3  ;;  %v1764_v3 = vld [vmem:[#allocation17 + $0x80] sm:$0xff] }
 0x31a   : > { %v1748_v5 = vld [vmem:[#allocation17] sm:$0xff] }
 0x31b   : > { %v1368_v7 = vadd.f32 %v9662_v6, %v9517_v4  ;;  %v9663_v8 = vpop.f32.mrb[2].mxu0 }
 0x31c   : > { %v9664_v9 = vpop.f32.mrb[3].mxu0 }
 0x31d   : > { %v1376_v10 = vmax.f32 %v1368_v7, 0.0  ;;  %v9665_v11 = vadd.f32 %v9664_v9, %v9663_v8  ;;  %v1749_v7 = vld [vmem:[#allocation17 + $0x8] sm:$0xff]  ;;  %v1766_v8 = vld [vmem:[#allocation17 + $0x90] sm:$0xff]  ;;  %v1767_v9 = vld [vmem:[#allocation17 + $0x98] sm:$0xff] }
 0x31f   : > { %1378 = vst [vmem:[#allocation2 + $0x2] sm:$0xff] %v1376_v10  ;;  %v1373_v12 = vadd.f32 %v9665_v11, %v9517_v4  ;;  %1487 = vmatprep.mubr.f32.mxu1 %v1376_v10  ;;  %v1765_v4 = vld [vmem:[#allocation17 + $0x88] sm:$0xff]  ;;  %v10120_v10 = vpack.c.bf16 %v1749_v7, %v1748_v5  ;;  %v10122_v11 = vpack.c.bf16 %v1767_v9, %v1766_v8  ;;  %v1878_v8 = vld [vmem:[#allocation20 + $0x70] sm:$0xff]  ;;  %v1879_v9 = vld [vmem:[#allocation20 + $0x78] sm:$0xff] }
 0x320   : > { %v10118_v6 = vpack.c.bf16 %v1765_v4, %v1764_v3  ;;  %v1874_v3 = vld [vmem:[#allocation20 + $0x50] sm:$0xff]  ;;  %v1875_v4 = vld [vmem:[#allocation20 + $0x58] sm:$0xff]  ;;  %v1876_v5 = vld [vmem:[#allocation20 + $0x60] sm:$0xff] }
 0x321   : > { %v1377_v13 = vmax.f32 %v1373_v12, 0.0  ;;  %v1750_v12 = vld [vmem:[#allocation17 + $0x10] sm:$0xff] }
 0x322   : > { %10119 = vmatprep.subr.bf16.mxu0 %v10118_v6  ;;  %v1877_v6 = vld [vmem:[#allocation20 + $0x68] sm:$0xff] }
 0x323   : > { %1379 = vst [vmem:[#allocation2 + $0xa] sm:$0xff] %v1377_v13  ;;  %10121 = vmatpush3.bf16.msra.mxu0 %v10120_v10  ;;  %v10174_v7 = vpack.c.bf16 %v1877_v6, %v1876_v5  ;;  %v10178_v10 = vpack.c.bf16 %v1879_v9, %v1878_v8 }
 0x324   : > { %10123 = vmatprep.subr.bf16.mxu0 %v10122_v11  ;;  %v1772_v11 = vld [vmem:[#allocation17 + $0xc0] sm:$0xff] }
 0x326   : > { %v1380_v21 = vld [vmem:[#allocation2 + $0x1] sm:$0xff] }
 0x327   : > { %1488 = vmatmul.mubr.f32.vlgmr.msra.gmra.mrb[0].mxu1 %v1380_v21 }
 0x328   : > { %1492 = vmatprep.mubr.f32.mxu1 %v1377_v13  ;;  %10089 = vmatpush3.bf16.msra.mxu1 %v10088_v17  ;;  %v1751_v13 = vld [vmem:[#allocation17 + $0x18] sm:$0xff]  ;;  %v1752_v17 = vld [vmem:[#allocation17 + $0x20] sm:$0xff] }
 0x329   : > { %10091 = vmatprep.subr.bf16.mxu1 %v10090_v18  ;;  %v10124_v28 = vpack.c.bf16 %v1751_v13, %v1750_v12  ;;  %v1753_v18 = vld [vmem:[#allocation17 + $0x28] sm:$0xff] }
 0x32a   : > { %v1381_v23 = vld [vmem:[#allocation2 + $0x9] sm:$0xff]  ;;  %v10128_v21 = vpack.c.bf16 %v1753_v18, %v1752_v17  ;;  %v1773_v12 = vld [vmem:[#allocation17 + $0xc8] sm:$0xff] }
 0x32b   : > { %1493 = vmatmul.mubr.f32.gmra.mrb[2].mxu1 %v1381_v23  ;;  %10125 = vmatpush3.bf16.msra.mxu0 %v10124_v28  ;;  %v1754_v23 = vld [vmem:[#allocation17 + $0x30] sm:$0xff]  ;;  %v10134_v13 = vpack.c.bf16 %v1773_v12, %v1772_v11  ;;  %v10136_v28 = vpack.c.bf16 %v1757_v15, %v1756_v14  ;;  %v1775_v17 = vld [vmem:[#allocation17 + $0xd8] sm:$0xff]  ;;  %v1990_v14 = vld [vmem:[#allocation26 + $0x20] sm:$0xff] }
 0x32c   : > { %10093 = vmatpush3.bf16.msra.mxu1 %v10092_v22  ;;  %10127 = vmatprep.subr.bf16.mxu0 %v10126_v16  ;;  %v10130_v22 = vpack.c.bf16 %v1771_v20, %v1770_v19  ;;  %v10132_v25 = vpack.c.bf16 %v1755_v24, %v1754_v23  ;;  %v1774_v16 = vld [vmem:[#allocation17 + $0xd0] sm:$0xff]  ;;  %v1759_v20 = vld [vmem:[#allocation17 + $0x58] sm:$0xff]  ;;  %v1777_v23 = vld [vmem:[#allocation17 + $0xe8] sm:$0xff] }
 0x32d   : > { %10095 = vmatprep.subr.bf16.mxu1 %v10094_v27  ;;  %v10138_v18 = vpack.c.bf16 %v1775_v17, %v1774_v16  ;;  %v1758_v19 = vld [vmem:[#allocation17 + $0x50] sm:$0xff] }
 0x32e   : > { %v1995_v15 = vld [vmem:[#allocation26 + $0x48] sm:$0xff] }
 0x32f   : > { %10129 = vmatpush3.bf16.msra.mxu0 %v10128_v21  ;;  %v10140_v21 = vpack.c.bf16 %v1759_v20, %v1758_v19  ;;  %v1998_v19 = vld [vmem:[#allocation26 + $0x60] sm:$0xff] }
 0x330   : > { %10097 = vmatpush3.bf16.msra.mxu1 %v10096_v31  ;;  %10131 = vmatprep.subr.bf16.mxu0 %v10130_v22  ;;  %v9519_v31 = vld [vmem:[#allocation10] ss:$0 sm:$0xff]  ;;  %v1776_v22 = vld [vmem:[#allocation17 + $0xe0] sm:$0xff] }
 0x331   : > { %10099 = vmatprep.subr.bf16.mxu1 %v10098_v34  ;;  %v10142_v24 = vpack.c.bf16 %v1777_v23, %v1776_v22  ;;  %v2007_v22 = vld [vmem:[#allocation26 + $0xa8] sm:$0xff] }
 0x333   : > { %10133 = vmatpush3.bf16.msra.mxu0 %v10132_v25  ;;  %v1760_v25 = vld [vmem:[#allocation17 + $0x60] sm:$0xff] }
 0x334   : > { %10101 = vmatpush3.bf16.msra.mxu1 %v10100_v36  ;;  %10135 = vmatprep.subr.bf16.mxu0 %v10134_v13  ;;  %v1986_v13 = vld [vmem:[#allocation26] sm:$0xff] }
 0x335   : > { %10103 = vmatprep.subr.bf16.mxu1 %v10102_v41  ;;  %v10184_v16 = vpack.c.bf16 %v1990_v14, %v1986_v13  ;;  %v2042_v13 = vld [vmem:[#allocation26 + $0x1c0] sm:$0xff] }
 0x337   : > { %v14359_v37 = vpop.f32.mrb[4].mxu0  ;;  %10137 = vmatpush3.bf16.msra.mxu0 %v10136_v28  ;;  %v1999_v28 = vld [vmem:[#allocation26 + $0x68] sm:$0xff] }
 0x338   : > { %v14361_v38 = vpop.f32.mrb[5].mxu0  ;;  %10105 = vmatpush3.bf16.msra.mxu1 %v10104_v44  ;;  %v1595_v44 = vadd.f32 %v14359_v37, %v9519_v31  ;;  %10139 = vmatprep.subr.bf16.mxu0 %v10138_v18  ;;  %v10186_v17 = vpack.c.bf16 %v1999_v28, %v1995_v15  ;;  %v1994_v18 = vld [vmem:[#allocation26 + $0x40] sm:$0xff]  ;;  %v2044_v28 = vld [vmem:[#allocation26 + $0x1d0] sm:$0xff] }
 0x339   : > { %10107 = vmatprep.subr.bf16.mxu1 %v10106_v47  ;;  %v1590_v35 = vadd.f32 %v9519_v31, %v14361_v38  ;;  %v1866_v38 = vld [vmem:[#allocation20 + $0x10] sm:$0xff]  ;;  %v10188_v23 = vpack.c.bf16 %v1998_v19, %v1994_v18  ;;  %v2046_v15 = vld [vmem:[#allocation26 + $0x1e0] sm:$0xff] }
 0x33a   : > { %v1779_v31 = vld [vmem:[#allocation17 + $0xf8] sm:$0xff]  ;;  %v2235_v19 = vld [vmem:[#allocation28 + $0x8] sm:$0xff] }
 0x33b   : > { %10141 = vmatpush3.bf16.msra.mxu0 %v10140_v21  ;;  %v2003_v21 = vld [vmem:[#allocation26 + $0x88] sm:$0xff] }
 0x33c   : > { %10109 = vmatpush3.bf16.msra.mxu1 %v10108_v50  ;;  %10143 = vmatprep.subr.bf16.mxu0 %v10142_v24  ;;  %v10190_v24 = vpack.c.bf16 %v2007_v22, %v2003_v21  ;;  %v2237_v21 = vld [vmem:[#allocation28 + $0x18] sm:$0xff] }
 0x33d   : > { %10111 = vmatprep.subr.bf16.mxu1 %v10110_v53  ;;  %v1867_v53 = vld [vmem:[#allocation20 + $0x18] sm:$0xff] }
 0x33e   : > { %v10154_v54 = vpack.c.bf16 %v1867_v53, %v1866_v38  ;;  %v2009_v38 = vld [vmem:[#allocation26 + $0xb8] sm:$0xff] }
 0x340   : > { %10113 = vmatpush3.bf16.msra.mxu1 %v10112_v56  ;;  %v1868_v56 = vld [vmem:[#allocation20 + $0x20] sm:$0xff] }
 0x341   : > { %10115 = vmatprep.subr.bf16.mxu1 %v10114_v59  ;;  %v10158_v37 = vpack.c.bf16 %v1869_v57, %v1868_v56  ;;  %v1870_v59 = vld [vmem:[#allocation20 + $0x30] sm:$0xff]  ;;  %v2013_v56 = vld [vmem:[#allocation26 + $0xd8] sm:$0xff] }
 0x342   : > { %v10162_v61 = vpack.c.bf16 %v1871_v60, %v1870_v59  ;;  %v2012_v59 = vld [vmem:[#allocation26 + $0xd0] sm:$0xff] }
 0x343   : > { %v2016_v60 = vld [vmem:[#allocation26 + $0xf0] sm:$0xff] }
 0x344   : > { %10117 = vmatpush3.bf16.msra.mxu1 %v10116_v62  ;;  %v1872_v62 = vld [vmem:[#allocation20 + $0x40] sm:$0xff] }
 0x345   : > { %10151 = vmatprep.subr.bf16.mxu1 %v14363_v2  ;;  %v10166_v1 = vpack.c.bf16 %v1873_v63, %v1872_v62  ;;  %v2025_v62 = vld [vmem:[#allocation26 + $0x138] sm:$0xff]  ;;  %v10228_v63 = vpack.c.bf16 %v2016_v60, %v2012_v59  ;;  %v2035_v59 = vld [vmem:[#allocation26 + $0x188] sm:$0xff] }
 0x346   : > { %v2039_v60 = vld [vmem:[#allocation26 + $0x1a8] sm:$0xff] }
 0x3fa   : > { %v9698_v27 = vpop.f32.mrb[0].mxu1 }
 0x3fb   : > { %v9699_v30 = vpop.f32.mrb[1].mxu1 }
 0x3fc   : > { %v9700_v32 = vadd.f32 %v9699_v30, %v9698_v27  ;;  %v1761_v27 = vld [vmem:[#allocation17 + $0x68] sm:$0xff]  ;;  %v1778_v30 = vld [vmem:[#allocation17 + $0xf0] sm:$0xff] }
 0x3fe   : > { %v1490_v33 = vadd.f32 %v9700_v32, %v9518_v29  ;;  %v9701_v34 = vpop.f32.mrb[2].mxu1  ;;  %v10146_v32 = vpack.c.bf16 %v1779_v31, %v1778_v30  ;;  %v2011_v30 = vld [vmem:[#allocation26 + $0xc8] sm:$0xff] }
 0x3ff   : > { %v9702_v26 = vpop.f32.mrb[3].mxu1  ;;  %v2015_v31 = vld [vmem:[#allocation26 + $0xe8] sm:$0xff] }
 0x400   : > { %v1498_v36 = vmax.f32 %v1490_v33, 0.0  ;;  %v9703_v39 = vadd.f32 %v9702_v26, %v9701_v34  ;;  %v1762_v33 = vld [vmem:[#allocation17 + $0x70] sm:$0xff]  ;;  %v1763_v34 = vld [vmem:[#allocation17 + $0x78] sm:$0xff] }
 0x401   : > { %v1987_v26 = vld [vmem:[#allocation26 + $0x8] sm:$0xff] }
 0x402   : > { %v1598_v41 = vadd.f32 %v1590_v35, %v1498_v36  ;;  %v1495_v42 = vadd.f32 %v9703_v39, %v9518_v29  ;;  %v10144_v29 = vpack.c.bf16 %v1761_v27, %v1760_v25  ;;  %v10148_v35 = vpack.c.bf16 %v1763_v34, %v1762_v33  ;;  %v1991_v36 = vld [vmem:[#allocation26 + $0x28] sm:$0xff]  ;;  %v1989_v39 = vld [vmem:[#allocation26 + $0x18] sm:$0xff]  ;;  %v2002_v25 = vld [vmem:[#allocation26 + $0x80] sm:$0xff] }
 0x403   : > { %v2006_v27 = vld [vmem:[#allocation26 + $0xa0] sm:$0xff]  ;;  %v10194_v33 = vpack.c.bf16 %v2015_v31, %v2011_v30  ;;  %v9524_v31 = vld [vmem:[#allocation22] ss:$0 sm:$0xff] }
 0x404   : > { %v1607_v45 = vmul.f32 %v9520_v40, %v1598_v41  ;;  %v1499_v46 = vmax.f32 %v1495_v42, 0.0  ;;  %10145 = vmatpush3.bf16.msra.mxu0 %v10144_v29  ;;  %v1993_v41 = vld [vmem:[#allocation26 + $0x38] sm:$0xff]  ;;  %v2010_v34 = vld [vmem:[#allocation26 + $0xc0] sm:$0xff] }
 0x405   : > { %10147 = vmatprep.subr.bf16.mxu0 %v10146_v32  ;;  %v10214_v42 = vpack.c.bf16 %v1993_v41, %v1989_v39  ;;  %v10192_v32 = vpack.c.bf16 %v2006_v27, %v2002_v25  ;;  %v9523_v27 = vld [vmem:[#allocation19] ss:$0 sm:$0xff] }
 0x406   : > { %v1616_v47 = vadd.f32 %v9521_v43, %v1607_v45  ;;  %v1599_v48 = vadd.f32 %v1595_v44, %v1499_v46  ;;  %v1992_v44 = vld [vmem:[#allocation26 + $0x30] sm:$0xff]  ;;  %v1997_v46 = vld [vmem:[#allocation26 + $0x58] sm:$0xff] }
 0x408   : > { %v1618_v49 = vmax.f32 %v1616_v47, 0.0  ;;  %v1608_v50 = vmul.f32 %v9520_v40, %v1599_v48  ;;  %10149 = vmatpush3.bf16.msra.mxu0 %v10148_v35  ;;  %v10182_v40 = vpack.c.bf16 %v1991_v36, %v1987_v26  ;;  %v2001_v47 = vld [vmem:[#allocation26 + $0x78] sm:$0xff]  ;;  %v2014_v35 = vld [vmem:[#allocation26 + $0xe0] sm:$0xff]  ;;  %v2019_v26 = vld [vmem:[#allocation26 + $0x108] sm:$0xff] }
 0x409   : > { %v10218_v48 = vpack.c.bf16 %v2001_v47, %v1997_v46  ;;  %v2023_v36 = vld [vmem:[#allocation26 + $0x128] sm:$0xff]  ;;  %v10196_v39 = vpack.c.bf16 %v2014_v35, %v2010_v34  ;;  %v2024_v47 = vld [vmem:[#allocation26 + $0x130] sm:$0xff] }
 0x40a   : > { %1620 = vst [vmem:[#allocation2 + $0x2] sm:$0xff] %v1618_v49  ;;  %v1617_v51 = vadd.f32 %v9521_v43, %v1608_v50  ;;  %1729 = vmatprep.mubr.f32.mxu1 %v1618_v49  ;;  %v1988_v43 = vld [vmem:[#allocation26 + $0x10] sm:$0xff]  ;;  %10183 = vmatprep.subr.bf16.mxu0 %v10182_v40  ;;  %v10198_v40 = vpack.c.bf16 %v2023_v36, %v2019_v26 }
 0x40b   : > { %v10216_v45 = vpack.c.bf16 %v1992_v44, %v1988_v43  ;;  %v2000_v50 = vld [vmem:[#allocation26 + $0x70] sm:$0xff]  ;;  %v2018_v43 = vld [vmem:[#allocation26 + $0x100] sm:$0xff] }
 0x40c   : > { %v1619_v52 = vmax.f32 %v1617_v51, 0.0  ;;  %v2022_v44 = vld [vmem:[#allocation26 + $0x120] sm:$0xff] }
 0x40d   : > { %v10200_v46 = vpack.c.bf16 %v2022_v44, %v2018_v43  ;;  %v9526_v44 = vld [vmem:[#allocation25] ss:$0 sm:$0xff] }
 0x40e   : > { %1621 = vst [vmem:[#allocation2 + $0xa] sm:$0xff] %v1619_v52 }
 0x411   : > { %v1622_v55 = vld [vmem:[#allocation2] sm:$0xff] }
 0x412   : > { %1730 = vmatmul.mubr.f32.vlgmr.msra.gmra.mrb[4].mxu1 %v1622_v55  ;;  %v2008_v55 = vld [vmem:[#allocation26 + $0xb0] sm:$0xff] }
 0x413   : > { %10153 = vmatpush3.bf16.msra.mxu1 %v14363_v2  ;;  %1734 = vmatprep.mubr.f32.mxu1 %v1619_v52  ;;  %v10170_v2 = vpack.c.bf16 %v1875_v4, %v1874_v3  ;;  %v9522_v4 = vld [vmem:[#allocation16] ss:$0 sm:$0xff] }
 0x414   : > { %10155 = vmatprep.subr.bf16.mxu1 %v10154_v54 }
 0x415   : > { %v1623_v58 = vld [vmem:[#allocation2 + $0x8] sm:$0xff] }
 0x416   : > { %1735 = vmatmul.mubr.f32.gmra.mrb[6].mxu1 %v1623_v58 }
 0x417   : > { %10157 = vmatpush3.bf16.msra.mxu1 %v10154_v54  ;;  %9917 = vmatprep.mubr.f32.mxu1 %v1618_v49  ;;  %v1996_v49 = vld [vmem:[#allocation26 + $0x50] sm:$0xff] }
 0x418   : > { %10159 = vmatprep.subr.bf16.mxu1 %v10158_v37  ;;  %v10220_v51 = vpack.c.bf16 %v2000_v50, %v1996_v49  ;;  %v2004_v54 = vld [vmem:[#allocation26 + $0x90] sm:$0xff]  ;;  %v2027_v49 = vld [vmem:[#allocation26 + $0x148] sm:$0xff] }
 0x419   : > { %v10224_v57 = vpack.c.bf16 %v2008_v55, %v2004_v54  ;;  %v2031_v50 = vld [vmem:[#allocation26 + $0x168] sm:$0xff]  ;;  %v2030_v54 = vld [vmem:[#allocation26 + $0x160] sm:$0xff] }
 0x41b   : > { %10161 = vmatpush3.bf16.msra.mxu1 %v10158_v37  ;;  %v2017_v37 = vld [vmem:[#allocation26 + $0xf8] sm:$0xff] }
 0x41c   : > { %10163 = vmatprep.subr.bf16.mxu1 %v10162_v61  ;;  %v10226_v58 = vpack.c.bf16 %v2017_v37, %v2013_v56  ;;  %v2032_v37 = vld [vmem:[#allocation26 + $0x170] sm:$0xff] }
 0x41f   : > { %10165 = vmatpush3.bf16.msra.mxu1 %v10162_v61  ;;  %v2021_v61 = vld [vmem:[#allocation26 + $0x118] sm:$0xff] }
 0x420   : > { %10167 = vmatprep.subr.bf16.mxu1 %v10166_v1 }
 0x423   : > { %10169 = vmatpush3.bf16.msra.mxu1 %v10166_v1  ;;  %v10230_v1 = vpack.c.bf16 %v2025_v62, %v2021_v61  ;;  %v2037_v61 = vld [vmem:[#allocation26 + $0x198] sm:$0xff]  ;;  %v10206_v62 = vpack.c.bf16 %v2039_v60, %v2035_v59 }
 0x424   : > { %10171 = vmatprep.subr.bf16.mxu1 %v10170_v2 }
 0x427   : > { %10173 = vmatpush3.bf16.msra.mxu1 %v10170_v2 }
 0x428   : > { %10175 = vmatprep.subr.bf16.mxu1 %v10174_v7 }
 0x42b   : > { %10177 = vmatpush3.bf16.msra.mxu1 %v10174_v7 }
 0x42c   : > { %10179 = vmatprep.subr.bf16.mxu1 %v10178_v10 }
 0x42f   : > { %10181 = vmatpush3.bf16.msra.mxu1 %v10178_v10 }
 0x430   : > { %10215 = vmatprep.subr.bf16.mxu1 %v10214_v42 }
 0x432   : > { %9918 = vmatmul.mubr.f32.vlgmr.msra.gmra.mrb[8].mxu1 %v1619_v52  ;;  %v2005_v52 = vld [vmem:[#allocation26 + $0x98] sm:$0xff] }
 0x433   : > { %2213 = vmatprep.mubr.f32.mxu1 %v13791_v0  ;;  %10217 = vmatpush1.bf16.msra.mxu1 %v10216_v45  ;;  %v10222_v53 = vpack.c.bf16 %v2009_v38, %v2005_v52  ;;  %v2020_v45 = vld [vmem:[#allocation26 + $0x110] sm:$0xff]  ;;  %v10202_v52 = vpack.c.bf16 %v2031_v50, %v2027_v49  ;;  %v2033_v38 = vld [vmem:[#allocation26 + $0x178] sm:$0xff]  ;;  %v2238_v49 = vld [vmem:[#allocation28 + $0x20] sm:$0xff] }
 0x434   : > { %10219 = vmatprep.subr.bf16.mxu1 %v10218_v48  ;;  %v10232_v48 = vpack.c.bf16 %v2024_v47, %v2020_v45  ;;  %v2234_v45 = vld [vmem:[#allocation28] sm:$0xff]  ;;  %v2236_v50 = vld [vmem:[#allocation28 + $0x10] sm:$0xff] }
 0x437   : > { %10221 = vmatpush1.bf16.msra.mxu1 %v10220_v51  ;;  %v2029_v51 = vld [vmem:[#allocation26 + $0x158] sm:$0xff] }
 0x438   : > { %10223 = vmatprep.subr.bf16.mxu1 %v10222_v53  ;;  %v2026_v53 = vld [vmem:[#allocation26 + $0x140] sm:$0xff]  ;;  %v10234_v55 = vpack.c.bf16 %v2033_v38, %v2029_v51  ;;  %v2240_v51 = vld [vmem:[#allocation28 + $0x30] sm:$0xff] }
 0x439   : > { %v10204_v56 = vpack.c.bf16 %v2030_v54, %v2026_v53  ;;  %v2247_v54 = vld [vmem:[#allocation28 + $0x68] sm:$0xff] }
 0x43b   : > { %10225 = vmatpush1.bf16.msra.mxu1 %v10224_v57  ;;  %v2028_v57 = vld [vmem:[#allocation26 + $0x150] sm:$0xff] }
 0x43c   : > { %10227 = vmatprep.subr.bf16.mxu1 %v10226_v58  ;;  %v10236_v58 = vpack.c.bf16 %v2032_v37, %v2028_v57  ;;  %v14386_v57 = vpack.c.bf16 %v2240_v51, %v2236_v50  ;;  %v2242_v37 = vld [vmem:[#allocation28 + $0x40] sm:$0xff] }
 0x43d   : > { %v2274_v51 = vld [vmem:[#allocation28 + $0x140] sm:$0xff] }
 0x43f   : > { %10229 = vmatpush1.bf16.msra.mxu1 %v10228_v63  ;;  %v2041_v63 = vld [vmem:[#allocation26 + $0x1b8] sm:$0xff] }
 0x440   : > { %10231 = vmatprep.subr.bf16.mxu1 %v10230_v1  ;;  %v2034_v1 = vld [vmem:[#allocation26 + $0x180] sm:$0xff] }
 0x443   : > { %10233 = vmatpush1.bf16.msra.mxu1 %v10232_v48 }
 0x444   : > { %10235 = vmatprep.subr.bf16.mxu1 %v10234_v55  ;;  %v2245_v55 = vld [vmem:[#allocation28 + $0x58] sm:$0xff] }
 0x447   : > { %10237 = vmatpush1.bf16.msra.mxu1 %v10236_v58  ;;  %v2246_v58 = vld [vmem:[#allocation28 + $0x60] sm:$0xff] }
 0x4e5   : > { %v9754_v3 = vpop.f32.mrb[4].mxu1 }
 0x4e6   : > { %v9755_v2 = vpop.f32.mrb[5].mxu1 }
 0x4e7   : > { %v9756_v5 = vadd.f32 %v9755_v2, %v9754_v3  ;;  %v2038_v3 = vld [vmem:[#allocation26 + $0x1a0] sm:$0xff] }
 0x4e8   : > { %v10208_v2 = vpack.c.bf16 %v2038_v3, %v2034_v1  ;;  %v2255_v3 = vld [vmem:[#allocation28 + $0xa8] sm:$0xff] }
 0x4e9   : > { %v1732_v6 = vadd.f32 %v9756_v5, %v9522_v4  ;;  %v9757_v7 = vpop.f32.mrb[6].mxu1  ;;  %v2036_v5 = vld [vmem:[#allocation26 + $0x190] sm:$0xff] }
 0x4ea   : > { %v9758_v8 = vpop.f32.mrb[7].mxu1 }
 0x4eb   : > { %v1740_v9 = vmax.f32 %v1732_v6, 0.0  ;;  %v9759_v10 = vadd.f32 %v9758_v8, %v9757_v7  ;;  %v2040_v6 = vld [vmem:[#allocation26 + $0x1b0] sm:$0xff]  ;;  %v2043_v8 = vld [vmem:[#allocation26 + $0x1c8] sm:$0xff] }
 0x4ec   : > { %v10240_v7 = vpack.c.bf16 %v2040_v6, %v2036_v5  ;;  %v14394_v6 = vpack.c.bf16 %v2246_v58, %v2242_v37  ;;  %v2287_v37 = vld [vmem:[#allocation28 + $0x1a8] sm:$0xff]  ;;  %v2285_v58 = vld [vmem:[#allocation28 + $0x198] sm:$0xff] }
 0x4ed   : > { %1742 = vst [vmem:[#allocation2 + $0x2] sm:$0xff] %v1740_v9  ;;  %v1737_v11 = vadd.f32 %v9759_v10, %v9522_v4  ;;  %1851 = vmatprep.mubr.f32.mxu0 %v1740_v9  ;;  %v10238_v4 = vpack.c.bf16 %v2041_v63, %v2037_v61  ;;  %v2047_v9 = vld [vmem:[#allocation26 + $0x1e8] sm:$0xff]  ;;  %v2045_v10 = vld [vmem:[#allocation26 + $0x1d8] sm:$0xff]  ;;  %v2248_v61 = vld [vmem:[#allocation28 + $0x70] sm:$0xff] }
 0x4ef   : > { %v1741_v12 = vmax.f32 %v1737_v11, 0.0  ;;  %10239 = vmatprep.subr.bf16.mxu1 %v10238_v4  ;;  %v10210_v11 = vpack.c.bf16 %v2047_v9, %v2043_v8  ;;  %v2253_v4 = vld [vmem:[#allocation28 + $0x98] sm:$0xff]  ;;  %v2250_v8 = vld [vmem:[#allocation28 + $0x80] sm:$0xff] }
 0x4f0   : > { %10241 = vmatpush1.bf16.msra.mxu1 %v10240_v7  ;;  %v2254_v9 = vld [vmem:[#allocation28 + $0xa0] sm:$0xff] }
 0x4f1   : > { %1743 = vst [vmem:[#allocation2 + $0xa] sm:$0xff] %v1741_v12 }
 0x4f4   : > { %v1744_v20 = vld [vmem:[#allocation2] sm:$0xff] }
 0x4f5   : > { %1852 = vmatmul.mubr.f32.vlgmr.msra.gmra.mrb[6].mxu0 %v1744_v20  ;;  %v2239_v20 = vld [vmem:[#allocation28 + $0x28] sm:$0xff] }
 0x4f6   : > { %1856 = vmatprep.mubr.f32.mxu0 %v1741_v12  ;;  %10185 = vmatpush1.bf16.msra.mxu0 %v10184_v16  ;;  %v2049_v12 = vld [vmem:[#allocation26 + $0x1f8] sm:$0xff]  ;;  %v2048_v16 = vld [vmem:[#allocation26 + $0x1f0] sm:$0xff]  ;;  %v14376_v22 = vpack.c.bf16 %v2239_v20, %v2235_v19  ;;  %v2258_v20 = vld [vmem:[#allocation28 + $0xc0] sm:$0xff] }
 0x4f7   : > { %10187 = vmatprep.subr.bf16.mxu0 %v10186_v17  ;;  %v10242_v14 = vpack.c.bf16 %v2049_v12, %v2045_v10  ;;  %v10212_v17 = vpack.c.bf16 %v2046_v15, %v2042_v13  ;;  %v10244_v18 = vpack.c.bf16 %v2048_v16, %v2044_v28  ;;  %v2252_v13 = vld [vmem:[#allocation28 + $0x90] sm:$0xff]  ;;  %v2259_v15 = vld [vmem:[#allocation28 + $0xc8] sm:$0xff]  ;;  %v2261_v16 = vld [vmem:[#allocation28 + $0xd8] sm:$0xff] }
 0x4f8   : > { %v1745_v29 = vld [vmem:[#allocation2 + $0x8] sm:$0xff]  ;;  %v2263_v28 = vld [vmem:[#allocation28 + $0xe8] sm:$0xff] }
 0x4f9   : > { %1857 = vmatmul.mubr.f32.gmra.mrb[8].mxu0 %v1745_v29  ;;  %10243 = vmatprep.subr.bf16.mxu1 %v10242_v14  ;;  %v2256_v14 = vld [vmem:[#allocation28 + $0xb0] sm:$0xff] }
 0x4fa   : > { %10189 = vmatpush1.bf16.msra.mxu0 %v10188_v23  ;;  %2136 = vmatprep.mubr.f32.mxu0 %v13791_v0  ;;  %v2241_v23 = vld [vmem:[#allocation28 + $0x38] sm:$0xff]  ;;  %v14410_v19 = vpack.c.bf16 %v2256_v14, %v2252_v13 }
 0x4fb   : > { %10191 = vmatprep.subr.bf16.mxu0 %v10190_v24  ;;  %10245 = vmatpush1.bf16.msra.mxu1 %v10244_v18  ;;  %v14378_v24 = vpack.c.bf16 %v2241_v23, %v2237_v21  ;;  %v14408_v18 = vpack.c.bf16 %v2254_v9, %v2250_v8  ;;  %v2262_v21 = vld [vmem:[#allocation28 + $0xe0] sm:$0xff]  ;;  %v14414_v23 = vpack.c.bf16 %v2263_v28, %v2259_v15  ;;  %v2288_v8 = vld [vmem:[#allocation28 + $0x1b0] sm:$0xff]  ;;  %v2291_v9 = vld [vmem:[#allocation28 + $0x1c8] sm:$0xff] }
 0x4fc   : > { %v2293_v13 = vld [vmem:[#allocation28 + $0x1d8] sm:$0xff] }
 0x4fd   : > { %10279 = vmatprep.subr.bf16.mxu1 %v14378_v24  ;;  %v2297_v14 = vld [vmem:[#allocation28 + $0x1f8] sm:$0xff] }
 0x4fe   : > { %10193 = vmatpush1.bf16.msra.mxu0 %v10192_v32 }
 0x4ff   : > { %10195 = vmatprep.subr.bf16.mxu0 %v10194_v33 }
 0x502   : > { %10197 = vmatpush1.bf16.msra.mxu0 %v10196_v39  ;;  %v9525_v39 = vld [vmem:[#allocation23] ss:$0 sm:$0xff] }
 0x503   : > { %10199 = vmatprep.subr.bf16.mxu0 %v10198_v40 }
 0x505   : > { %v14372_v41 = vpop.f32.mrb[8].mxu1 }
 0x506   : > { %v14374_v42 = vpop.f32.mrb[9].mxu1  ;;  %10201 = vmatpush1.bf16.msra.mxu0 %v10200_v46  ;;  %v1959_v46 = vadd.f32 %v14372_v41, %v9524_v31  ;;  %v2244_v41 = vld [vmem:[#allocation28 + $0x50] sm:$0xff] }
 0x507   : > { %10203 = vmatprep.subr.bf16.mxu0 %v10202_v52  ;;  %v1954_v35 = vadd.f32 %v9524_v31, %v14374_v42  ;;  %v2243_v52 = vld [vmem:[#allocation28 + $0x48] sm:$0xff]  ;;  %v2249_v42 = vld [vmem:[#allocation28 + $0x78] sm:$0xff]  ;;  %v14396_v7 = vpack.c.bf16 %v2248_v61, %v2244_v41 }
 0x508   : > { %v14388_v63 = vpack.c.bf16 %v2247_v54, %v2243_v52  ;;  %v14390_v1 = vpack.c.bf16 %v2249_v42, %v2245_v55  ;;  %v2271_v31 = vld [vmem:[#allocation28 + $0x128] sm:$0xff]  ;;  %v2278_v52 = vld [vmem:[#allocation28 + $0x160] sm:$0xff]  ;;  %v2276_v54 = vld [vmem:[#allocation28 + $0x150] sm:$0xff] }
 0x509   : > { %v2280_v55 = vld [vmem:[#allocation28 + $0x170] sm:$0xff]  ;;  %v2283_v42 = vld [vmem:[#allocation28 + $0x188] sm:$0xff]  ;;  %v14446_v41 = vpack.c.bf16 %v2278_v52, %v2274_v51 }
 0x50a   : > { %10205 = vmatpush1.bf16.msra.mxu0 %v10204_v56  ;;  %v14384_v56 = vpack.c.bf16 %v2238_v49, %v2234_v45  ;;  %v2275_v45 = vld [vmem:[#allocation28 + $0x148] sm:$0xff]  ;;  %v14448_v61 = vpack.c.bf16 %v2280_v55, %v2276_v54 }
 0x50b   : > { %10207 = vmatprep.subr.bf16.mxu0 %v10206_v62  ;;  %v2251_v62 = vld [vmem:[#allocation28 + $0x88] sm:$0xff] }
 0x50e   : > { %10209 = vmatpush1.bf16.msra.mxu0 %v10208_v2  ;;  %v2257_v2 = vld [vmem:[#allocation28 + $0xb8] sm:$0xff] }
 0x50f   : > { %10211 = vmatprep.subr.bf16.mxu0 %v10210_v11  ;;  %v14400_v11 = vpack.c.bf16 %v2255_v3, %v2251_v62  ;;  %v14402_v12 = vpack.c.bf16 %v2257_v2, %v2253_v4  ;;  %v2282_v62 = vld [vmem:[#allocation28 + $0x180] sm:$0xff]  ;;  %v14452_v4 = vpack.c.bf16 %v2287_v37, %v2283_v42 }
 0x510   : > { %v2286_v3 = vld [vmem:[#allocation28 + $0x1a0] sm:$0xff] }
 0x511   : > { %v14461_v28 = vpack.c.bf16 %v2286_v3, %v2282_v62 }
 0x512   : > { %10213 = vmatpush1.bf16.msra.mxu0 %v10212_v17  ;;  %v2265_v17 = vld [vmem:[#allocation28 + $0xf8] sm:$0xff] }
 0x513   : > { %10247 = vmatprep.subr.bf16.mxu0 %v14376_v22 }
 0x5c8   : > { %v9792_v25 = vpop.f32.mrb[6].mxu0 }
 0x5c9   : > { %v9793_v29 = vpop.f32.mrb[7].mxu0 }
 0x5ca   : > { %v9794_v30 = vadd.f32 %v9793_v29, %v9792_v25  ;;  %v14416_v25 = vpack.c.bf16 %v2265_v17, %v2261_v16  ;;  %v2264_v29 = vld [vmem:[#allocation28 + $0xf0] sm:$0xff]  ;;  %v2290_v17 = vld [vmem:[#allocation28 + $0x1c0] sm:$0xff] }
 0x5cc   : > { %v1854_v32 = vadd.f32 %v9794_v30, %v9523_v27  ;;  %v9795_v33 = vpop.f32.mrb[8].mxu0  ;;  %v2267_v30 = vld [vmem:[#allocation28 + $0x108] sm:$0xff] }
 0x5cd   : > { %v9796_v34 = vpop.f32.mrb[9].mxu0 }
 0x5ce   : > { %v1862_v26 = vmax.f32 %v1854_v32, 0.0  ;;  %v9797_v36 = vadd.f32 %v9796_v34, %v9795_v33  ;;  %v2269_v32 = vld [vmem:[#allocation28 + $0x118] sm:$0xff]  ;;  %v14422_v34 = vpack.c.bf16 %v2262_v21, %v2258_v20  ;;  %v14469_v21 = vpack.c.bf16 %v2297_v14, %v2293_v13 }
 0x5cf   : > { %v2273_v33 = vld [vmem:[#allocation28 + $0x138] sm:$0xff] }
 0x5d0   : > { %v1962_v40 = vadd.f32 %v1954_v35, %v1862_v26  ;;  %v1859_v43 = vadd.f32 %v9797_v36, %v9523_v27  ;;  %v2260_v27 = vld [vmem:[#allocation28 + $0xd0] sm:$0xff]  ;;  %v2266_v26 = vld [vmem:[#allocation28 + $0x100] sm:$0xff] }
 0x5d1   : > { %v14424_v35 = vpack.c.bf16 %v2264_v29, %v2260_v27  ;;  %v2270_v36 = vld [vmem:[#allocation28 + $0x120] sm:$0xff]  ;;  %v2292_v29 = vld [vmem:[#allocation28 + $0x1d0] sm:$0xff] }
 0x5d2   : > { %v1971_v47 = vmul.f32 %v9525_v39, %v1962_v40  ;;  %v1863_v48 = vmax.f32 %v1859_v43, 0.0  ;;  %v14430_v40 = vpack.c.bf16 %v2273_v33, %v2269_v32  ;;  %v2268_v43 = vld [vmem:[#allocation28 + $0x110] sm:$0xff]  ;;  %v14434_v49 = vpack.c.bf16 %v2270_v36, %v2266_v26  ;;  %v2294_v27 = vld [vmem:[#allocation28 + $0x1e0] sm:$0xff]  ;;  %v1984_v26 = vld [vmem:[%s14474_s22] sm:$0x3] }
 0x5d3   : > { %v14481_v32 = vpack.c.bf16 %v2294_v27, %v2290_v17  ;;  %v2298_v17 = vld [vmem:[%s16172_s16] sm:$0xf] }
 0x5d4   : > { %v1980_v38 = vadd.f32 %v9526_v44, %v1971_v47  ;;  %v1963_v53 = vadd.f32 %v1959_v46, %v1863_v48  ;;  %v2279_v46 = vld [vmem:[#allocation28 + $0x168] sm:$0xff]  ;;  %v2277_v47 = vld [vmem:[#allocation28 + $0x158] sm:$0xff] }
 0x5d5   : > { %v2281_v48 = vld [vmem:[#allocation28 + $0x178] sm:$0xff] }
 0x5d6   : > { %v1982_v59 = vmax.f32 %v1980_v38, 0.0  ;;  %v1972_v60 = vmul.f32 %v9525_v39, %v1963_v53  ;;  %v14428_v39 = vpack.c.bf16 %v2271_v31, %v2267_v30  ;;  %v14440_v38 = vpack.c.bf16 %v2279_v46, %v2275_v45  ;;  %v2296_v30 = vld [vmem:[#allocation28 + $0x1f0] sm:$0xff]  ;;  %v2050_v45 = vld [vmem:[%s16171_s11] sm:$0xf] }
 0x5d7   : > { %v14442_v53 = vpack.c.bf16 %v2281_v48, %v2277_v47  ;;  %v14483_v33 = vpack.c.bf16 %v2296_v30, %v2292_v29 }
 0x5d8   : > { %2137 = vmatmul.mubr.f32.vlgmr.msra.gmra.mrb[10].mxu0 %v1982_v59  ;;  %2214 = vmatmul.mubr.f32.vlgmr.msra.gmra.mrb[10].mxu1 %v1982_v59  ;;  %v1981_v5 = vadd.f32 %v9526_v44, %v1972_v60  ;;  %v2272_v44 = vld [vmem:[#allocation28 + $0x130] sm:$0xff]  ;;  %v2289_v59 = vld [vmem:[#allocation28 + $0x1b8] sm:$0xff]  ;;  %v2052_v60 = vlaneseq }
 0x5d9   : > { %10249 = vmatpush1.bf16.msra.mxu0 %v14384_v56  ;;  %10281 = vmatpush1.bf16.msra.mxu1 %v14386_v57  ;;  %v14436_v50 = vpack.c.bf16 %v2272_v44, %v2268_v43  ;;  %v14454_v2 = vpack.c.bf16 %v2289_v59, %v2285_v58 }
 0x5da   : > { %2142 = vmatprep.mubr.f32.mxu0 %v13791_v0  ;;  %2219 = vmatprep.mubr.f32.mxu1 %v13791_v0  ;;  %v1983_v10 = vmax.f32 %v1981_v5, 0.0  ;;  %v2284_v5 = vld [vmem:[#allocation28 + $0x190] sm:$0xff]  ;;  %v14457_v15 = vshrl.u32 %v2052_v60, 7 }
 0x5db   : > { %10251 = vmatprep.subr.bf16.mxu0 %v14388_v63  ;;  %10283 = vmatprep.subr.bf16.mxu1 %v14390_v1  ;;  %v14463_v16 = vpack.c.bf16 %v2288_v8, %v2284_v5 }
 0x5dc   : > { %2143 = vmatmul.mubr.f32.gmra.mrb[12].mxu0 %v1983_v10  ;;  %2220 = vmatmul.mubr.f32.gmra.mrb[12].mxu1 %v1983_v10  ;;  %v2295_v10 = vld [vmem:[#allocation28 + $0x1e8] sm:$0xff]  ;;  %v14477_v31 = vsub.s32 0, %v14457_v15  ;;  %v14528_v43 = vsub.s32 2, %v14457_v15  ;;  %v14531_v44 = vsub.s32 1, %v14457_v15  ;;  %v14535_v46 = vsub.s32 3, %v14457_v15 }
 0x5dd   : > { %10253 = vmatpush1.bf16.msra.mxu0 %v14394_v6  ;;  %10285 = vmatpush1.bf16.msra.mxu1 %v14396_v7  ;;  %v14467_v20 = vpack.c.bf16 %v2295_v10, %v2291_v9 }
 0x5de   : > { %10255 = vmatprep.subr.bf16.mxu0 %v14400_v11  ;;  %10287 = vmatprep.subr.bf16.mxu1 %v14402_v12  ;;  %v2302_v36 = vrot.slane %v1984_v26, %v14477_v31  ;;  %v2055_v47 = vrot.slane %v2050_v45, %v14477_v31  ;;  %v2063_v48 = vrot.slane %v2050_v45, %v14528_v43 }
 0x5df   : > { %2372 = vmatprep.mubr.f32.mxu0 %v13791_v0  ;;  %2443 = vmatprep.mubr.f32.mxu1 %v13791_v0  ;;  %v2059_v51 = vrot.slane %v2050_v45, %v14531_v44  ;;  %v2067_v52 = vrot.slane %v2050_v45, %v14535_v46  ;;  %v14544_v30 = vrot.slane %v2298_v17, %v14477_v31 }
 0x5e1   : > { %10257 = vmatpush1.bf16.msra.mxu0 %v14408_v18  ;;  %10289 = vmatpush1.bf16.msra.mxu1 %v14410_v19 }
 0x5e2   : > { %10259 = vmatprep.subr.bf16.mxu0 %v14414_v23  ;;  %10291 = vmatprep.subr.bf16.mxu1 %v14416_v25 }
 0x5e5   : > { %10261 = vmatpush1.bf16.msra.mxu0 %v14422_v34  ;;  %10293 = vmatpush1.bf16.msra.mxu1 %v14424_v35 }
 0x5e6   : > { %10263 = vmatprep.subr.bf16.mxu0 %v14428_v39  ;;  %10295 = vmatprep.subr.bf16.mxu1 %v14430_v40 }
 0x5e9   : > { %10265 = vmatpush1.bf16.msra.mxu0 %v14434_v49  ;;  %10297 = vmatpush1.bf16.msra.mxu1 %v14436_v50 }
 0x5ea   : > { %10267 = vmatprep.subr.bf16.mxu0 %v14440_v38  ;;  %10299 = vmatprep.subr.bf16.mxu1 %v14442_v53 }
 0x5ed   : > { %10269 = vmatpush1.bf16.msra.mxu0 %v14446_v41  ;;  %10301 = vmatpush1.bf16.msra.mxu1 %v14448_v61 }
 0x5ee   : > { %10271 = vmatprep.subr.bf16.mxu0 %v14452_v4  ;;  %10303 = vmatprep.subr.bf16.mxu1 %v14454_v2 }
 0x5f1   : > { %10273 = vmatpush1.bf16.msra.mxu0 %v14461_v28  ;;  %10305 = vmatpush1.bf16.msra.mxu1 %v14463_v16 }
 0x5f2   : > { %10275 = vmatprep.subr.bf16.mxu0 %v14467_v20  ;;  %10307 = vmatprep.subr.bf16.mxu1 %v14469_v21 }
 0x5f5   : > { %10277 = vmatpush1.bf16.msra.mxu0 %v14481_v32  ;;  %10309 = vmatpush1.bf16.msra.mxu1 %v14483_v33 }
 0x5f6   : > { %10311 = vmatprep.subr.bf16.mxu0 %v14376_v22  ;;  %10343 = vmatprep.subr.bf16.mxu1 %v14378_v24 }
 0x5f8   : > { %2373 = vmatmul.mubr.f32.vlgmr.msra.gmra.mrb[14].mxu0 %v2302_v36  ;;  %2444 = vmatmul.mubr.f32.vlgmr.msra.gmra.mrb[14].mxu1 %v2302_v36 }
 0x5f9   : > { %10313 = vmatpush1.bf16.msra.mxu0 %v14384_v56  ;;  %10345 = vmatpush1.bf16.msra.mxu1 %v14386_v57 }
 0x5fa   : > { %10315 = vmatprep.subr.bf16.mxu0 %v14388_v63  ;;  %10347 = vmatprep.subr.bf16.mxu1 %v14390_v1 }
 0x5fb   : > { %2591 = vmatprep.mubr.f32.mxu0 %v13791_v0  ;;  %2662 = vmatprep.mubr.f32.mxu1 %v13791_v0 }
 0x5fd   : > { %10317 = vmatpush1.bf16.msra.mxu0 %v14394_v6  ;;  %10349 = vmatpush1.bf16.msra.mxu1 %v14396_v7 }
 0x5fe   : > { %10319 = vmatprep.subr.bf16.mxu0 %v14400_v11  ;;  %10351 = vmatprep.subr.bf16.mxu1 %v14402_v12 }
 0x601   : > { %10321 = vmatpush1.bf16.msra.mxu0 %v14408_v18  ;;  %10353 = vmatpush1.bf16.msra.mxu1 %v14410_v19 }
 0x602   : > { %10323 = vmatprep.subr.bf16.mxu0 %v14414_v23  ;;  %10355 = vmatprep.subr.bf16.mxu1 %v14416_v25 }
 0x605   : > { %10325 = vmatpush1.bf16.msra.mxu0 %v14422_v34  ;;  %10357 = vmatpush1.bf16.msra.mxu1 %v14424_v35 }
 0x606   : > { %10327 = vmatprep.subr.bf16.mxu0 %v14428_v39  ;;  %10359 = vmatprep.subr.bf16.mxu1 %v14430_v40 }
 0x609   : > { %10329 = vmatpush1.bf16.msra.mxu0 %v14434_v49  ;;  %10361 = vmatpush1.bf16.msra.mxu1 %v14436_v50 }
 0x60a   : > { %10331 = vmatprep.subr.bf16.mxu0 %v14440_v38  ;;  %10363 = vmatprep.subr.bf16.mxu1 %v14442_v53 }
 0x60d   : > { %10333 = vmatpush1.bf16.msra.mxu0 %v14446_v41  ;;  %10365 = vmatpush1.bf16.msra.mxu1 %v14448_v61 }
 0x60e   : > { %10335 = vmatprep.subr.bf16.mxu0 %v14452_v4  ;;  %10367 = vmatprep.subr.bf16.mxu1 %v14454_v2 }
 0x611   : > { %10337 = vmatpush1.bf16.msra.mxu0 %v14461_v28  ;;  %10369 = vmatpush1.bf16.msra.mxu1 %v14463_v16 }
 0x612   : > { %10339 = vmatprep.subr.bf16.mxu0 %v14467_v20  ;;  %10371 = vmatprep.subr.bf16.mxu1 %v14469_v21 }
 0x615   : > { %10341 = vmatpush1.bf16.msra.mxu0 %v14481_v32  ;;  %10373 = vmatpush1.bf16.msra.mxu1 %v14483_v33 }
 0x616   : > { %10375 = vmatprep.subr.bf16.mxu0 %v14376_v22  ;;  %10407 = vmatprep.subr.bf16.mxu1 %v14378_v24 }
 0x6ab   : > { %v2138_v54 = vpop.f32.mrb[10].mxu0  ;;  %v2215_v55 = vpop.f32.mrb[10].mxu1 }
 0x6ac   : > { %v2139_v42 = vadd.f32 %v2138_v54, %v2055_v47  ;;  %v2216_v37 = vadd.f32 %v2215_v55, %v2063_v48  ;;  %v2140_v58 = vpop.f32.mrb[11].mxu0  ;;  %v2217_v59 = vpop.f32.mrb[11].mxu1 }
 0x6ad   : > { %v2141_v60 = vadd.f32 %v2140_v58, %v2059_v51  ;;  %v2218_v62 = vadd.f32 %v2217_v59, %v2067_v52 }
 0x6ae   : > { %2226 = vst [vmem:[#allocation3] sm:$0xff] %v2139_v42  ;;  %2228 = vst [vmem:[#allocation3 + $0x10] sm:$0xff] %v2216_v37 }
 0x6af   : > { %2227 = vst [vmem:[#allocation3 + $0x8] sm:$0xff] %v2141_v60  ;;  %2229 = vst [vmem:[#allocation3 + $0x18] sm:$0xff] %v2218_v62  ;;  %v2144_v3 = vpop.f32.mrb[12].mxu0  ;;  %v2221_v5 = vpop.f32.mrb[12].mxu1  ;;  %v14554_v62 = vrot.slane %v2298_v17, %v14535_v46 }
 0x6b0   : > { %v2145_v8 = vadd.f32 %v2144_v3, %v2055_v47  ;;  %v2222_v9 = vadd.f32 %v2221_v5, %v2063_v48  ;;  %v2146_v10 = vpop.f32.mrb[13].mxu0  ;;  %v2223_v13 = vpop.f32.mrb[13].mxu1  ;;  %v14548_v47 = vrot.slane %v2298_v17, %v14531_v44 }
 0x6b1   : > { %v2147_v14 = vadd.f32 %v2146_v10, %v2059_v51  ;;  %v2224_v15 = vadd.f32 %v2223_v13, %v2067_v52 }
 0x6b2   : > { %2230 = vst [vmem:[#allocation3 + $0x20] sm:$0xff] %v2145_v8  ;;  %2232 = vst [vmem:[#allocation3 + $0x30] sm:$0xff] %v2222_v9  ;;  %v14559_v9 = vrot.slane %v2298_v17, %v14528_v43 }
 0x6b3   : > { %2231 = vst [vmem:[#allocation3 + $0x28] sm:$0xff] %v2147_v14  ;;  %2233 = vst [vmem:[#allocation3 + $0x38] sm:$0xff] %v2224_v15 }
 0x6b6   : > { %v2307_v27 = vld [vmem:[#allocation3] ss:$8 sm:$0xf] }
 0x6b7   : > { %v2454_v29 = vrot.slane %v2307_v27, %v14477_v31  ;;  %v2458_v45 = vrot.slane %v2307_v27, %v14531_v44  ;;  %v2466_v37 = vrot.slane %v2307_v27, %v14535_v46  ;;  %v2462_v3 = vrot.slane %v2307_v27, %v14528_v43  ;;  %v1985_v27 = vld [vmem:[%s14565_s5] sm:$0x3] }
 0x6b8   : > { %v2306_v17 = vrot.slane %v1985_v27, %v14477_v31 }
 0x6cb   : > { %v2374_v26 = vpop.f32.mrb[14].mxu0  ;;  %v2445_v36 = vpop.f32.mrb[14].mxu1 }
 0x6cc   : > { %v2471_v48 = vadd.f32 %v2454_v29, %v2374_v26  ;;  %v2376_v51 = vpop.f32.mrb[15].mxu0  ;;  %v2447_v52 = vpop.f32.mrb[15].mxu1  ;;  %v2473_v8 = vadd.f32 %v2462_v3, %v2445_v36 }
 0x6cd   : > { %v2472_v54 = vadd.f32 %v2458_v45, %v2376_v51  ;;  %v2474_v60 = vadd.f32 %v2466_v37, %v2447_v52 }
 0x6ce   : > { %v2496_v55 = vadd.f32 %v14544_v30, %v2471_v48  ;;  %v2498_v13 = vadd.f32 %v14559_v9, %v2473_v8 }
 0x6cf   : > { %v2497_v42 = vadd.f32 %v14548_v47, %v2472_v54  ;;  %v2499_v5 = vadd.f32 %v14554_v62, %v2474_v60  ;;  %v2526_v60 = vld [vmem:[#allocation3 + $0x1] ss:$8 sm:$0xf] }
 0x6d0   : > { %v9527_v58 = vmul.f32 -1.442695, %v2496_v55  ;;  %v2673_v3 = vrot.slane %v2526_v60, %v14477_v31 }
 0x6d1   : > { %v9528_v59 = vmul.f32 -1.442695, %v2497_v42  ;;  %v9529_v10 = vmul.f32 -1.442695, %v2499_v5 }
 0x6d2   : > { %12643 = vpow2.f32 %v9527_v58 }
 0x6d3   : > { %12645 = vpow2.f32 %v9528_v59 }
 0x6d4   : > { %12647 = vpow2.f32 %v9529_v10  ;;  %v2677_v10 = vrot.slane %v2526_v60, %v14531_v44 }
 0x6d5   : > { %12649 = vtanh.f32 %v2498_v13 }
 0x6dc   : > { %v12644_v14 = vpop.eup %12643 }
 0x6dd   : > { %v12646_v15 = vpop.eup %12645  ;;  %v2503_v29 = vadd.f32 1.0, %v12644_v14 }
 0x6de   : > { %v2509_v26 = vadd.f32 1.0, %v12646_v15  ;;  %v12648_v36 = vpop.eup %12647 }
 0x6df   : > { %12651 = vrcp.f32 %v2503_v29  ;;  %v12650_v45 = vpop.eup %12649  ;;  %v2516_v54 = vadd.f32 1.0, %v12648_v36  ;;  %v2685_v36 = vrot.slane %v2526_v60, %v14535_v46 }
 0x6e0   : > { %12653 = vrcp.f32 %v2509_v26 }
 0x6e1   : > { %12655 = vrcp.f32 %v2516_v54 }
 0x6e9   : > { %v12652_v48 = vpop.eup %12651 }
 0x6ea   : > { %v12654_v51 = vpop.eup %12653  ;;  %v2520_v52 = vmul.f32 %v12652_v48, %v12650_v45 }
 0x6eb   : > { %v2519_v55 = vmul.f32 %v12654_v51, %v2306_v17  ;;  %v12656_v37 = vpop.eup %12655  ;;  %v2681_v51 = vrot.slane %v2526_v60, %v14528_v43 }
 0x6ed   : > { %v14569_v42 = vadd.f32 %v2520_v52, %v2519_v55 }
 0x6ef   : > { %12657 = vtanh.f32 %v14569_v42 }
 0x6f9   : > { %v12658_v58 = vpop.eup %12657 }
 0x6fa   : > { %v2523_v59 = vmul.f32 %v12658_v58, %v12656_v37 }
 0x6fc   : > { %2524 = vst [vmem:[#allocation5] sm:$0x1] %v2523_v59  ;;  %2592 = vmatmul.mubr.f32.vlgmr.msra.gmra.mrb[16].mxu0 %v2523_v59  ;;  %2663 = vmatmul.mubr.f32.vlgmr.msra.gmra.mrb[16].mxu1 %v2523_v59 }
 0x6fd   : > { %10377 = vmatpush1.bf16.msra.mxu0 %v14384_v56  ;;  %10409 = vmatpush1.bf16.msra.mxu1 %v14386_v57 }
 0x6fe   : > { %10379 = vmatprep.subr.bf16.mxu0 %v14388_v63  ;;  %10411 = vmatprep.subr.bf16.mxu1 %v14390_v1 }
 0x6ff   : > { %2789 = vmatprep.mubr.f32.mxu0 %v13791_v0  ;;  %2860 = vmatprep.mubr.f32.mxu1 %v13791_v0 }
 0x701   : > { %10381 = vmatpush1.bf16.msra.mxu0 %v14394_v6  ;;  %10413 = vmatpush1.bf16.msra.mxu1 %v14396_v7 }
 0x702   : > { %10383 = vmatprep.subr.bf16.mxu0 %v14400_v11  ;;  %10415 = vmatprep.subr.bf16.mxu1 %v14402_v12 }
 0x705   : > { %10385 = vmatpush1.bf16.msra.mxu0 %v14408_v18  ;;  %10417 = vmatpush1.bf16.msra.mxu1 %v14410_v19 }
 0x706   : > { %10387 = vmatprep.subr.bf16.mxu0 %v14414_v23  ;;  %10419 = vmatprep.subr.bf16.mxu1 %v14416_v25 }
 0x709   : > { %10389 = vmatpush1.bf16.msra.mxu0 %v14422_v34  ;;  %10421 = vmatpush1.bf16.msra.mxu1 %v14424_v35 }
 0x70a   : > { %10391 = vmatprep.subr.bf16.mxu0 %v14428_v39  ;;  %10423 = vmatprep.subr.bf16.mxu1 %v14430_v40 }
 0x70d   : > { %10393 = vmatpush1.bf16.msra.mxu0 %v14434_v49  ;;  %10425 = vmatpush1.bf16.msra.mxu1 %v14436_v50 }
 0x70e   : > { %10395 = vmatprep.subr.bf16.mxu0 %v14440_v38  ;;  %10427 = vmatprep.subr.bf16.mxu1 %v14442_v53 }
 0x711   : > { %10397 = vmatpush1.bf16.msra.mxu0 %v14446_v41  ;;  %10429 = vmatpush1.bf16.msra.mxu1 %v14448_v61 }
 0x712   : > { %10399 = vmatprep.subr.bf16.mxu0 %v14452_v4  ;;  %10431 = vmatprep.subr.bf16.mxu1 %v14454_v2 }
 0x715   : > { %10401 = vmatpush1.bf16.msra.mxu0 %v14461_v28  ;;  %10433 = vmatpush1.bf16.msra.mxu1 %v14463_v16 }
 0x716   : > { %10403 = vmatprep.subr.bf16.mxu0 %v14467_v20  ;;  %10435 = vmatprep.subr.bf16.mxu1 %v14469_v21 }
 0x719   : > { %10405 = vmatpush1.bf16.msra.mxu0 %v14481_v32  ;;  %10437 = vmatpush1.bf16.msra.mxu1 %v14483_v33 }
 0x71a   : > { %10439 = vmatprep.subr.bf16.mxu0 %v14376_v22  ;;  %10471 = vmatprep.subr.bf16.mxu1 %v14378_v24 }
 0x7cf   : > { %v2593_v5 = vpop.f32.mrb[16].mxu0  ;;  %v2664_v8 = vpop.f32.mrb[16].mxu1 }
 0x7d0   : > { %v2690_v13 = vadd.f32 %v2673_v3, %v2593_v5  ;;  %v2595_v14 = vpop.f32.mrb[17].mxu0  ;;  %v2666_v15 = vpop.f32.mrb[17].mxu1  ;;  %v2692_v54 = vadd.f32 %v2681_v51, %v2664_v8 }
 0x7d1   : > { %v2691_v29 = vadd.f32 %v2677_v10, %v2595_v14  ;;  %v2693_v48 = vadd.f32 %v2685_v36, %v2666_v15 }
 0x7d2   : > { %v2694_v26 = vadd.f32 %v2690_v13, %v14544_v30  ;;  %v2696_v37 = vadd.f32 %v2692_v54, %v14559_v9 }
 0x7d3   : > { %v2695_v27 = vadd.f32 %v2691_v29, %v14548_v47  ;;  %v2697_v52 = vadd.f32 %v2693_v48, %v14554_v62 }
 0x7d4   : > { %v9530_v17 = vmul.f32 -1.442695, %v2694_v26 }
 0x7d5   : > { %v9531_v45 = vmul.f32 -1.442695, %v2695_v27  ;;  %v9532_v55 = vmul.f32 -1.442695, %v2697_v52 }
 0x7d6   : > { %12659 = vpow2.f32 %v9530_v17 }
 0x7d7   : > { %12661 = vpow2.f32 %v9531_v45 }
 0x7d8   : > { %12663 = vpow2.f32 %v9532_v55 }
 0x7d9   : > { %12665 = vtanh.f32 %v2696_v37 }
 0x7e0   : > { %v12660_v58 = vpop.eup %12659 }
 0x7e1   : > { %v12662_v59 = vpop.eup %12661  ;;  %v2701_v3 = vadd.f32 1.0, %v12660_v58 }
 0x7e2   : > { %v2707_v5 = vadd.f32 1.0, %v12662_v59  ;;  %v12664_v10 = vpop.eup %12663 }
 0x7e3   : > { %12667 = vrcp.f32 %v2701_v3  ;;  %v12666_v13 = vpop.eup %12665  ;;  %v2714_v60 = vadd.f32 1.0, %v12664_v10 }
 0x7e4   : > { %12669 = vrcp.f32 %v2707_v5 }
 0x7e5   : > { %12671 = vrcp.f32 %v2714_v60 }
 0x7ed   : > { %v12668_v14 = vpop.eup %12667 }
 0x7ee   : > { %v12670_v15 = vpop.eup %12669  ;;  %v2718_v29 = vmul.f32 %v12668_v14, %v12666_v13 }
 0x7ef   : > { %v2717_v26 = vmul.f32 %v12670_v15, %v14569_v42  ;;  %v12672_v27 = vpop.eup %12671  ;;  %v2724_v42 = vld [vmem:[#allocation3 + $0x2] ss:$8 sm:$0xf] }
 0x7f0   : > { %v2871_v45 = vrot.slane %v2724_v42, %v14477_v31  ;;  %v2875_v52 = vrot.slane %v2724_v42, %v14531_v44  ;;  %v2883_v5 = vrot.slane %v2724_v42, %v14535_v46  ;;  %v2879_v15 = vrot.slane %v2724_v42, %v14528_v43 }
 0x7f1   : > { %v14615_v8 = vadd.f32 %v2718_v29, %v2717_v26 }
 0x7f3   : > { %12673 = vtanh.f32 %v14615_v8 }
 0x7fd   : > { %v12674_v36 = vpop.eup %12673 }
 0x7fe   : > { %v2721_v17 = vmul.f32 %v12674_v36, %v12672_v27 }
 0x800   : > { %2722 = vst [vmem:[#allocation5 + $0x1] sm:$0x1] %v2721_v17  ;;  %2790 = vmatmul.mubr.f32.vlgmr.msra.gmra.mrb[18].mxu0 %v2721_v17  ;;  %2861 = vmatmul.mubr.f32.vlgmr.msra.gmra.mrb[18].mxu1 %v2721_v17 }
 0x801   : > { %10441 = vmatpush1.bf16.msra.mxu0 %v14384_v56  ;;  %10473 = vmatpush1.bf16.msra.mxu1 %v14386_v57 }
 0x802   : > { %10443 = vmatprep.subr.bf16.mxu0 %v14388_v63  ;;  %10475 = vmatprep.subr.bf16.mxu1 %v14390_v1 }
 0x803   : > { %2987 = vmatprep.mubr.f32.mxu0 %v13791_v0  ;;  %3058 = vmatprep.mubr.f32.mxu1 %v13791_v0 }
 0x805   : > { %10445 = vmatpush1.bf16.msra.mxu0 %v14394_v6  ;;  %10477 = vmatpush1.bf16.msra.mxu1 %v14396_v7 }
 0x806   : > { %10447 = vmatprep.subr.bf16.mxu0 %v14400_v11  ;;  %10479 = vmatprep.subr.bf16.mxu1 %v14402_v12 }
 0x809   : > { %10449 = vmatpush1.bf16.msra.mxu0 %v14408_v18  ;;  %10481 = vmatpush1.bf16.msra.mxu1 %v14410_v19 }
 0x80a   : > { %10451 = vmatprep.subr.bf16.mxu0 %v14414_v23  ;;  %10483 = vmatprep.subr.bf16.mxu1 %v14416_v25 }
 0x80d   : > { %10453 = vmatpush1.bf16.msra.mxu0 %v14422_v34  ;;  %10485 = vmatpush1.bf16.msra.mxu1 %v14424_v35 }
 0x80e   : > { %10455 = vmatprep.subr.bf16.mxu0 %v14428_v39  ;;  %10487 = vmatprep.subr.bf16.mxu1 %v14430_v40 }
 0x811   : > { %10457 = vmatpush1.bf16.msra.mxu0 %v14434_v49  ;;  %10489 = vmatpush1.bf16.msra.mxu1 %v14436_v50 }
 0x812   : > { %10459 = vmatprep.subr.bf16.mxu0 %v14440_v38  ;;  %10491 = vmatprep.subr.bf16.mxu1 %v14442_v53 }
 0x815   : > { %10461 = vmatpush1.bf16.msra.mxu0 %v14446_v41  ;;  %10493 = vmatpush1.bf16.msra.mxu1 %v14448_v61 }
 0x816   : > { %10463 = vmatprep.subr.bf16.mxu0 %v14452_v4  ;;  %10495 = vmatprep.subr.bf16.mxu1 %v14454_v2 }
 0x819   : > { %10465 = vmatpush1.bf16.msra.mxu0 %v14461_v28  ;;  %10497 = vmatpush1.bf16.msra.mxu1 %v14463_v16 }
 0x81a   : > { %10467 = vmatprep.subr.bf16.mxu0 %v14467_v20  ;;  %10499 = vmatprep.subr.bf16.mxu1 %v14469_v21 }
 0x81d   : > { %10469 = vmatpush1.bf16.msra.mxu0 %v14481_v32  ;;  %10501 = vmatpush1.bf16.msra.mxu1 %v14483_v33 }
 0x81e   : > { %10503 = vmatprep.subr.bf16.mxu0 %v14376_v22  ;;  %10535 = vmatprep.subr.bf16.mxu1 %v14378_v24 }
 0x8d3   : > { %v2791_v48 = vpop.f32.mrb[18].mxu0  ;;  %v2862_v51 = vpop.f32.mrb[18].mxu1 }
 0x8d4   : > { %v2888_v54 = vadd.f32 %v2871_v45, %v2791_v48  ;;  %v2793_v55 = vpop.f32.mrb[19].mxu0  ;;  %v2864_v37 = vpop.f32.mrb[19].mxu1  ;;  %v2890_v60 = vadd.f32 %v2879_v15, %v2862_v51 }
 0x8d5   : > { %v2889_v58 = vadd.f32 %v2875_v52, %v2793_v55  ;;  %v2891_v14 = vadd.f32 %v2883_v5, %v2864_v37 }
 0x8d6   : > { %v2892_v59 = vadd.f32 %v2888_v54, %v14544_v30  ;;  %v2894_v27 = vadd.f32 %v2890_v60, %v14559_v9 }
 0x8d7   : > { %v2893_v3 = vadd.f32 %v2889_v58, %v14548_v47  ;;  %v2895_v29 = vadd.f32 %v2891_v14, %v14554_v62 }
 0x8d8   : > { %v9533_v10 = vmul.f32 -1.442695, %v2892_v59 }
 0x8d9   : > { %v9534_v13 = vmul.f32 -1.442695, %v2893_v3  ;;  %v9535_v26 = vmul.f32 -1.442695, %v2895_v29 }
 0x8da   : > { %12675 = vpow2.f32 %v9533_v10 }
 0x8db   : > { %12677 = vpow2.f32 %v9534_v13 }
 0x8dc   : > { %12679 = vpow2.f32 %v9535_v26 }
 0x8dd   : > { %12681 = vtanh.f32 %v2894_v27 }
 0x8e4   : > { %v12676_v36 = vpop.eup %12675 }
 0x8e5   : > { %v12678_v17 = vpop.eup %12677  ;;  %v2899_v45 = vadd.f32 1.0, %v12676_v36 }
 0x8e6   : > { %v2905_v48 = vadd.f32 1.0, %v12678_v17  ;;  %v12680_v52 = vpop.eup %12679 }
 0x8e7   : > { %12683 = vrcp.f32 %v2899_v45  ;;  %v12682_v54 = vpop.eup %12681  ;;  %v2912_v42 = vadd.f32 1.0, %v12680_v52 }
 0x8e8   : > { %12685 = vrcp.f32 %v2905_v48 }
 0x8e9   : > { %12687 = vrcp.f32 %v2912_v42 }
 0x8f1   : > { %v12684_v55 = vpop.eup %12683 }
 0x8f2   : > { %v12686_v37 = vpop.eup %12685  ;;  %v2916_v58 = vmul.f32 %v12684_v55, %v12682_v54 }
 0x8f3   : > { %v2915_v59 = vmul.f32 %v12686_v37, %v14615_v8  ;;  %v12688_v3 = vpop.eup %12687  ;;  %v2922_v8 = vld [vmem:[#allocation3 + $0x3] ss:$8 sm:$0xf] }
 0x8f4   : > { %v3069_v13 = vrot.slane %v2922_v8, %v14477_v31  ;;  %v3073_v29 = vrot.slane %v2922_v8, %v14531_v44  ;;  %v3081_v48 = vrot.slane %v2922_v8, %v14535_v46  ;;  %v3077_v37 = vrot.slane %v2922_v8, %v14528_v43 }
 0x8f5   : > { %v14661_v51 = vadd.f32 %v2916_v58, %v2915_v59 }
 0x8f7   : > { %12689 = vtanh.f32 %v14661_v51 }
 0x901   : > { %v12690_v5 = vpop.eup %12689 }
 0x902   : > { %v2919_v10 = vmul.f32 %v12690_v5, %v12688_v3 }
 0x904   : > { %2920 = vst [vmem:[#allocation5 + $0x2] sm:$0x1] %v2919_v10  ;;  %2988 = vmatmul.mubr.f32.vlgmr.msra.gmra.mrb[20].mxu0 %v2919_v10  ;;  %3059 = vmatmul.mubr.f32.vlgmr.msra.gmra.mrb[20].mxu1 %v2919_v10 }
 0x905   : > { %10505 = vmatpush1.bf16.msra.mxu0 %v14384_v56  ;;  %10537 = vmatpush1.bf16.msra.mxu1 %v14386_v57 }
 0x906   : > { %10507 = vmatprep.subr.bf16.mxu0 %v14388_v63  ;;  %10539 = vmatprep.subr.bf16.mxu1 %v14390_v1 }
 0x907   : > { %3185 = vmatprep.mubr.f32.mxu0 %v13791_v0  ;;  %3256 = vmatprep.mubr.f32.mxu1 %v13791_v0 }
 0x909   : > { %10509 = vmatpush1.bf16.msra.mxu0 %v14394_v6  ;;  %10541 = vmatpush1.bf16.msra.mxu1 %v14396_v7 }
 0x90a   : > { %10511 = vmatprep.subr.bf16.mxu0 %v14400_v11  ;;  %10543 = vmatprep.subr.bf16.mxu1 %v14402_v12 }
 0x90d   : > { %10513 = vmatpush1.bf16.msra.mxu0 %v14408_v18  ;;  %10545 = vmatpush1.bf16.msra.mxu1 %v14410_v19 }
 0x90e   : > { %10515 = vmatprep.subr.bf16.mxu0 %v14414_v23  ;;  %10547 = vmatprep.subr.bf16.mxu1 %v14416_v25 }
 0x911   : > { %10517 = vmatpush1.bf16.msra.mxu0 %v14422_v34  ;;  %10549 = vmatpush1.bf16.msra.mxu1 %v14424_v35 }
 0x912   : > { %10519 = vmatprep.subr.bf16.mxu0 %v14428_v39  ;;  %10551 = vmatprep.subr.bf16.mxu1 %v14430_v40 }
 0x915   : > { %10521 = vmatpush1.bf16.msra.mxu0 %v14434_v49  ;;  %10553 = vmatpush1.bf16.msra.mxu1 %v14436_v50 }
 0x916   : > { %10523 = vmatprep.subr.bf16.mxu0 %v14440_v38  ;;  %10555 = vmatprep.subr.bf16.mxu1 %v14442_v53 }
 0x919   : > { %10525 = vmatpush1.bf16.msra.mxu0 %v14446_v41  ;;  %10557 = vmatpush1.bf16.msra.mxu1 %v14448_v61 }
 0x91a   : > { %10527 = vmatprep.subr.bf16.mxu0 %v14452_v4  ;;  %10559 = vmatprep.subr.bf16.mxu1 %v14454_v2 }
 0x91d   : > { %10529 = vmatpush1.bf16.msra.mxu0 %v14461_v28  ;;  %10561 = vmatpush1.bf16.msra.mxu1 %v14463_v16 }
 0x91e   : > { %10531 = vmatprep.subr.bf16.mxu0 %v14467_v20  ;;  %10563 = vmatprep.subr.bf16.mxu1 %v14469_v21 }
 0x921   : > { %10533 = vmatpush1.bf16.msra.mxu0 %v14481_v32  ;;  %10565 = vmatpush1.bf16.msra.mxu1 %v14483_v33 }
 0x922   : > { %10567 = vmatprep.subr.bf16.mxu0 %v14376_v22  ;;  %10599 = vmatprep.subr.bf16.mxu1 %v14378_v24 }
 0x9d7   : > { %v2989_v14 = vpop.f32.mrb[20].mxu0  ;;  %v3060_v15 = vpop.f32.mrb[20].mxu1 }
 0x9d8   : > { %v3086_v60 = vadd.f32 %v3069_v13, %v2989_v14  ;;  %v2991_v26 = vpop.f32.mrb[21].mxu0  ;;  %v3062_v27 = vpop.f32.mrb[21].mxu1  ;;  %v3088_v42 = vadd.f32 %v3077_v37, %v3060_v15 }
 0x9d9   : > { %v3087_v36 = vadd.f32 %v3073_v29, %v2991_v26  ;;  %v3089_v55 = vadd.f32 %v3081_v48, %v3062_v27 }
 0x9da   : > { %v3090_v17 = vadd.f32 %v3086_v60, %v14544_v30  ;;  %v3092_v3 = vadd.f32 %v3088_v42, %v14559_v9 }
 0x9db   : > { %v3091_v45 = vadd.f32 %v3087_v36, %v14548_v47  ;;  %v3093_v58 = vadd.f32 %v3089_v55, %v14554_v62 }
 0x9dc   : > { %v9536_v52 = vmul.f32 -1.442695, %v3090_v17 }
 0x9dd   : > { %v9537_v54 = vmul.f32 -1.442695, %v3091_v45  ;;  %v9538_v59 = vmul.f32 -1.442695, %v3093_v58 }
 0x9de   : > { %12691 = vpow2.f32 %v9536_v52 }
 0x9df   : > { %12693 = vpow2.f32 %v9537_v54 }
 0x9e0   : > { %12695 = vpow2.f32 %v9538_v59 }
 0x9e1   : > { %12697 = vtanh.f32 %v3092_v3 }
 0x9e8   : > { %v12692_v5 = vpop.eup %12691 }
 0x9e9   : > { %v12694_v10 = vpop.eup %12693  ;;  %v3097_v13 = vadd.f32 1.0, %v12692_v5 }
 0x9ea   : > { %v3103_v14 = vadd.f32 1.0, %v12694_v10  ;;  %v12696_v29 = vpop.eup %12695 }
 0x9eb   : > { %12699 = vrcp.f32 %v3097_v13  ;;  %v12698_v60 = vpop.eup %12697  ;;  %v3110_v8 = vadd.f32 1.0, %v12696_v29 }
 0x9ec   : > { %12701 = vrcp.f32 %v3103_v14 }
 0x9ed   : > { %12703 = vrcp.f32 %v3110_v8 }
 0x9f5   : > { %v12700_v26 = vpop.eup %12699 }
 0x9f6   : > { %v12702_v27 = vpop.eup %12701  ;;  %v3114_v36 = vmul.f32 %v12700_v26, %v12698_v60 }
 0x9f7   : > { %v3113_v17 = vmul.f32 %v12702_v27, %v14661_v51  ;;  %v12704_v45 = vpop.eup %12703  ;;  %v3120_v51 = vld [vmem:[#allocation3 + $0x4] ss:$8 sm:$0xf] }
 0x9f8   : > { %v3267_v54 = vrot.slane %v3120_v51, %v14477_v31  ;;  %v3271_v58 = vrot.slane %v3120_v51, %v14531_v44  ;;  %v3279_v14 = vrot.slane %v3120_v51, %v14535_v46  ;;  %v3275_v27 = vrot.slane %v3120_v51, %v14528_v43 }
 0x9f9   : > { %v14707_v15 = vadd.f32 %v3114_v36, %v3113_v17 }
 0x9fb   : > { %12705 = vtanh.f32 %v14707_v15 }
 0xa05   : > { %v12706_v48 = vpop.eup %12705 }
 0xa06   : > { %v3117_v52 = vmul.f32 %v12706_v48, %v12704_v45 }
 0xa08   : > { %3118 = vst [vmem:[#allocation5 + $0x3] sm:$0x1] %v3117_v52  ;;  %3186 = vmatmul.mubr.f32.vlgmr.msra.gmra.mrb[22].mxu0 %v3117_v52  ;;  %3257 = vmatmul.mubr.f32.vlgmr.msra.gmra.mrb[22].mxu1 %v3117_v52 }
 0xa09   : > { %10569 = vmatpush1.bf16.msra.mxu0 %v14384_v56  ;;  %10601 = vmatpush1.bf16.msra.mxu1 %v14386_v57 }
 0xa0a   : > { %10571 = vmatprep.subr.bf16.mxu0 %v14388_v63  ;;  %10603 = vmatprep.subr.bf16.mxu1 %v14390_v1 }
 0xa0b   : > { %3383 = vmatprep.mubr.f32.mxu0 %v13791_v0  ;;  %3454 = vmatprep.mubr.f32.mxu1 %v13791_v0 }
 0xa0d   : > { %10573 = vmatpush1.bf16.msra.mxu0 %v14394_v6  ;;  %10605 = vmatpush1.bf16.msra.mxu1 %v14396_v7 }
 0xa0e   : > { %10575 = vmatprep.subr.bf16.mxu0 %v14400_v11  ;;  %10607 = vmatprep.subr.bf16.mxu1 %v14402_v12 }
 0xa11   : > { %10577 = vmatpush1.bf16.msra.mxu0 %v14408_v18  ;;  %10609 = vmatpush1.bf16.msra.mxu1 %v14410_v19 }
 0xa12   : > { %10579 = vmatprep.subr.bf16.mxu0 %v14414_v23  ;;  %10611 = vmatprep.subr.bf16.mxu1 %v14416_v25 }
 0xa15   : > { %10581 = vmatpush1.bf16.msra.mxu0 %v14422_v34  ;;  %10613 = vmatpush1.bf16.msra.mxu1 %v14424_v35 }
 0xa16   : > { %10583 = vmatprep.subr.bf16.mxu0 %v14428_v39  ;;  %10615 = vmatprep.subr.bf16.mxu1 %v14430_v40 }
 0xa19   : > { %10585 = vmatpush1.bf16.msra.mxu0 %v14434_v49  ;;  %10617 = vmatpush1.bf16.msra.mxu1 %v14436_v50 }
 0xa1a   : > { %10587 = vmatprep.subr.bf16.mxu0 %v14440_v38  ;;  %10619 = vmatprep.subr.bf16.mxu1 %v14442_v53 }
 0xa1d   : > { %10589 = vmatpush1.bf16.msra.mxu0 %v14446_v41  ;;  %10621 = vmatpush1.bf16.msra.mxu1 %v14448_v61 }
 0xa1e   : > { %10591 = vmatprep.subr.bf16.mxu0 %v14452_v4  ;;  %10623 = vmatprep.subr.bf16.mxu1 %v14454_v2 }
 0xa21   : > { %10593 = vmatpush1.bf16.msra.mxu0 %v14461_v28  ;;  %10625 = vmatpush1.bf16.msra.mxu1 %v14463_v16 }
 0xa22   : > { %10595 = vmatprep.subr.bf16.mxu0 %v14467_v20  ;;  %10627 = vmatprep.subr.bf16.mxu1 %v14469_v21 }
 0xa25   : > { %10597 = vmatpush1.bf16.msra.mxu0 %v14481_v32  ;;  %10629 = vmatpush1.bf16.msra.mxu1 %v14483_v33 }
 0xa26   : > { %10631 = vmatprep.subr.bf16.mxu0 %v14376_v22  ;;  %10663 = vmatprep.subr.bf16.mxu1 %v14378_v24 }
 0xadb   : > { %v3187_v55 = vpop.f32.mrb[22].mxu0  ;;  %v3258_v37 = vpop.f32.mrb[22].mxu1 }
 0xadc   : > { %v3284_v42 = vadd.f32 %v3267_v54, %v3187_v55  ;;  %v3189_v59 = vpop.f32.mrb[23].mxu0  ;;  %v3260_v3 = vpop.f32.mrb[23].mxu1  ;;  %v3286_v8 = vadd.f32 %v3275_v27, %v3258_v37 }
 0xadd   : > { %v3285_v5 = vadd.f32 %v3271_v58, %v3189_v59  ;;  %v3287_v26 = vadd.f32 %v3279_v14, %v3260_v3 }
 0xade   : > { %v3288_v10 = vadd.f32 %v3284_v42, %v14544_v30  ;;  %v3290_v45 = vadd.f32 %v3286_v8, %v14559_v9 }
 0xadf   : > { %v3289_v13 = vadd.f32 %v3285_v5, %v14548_v47  ;;  %v3291_v36 = vadd.f32 %v3287_v26, %v14554_v62 }
 0xae0   : > { %v9539_v29 = vmul.f32 -1.442695, %v3288_v10 }
 0xae1   : > { %v9540_v60 = vmul.f32 -1.442695, %v3289_v13  ;;  %v9541_v17 = vmul.f32 -1.442695, %v3291_v36 }
 0xae2   : > { %12707 = vpow2.f32 %v9539_v29 }
 0xae3   : > { %12709 = vpow2.f32 %v9540_v60 }
 0xae4   : > { %12711 = vpow2.f32 %v9541_v17 }
 0xae5   : > { %12713 = vtanh.f32 %v3290_v45 }
 0xaec   : > { %v12708_v48 = vpop.eup %12707 }
 0xaed   : > { %v12710_v52 = vpop.eup %12709  ;;  %v3295_v54 = vadd.f32 1.0, %v12708_v48 }
 0xaee   : > { %v3301_v55 = vadd.f32 1.0, %v12710_v52  ;;  %v12712_v58 = vpop.eup %12711 }
 0xaef   : > { %12715 = vrcp.f32 %v3295_v54  ;;  %v12714_v42 = vpop.eup %12713  ;;  %v3308_v51 = vadd.f32 1.0, %v12712_v58 }
 0xaf0   : > { %12717 = vrcp.f32 %v3301_v55 }
 0xaf1   : > { %12719 = vrcp.f32 %v3308_v51 }
 0xaf9   : > { %v12716_v59 = vpop.eup %12715 }
 0xafa   : > { %v12718_v3 = vpop.eup %12717  ;;  %v3312_v5 = vmul.f32 %v12716_v59, %v12714_v42 }
 0xafb   : > { %v3311_v10 = vmul.f32 %v12718_v3, %v14707_v15  ;;  %v12720_v13 = vpop.eup %12719  ;;  %v3318_v15 = vld [vmem:[#allocation3 + $0x5] ss:$8 sm:$0xf] }
 0xafc   : > { %v3465_v60 = vrot.slane %v3318_v15, %v14477_v31  ;;  %v3469_v36 = vrot.slane %v3318_v15, %v14531_v44  ;;  %v3477_v55 = vrot.slane %v3318_v15, %v14535_v46  ;;  %v3473_v3 = vrot.slane %v3318_v15, %v14528_v43 }
 0xafd   : > { %v14753_v37 = vadd.f32 %v3312_v5, %v3311_v10 }
 0xaff   : > { %12721 = vtanh.f32 %v14753_v37 }
 0xb09   : > { %v12722_v14 = vpop.eup %12721 }
 0xb0a   : > { %v3315_v29 = vmul.f32 %v12722_v14, %v12720_v13 }
 0xb0c   : > { %3316 = vst [vmem:[#allocation5 + $0x4] sm:$0x1] %v3315_v29  ;;  %3384 = vmatmul.mubr.f32.vlgmr.msra.gmra.mrb[24].mxu0 %v3315_v29  ;;  %3455 = vmatmul.mubr.f32.vlgmr.msra.gmra.mrb[24].mxu1 %v3315_v29 }
 0xb0d   : > { %10633 = vmatpush1.bf16.msra.mxu0 %v14384_v56  ;;  %10665 = vmatpush1.bf16.msra.mxu1 %v14386_v57 }
 0xb0e   : > { %10635 = vmatprep.subr.bf16.mxu0 %v14388_v63  ;;  %10667 = vmatprep.subr.bf16.mxu1 %v14390_v1 }
 0xb0f   : > { %3581 = vmatprep.mubr.f32.mxu0 %v13791_v0  ;;  %3652 = vmatprep.mubr.f32.mxu1 %v13791_v0 }
 0xb11   : > { %10637 = vmatpush1.bf16.msra.mxu0 %v14394_v6  ;;  %10669 = vmatpush1.bf16.msra.mxu1 %v14396_v7 }
 0xb12   : > { %10639 = vmatprep.subr.bf16.mxu0 %v14400_v11  ;;  %10671 = vmatprep.subr.bf16.mxu1 %v14402_v12 }
 0xb15   : > { %10641 = vmatpush1.bf16.msra.mxu0 %v14408_v18  ;;  %10673 = vmatpush1.bf16.msra.mxu1 %v14410_v19 }
 0xb16   : > { %10643 = vmatprep.subr.bf16.mxu0 %v14414_v23  ;;  %10675 = vmatprep.subr.bf16.mxu1 %v14416_v25 }
 0xb19   : > { %10645 = vmatpush1.bf16.msra.mxu0 %v14422_v34  ;;  %10677 = vmatpush1.bf16.msra.mxu1 %v14424_v35 }
 0xb1a   : > { %10647 = vmatprep.subr.bf16.mxu0 %v14428_v39  ;;  %10679 = vmatprep.subr.bf16.mxu1 %v14430_v40 }
 0xb1d   : > { %10649 = vmatpush1.bf16.msra.mxu0 %v14434_v49  ;;  %10681 = vmatpush1.bf16.msra.mxu1 %v14436_v50 }
 0xb1e   : > { %10651 = vmatprep.subr.bf16.mxu0 %v14440_v38  ;;  %10683 = vmatprep.subr.bf16.mxu1 %v14442_v53 }
 0xb21   : > { %10653 = vmatpush1.bf16.msra.mxu0 %v14446_v41  ;;  %10685 = vmatpush1.bf16.msra.mxu1 %v14448_v61 }
 0xb22   : > { %10655 = vmatprep.subr.bf16.mxu0 %v14452_v4  ;;  %10687 = vmatprep.subr.bf16.mxu1 %v14454_v2 }
 0xb25   : > { %10657 = vmatpush1.bf16.msra.mxu0 %v14461_v28  ;;  %10689 = vmatpush1.bf16.msra.mxu1 %v14463_v16 }
 0xb26   : > { %10659 = vmatprep.subr.bf16.mxu0 %v14467_v20  ;;  %10691 = vmatprep.subr.bf16.mxu1 %v14469_v21 }
 0xb29   : > { %10661 = vmatpush1.bf16.msra.mxu0 %v14481_v32  ;;  %10693 = vmatpush1.bf16.msra.mxu1 %v14483_v33 }
 0xb2a   : > { %10695 = vmatprep.subr.bf16.mxu0 %v14376_v22  ;;  %10727 = vmatprep.subr.bf16.mxu1 %v14378_v24 }
 0xbdf   : > { %v3385_v26 = vpop.f32.mrb[24].mxu0  ;;  %v3456_v27 = vpop.f32.mrb[24].mxu1 }
 0xbe0   : > { %v3482_v8 = vadd.f32 %v3465_v60, %v3385_v26  ;;  %v3387_v17 = vpop.f32.mrb[25].mxu0  ;;  %v3458_v45 = vpop.f32.mrb[25].mxu1  ;;  %v3484_v51 = vadd.f32 %v3473_v3, %v3456_v27 }
 0xbe1   : > { %v3483_v48 = vadd.f32 %v3469_v36, %v3387_v17  ;;  %v3485_v59 = vadd.f32 %v3477_v55, %v3458_v45 }
 0xbe2   : > { %v3486_v52 = vadd.f32 %v3482_v8, %v14544_v30  ;;  %v3488_v13 = vadd.f32 %v3484_v51, %v14559_v9 }
 0xbe3   : > { %v3487_v54 = vadd.f32 %v3483_v48, %v14548_v47  ;;  %v3489_v5 = vadd.f32 %v3485_v59, %v14554_v62 }
 0xbe4   : > { %v9542_v58 = vmul.f32 -1.442695, %v3486_v52 }
 0xbe5   : > { %v9543_v42 = vmul.f32 -1.442695, %v3487_v54  ;;  %v9544_v10 = vmul.f32 -1.442695, %v3489_v5 }
 0xbe6   : > { %12723 = vpow2.f32 %v9542_v58 }
 0xbe7   : > { %12725 = vpow2.f32 %v9543_v42 }
 0xbe8   : > { %12727 = vpow2.f32 %v9544_v10 }
 0xbe9   : > { %12729 = vtanh.f32 %v3488_v13 }
 0xbf0   : > { %v12724_v14 = vpop.eup %12723 }
 0xbf1   : > { %v12726_v29 = vpop.eup %12725  ;;  %v3493_v60 = vadd.f32 1.0, %v12724_v14 }
 0xbf2   : > { %v3499_v26 = vadd.f32 1.0, %v12726_v29  ;;  %v12728_v36 = vpop.eup %12727 }
 0xbf3   : > { %12731 = vrcp.f32 %v3493_v60  ;;  %v12730_v8 = vpop.eup %12729  ;;  %v3506_v15 = vadd.f32 1.0, %v12728_v36 }
 0xbf4   : > { %12733 = vrcp.f32 %v3499_v26 }
 0xbf5   : > { %12735 = vrcp.f32 %v3506_v15 }
 0xbfd   : > { %v12732_v17 = vpop.eup %12731 }
 0xbfe   : > { %v12734_v45 = vpop.eup %12733  ;;  %v3510_v48 = vmul.f32 %v12732_v17, %v12730_v8 }
 0xbff   : > { %v3509_v52 = vmul.f32 %v12734_v45, %v14753_v37  ;;  %v12736_v54 = vpop.eup %12735  ;;  %v3516_v37 = vld [vmem:[#allocation3 + $0x6] ss:$8 sm:$0xf] }
 0xc00   : > { %v3663_v42 = vrot.slane %v3516_v37, %v14477_v31  ;;  %v3667_v5 = vrot.slane %v3516_v37, %v14531_v44  ;;  %v3675_v26 = vrot.slane %v3516_v37, %v14535_v46  ;;  %v3671_v45 = vrot.slane %v3516_v37, %v14528_v43 }
 0xc01   : > { %v14799_v27 = vadd.f32 %v3510_v48, %v3509_v52 }
 0xc03   : > { %12737 = vtanh.f32 %v14799_v27 }
 0xc0d   : > { %v12738_v55 = vpop.eup %12737 }
 0xc0e   : > { %v3513_v58 = vmul.f32 %v12738_v55, %v12736_v54 }
 0xc10   : > { %3514 = vst [vmem:[#allocation5 + $0x5] sm:$0x1] %v3513_v58  ;;  %3582 = vmatmul.mubr.f32.vlgmr.msra.gmra.mrb[26].mxu0 %v3513_v58  ;;  %3653 = vmatmul.mubr.f32.vlgmr.msra.gmra.mrb[26].mxu1 %v3513_v58 }
 0xc11   : > { %10697 = vmatpush1.bf16.msra.mxu0 %v14384_v56  ;;  %10729 = vmatpush1.bf16.msra.mxu1 %v14386_v57 }
 0xc12   : > { %10699 = vmatprep.subr.bf16.mxu0 %v14388_v63  ;;  %10731 = vmatprep.subr.bf16.mxu1 %v14390_v1 }
 0xc13   : > { %3779 = vmatprep.mubr.f32.mxu0 %v13791_v0  ;;  %3850 = vmatprep.mubr.f32.mxu1 %v13791_v0 }
 0xc15   : > { %10701 = vmatpush1.bf16.msra.mxu0 %v14394_v6  ;;  %10733 = vmatpush1.bf16.msra.mxu1 %v14396_v7 }
 0xc16   : > { %10703 = vmatprep.subr.bf16.mxu0 %v14400_v11  ;;  %10735 = vmatprep.subr.bf16.mxu1 %v14402_v12 }
 0xc19   : > { %10705 = vmatpush1.bf16.msra.mxu0 %v14408_v18  ;;  %10737 = vmatpush1.bf16.msra.mxu1 %v14410_v19 }
 0xc1a   : > { %10707 = vmatprep.subr.bf16.mxu0 %v14414_v23  ;;  %10739 = vmatprep.subr.bf16.mxu1 %v14416_v25 }
 0xc1d   : > { %10709 = vmatpush1.bf16.msra.mxu0 %v14422_v34  ;;  %10741 = vmatpush1.bf16.msra.mxu1 %v14424_v35 }
 0xc1e   : > { %10711 = vmatprep.subr.bf16.mxu0 %v14428_v39  ;;  %10743 = vmatprep.subr.bf16.mxu1 %v14430_v40 }
 0xc21   : > { %10713 = vmatpush1.bf16.msra.mxu0 %v14434_v49  ;;  %10745 = vmatpush1.bf16.msra.mxu1 %v14436_v50 }
 0xc22   : > { %10715 = vmatprep.subr.bf16.mxu0 %v14440_v38  ;;  %10747 = vmatprep.subr.bf16.mxu1 %v14442_v53 }
 0xc25   : > { %10717 = vmatpush1.bf16.msra.mxu0 %v14446_v41  ;;  %10749 = vmatpush1.bf16.msra.mxu1 %v14448_v61 }
 0xc26   : > { %10719 = vmatprep.subr.bf16.mxu0 %v14452_v4  ;;  %10751 = vmatprep.subr.bf16.mxu1 %v14454_v2 }
 0xc29   : > { %10721 = vmatpush1.bf16.msra.mxu0 %v14461_v28  ;;  %10753 = vmatpush1.bf16.msra.mxu1 %v14463_v16 }
 0xc2a   : > { %10723 = vmatprep.subr.bf16.mxu0 %v14467_v20  ;;  %10755 = vmatprep.subr.bf16.mxu1 %v14469_v21 }
 0xc2d   : > { %10725 = vmatpush1.bf16.msra.mxu0 %v14481_v32  ;;  %10757 = vmatpush1.bf16.msra.mxu1 %v14483_v33 }
 0xc2e   : > { %10759 = vmatprep.subr.bf16.mxu0 %v14376_v22  ;;  %10791 = vmatprep.subr.bf16.mxu1 %v14378_v24 }
 0xce3   : > { %v3583_v59 = vpop.f32.mrb[26].mxu0  ;;  %v3654_v3 = vpop.f32.mrb[26].mxu1 }
 0xce4   : > { %v3680_v51 = vadd.f32 %v3663_v42, %v3583_v59  ;;  %v3585_v10 = vpop.f32.mrb[27].mxu0  ;;  %v3656_v13 = vpop.f32.mrb[27].mxu1  ;;  %v3682_v15 = vadd.f32 %v3671_v45, %v3654_v3 }
 0xce5   : > { %v3681_v14 = vadd.f32 %v3667_v5, %v3585_v10  ;;  %v3683_v17 = vadd.f32 %v3675_v26, %v3656_v13 }
 0xce6   : > { %v3684_v29 = vadd.f32 %v3680_v51, %v14544_v30  ;;  %v3686_v54 = vadd.f32 %v3682_v15, %v14559_v9 }
 0xce7   : > { %v3685_v60 = vadd.f32 %v3681_v14, %v14548_v47  ;;  %v3687_v48 = vadd.f32 %v3683_v17, %v14554_v62 }
 0xce8   : > { %v9545_v36 = vmul.f32 -1.442695, %v3684_v29 }
 0xce9   : > { %v9546_v8 = vmul.f32 -1.442695, %v3685_v60  ;;  %v9547_v52 = vmul.f32 -1.442695, %v3687_v48 }
 0xcea   : > { %12739 = vpow2.f32 %v9545_v36 }
 0xceb   : > { %12741 = vpow2.f32 %v9546_v8 }
 0xcec   : > { %12743 = vpow2.f32 %v9547_v52 }
 0xced   : > { %12745 = vtanh.f32 %v3686_v54 }
 0xcf4   : > { %v12740_v55 = vpop.eup %12739 }
 0xcf5   : > { %v12742_v58 = vpop.eup %12741  ;;  %v3691_v42 = vadd.f32 1.0, %v12740_v55 }
 0xcf6   : > { %v3697_v59 = vadd.f32 1.0, %v12742_v58  ;;  %v12744_v5 = vpop.eup %12743 }
 0xcf7   : > { %12747 = vrcp.f32 %v3691_v42  ;;  %v12746_v51 = vpop.eup %12745  ;;  %v3704_v37 = vadd.f32 1.0, %v12744_v5 }
 0xcf8   : > { %12749 = vrcp.f32 %v3697_v59 }
 0xcf9   : > { %12751 = vrcp.f32 %v3704_v37 }
 0xd01   : > { %v12748_v10 = vpop.eup %12747 }
 0xd02   : > { %v12750_v13 = vpop.eup %12749  ;;  %v3708_v14 = vmul.f32 %v12748_v10, %v12746_v51 }
 0xd03   : > { %v3707_v29 = vmul.f32 %v12750_v13, %v14799_v27  ;;  %v12752_v60 = vpop.eup %12751  ;;  %v3714_v27 = vld [vmem:[#allocation3 + $0x7] ss:$8 sm:$0xf] }
 0xd04   : > { %v3861_v8 = vrot.slane %v3714_v27, %v14477_v31  ;;  %v3865_v48 = vrot.slane %v3714_v27, %v14531_v44  ;;  %v3873_v59 = vrot.slane %v3714_v27, %v14535_v46  ;;  %v3869_v13 = vrot.slane %v3714_v27, %v14528_v43 }
 0xd05   : > { %v14845_v3 = vadd.f32 %v3708_v14, %v3707_v29 }
 0xd07   : > { %12753 = vtanh.f32 %v14845_v3 }
 0xd11   : > { %v12754_v26 = vpop.eup %12753 }
 0xd12   : > { %v3711_v36 = vmul.f32 %v12754_v26, %v12752_v60 }
 0xd14   : > { %3712 = vst [vmem:[#allocation5 + $0x6] sm:$0x1] %v3711_v36  ;;  %3780 = vmatmul.mubr.f32.vlgmr.msra.gmra.mrb[28].mxu0 %v3711_v36  ;;  %3851 = vmatmul.mubr.f32.vlgmr.msra.gmra.mrb[28].mxu1 %v3711_v36 }
 0xd15   : > { %10761 = vmatpush1.bf16.msra.mxu0 %v14384_v56  ;;  %10793 = vmatpush1.bf16.msra.mxu1 %v14386_v57 }
 0xd16   : > { %10763 = vmatprep.subr.bf16.mxu0 %v14388_v63  ;;  %10795 = vmatprep.subr.bf16.mxu1 %v14390_v1 }
 0xd17   : > { %3977 = vmatprep.mubr.f32.mxu0 %v13791_v0  ;;  %4048 = vmatprep.mubr.f32.mxu1 %v13791_v0 }
 0xd19   : > { %10765 = vmatpush1.bf16.msra.mxu0 %v14394_v6  ;;  %10797 = vmatpush1.bf16.msra.mxu1 %v14396_v7 }
 0xd1a   : > { %10767 = vmatprep.subr.bf16.mxu0 %v14400_v11  ;;  %10799 = vmatprep.subr.bf16.mxu1 %v14402_v12 }
 0xd1d   : > { %10769 = vmatpush1.bf16.msra.mxu0 %v14408_v18  ;;  %10801 = vmatpush1.bf16.msra.mxu1 %v14410_v19 }
 0xd1e   : > { %10771 = vmatprep.subr.bf16.mxu0 %v14414_v23  ;;  %10803 = vmatprep.subr.bf16.mxu1 %v14416_v25 }
 0xd21   : > { %10773 = vmatpush1.bf16.msra.mxu0 %v14422_v34  ;;  %10805 = vmatpush1.bf16.msra.mxu1 %v14424_v35 }
 0xd22   : > { %10775 = vmatprep.subr.bf16.mxu0 %v14428_v39  ;;  %10807 = vmatprep.subr.bf16.mxu1 %v14430_v40 }
 0xd25   : > { %10777 = vmatpush1.bf16.msra.mxu0 %v14434_v49  ;;  %10809 = vmatpush1.bf16.msra.mxu1 %v14436_v50 }
 0xd26   : > { %10779 = vmatprep.subr.bf16.mxu0 %v14440_v38  ;;  %10811 = vmatprep.subr.bf16.mxu1 %v14442_v53 }
 0xd29   : > { %10781 = vmatpush1.bf16.msra.mxu0 %v14446_v41  ;;  %10813 = vmatpush1.bf16.msra.mxu1 %v14448_v61 }
 0xd2a   : > { %10783 = vmatprep.subr.bf16.mxu0 %v14452_v4  ;;  %10815 = vmatprep.subr.bf16.mxu1 %v14454_v2 }
 0xd2d   : > { %10785 = vmatpush1.bf16.msra.mxu0 %v14461_v28  ;;  %10817 = vmatpush1.bf16.msra.mxu1 %v14463_v16 }
 0xd2e   : > { %10787 = vmatprep.subr.bf16.mxu0 %v14467_v20  ;;  %10819 = vmatprep.subr.bf16.mxu1 %v14469_v21 }
 0xd31   : > { %10789 = vmatpush1.bf16.msra.mxu0 %v14481_v32  ;;  %10821 = vmatpush1.bf16.msra.mxu1 %v14483_v33 }
 0xd32   : > { %10823 = vmatprep.subr.bf16.mxu0 %v14376_v22  ;;  %10855 = vmatprep.subr.bf16.mxu1 %v14378_v24 }
 0xde7   : > { %v3781_v17 = vpop.f32.mrb[28].mxu0  ;;  %v3852_v45 = vpop.f32.mrb[28].mxu1 }
 0xde8   : > { %v3878_v15 = vadd.f32 %v3861_v8, %v3781_v17  ;;  %v3783_v52 = vpop.f32.mrb[29].mxu0  ;;  %v3854_v54 = vpop.f32.mrb[29].mxu1  ;;  %v3880_v37 = vadd.f32 %v3869_v13, %v3852_v45 }
 0xde9   : > { %v3879_v55 = vadd.f32 %v3865_v48, %v3783_v52  ;;  %v3881_v10 = vadd.f32 %v3873_v59, %v3854_v54 }
 0xdea   : > { %v3882_v58 = vadd.f32 %v3878_v15, %v14544_v30  ;;  %v3884_v60 = vadd.f32 %v3880_v37, %v14559_v9 }
 0xdeb   : > { %v3883_v42 = vadd.f32 %v3879_v55, %v14548_v47  ;;  %v3885_v14 = vadd.f32 %v3881_v10, %v14554_v62 }
 0xdec   : > { %v9548_v5 = vmul.f32 -1.442695, %v3882_v58 }
 0xded   : > { %v9549_v51 = vmul.f32 -1.442695, %v3883_v42  ;;  %v9550_v29 = vmul.f32 -1.442695, %v3885_v14 }
 0xdee   : > { %12755 = vpow2.f32 %v9548_v5 }
 0xdef   : > { %12757 = vpow2.f32 %v9549_v51 }
 0xdf0   : > { %12759 = vpow2.f32 %v9550_v29 }
 0xdf1   : > { %12761 = vtanh.f32 %v3884_v60 }
 0xdf8   : > { %v12756_v26 = vpop.eup %12755 }
 0xdf9   : > { %v12758_v36 = vpop.eup %12757  ;;  %v3889_v8 = vadd.f32 1.0, %v12756_v26 }
 0xdfa   : > { %v3895_v17 = vadd.f32 1.0, %v12758_v36  ;;  %v12760_v48 = vpop.eup %12759 }
 0xdfb   : > { %12763 = vrcp.f32 %v3889_v8  ;;  %v12762_v15 = vpop.eup %12761  ;;  %v3902_v27 = vadd.f32 1.0, %v12760_v48 }
 0xdfc   : > { %12765 = vrcp.f32 %v3895_v17 }
 0xdfd   : > { %12767 = vrcp.f32 %v3902_v27 }
 0xe05   : > { %v12764_v52 = vpop.eup %12763 }
 0xe06   : > { %v12766_v54 = vpop.eup %12765  ;;  %v3906_v55 = vmul.f32 %v12764_v52, %v12762_v15 }
 0xe07   : > { %v3905_v58 = vmul.f32 %v12766_v54, %v14845_v3  ;;  %v12768_v42 = vpop.eup %12767  ;;  %v3912_v3 = vld [vmem:[#allocation3 + $0x20] ss:$8 sm:$0xf] }
 0xe08   : > { %v4059_v51 = vrot.slane %v3912_v3, %v14477_v31  ;;  %v4063_v14 = vrot.slane %v3912_v3, %v14531_v44  ;;  %v4071_v17 = vrot.slane %v3912_v3, %v14535_v46  ;;  %v4067_v54 = vrot.slane %v3912_v3, %v14528_v43 }
 0xe09   : > { %v14891_v45 = vadd.f32 %v3906_v55, %v3905_v58 }
 0xe0b   : > { %12769 = vtanh.f32 %v14891_v45 }
 0xe15   : > { %v12770_v59 = vpop.eup %12769 }
 0xe16   : > { %v3909_v5 = vmul.f32 %v12770_v59, %v12768_v42 }
 0xe18   : > { %3910 = vst [vmem:[#allocation5 + $0x7] sm:$0x1] %v3909_v5  ;;  %3978 = vmatmul.mubr.f32.vlgmr.msra.gmra.mrb[30].mxu0 %v3909_v5  ;;  %4049 = vmatmul.mubr.f32.vlgmr.msra.gmra.mrb[30].mxu1 %v3909_v5 }
 0xe19   : > { %10825 = vmatpush1.bf16.msra.mxu0 %v14384_v56  ;;  %10857 = vmatpush1.bf16.msra.mxu1 %v14386_v57 }
 0xe1a   : > { %10827 = vmatprep.subr.bf16.mxu0 %v14388_v63  ;;  %10859 = vmatprep.subr.bf16.mxu1 %v14390_v1 }
 0xe1b   : > { %4175 = vmatprep.mubr.f32.mxu0 %v13791_v0  ;;  %4246 = vmatprep.mubr.f32.mxu1 %v13791_v0 }
 0xe1d   : > { %10829 = vmatpush1.bf16.msra.mxu0 %v14394_v6  ;;  %10861 = vmatpush1.bf16.msra.mxu1 %v14396_v7 }
 0xe1e   : > { %10831 = vmatprep.subr.bf16.mxu0 %v14400_v11  ;;  %10863 = vmatprep.subr.bf16.mxu1 %v14402_v12 }
 0xe21   : > { %10833 = vmatpush1.bf16.msra.mxu0 %v14408_v18  ;;  %10865 = vmatpush1.bf16.msra.mxu1 %v14410_v19 }
 0xe22   : > { %10835 = vmatprep.subr.bf16.mxu0 %v14414_v23  ;;  %10867 = vmatprep.subr.bf16.mxu1 %v14416_v25 }
 0xe25   : > { %10837 = vmatpush1.bf16.msra.mxu0 %v14422_v34  ;;  %10869 = vmatpush1.bf16.msra.mxu1 %v14424_v35 }
 0xe26   : > { %10839 = vmatprep.subr.bf16.mxu0 %v14428_v39  ;;  %10871 = vmatprep.subr.bf16.mxu1 %v14430_v40 }
 0xe29   : > { %10841 = vmatpush1.bf16.msra.mxu0 %v14434_v49  ;;  %10873 = vmatpush1.bf16.msra.mxu1 %v14436_v50 }
 0xe2a   : > { %10843 = vmatprep.subr.bf16.mxu0 %v14440_v38  ;;  %10875 = vmatprep.subr.bf16.mxu1 %v14442_v53 }
 0xe2d   : > { %10845 = vmatpush1.bf16.msra.mxu0 %v14446_v41  ;;  %10877 = vmatpush1.bf16.msra.mxu1 %v14448_v61 }
 0xe2e   : > { %10847 = vmatprep.subr.bf16.mxu0 %v14452_v4  ;;  %10879 = vmatprep.subr.bf16.mxu1 %v14454_v2 }
 0xe31   : > { %10849 = vmatpush1.bf16.msra.mxu0 %v14461_v28  ;;  %10881 = vmatpush1.bf16.msra.mxu1 %v14463_v16 }
 0xe32   : > { %10851 = vmatprep.subr.bf16.mxu0 %v14467_v20  ;;  %10883 = vmatprep.subr.bf16.mxu1 %v14469_v21 }
 0xe35   : > { %10853 = vmatpush1.bf16.msra.mxu0 %v14481_v32  ;;  %10885 = vmatpush1.bf16.msra.mxu1 %v14483_v33 }
 0xe36   : > { %10887 = vmatprep.subr.bf16.mxu0 %v14376_v22  ;;  %10919 = vmatprep.subr.bf16.mxu1 %v14378_v24 }
 0xeeb   : > { %v3979_v10 = vpop.f32.mrb[30].mxu0  ;;  %v4050_v13 = vpop.f32.mrb[30].mxu1 }
 0xeec   : > { %v4076_v37 = vadd.f32 %v4059_v51, %v3979_v10  ;;  %v3981_v29 = vpop.f32.mrb[31].mxu0  ;;  %v4052_v60 = vpop.f32.mrb[31].mxu1  ;;  %v4078_v27 = vadd.f32 %v4067_v54, %v4050_v13 }
 0xeed   : > { %v4077_v26 = vadd.f32 %v4063_v14, %v3981_v29  ;;  %v4079_v52 = vadd.f32 %v4071_v17, %v4052_v60 }
 0xeee   : > { %v4080_v36 = vadd.f32 %v4076_v37, %v14544_v30  ;;  %v4082_v42 = vadd.f32 %v4078_v27, %v14559_v9 }
 0xeef   : > { %v4081_v8 = vadd.f32 %v4077_v26, %v14548_v47  ;;  %v4083_v55 = vadd.f32 %v4079_v52, %v14554_v62 }
 0xef0   : > { %v9551_v48 = vmul.f32 -1.442695, %v4080_v36 }
 0xef1   : > { %v9552_v15 = vmul.f32 -1.442695, %v4081_v8  ;;  %v9553_v58 = vmul.f32 -1.442695, %v4083_v55 }
 0xef2   : > { %12771 = vpow2.f32 %v9551_v48 }
 0xef3   : > { %12773 = vpow2.f32 %v9552_v15 }
 0xef4   : > { %12775 = vpow2.f32 %v9553_v58 }
 0xef5   : > { %12777 = vtanh.f32 %v4082_v42 }
 0xefc   : > { %v12772_v59 = vpop.eup %12771 }
 0xefd   : > { %v12774_v5 = vpop.eup %12773  ;;  %v4087_v51 = vadd.f32 1.0, %v12772_v59 }
 0xefe   : > { %v4093_v10 = vadd.f32 1.0, %v12774_v5  ;;  %v12776_v14 = vpop.eup %12775 }
 0xeff   : > { %12779 = vrcp.f32 %v4087_v51  ;;  %v12778_v37 = vpop.eup %12777  ;;  %v4100_v3 = vadd.f32 1.0, %v12776_v14 }
 0xf00   : > { %12781 = vrcp.f32 %v4093_v10 }
 0xf01   : > { %12783 = vrcp.f32 %v4100_v3 }
 0xf09   : > { %v12780_v29 = vpop.eup %12779 }
 0xf0a   : > { %v12782_v60 = vpop.eup %12781  ;;  %v4104_v26 = vmul.f32 %v12780_v29, %v12778_v37 }
 0xf0b   : > { %v4103_v36 = vmul.f32 %v12782_v60, %v14891_v45  ;;  %v12784_v8 = vpop.eup %12783  ;;  %v4110_v45 = vld [vmem:[#allocation3 + $0x21] ss:$8 sm:$0xf] }
 0xf0c   : > { %v4257_v15 = vrot.slane %v4110_v45, %v14477_v31  ;;  %v4261_v55 = vrot.slane %v4110_v45, %v14531_v44  ;;  %v4269_v10 = vrot.slane %v4110_v45, %v14535_v46  ;;  %v4265_v60 = vrot.slane %v4110_v45, %v14528_v43 }
 0xf0d   : > { %v14937_v13 = vadd.f32 %v4104_v26, %v4103_v36 }
 0xf0f   : > { %12785 = vtanh.f32 %v14937_v13 }
 0xf19   : > { %v12786_v17 = vpop.eup %12785 }
 0xf1a   : > { %v4107_v48 = vmul.f32 %v12786_v17, %v12784_v8 }
 0xf1c   : > { %4108 = vst [vmem:[#allocation5 + $0x8] sm:$0x1] %v4107_v48  ;;  %4176 = vmatmul.mubr.f32.vlgmr.msra.gmra.mrb[32].mxu0 %v4107_v48  ;;  %4247 = vmatmul.mubr.f32.vlgmr.msra.gmra.mrb[32].mxu1 %v4107_v48 }
 0xf1d   : > { %10889 = vmatpush1.bf16.msra.mxu0 %v14384_v56  ;;  %10921 = vmatpush1.bf16.msra.mxu1 %v14386_v57 }
 0xf1e   : > { %10891 = vmatprep.subr.bf16.mxu0 %v14388_v63  ;;  %10923 = vmatprep.subr.bf16.mxu1 %v14390_v1 }
 0xf1f   : > { %4373 = vmatprep.mubr.f32.mxu0 %v13791_v0  ;;  %4444 = vmatprep.mubr.f32.mxu1 %v13791_v0 }
 0xf21   : > { %10893 = vmatpush1.bf16.msra.mxu0 %v14394_v6  ;;  %10925 = vmatpush1.bf16.msra.mxu1 %v14396_v7 }
 0xf22   : > { %10895 = vmatprep.subr.bf16.mxu0 %v14400_v11  ;;  %10927 = vmatprep.subr.bf16.mxu1 %v14402_v12 }
 0xf25   : > { %10897 = vmatpush1.bf16.msra.mxu0 %v14408_v18  ;;  %10929 = vmatpush1.bf16.msra.mxu1 %v14410_v19 }
 0xf26   : > { %10899 = vmatprep.subr.bf16.mxu0 %v14414_v23  ;;  %10931 = vmatprep.subr.bf16.mxu1 %v14416_v25 }
 0xf29   : > { %10901 = vmatpush1.bf16.msra.mxu0 %v14422_v34  ;;  %10933 = vmatpush1.bf16.msra.mxu1 %v14424_v35 }
 0xf2a   : > { %10903 = vmatprep.subr.bf16.mxu0 %v14428_v39  ;;  %10935 = vmatprep.subr.bf16.mxu1 %v14430_v40 }
 0xf2d   : > { %10905 = vmatpush1.bf16.msra.mxu0 %v14434_v49  ;;  %10937 = vmatpush1.bf16.msra.mxu1 %v14436_v50 }
 0xf2e   : > { %10907 = vmatprep.subr.bf16.mxu0 %v14440_v38  ;;  %10939 = vmatprep.subr.bf16.mxu1 %v14442_v53 }
 0xf31   : > { %10909 = vmatpush1.bf16.msra.mxu0 %v14446_v41  ;;  %10941 = vmatpush1.bf16.msra.mxu1 %v14448_v61 }
 0xf32   : > { %10911 = vmatprep.subr.bf16.mxu0 %v14452_v4  ;;  %10943 = vmatprep.subr.bf16.mxu1 %v14454_v2 }
 0xf35   : > { %10913 = vmatpush1.bf16.msra.mxu0 %v14461_v28  ;;  %10945 = vmatpush1.bf16.msra.mxu1 %v14463_v16 }
 0xf36   : > { %10915 = vmatprep.subr.bf16.mxu0 %v14467_v20  ;;  %10947 = vmatprep.subr.bf16.mxu1 %v14469_v21 }
 0xf39   : > { %10917 = vmatpush1.bf16.msra.mxu0 %v14481_v32  ;;  %10949 = vmatpush1.bf16.msra.mxu1 %v14483_v33 }
 0xf3a   : > { %10951 = vmatprep.subr.bf16.mxu0 %v14376_v22  ;;  %10983 = vmatprep.subr.bf16.mxu1 %v14378_v24 }
 0xfef   : > { %v4177_v52 = vpop.f32.mrb[32].mxu0  ;;  %v4248_v54 = vpop.f32.mrb[32].mxu1 }
 0xff0   : > { %v4274_v27 = vadd.f32 %v4257_v15, %v4177_v52  ;;  %v4179_v58 = vpop.f32.mrb[33].mxu0  ;;  %v4250_v42 = vpop.f32.mrb[33].mxu1  ;;  %v4276_v3 = vadd.f32 %v4265_v60, %v4248_v54 }
 0xff1   : > { %v4275_v59 = vadd.f32 %v4261_v55, %v4179_v58  ;;  %v4277_v29 = vadd.f32 %v4269_v10, %v4250_v42 }
 0xff2   : > { %v4278_v5 = vadd.f32 %v4274_v27, %v14544_v30  ;;  %v4280_v8 = vadd.f32 %v4276_v3, %v14559_v9 }
 0xff3   : > { %v4279_v51 = vadd.f32 %v4275_v59, %v14548_v47  ;;  %v4281_v26 = vadd.f32 %v4277_v29, %v14554_v62 }
 0xff4   : > { %v9554_v14 = vmul.f32 -1.442695, %v4278_v5 }
 0xff5   : > { %v9555_v37 = vmul.f32 -1.442695, %v4279_v51  ;;  %v9556_v36 = vmul.f32 -1.442695, %v4281_v26 }
 0xff6   : > { %12787 = vpow2.f32 %v9554_v14 }
 0xff7   : > { %12789 = vpow2.f32 %v9555_v37 }
 0xff8   : > { %12791 = vpow2.f32 %v9556_v36 }
 0xff9   : > { %12793 = vtanh.f32 %v4280_v8 }
0x1000   : > { %v12788_v17 = vpop.eup %12787 }
0x1001   : > { %v12790_v48 = vpop.eup %12789  ;;  %v4285_v15 = vadd.f32 1.0, %v12788_v17 }
0x1002   : > { %v4291_v52 = vadd.f32 1.0, %v12790_v48  ;;  %v12792_v55 = vpop.eup %12791 }
0x1003   : > { %12795 = vrcp.f32 %v4285_v15  ;;  %v12794_v27 = vpop.eup %12793  ;;  %v4298_v45 = vadd.f32 1.0, %v12792_v55 }
0x1004   : > { %12797 = vrcp.f32 %v4291_v52 }
0x1005   : > { %12799 = vrcp.f32 %v4298_v45 }
0x100d   : > { %v12796_v58 = vpop.eup %12795 }
0x100e   : > { %v12798_v42 = vpop.eup %12797  ;;  %v4302_v59 = vmul.f32 %v12796_v58, %v12794_v27 }
0x100f   : > { %v4301_v5 = vmul.f32 %v12798_v42, %v14937_v13  ;;  %v12800_v51 = vpop.eup %12799  ;;  %v4308_v13 = vld [vmem:[#allocation3 + $0x22] ss:$8 sm:$0xf] }
0x1010   : > { %v4455_v37 = vrot.slane %v4308_v13, %v14477_v31  ;;  %v4459_v26 = vrot.slane %v4308_v13, %v14531_v44  ;;  %v4467_v52 = vrot.slane %v4308_v13, %v14535_v46  ;;  %v4463_v42 = vrot.slane %v4308_v13, %v14528_v43 }
0x1011   : > { %v14983_v54 = vadd.f32 %v4302_v59, %v4301_v5 }
0x1013   : > { %12801 = vtanh.f32 %v14983_v54 }
0x101d   : > { %v12802_v10 = vpop.eup %12801 }
0x101e   : > { %v4305_v14 = vmul.f32 %v12802_v10, %v12800_v51 }
0x1020   : > { %4306 = vst [vmem:[#allocation5 + $0x9] sm:$0x1] %v4305_v14  ;;  %4374 = vmatmul.mubr.f32.vlgmr.msra.gmra.mrb[34].mxu0 %v4305_v14  ;;  %4445 = vmatmul.mubr.f32.vlgmr.msra.gmra.mrb[34].mxu1 %v4305_v14 }
0x1021   : > { %10953 = vmatpush1.bf16.msra.mxu0 %v14384_v56  ;;  %10985 = vmatpush1.bf16.msra.mxu1 %v14386_v57 }
0x1022   : > { %10955 = vmatprep.subr.bf16.mxu0 %v14388_v63  ;;  %10987 = vmatprep.subr.bf16.mxu1 %v14390_v1 }
0x1023   : > { %4571 = vmatprep.mubr.f32.mxu0 %v13791_v0  ;;  %4642 = vmatprep.mubr.f32.mxu1 %v13791_v0 }
0x1025   : > { %10957 = vmatpush1.bf16.msra.mxu0 %v14394_v6  ;;  %10989 = vmatpush1.bf16.msra.mxu1 %v14396_v7 }
0x1026   : > { %10959 = vmatprep.subr.bf16.mxu0 %v14400_v11  ;;  %10991 = vmatprep.subr.bf16.mxu1 %v14402_v12 }
0x1029   : > { %10961 = vmatpush1.bf16.msra.mxu0 %v14408_v18  ;;  %10993 = vmatpush1.bf16.msra.mxu1 %v14410_v19 }
0x102a   : > { %10963 = vmatprep.subr.bf16.mxu0 %v14414_v23  ;;  %10995 = vmatprep.subr.bf16.mxu1 %v14416_v25 }
0x102d   : > { %10965 = vmatpush1.bf16.msra.mxu0 %v14422_v34  ;;  %10997 = vmatpush1.bf16.msra.mxu1 %v14424_v35 }
0x102e   : > { %10967 = vmatprep.subr.bf16.mxu0 %v14428_v39  ;;  %10999 = vmatprep.subr.bf16.mxu1 %v14430_v40 }
0x1031   : > { %10969 = vmatpush1.bf16.msra.mxu0 %v14434_v49  ;;  %11001 = vmatpush1.bf16.msra.mxu1 %v14436_v50 }
0x1032   : > { %10971 = vmatprep.subr.bf16.mxu0 %v14440_v38  ;;  %11003 = vmatprep.subr.bf16.mxu1 %v14442_v53 }
0x1035   : > { %10973 = vmatpush1.bf16.msra.mxu0 %v14446_v41  ;;  %11005 = vmatpush1.bf16.msra.mxu1 %v14448_v61 }
0x1036   : > { %10975 = vmatprep.subr.bf16.mxu0 %v14452_v4  ;;  %11007 = vmatprep.subr.bf16.mxu1 %v14454_v2 }
0x1039   : > { %10977 = vmatpush1.bf16.msra.mxu0 %v14461_v28  ;;  %11009 = vmatpush1.bf16.msra.mxu1 %v14463_v16 }
0x103a   : > { %10979 = vmatprep.subr.bf16.mxu0 %v14467_v20  ;;  %11011 = vmatprep.subr.bf16.mxu1 %v14469_v21 }
0x103d   : > { %10981 = vmatpush1.bf16.msra.mxu0 %v14481_v32  ;;  %11013 = vmatpush1.bf16.msra.mxu1 %v14483_v33 }
0x103e   : > { %11015 = vmatprep.subr.bf16.mxu0 %v14376_v22  ;;  %11047 = vmatprep.subr.bf16.mxu1 %v14378_v24 }
0x10f3   : > { %v4375_v29 = vpop.f32.mrb[34].mxu0  ;;  %v4446_v60 = vpop.f32.mrb[34].mxu1 }
0x10f4   : > { %v4472_v3 = vadd.f32 %v4455_v37, %v4375_v29  ;;  %v4377_v36 = vpop.f32.mrb[35].mxu0  ;;  %v4448_v8 = vpop.f32.mrb[35].mxu1  ;;  %v4474_v45 = vadd.f32 %v4463_v42, %v4446_v60 }
0x10f5   : > { %v4473_v17 = vadd.f32 %v4459_v26, %v4377_v36  ;;  %v4475_v58 = vadd.f32 %v4467_v52, %v4448_v8 }
0x10f6   : > { %v4476_v48 = vadd.f32 %v4472_v3, %v14544_v30  ;;  %v4478_v51 = vadd.f32 %v4474_v45, %v14559_v9 }
0x10f7   : > { %v4477_v15 = vadd.f32 %v4473_v17, %v14548_v47  ;;  %v4479_v59 = vadd.f32 %v4475_v58, %v14554_v62 }
0x10f8   : > { %v9557_v55 = vmul.f32 -1.442695, %v4476_v48 }
0x10f9   : > { %v9558_v27 = vmul.f32 -1.442695, %v4477_v15  ;;  %v9559_v5 = vmul.f32 -1.442695, %v4479_v59 }
0x10fa   : > { %12803 = vpow2.f32 %v9557_v55 }
0x10fb   : > { %12805 = vpow2.f32 %v9558_v27 }
0x10fc   : > { %12807 = vpow2.f32 %v9559_v5 }
0x10fd   : > { %12809 = vtanh.f32 %v4478_v51 }
0x1104   : > { %v12804_v10 = vpop.eup %12803 }
0x1105   : > { %v12806_v14 = vpop.eup %12805  ;;  %v4483_v37 = vadd.f32 1.0, %v12804_v10 }
0x1106   : > { %v4489_v29 = vadd.f32 1.0, %v12806_v14  ;;  %v12808_v26 = vpop.eup %12807 }
0x1107   : > { %12811 = vrcp.f32 %v4483_v37  ;;  %v12810_v3 = vpop.eup %12809  ;;  %v4496_v13 = vadd.f32 1.0, %v12808_v26 }
0x1108   : > { %12813 = vrcp.f32 %v4489_v29 }
0x1109   : > { %12815 = vrcp.f32 %v4496_v13 }
0x1111   : > { %v12812_v36 = vpop.eup %12811 }
0x1112   : > { %v12814_v8 = vpop.eup %12813  ;;  %v4500_v17 = vmul.f32 %v12812_v36, %v12810_v3 }
0x1113   : > { %v4499_v48 = vmul.f32 %v12814_v8, %v14983_v54  ;;  %v12816_v15 = vpop.eup %12815  ;;  %v4506_v54 = vld [vmem:[#allocation3 + $0x23] ss:$8 sm:$0xf] }
0x1114   : > { %v4653_v27 = vrot.slane %v4506_v54, %v14477_v31  ;;  %v4657_v59 = vrot.slane %v4506_v54, %v14531_v44  ;;  %v4665_v29 = vrot.slane %v4506_v54, %v14535_v46  ;;  %v4661_v8 = vrot.slane %v4506_v54, %v14528_v43 }
0x1115   : > { %v15029_v60 = vadd.f32 %v4500_v17, %v4499_v48 }
0x1117   : > { %12817 = vtanh.f32 %v15029_v60 }
0x1121   : > { %v12818_v52 = vpop.eup %12817 }
0x1122   : > { %v4503_v55 = vmul.f32 %v12818_v52, %v12816_v15 }
0x1124   : > { %4504 = vst [vmem:[#allocation5 + $0xa] sm:$0x1] %v4503_v55  ;;  %4572 = vmatmul.mubr.f32.vlgmr.msra.gmra.mrb[36].mxu0 %v4503_v55  ;;  %4643 = vmatmul.mubr.f32.vlgmr.msra.gmra.mrb[36].mxu1 %v4503_v55 }
0x1125   : > { %11017 = vmatpush1.bf16.msra.mxu0 %v14384_v56  ;;  %11049 = vmatpush1.bf16.msra.mxu1 %v14386_v57 }
0x1126   : > { %11019 = vmatprep.subr.bf16.mxu0 %v14388_v63  ;;  %11051 = vmatprep.subr.bf16.mxu1 %v14390_v1 }
0x1127   : > { %4769 = vmatprep.mubr.f32.mxu0 %v13791_v0  ;;  %4840 = vmatprep.mubr.f32.mxu1 %v13791_v0 }
0x1129   : > { %11021 = vmatpush1.bf16.msra.mxu0 %v14394_v6  ;;  %11053 = vmatpush1.bf16.msra.mxu1 %v14396_v7 }
0x112a   : > { %11023 = vmatprep.subr.bf16.mxu0 %v14400_v11  ;;  %11055 = vmatprep.subr.bf16.mxu1 %v14402_v12 }
0x112d   : > { %11025 = vmatpush1.bf16.msra.mxu0 %v14408_v18  ;;  %11057 = vmatpush1.bf16.msra.mxu1 %v14410_v19 }
0x112e   : > { %11027 = vmatprep.subr.bf16.mxu0 %v14414_v23  ;;  %11059 = vmatprep.subr.bf16.mxu1 %v14416_v25 }
0x1131   : > { %11029 = vmatpush1.bf16.msra.mxu0 %v14422_v34  ;;  %11061 = vmatpush1.bf16.msra.mxu1 %v14424_v35 }
0x1132   : > { %11031 = vmatprep.subr.bf16.mxu0 %v14428_v39  ;;  %11063 = vmatprep.subr.bf16.mxu1 %v14430_v40 }
0x1135   : > { %11033 = vmatpush1.bf16.msra.mxu0 %v14434_v49  ;;  %11065 = vmatpush1.bf16.msra.mxu1 %v14436_v50 }
0x1136   : > { %11035 = vmatprep.subr.bf16.mxu0 %v14440_v38  ;;  %11067 = vmatprep.subr.bf16.mxu1 %v14442_v53 }
0x1139   : > { %11037 = vmatpush1.bf16.msra.mxu0 %v14446_v41  ;;  %11069 = vmatpush1.bf16.msra.mxu1 %v14448_v61 }
0x113a   : > { %11039 = vmatprep.subr.bf16.mxu0 %v14452_v4  ;;  %11071 = vmatprep.subr.bf16.mxu1 %v14454_v2 }
0x113d   : > { %11041 = vmatpush1.bf16.msra.mxu0 %v14461_v28  ;;  %11073 = vmatpush1.bf16.msra.mxu1 %v14463_v16 }
0x113e   : > { %11043 = vmatprep.subr.bf16.mxu0 %v14467_v20  ;;  %11075 = vmatprep.subr.bf16.mxu1 %v14469_v21 }
0x1141   : > { %11045 = vmatpush1.bf16.msra.mxu0 %v14481_v32  ;;  %11077 = vmatpush1.bf16.msra.mxu1 %v14483_v33 }
0x1142   : > { %11079 = vmatprep.subr.bf16.mxu0 %v14376_v22  ;;  %11111 = vmatprep.subr.bf16.mxu1 %v14378_v24 }
0x11f7   : > { %v4573_v58 = vpop.f32.mrb[36].mxu0  ;;  %v4644_v42 = vpop.f32.mrb[36].mxu1 }
0x11f8   : > { %v4670_v45 = vadd.f32 %v4653_v27, %v4573_v58  ;;  %v4575_v5 = vpop.f32.mrb[37].mxu0  ;;  %v4646_v51 = vpop.f32.mrb[37].mxu1  ;;  %v4672_v13 = vadd.f32 %v4661_v8, %v4644_v42 }
0x11f9   : > { %v4671_v10 = vadd.f32 %v4657_v59, %v4575_v5  ;;  %v4673_v36 = vadd.f32 %v4665_v29, %v4646_v51 }
0x11fa   : > { %v4674_v14 = vadd.f32 %v4670_v45, %v14544_v30  ;;  %v4676_v15 = vadd.f32 %v4672_v13, %v14559_v9 }
0x11fb   : > { %v4675_v37 = vadd.f32 %v4671_v10, %v14548_v47  ;;  %v4677_v17 = vadd.f32 %v4673_v36, %v14554_v62 }
0x11fc   : > { %v9560_v26 = vmul.f32 -1.442695, %v4674_v14 }
0x11fd   : > { %v9561_v3 = vmul.f32 -1.442695, %v4675_v37  ;;  %v9562_v48 = vmul.f32 -1.442695, %v4677_v17 }
0x11fe   : > { %12819 = vpow2.f32 %v9560_v26 }
0x11ff   : > { %12821 = vpow2.f32 %v9561_v3 }
0x1200   : > { %12823 = vpow2.f32 %v9562_v48 }
0x1201   : > { %12825 = vtanh.f32 %v4676_v15 }
0x1208   : > { %v12820_v52 = vpop.eup %12819 }
0x1209   : > { %v12822_v55 = vpop.eup %12821  ;;  %v4681_v27 = vadd.f32 1.0, %v12820_v52 }
0x120a   : > { %v4687_v58 = vadd.f32 1.0, %v12822_v55  ;;  %v12824_v59 = vpop.eup %12823 }
0x120b   : > { %12827 = vrcp.f32 %v4681_v27  ;;  %v12826_v45 = vpop.eup %12825  ;;  %v4694_v54 = vadd.f32 1.0, %v12824_v59 }
0x120c   : > { %12829 = vrcp.f32 %v4687_v58 }
0x120d   : > { %12831 = vrcp.f32 %v4694_v54 }
0x1215   : > { %v12828_v5 = vpop.eup %12827 }
0x1216   : > { %v12830_v51 = vpop.eup %12829  ;;  %v4698_v10 = vmul.f32 %v12828_v5, %v12826_v45 }
0x1217   : > { %v4697_v14 = vmul.f32 %v12830_v51, %v15029_v60  ;;  %v12832_v37 = vpop.eup %12831  ;;  %v4704_v60 = vld [vmem:[#allocation3 + $0x24] ss:$8 sm:$0xf] }
0x1218   : > { %v4851_v3 = vrot.slane %v4704_v60, %v14477_v31  ;;  %v4855_v17 = vrot.slane %v4704_v60, %v14531_v44  ;;  %v4863_v58 = vrot.slane %v4704_v60, %v14535_v46  ;;  %v4859_v51 = vrot.slane %v4704_v60, %v14528_v43 }
0x1219   : > { %v15075_v42 = vadd.f32 %v4698_v10, %v4697_v14 }
0x121b   : > { %12833 = vtanh.f32 %v15075_v42 }
0x1225   : > { %v12834_v29 = vpop.eup %12833 }
0x1226   : > { %v4701_v26 = vmul.f32 %v12834_v29, %v12832_v37 }
0x1228   : > { %4702 = vst [vmem:[#allocation5 + $0xb] sm:$0x1] %v4701_v26  ;;  %4770 = vmatmul.mubr.f32.vlgmr.msra.gmra.mrb[38].mxu0 %v4701_v26  ;;  %4841 = vmatmul.mubr.f32.vlgmr.msra.gmra.mrb[38].mxu1 %v4701_v26 }
0x1229   : > { %11081 = vmatpush1.bf16.msra.mxu0 %v14384_v56  ;;  %11113 = vmatpush1.bf16.msra.mxu1 %v14386_v57 }
0x122a   : > { %11083 = vmatprep.subr.bf16.mxu0 %v14388_v63  ;;  %11115 = vmatprep.subr.bf16.mxu1 %v14390_v1 }
0x122b   : > { %4967 = vmatprep.mubr.f32.mxu0 %v13791_v0  ;;  %5038 = vmatprep.mubr.f32.mxu1 %v13791_v0 }
0x122d   : > { %11085 = vmatpush1.bf16.msra.mxu0 %v14394_v6  ;;  %11117 = vmatpush1.bf16.msra.mxu1 %v14396_v7 }
0x122e   : > { %11087 = vmatprep.subr.bf16.mxu0 %v14400_v11  ;;  %11119 = vmatprep.subr.bf16.mxu1 %v14402_v12 }
0x1231   : > { %11089 = vmatpush1.bf16.msra.mxu0 %v14408_v18  ;;  %11121 = vmatpush1.bf16.msra.mxu1 %v14410_v19 }
0x1232   : > { %11091 = vmatprep.subr.bf16.mxu0 %v14414_v23  ;;  %11123 = vmatprep.subr.bf16.mxu1 %v14416_v25 }
0x1235   : > { %11093 = vmatpush1.bf16.msra.mxu0 %v14422_v34  ;;  %11125 = vmatpush1.bf16.msra.mxu1 %v14424_v35 }
0x1236   : > { %11095 = vmatprep.subr.bf16.mxu0 %v14428_v39  ;;  %11127 = vmatprep.subr.bf16.mxu1 %v14430_v40 }
0x1239   : > { %11097 = vmatpush1.bf16.msra.mxu0 %v14434_v49  ;;  %11129 = vmatpush1.bf16.msra.mxu1 %v14436_v50 }
0x123a   : > { %11099 = vmatprep.subr.bf16.mxu0 %v14440_v38  ;;  %11131 = vmatprep.subr.bf16.mxu1 %v14442_v53 }
0x123d   : > { %11101 = vmatpush1.bf16.msra.mxu0 %v14446_v41  ;;  %11133 = vmatpush1.bf16.msra.mxu1 %v14448_v61 }
0x123e   : > { %11103 = vmatprep.subr.bf16.mxu0 %v14452_v4  ;;  %11135 = vmatprep.subr.bf16.mxu1 %v14454_v2 }
0x1241   : > { %11105 = vmatpush1.bf16.msra.mxu0 %v14461_v28  ;;  %11137 = vmatpush1.bf16.msra.mxu1 %v14463_v16 }
0x1242   : > { %11107 = vmatprep.subr.bf16.mxu0 %v14467_v20  ;;  %11139 = vmatprep.subr.bf16.mxu1 %v14469_v21 }
0x1245   : > { %11109 = vmatpush1.bf16.msra.mxu0 %v14481_v32  ;;  %11141 = vmatpush1.bf16.msra.mxu1 %v14483_v33 }
0x1246   : > { %11143 = vmatprep.subr.bf16.mxu0 %v14376_v22  ;;  %11175 = vmatprep.subr.bf16.mxu1 %v14378_v24 }
0x12fb   : > { %v4771_v36 = vpop.f32.mrb[38].mxu0  ;;  %v4842_v8 = vpop.f32.mrb[38].mxu1 }
0x12fc   : > { %v4868_v13 = vadd.f32 %v4851_v3, %v4771_v36  ;;  %v4773_v48 = vpop.f32.mrb[39].mxu0  ;;  %v4844_v15 = vpop.f32.mrb[39].mxu1  ;;  %v4870_v54 = vadd.f32 %v4859_v51, %v4842_v8 }
0x12fd   : > { %v4869_v52 = vadd.f32 %v4855_v17, %v4773_v48  ;;  %v4871_v5 = vadd.f32 %v4863_v58, %v4844_v15 }
0x12fe   : > { %v4872_v55 = vadd.f32 %v4868_v13, %v14544_v30  ;;  %v4874_v37 = vadd.f32 %v4870_v54, %v14559_v9 }
0x12ff   : > { %v4873_v27 = vadd.f32 %v4869_v52, %v14548_v47  ;;  %v4875_v10 = vadd.f32 %v4871_v5, %v14554_v62 }
0x1300   : > { %v9563_v59 = vmul.f32 -1.442695, %v4872_v55 }
0x1301   : > { %v9564_v45 = vmul.f32 -1.442695, %v4873_v27  ;;  %v9565_v14 = vmul.f32 -1.442695, %v4875_v10 }
0x1302   : > { %12835 = vpow2.f32 %v9563_v59 }
0x1303   : > { %12837 = vpow2.f32 %v9564_v45 }
0x1304   : > { %12839 = vpow2.f32 %v9565_v14 }
0x1305   : > { %12841 = vtanh.f32 %v4874_v37 }
0x130c   : > { %v12836_v29 = vpop.eup %12835 }
0x130d   : > { %v12838_v26 = vpop.eup %12837  ;;  %v4879_v3 = vadd.f32 1.0, %v12836_v29 }
0x130e   : > { %v4885_v36 = vadd.f32 1.0, %v12838_v26  ;;  %v12840_v17 = vpop.eup %12839 }
0x130f   : > { %12843 = vrcp.f32 %v4879_v3  ;;  %v12842_v13 = vpop.eup %12841  ;;  %v4892_v60 = vadd.f32 1.0, %v12840_v17 }
0x1310   : > { %12845 = vrcp.f32 %v4885_v36 }
0x1311   : > { %12847 = vrcp.f32 %v4892_v60 }
0x1319   : > { %v12844_v48 = vpop.eup %12843 }
0x131a   : > { %v12846_v15 = vpop.eup %12845  ;;  %v4896_v52 = vmul.f32 %v12844_v48, %v12842_v13 }
0x131b   : > { %v4895_v55 = vmul.f32 %v12846_v15, %v15075_v42  ;;  %v12848_v27 = vpop.eup %12847  ;;  %v4902_v42 = vld [vmem:[#allocation3 + $0x25] ss:$8 sm:$0xf] }
0x131c   : > { %v5049_v45 = vrot.slane %v4902_v42, %v14477_v31  ;;  %v5053_v10 = vrot.slane %v4902_v42, %v14531_v44  ;;  %v5061_v36 = vrot.slane %v4902_v42, %v14535_v46  ;;  %v5057_v13 = vrot.slane %v4902_v42, %v14528_v43 }
0x131d   : > { %v15121_v8 = vadd.f32 %v4896_v52, %v4895_v55 }
0x131f   : > { %12849 = vtanh.f32 %v15121_v8 }
0x1329   : > { %v12850_v58 = vpop.eup %12849 }
0x132a   : > { %v4899_v59 = vmul.f32 %v12850_v58, %v12848_v27 }
0x132c   : > { %4900 = vst [vmem:[#allocation5 + $0xc] sm:$0x1] %v4899_v59  ;;  %4968 = vmatmul.mubr.f32.vlgmr.msra.gmra.mrb[40].mxu0 %v4899_v59  ;;  %5039 = vmatmul.mubr.f32.vlgmr.msra.gmra.mrb[40].mxu1 %v4899_v59 }
0x132d   : > { %11145 = vmatpush1.bf16.msra.mxu0 %v14384_v56  ;;  %11177 = vmatpush1.bf16.msra.mxu1 %v14386_v57 }
0x132e   : > { %11147 = vmatprep.subr.bf16.mxu0 %v14388_v63  ;;  %11179 = vmatprep.subr.bf16.mxu1 %v14390_v1 }
0x132f   : > { %5165 = vmatprep.mubr.f32.mxu0 %v13791_v0  ;;  %5236 = vmatprep.mubr.f32.mxu1 %v13791_v0 }
0x1331   : > { %11149 = vmatpush1.bf16.msra.mxu0 %v14394_v6  ;;  %11181 = vmatpush1.bf16.msra.mxu1 %v14396_v7 }
0x1332   : > { %11151 = vmatprep.subr.bf16.mxu0 %v14400_v11  ;;  %11183 = vmatprep.subr.bf16.mxu1 %v14402_v12 }
0x1335   : > { %11153 = vmatpush1.bf16.msra.mxu0 %v14408_v18  ;;  %11185 = vmatpush1.bf16.msra.mxu1 %v14410_v19 }
0x1336   : > { %11155 = vmatprep.subr.bf16.mxu0 %v14414_v23  ;;  %11187 = vmatprep.subr.bf16.mxu1 %v14416_v25 }
0x1339   : > { %11157 = vmatpush1.bf16.msra.mxu0 %v14422_v34  ;;  %11189 = vmatpush1.bf16.msra.mxu1 %v14424_v35 }
0x133a   : > { %11159 = vmatprep.subr.bf16.mxu0 %v14428_v39  ;;  %11191 = vmatprep.subr.bf16.mxu1 %v14430_v40 }
0x133d   : > { %11161 = vmatpush1.bf16.msra.mxu0 %v14434_v49  ;;  %11193 = vmatpush1.bf16.msra.mxu1 %v14436_v50 }
0x133e   : > { %11163 = vmatprep.subr.bf16.mxu0 %v14440_v38  ;;  %11195 = vmatprep.subr.bf16.mxu1 %v14442_v53 }
0x1341   : > { %11165 = vmatpush1.bf16.msra.mxu0 %v14446_v41  ;;  %11197 = vmatpush1.bf16.msra.mxu1 %v14448_v61 }
0x1342   : > { %11167 = vmatprep.subr.bf16.mxu0 %v14452_v4  ;;  %11199 = vmatprep.subr.bf16.mxu1 %v14454_v2 }
0x1345   : > { %11169 = vmatpush1.bf16.msra.mxu0 %v14461_v28  ;;  %11201 = vmatpush1.bf16.msra.mxu1 %v14463_v16 }
0x1346   : > { %11171 = vmatprep.subr.bf16.mxu0 %v14467_v20  ;;  %11203 = vmatprep.subr.bf16.mxu1 %v14469_v21 }
0x1349   : > { %11173 = vmatpush1.bf16.msra.mxu0 %v14481_v32  ;;  %11205 = vmatpush1.bf16.msra.mxu1 %v14483_v33 }
0x134a   : > { %11207 = vmatprep.subr.bf16.mxu0 %v14376_v22  ;;  %11239 = vmatprep.subr.bf16.mxu1 %v14378_v24 }
0x13ff   : > { %v4969_v5 = vpop.f32.mrb[40].mxu0  ;;  %v5040_v51 = vpop.f32.mrb[40].mxu1 }
0x1400   : > { %v5066_v54 = vadd.f32 %v5049_v45, %v4969_v5  ;;  %v4971_v14 = vpop.f32.mrb[41].mxu0  ;;  %v5042_v37 = vpop.f32.mrb[41].mxu1  ;;  %v5068_v15 = vadd.f32 %v5057_v13, %v5040_v51 }
0x1401   : > { %v5067_v29 = vadd.f32 %v5053_v10, %v4971_v14  ;;  %v5069_v24 = vadd.f32 %v5061_v36, %v5042_v37 }
0x1402   : > { %v5070_v26 = vadd.f32 %v5066_v54, %v14544_v30  ;;  %v5072_v60 = vadd.f32 %v5068_v15, %v14559_v9 }
0x1403   : > { %v5071_v3 = vadd.f32 %v5067_v29, %v14548_v47  ;;  %v5073_v48 = vadd.f32 %v5069_v24, %v14554_v62 }
0x1404   : > { %v9566_v22 = vmul.f32 -1.442695, %v5070_v26 }
0x1405   : > { %v9567_v17 = vmul.f32 -1.442695, %v5071_v3  ;;  %v9568_v52 = vmul.f32 -1.442695, %v5073_v48 }
0x1406   : > { %12851 = vpow2.f32 %v9566_v22 }
0x1407   : > { %12853 = vpow2.f32 %v9567_v17 }
0x1408   : > { %12855 = vpow2.f32 %v9568_v52  ;;  %v5497_v52 = vld [vmem:[#allocation29] sm:$0xff] }
0x1409   : > { %12857 = vtanh.f32 %v5072_v60  ;;  %v5501_v60 = vld [vmem:[#allocation29 + $0x20] sm:$0xff] }
0x1410   : > { %v12852_v55 = vpop.eup %12851 }
0x1411   : > { %v12854_v27 = vpop.eup %12853  ;;  %v5077_v58 = vadd.f32 1.0, %v12852_v55  ;;  %v5499_v55 = vld [vmem:[#allocation29 + $0x10] sm:$0xff] }
0x1412   : > { %v5083_v59 = vadd.f32 1.0, %v12854_v27  ;;  %v12856_v45 = vpop.eup %12855  ;;  %v5503_v27 = vld [vmem:[#allocation29 + $0x30] sm:$0xff] }
0x1413   : > { %12859 = vrcp.f32 %v5077_v58  ;;  %v12858_v5 = vpop.eup %12857  ;;  %v5090_v42 = vadd.f32 1.0, %v12856_v45  ;;  %v5506_v58 = vld [vmem:[#allocation29 + $0x48] sm:$0xff]  ;;  %v5508_v45 = vld [vmem:[#allocation29 + $0x58] sm:$0xff] }
0x1414   : > { %12861 = vrcp.f32 %v5083_v59  ;;  %v5510_v59 = vld [vmem:[#allocation29 + $0x68] sm:$0xff] }
0x1415   : > { %12863 = vrcp.f32 %v5090_v42  ;;  %v11304_v42 = vpack.c.bf16 %v5503_v27, %v5499_v55  ;;  %v5542_v55 = vld [vmem:[#allocation29 + $0x168] sm:$0xff]  ;;  %v5540_v27 = vld [vmem:[#allocation29 + $0x158] sm:$0xff] }
0x141d   : > { %v12860_v10 = vpop.eup %12859 }
0x141e   : > { %v12862_v54 = vpop.eup %12861  ;;  %v5094_v14 = vmul.f32 %v12860_v10, %v12858_v5  ;;  %v5512_v5 = vld [vmem:[#allocation29 + $0x78] sm:$0xff] }
0x141f   : > { %v5093_v37 = vmul.f32 %v12862_v54, %v15121_v8  ;;  %v12864_v29 = vpop.eup %12863 }
0x1421   : > { %v15167_v51 = vadd.f32 %v5094_v14, %v5093_v37  ;;  %v11272_v14 = vpack.c.bf16 %v5501_v60, %v5497_v52  ;;  %v5505_v37 = vld [vmem:[#allocation29 + $0x40] sm:$0xff]  ;;  %v5535_v52 = vld [vmem:[#allocation29 + $0x130] sm:$0xff]  ;;  %v5538_v60 = vld [vmem:[#allocation29 + $0x148] sm:$0xff] }
0x1423   : > { %12865 = vtanh.f32 %v15167_v51 }
0x142d   : > { %v12866_v26 = vpop.eup %12865 }
0x142e   : > { %v5097_v3 = vmul.f32 %v12866_v26, %v12864_v29  ;;  %v5509_v29 = vld [vmem:[#allocation29 + $0x60] sm:$0xff]  ;;  %v11274_v26 = vpack.c.bf16 %v5510_v59, %v5506_v58  ;;  %v5544_v58 = vld [vmem:[#allocation29 + $0x178] sm:$0xff] }
0x1430   : > { %5098 = vst [vmem:[#allocation5 + $0xd] sm:$0x1] %v5097_v3  ;;  %5166 = vmatmul.mubr.f32.vlgmr.msra.gmra.mrb[42].mxu0 %v5097_v3  ;;  %5237 = vmatmul.mubr.f32.vlgmr.msra.gmra.mrb[42].mxu1 %v5097_v3  ;;  %v11306_v3 = vpack.c.bf16 %v5512_v5, %v5508_v45  ;;  %v5537_v5 = vld [vmem:[#allocation29 + $0x140] sm:$0xff] }
0x1431   : > { %11209 = vmatpush1.bf16.msra.mxu0 %v14384_v56  ;;  %11241 = vmatpush1.bf16.msra.mxu1 %v14386_v57  ;;  %v5498_v56 = vld [vmem:[#allocation29 + $0x8] sm:$0xff] }
0x1432   : > { %11211 = vmatprep.subr.bf16.mxu0 %v14388_v63  ;;  %11243 = vmatprep.subr.bf16.mxu1 %v14390_v1  ;;  %v5502_v57 = vld [vmem:[#allocation29 + $0x28] sm:$0xff]  ;;  %v5500_v63 = vld [vmem:[#allocation29 + $0x18] sm:$0xff] }
0x1433   : > { %5363 = vmatprep.mubr.f32.mxu0 %v13791_v0  ;;  %5434 = vmatprep.mubr.f32.mxu1 %v13791_v0  ;;  %v11270_v1 = vpack.c.bf16 %v5502_v57, %v5498_v56  ;;  %v5507_v56 = vld [vmem:[#allocation29 + $0x50] sm:$0xff] }
0x1434   : > { %v5511_v57 = vld [vmem:[#allocation29 + $0x70] sm:$0xff] }
0x1435   : > { %11213 = vmatpush1.bf16.msra.mxu0 %v14394_v6  ;;  %11245 = vmatpush1.bf16.msra.mxu1 %v14396_v7  ;;  %v5504_v6 = vld [vmem:[#allocation29 + $0x38] sm:$0xff] }
0x1436   : > { %11215 = vmatprep.subr.bf16.mxu0 %v14400_v11  ;;  %11247 = vmatprep.subr.bf16.mxu1 %v14402_v12  ;;  %v11302_v7 = vpack.c.bf16 %v5504_v6, %v5500_v63  ;;  %v5100_v11 = vld [vmem:[#allocation3 + $0x26] ss:$8 sm:$0xf] }
0x1437   : > { %v5247_v12 = vrot.slane %v5100_v11, %v14477_v31  ;;  %v5514_v63 = vld [vmem:[#allocation29 + $0x88] sm:$0xff]  ;;  %v5516_v6 = vld [vmem:[#allocation29 + $0x98] sm:$0xff] }
0x1439   : > { %11217 = vmatpush1.bf16.msra.mxu0 %v14408_v18  ;;  %11249 = vmatpush1.bf16.msra.mxu1 %v14410_v19 }
0x143a   : > { %11219 = vmatprep.subr.bf16.mxu0 %v14414_v23  ;;  %11251 = vmatprep.subr.bf16.mxu1 %v14416_v25  ;;  %v5251_v23 = vrot.slane %v5100_v11, %v14531_v44 }
0x143d   : > { %11221 = vmatpush1.bf16.msra.mxu0 %v14422_v34  ;;  %11253 = vmatpush1.bf16.msra.mxu1 %v14424_v35 }
0x143e   : > { %11223 = vmatprep.subr.bf16.mxu0 %v14428_v39  ;;  %11255 = vmatprep.subr.bf16.mxu1 %v14430_v40 }
0x1441   : > { %11225 = vmatpush1.bf16.msra.mxu0 %v14434_v49  ;;  %11257 = vmatpush1.bf16.msra.mxu1 %v14436_v50  ;;  %v5259_v50 = vrot.slane %v5100_v11, %v14535_v46 }
0x1442   : > { %11227 = vmatprep.subr.bf16.mxu0 %v14440_v38  ;;  %11259 = vmatprep.subr.bf16.mxu1 %v14442_v53 }
0x1445   : > { %11229 = vmatpush1.bf16.msra.mxu0 %v14446_v41  ;;  %11261 = vmatpush1.bf16.msra.mxu1 %v14448_v61  ;;  %v5255_v61 = vrot.slane %v5100_v11, %v14528_v43  ;;  %v11276_v11 = vpack.c.bf16 %v5509_v29, %v5505_v37  ;;  %v5543_v37 = vld [vmem:[#allocation29 + $0x170] sm:$0xff]  ;;  %v5546_v29 = vld [vmem:[#allocation29 + $0x188] sm:$0xff] }
0x1446   : > { %11231 = vmatprep.subr.bf16.mxu0 %v14452_v4  ;;  %11263 = vmatprep.subr.bf16.mxu1 %v14454_v2 }
0x1449   : > { %11233 = vmatpush1.bf16.msra.mxu0 %v14461_v28  ;;  %11265 = vmatpush1.bf16.msra.mxu1 %v14463_v16 }
0x144a   : > { %11235 = vmatprep.subr.bf16.mxu0 %v14467_v20  ;;  %11267 = vmatprep.subr.bf16.mxu1 %v14469_v21 }
0x144d   : > { %11237 = vmatpush1.bf16.msra.mxu0 %v14481_v32  ;;  %11269 = vmatpush1.bf16.msra.mxu1 %v14483_v33 }
0x144e   : > { %11271 = vmatprep.subr.bf16.mxu0 %v11270_v1  ;;  %11303 = vmatprep.subr.bf16.mxu1 %v11302_v7  ;;  %v5518_v1 = vld [vmem:[#allocation29 + $0xa8] sm:$0xff]  ;;  %v5520_v7 = vld [vmem:[#allocation29 + $0xb8] sm:$0xff] }
0x1503   : > { %v5167_v18 = vpop.f32.mrb[42].mxu0  ;;  %v5238_v19 = vpop.f32.mrb[42].mxu1 }
0x1504   : > { %v5264_v25 = vadd.f32 %v5247_v12, %v5167_v18  ;;  %v5169_v34 = vpop.f32.mrb[43].mxu0  ;;  %v5240_v35 = vpop.f32.mrb[43].mxu1  ;;  %v5266_v2 = vadd.f32 %v5255_v61, %v5238_v19  ;;  %v11308_v12 = vpack.c.bf16 %v5511_v57, %v5507_v56  ;;  %v5513_v18 = vld [vmem:[#allocation29 + $0x80] sm:$0xff] }
0x1505   : > { %v5265_v39 = vadd.f32 %v5251_v23, %v5169_v34  ;;  %v5267_v41 = vadd.f32 %v5259_v50, %v5240_v35  ;;  %v5517_v19 = vld [vmem:[#allocation29 + $0xa0] sm:$0xff]  ;;  %v11278_v23 = vpack.c.bf16 %v5518_v1, %v5514_v63  ;;  %v5515_v34 = vld [vmem:[#allocation29 + $0x90] sm:$0xff]  ;;  %v5528_v50 = vld [vmem:[#allocation29 + $0xf8] sm:$0xff] }
0x1506   : > { %v5268_v40 = vadd.f32 %v5264_v25, %v14544_v30  ;;  %v5270_v16 = vadd.f32 %v5266_v2, %v14559_v9  ;;  %v11310_v25 = vpack.c.bf16 %v5520_v7, %v5516_v6  ;;  %v5519_v35 = vld [vmem:[#allocation29 + $0xb0] sm:$0xff]  ;;  %v5525_v61 = vld [vmem:[#allocation29 + $0xe0] sm:$0xff] }
0x1507   : > { %v5269_v49 = vadd.f32 %v5265_v39, %v14548_v47  ;;  %v5271_v4 = vadd.f32 %v5267_v41, %v14554_v62  ;;  %v5522_v39 = vld [vmem:[#allocation29 + $0xc8] sm:$0xff]  ;;  %v5521_v41 = vld [vmem:[#allocation29 + $0xc0] sm:$0xff] }
0x1508   : > { %v9569_v38 = vmul.f32 -1.442695, %v5268_v40  ;;  %v5526_v40 = vld [vmem:[#allocation29 + $0xe8] sm:$0xff]  ;;  %v5545_v63 = vld [vmem:[#allocation29 + $0x180] sm:$0xff] }
0x1509   : > { %v9570_v53 = vmul.f32 -1.442695, %v5269_v49  ;;  %v9571_v28 = vmul.f32 -1.442695, %v5271_v4  ;;  %v5524_v49 = vld [vmem:[#allocation29 + $0xd8] sm:$0xff]  ;;  %v11282_v4 = vpack.c.bf16 %v5526_v40, %v5522_v39  ;;  %v5549_v1 = vld [vmem:[#allocation29 + $0x1a0] sm:$0xff] }
0x150a   : > { %12867 = vpow2.f32 %v9569_v38  ;;  %v11280_v38 = vpack.c.bf16 %v5517_v19, %v5513_v18  ;;  %v11314_v2 = vpack.c.bf16 %v5528_v50, %v5524_v49  ;;  %v5554_v18 = vld [vmem:[#allocation29 + $0x1c8] sm:$0xff]  ;;  %v5553_v39 = vld [vmem:[#allocation29 + $0x1c0] sm:$0xff] }
0x150b   : > { %12869 = vpow2.f32 %v9570_v53  ;;  %v11312_v53 = vpack.c.bf16 %v5519_v35, %v5515_v34  ;;  %v5558_v19 = vld [vmem:[#allocation29 + $0x1e8] sm:$0xff]  ;;  %v11296_v34 = vpack.c.bf16 %v5549_v1, %v5545_v63  ;;  %v5557_v50 = vld [vmem:[#allocation29 + $0x1e0] sm:$0xff]  ;;  %v5763_v63 = vld [vmem:[#allocation31 + $0x90] sm:$0xff] }
0x150c   : > { %12871 = vpow2.f32 %v9571_v28  ;;  %v5523_v28 = vld [vmem:[#allocation29 + $0xd0] sm:$0xff]  ;;  %v11298_v40 = vpack.c.bf16 %v5558_v19, %v5554_v18  ;;  %v5776_v19 = vld [vmem:[#allocation31 + $0xf8] sm:$0xff] }
0x150d   : > { %12873 = vtanh.f32 %v5270_v16  ;;  %v5527_v16 = vld [vmem:[#allocation29 + $0xf0] sm:$0xff] }
0x150e   : > { %v5767_v1 = vld [vmem:[#allocation31 + $0xb0] sm:$0xff] }
0x1514   : > { %v12868_v20 = vpop.eup %12867 }
0x1515   : > { %v12870_v21 = vpop.eup %12869  ;;  %v5275_v32 = vadd.f32 1.0, %v12868_v20  ;;  %v5530_v20 = vld [vmem:[#allocation29 + $0x108] sm:$0xff] }
0x1516   : > { %v5281_v33 = vadd.f32 1.0, %v12870_v21  ;;  %v12872_v8 = vpop.eup %12871  ;;  %v5534_v21 = vld [vmem:[#allocation29 + $0x128] sm:$0xff] }
0x1517   : > { %12875 = vrcp.f32 %v5275_v32  ;;  %v12874_v36 = vpop.eup %12873  ;;  %v5288_v13 = vadd.f32 1.0, %v12872_v8  ;;  %v5532_v32 = vld [vmem:[#allocation29 + $0x118] sm:$0xff]  ;;  %v11284_v8 = vpack.c.bf16 %v5525_v61, %v5521_v41  ;;  %v11300_v41 = vpack.c.bf16 %v5557_v50, %v5553_v39  ;;  %v5771_v39 = vld [vmem:[#allocation31 + $0xd0] sm:$0xff] }
0x1518   : > { %12877 = vrcp.f32 %v5281_v33  ;;  %v5536_v33 = vld [vmem:[#allocation29 + $0x138] sm:$0xff] }
0x1519   : > { %12879 = vrcp.f32 %v5288_v13  ;;  %v11318_v13 = vpack.c.bf16 %v5536_v33, %v5532_v32  ;;  %v5745_v32 = vld [vmem:[#allocation31] sm:$0xff] }
0x151a   : > { %v5749_v33 = vld [vmem:[#allocation31 + $0x20] sm:$0xff] }
0x1521   : > { %v12876_v22 = vpop.eup %12875 }
0x1522   : > { %v12878_v17 = vpop.eup %12877  ;;  %v5292_v24 = vmul.f32 %v12876_v22, %v12874_v36  ;;  %v11316_v36 = vpack.c.bf16 %v5527_v16, %v5523_v28  ;;  %v5529_v22 = vld [vmem:[#allocation29 + $0x100] sm:$0xff]  ;;  %v5750_v28 = vld [vmem:[#allocation31 + $0x28] sm:$0xff]  ;;  %v5748_v16 = vld [vmem:[#allocation31 + $0x18] sm:$0xff] }
0x1523   : > { %v5291_v48 = vmul.f32 %v12878_v17, %v15167_v51  ;;  %v12880_v10 = vpop.eup %12879  ;;  %v5533_v17 = vld [vmem:[#allocation29 + $0x120] sm:$0xff] }
0x1524   : > { %v11288_v59 = vpack.c.bf16 %v5533_v17, %v5529_v22  ;;  %v5747_v22 = vld [vmem:[#allocation31 + $0x10] sm:$0xff] }
0x1525   : > { %v15211_v15 = vadd.f32 %v5292_v24, %v5291_v48  ;;  %v11286_v24 = vpack.c.bf16 %v5534_v21, %v5530_v20  ;;  %v5531_v48 = vld [vmem:[#allocation29 + $0x110] sm:$0xff]  ;;  %v5752_v21 = vld [vmem:[#allocation31 + $0x38] sm:$0xff] }
0x1526   : > { %v11320_v45 = vpack.c.bf16 %v5535_v52, %v5531_v48  ;;  %v5751_v17 = vld [vmem:[#allocation31 + $0x30] sm:$0xff]  ;;  %v5758_v48 = vld [vmem:[#allocation31 + $0x68] sm:$0xff]  ;;  %v5756_v52 = vld [vmem:[#allocation31 + $0x58] sm:$0xff] }
0x1527   : > { %12881 = vtanh.f32 %v15211_v15 }
0x1531   : > { %v12882_v54 = vpop.eup %12881 }
0x1532   : > { %v5295_v51 = vmul.f32 %v12882_v54, %v12880_v10  ;;  %v5541_v10 = vld [vmem:[#allocation29 + $0x160] sm:$0xff]  ;;  %v11290_v54 = vpack.c.bf16 %v5542_v55, %v5538_v60  ;;  %v5760_v55 = vld [vmem:[#allocation31 + $0x78] sm:$0xff] }
0x1533   : > { %v11292_v56 = vpack.c.bf16 %v5541_v10, %v5537_v5  ;;  %v5755_v5 = vld [vmem:[#allocation31 + $0x50] sm:$0xff] }
0x1534   : > { %5296 = vst [vmem:[#allocation5 + $0xe] sm:$0x1] %v5295_v51  ;;  %5364 = vmatmul.mubr.f32.vlgmr.msra.gmra.mrb[44].mxu0 %v5295_v51  ;;  %5435 = vmatmul.mubr.f32.vlgmr.msra.gmra.mrb[44].mxu1 %v5295_v51  ;;  %v5550_v51 = vld [vmem:[#allocation29 + $0x1a8] sm:$0xff]  ;;  %v5759_v10 = vld [vmem:[#allocation31 + $0x70] sm:$0xff] }
0x1535   : > { %11273 = vmatpush1.bf16.msra.mxu0 %v11272_v14  ;;  %11305 = vmatpush1.bf16.msra.mxu1 %v11304_v42  ;;  %v11322_v14 = vpack.c.bf16 %v5544_v58, %v5540_v27  ;;  %v5539_v42 = vld [vmem:[#allocation29 + $0x150] sm:$0xff]  ;;  %v11294_v6 = vpack.c.bf16 %v5550_v51, %v5546_v29  ;;  %v5753_v27 = vld [vmem:[#allocation31 + $0x40] sm:$0xff]  ;;  %v5768_v51 = vld [vmem:[#allocation31 + $0xb8] sm:$0xff] }
0x1536   : > { %11275 = vmatprep.subr.bf16.mxu0 %v11274_v26  ;;  %11307 = vmatprep.subr.bf16.mxu1 %v11306_v3  ;;  %v5548_v26 = vld [vmem:[#allocation29 + $0x198] sm:$0xff]  ;;  %v11324_v57 = vpack.c.bf16 %v5543_v37, %v5539_v42  ;;  %v5757_v58 = vld [vmem:[#allocation31 + $0x60] sm:$0xff]  ;;  %v5766_v42 = vld [vmem:[#allocation31 + $0xa8] sm:$0xff] }
0x1537   : > { %5647 = vmatprep.mubr.f32.mxu0 %v13791_v0  ;;  %5724 = vmatprep.mubr.f32.mxu1 %v13791_v0  ;;  %v5552_v3 = vld [vmem:[#allocation29 + $0x1b8] sm:$0xff] }
0x1538   : > { %v11326_v7 = vpack.c.bf16 %v5552_v3, %v5548_v26  ;;  %v5764_v37 = vld [vmem:[#allocation31 + $0x98] sm:$0xff]  ;;  %v5761_v26 = vld [vmem:[#allocation31 + $0x80] sm:$0xff] }
0x1539   : > { %11277 = vmatpush1.bf16.msra.mxu0 %v11276_v11  ;;  %11309 = vmatpush1.bf16.msra.mxu1 %v11308_v12  ;;  %v5547_v11 = vld [vmem:[#allocation29 + $0x190] sm:$0xff]  ;;  %v5765_v3 = vld [vmem:[#allocation31 + $0xa0] sm:$0xff] }
0x153a   : > { %11279 = vmatprep.subr.bf16.mxu0 %v11278_v23  ;;  %11311 = vmatprep.subr.bf16.mxu1 %v11310_v25  ;;  %v5551_v12 = vld [vmem:[#allocation29 + $0x1b0] sm:$0xff]  ;;  %v5556_v23 = vld [vmem:[#allocation29 + $0x1d8] sm:$0xff] }
0x153b   : > { %v5560_v25 = vld [vmem:[#allocation29 + $0x1f8] sm:$0xff]  ;;  %v11328_v35 = vpack.c.bf16 %v5551_v12, %v5547_v11  ;;  %v5774_v11 = vld [vmem:[#allocation31 + $0xe8] sm:$0xff] }
0x153c   : > { %v11330_v49 = vpack.c.bf16 %v5560_v25, %v5556_v23  ;;  %v5772_v12 = vld [vmem:[#allocation31 + $0xd8] sm:$0xff]  ;;  %v5769_v23 = vld [vmem:[#allocation31 + $0xc0] sm:$0xff] }
0x153d   : > { %11281 = vmatpush1.bf16.msra.mxu0 %v11280_v38  ;;  %11313 = vmatpush1.bf16.msra.mxu1 %v11312_v53  ;;  %v5555_v38 = vld [vmem:[#allocation29 + $0x1d0] sm:$0xff]  ;;  %v5773_v25 = vld [vmem:[#allocation31 + $0xe0] sm:$0xff] }
0x153e   : > { %11283 = vmatprep.subr.bf16.mxu0 %v11282_v4  ;;  %11315 = vmatprep.subr.bf16.mxu1 %v11314_v2  ;;  %v5559_v53 = vld [vmem:[#allocation29 + $0x1f0] sm:$0xff]  ;;  %v5495_v4 = vld [vmem:[#allocation5] sm:$0xff]  ;;  %v5746_v2 = vld [vmem:[#allocation31 + $0x8] sm:$0xff] }
0x153f   : > { %v11332_v61 = vpack.c.bf16 %v5559_v53, %v5555_v38  ;;  %v15218_v20 = vpack.c.bf16 %v5750_v28, %v5746_v2  ;;  %v5782_v38 = vld [vmem:[#allocation31 + $0x128] sm:$0xff]  ;;  %v5780_v53 = vld [vmem:[#allocation31 + $0x118] sm:$0xff]  ;;  %v5777_v2 = vld [vmem:[#allocation31 + $0x100] sm:$0xff] }
0x1540   : > { %v5781_v28 = vld [vmem:[#allocation31 + $0x120] sm:$0xff] }
0x1541   : > { %11285 = vmatpush1.bf16.msra.mxu0 %v11284_v8  ;;  %11317 = vmatpush1.bf16.msra.mxu1 %v11316_v36  ;;  %v15220_v8 = vpack.c.bf16 %v5752_v21, %v5748_v16  ;;  %v15222_v36 = vpack.c.bf16 %v5749_v33, %v5745_v32  ;;  %v5779_v16 = vld [vmem:[#allocation31 + $0x110] sm:$0xff]  ;;  %v15270_v21 = vpack.c.bf16 %v5781_v28, %v5777_v2  ;;  %v5786_v33 = vld [vmem:[#allocation31 + $0x148] sm:$0xff]  ;;  %v5805_v2 = vld [vmem:[#allocation31 + $0x1e0] sm:$0xff] }
0x1542   : > { %11287 = vmatprep.subr.bf16.mxu0 %v11286_v24  ;;  %11319 = vmatprep.subr.bf16.mxu1 %v11318_v13  ;;  %v15225_v24 = vpack.c.bf16 %v5751_v17, %v5747_v22  ;;  %v5754_v13 = vld [vmem:[#allocation31 + $0x48] sm:$0xff]  ;;  %v5783_v32 = vld [vmem:[#allocation31 + $0x130] sm:$0xff] }
0x1543   : > { %v15230_v60 = vpack.c.bf16 %v5758_v48, %v5754_v13  ;;  %v5790_v22 = vld [vmem:[#allocation31 + $0x168] sm:$0xff]  ;;  %v15274_v17 = vpack.c.bf16 %v5783_v32, %v5779_v16  ;;  %v5788_v48 = vld [vmem:[#allocation31 + $0x158] sm:$0xff]  ;;  %v5803_v16 = vld [vmem:[#allocation31 + $0x1d0] sm:$0xff] }
0x1544   : > { %v15276_v13 = vpack.c.bf16 %v5790_v22, %v5786_v33  ;;  %v5807_v32 = vld [vmem:[#allocation31 + $0x1f0] sm:$0xff] }
0x1545   : > { %11289 = vmatpush1.bf16.msra.mxu0 %v11288_v59  ;;  %11321 = vmatpush1.bf16.msra.mxu1 %v11320_v45  ;;  %v15232_v59 = vpack.c.bf16 %v5760_v55, %v5756_v52  ;;  %v15234_v45 = vpack.c.bf16 %v5757_v58, %v5753_v27  ;;  %v5792_v52 = vld [vmem:[#allocation31 + $0x178] sm:$0xff]  ;;  %v5785_v55 = vld [vmem:[#allocation31 + $0x140] sm:$0xff]  ;;  %v15309_v22 = vpack.c.bf16 %v5807_v32, %v5803_v16 }
0x1546   : > { %11291 = vmatprep.subr.bf16.mxu0 %v11290_v54  ;;  %11323 = vmatprep.subr.bf16.mxu1 %v11322_v14  ;;  %v15237_v54 = vpack.c.bf16 %v5759_v10, %v5755_v5  ;;  %v5762_v14 = vld [vmem:[#allocation31 + $0x88] sm:$0xff]  ;;  %v15278_v27 = vpack.c.bf16 %v5792_v52, %v5788_v48  ;;  %v5789_v58 = vld [vmem:[#allocation31 + $0x160] sm:$0xff]  ;;  %v5787_v5 = vld [vmem:[#allocation31 + $0x150] sm:$0xff] }
0x1547   : > { %v15242_v29 = vpack.c.bf16 %v5766_v42, %v5762_v14  ;;  %v5791_v10 = vld [vmem:[#allocation31 + $0x170] sm:$0xff]  ;;  %v15281_v14 = vpack.c.bf16 %v5789_v58, %v5785_v55  ;;  %v5794_v42 = vld [vmem:[#allocation31 + $0x188] sm:$0xff] }
0x1548   : > { %v5298_v48 = vld [vmem:[#allocation3 + $0x27] ss:$8 sm:$0xf] }
0x1549   : > { %11293 = vmatpush1.bf16.msra.mxu0 %v11292_v56  ;;  %11325 = vmatpush1.bf16.msra.mxu1 %v11324_v57  ;;  %v15244_v56 = vpack.c.bf16 %v5768_v51, %v5764_v37  ;;  %v15246_v57 = vpack.c.bf16 %v5765_v3, %v5761_v26  ;;  %v5798_v37 = vld [vmem:[#allocation31 + $0x1a8] sm:$0xff]  ;;  %v5796_v51 = vld [vmem:[#allocation31 + $0x198] sm:$0xff]  ;;  %v15285_v26 = vpack.c.bf16 %v5791_v10, %v5787_v5 }
0x154a   : > { %11295 = vmatprep.subr.bf16.mxu0 %v11294_v6  ;;  %11327 = vmatprep.subr.bf16.mxu1 %v11326_v7  ;;  %v15249_v6 = vpack.c.bf16 %v5767_v1, %v5763_v63  ;;  %v5770_v7 = vld [vmem:[#allocation31 + $0xc8] sm:$0xff]  ;;  %v15287_v3 = vpack.c.bf16 %v5798_v37, %v5794_v42  ;;  %v5800_v63 = vld [vmem:[#allocation31 + $0x1b8] sm:$0xff]  ;;  %v5793_v1 = vld [vmem:[#allocation31 + $0x180] sm:$0xff]  ;;  %v5445_v52 = vrot.slane %v5298_v48, %v14477_v31 }
0x154b   : > { %v15254_v18 = vpack.c.bf16 %v5774_v11, %v5770_v7  ;;  %v5797_v7 = vld [vmem:[#allocation31 + $0x1a0] sm:$0xff]  ;;  %v15290_v11 = vpack.c.bf16 %v5800_v63, %v5796_v51  ;;  %v5449_v5 = vrot.slane %v5298_v48, %v14531_v44 }
0x154d   : > { %11297 = vmatpush1.bf16.msra.mxu0 %v11296_v34  ;;  %11329 = vmatpush1.bf16.msra.mxu1 %v11328_v35  ;;  %v15256_v34 = vpack.c.bf16 %v5776_v19, %v5772_v12  ;;  %v15258_v35 = vpack.c.bf16 %v5773_v25, %v5769_v23  ;;  %v5795_v12 = vld [vmem:[#allocation31 + $0x190] sm:$0xff]  ;;  %v5802_v23 = vld [vmem:[#allocation31 + $0x1c8] sm:$0xff] }
0x154e   : > { %11299 = vmatprep.subr.bf16.mxu0 %v11298_v40  ;;  %11331 = vmatprep.subr.bf16.mxu1 %v11330_v49  ;;  %v5775_v40 = vld [vmem:[#allocation31 + $0xf0] sm:$0xff]  ;;  %v5778_v49 = vld [vmem:[#allocation31 + $0x108] sm:$0xff] }
0x154f   : > { %v15261_v50 = vpack.c.bf16 %v5775_v40, %v5771_v39  ;;  %v5799_v19 = vld [vmem:[#allocation31 + $0x1b0] sm:$0xff]  ;;  %v5806_v25 = vld [vmem:[#allocation31 + $0x1e8] sm:$0xff]  ;;  %v5804_v39 = vld [vmem:[#allocation31 + $0x1d8] sm:$0xff] }
0x1550   : > { %v5808_v40 = vld [vmem:[#allocation31 + $0x1f8] sm:$0xff] }
0x1551   : > { %11301 = vmatpush1.bf16.msra.mxu0 %v11300_v41  ;;  %11333 = vmatpush1.bf16.msra.mxu1 %v11332_v61  ;;  %v5784_v41 = vld [vmem:[#allocation31 + $0x138] sm:$0xff]  ;;  %v15265_v61 = vpack.c.bf16 %v5782_v38, %v5778_v49  ;;  %v15293_v49 = vpack.c.bf16 %v5797_v7, %v5793_v1  ;;  %v15297_v38 = vpack.c.bf16 %v5799_v19, %v5795_v12 }
0x1552   : > { %11335 = vmatprep.subr.bf16.mxu0 %v15218_v20  ;;  %11367 = vmatprep.subr.bf16.mxu1 %v15220_v8  ;;  %v15302_v28 = vpack.c.bf16 %v5808_v40, %v5804_v39  ;;  %v5457_v7 = vrot.slane %v5298_v48, %v14535_v46 }
0x1554   : > { %5648 = vmatmul.mubr.f32.vlgmr.msra.gmra.mrb[46].mxu0 %v5495_v4  ;;  %5725 = vmatmul.mubr.f32.vlgmr.msra.gmra.mrb[46].mxu1 %v5495_v4  ;;  %v15267_v4 = vpack.c.bf16 %v5784_v41, %v5780_v53  ;;  %v15299_v53 = vpack.c.bf16 %v5806_v25, %v5802_v23  ;;  %v5801_v41 = vld [vmem:[#allocation31 + $0x1c0] sm:$0xff]  ;;  %v5453_v25 = vrot.slane %v5298_v48, %v14528_v43 }
0x1555   : > { %5653 = vmatprep.mubr.f32.mxu0 %v13791_v0  ;;  %5730 = vmatprep.mubr.f32.mxu1 %v13791_v0  ;;  %v15305_v33 = vpack.c.bf16 %v5805_v2, %v5801_v41 }
0x1556   : > { %11337 = vmatpush1.bf16.msra.mxu0 %v15222_v36  ;;  %11369 = vmatpush1.bf16.msra.mxu1 %v15225_v24 }
0x1557   : > { %11339 = vmatprep.subr.bf16.mxu0 %v15230_v60  ;;  %11371 = vmatprep.subr.bf16.mxu1 %v15232_v59 }
0x155a   : > { %11341 = vmatpush1.bf16.msra.mxu0 %v15234_v45  ;;  %11373 = vmatpush1.bf16.msra.mxu1 %v15237_v54 }
0x155b   : > { %11343 = vmatprep.subr.bf16.mxu0 %v15242_v29  ;;  %11375 = vmatprep.subr.bf16.mxu1 %v15244_v56 }
0x155e   : > { %11345 = vmatpush1.bf16.msra.mxu0 %v15246_v57  ;;  %11377 = vmatpush1.bf16.msra.mxu1 %v15249_v6 }
0x155f   : > { %11347 = vmatprep.subr.bf16.mxu0 %v15254_v18  ;;  %11379 = vmatprep.subr.bf16.mxu1 %v15256_v34 }
0x1562   : > { %11349 = vmatpush1.bf16.msra.mxu0 %v15258_v35  ;;  %11381 = vmatpush1.bf16.msra.mxu1 %v15261_v50 }
0x1563   : > { %11351 = vmatprep.subr.bf16.mxu0 %v15265_v61  ;;  %11383 = vmatprep.subr.bf16.mxu1 %v15267_v4 }
0x1566   : > { %11353 = vmatpush1.bf16.msra.mxu0 %v15270_v21  ;;  %11385 = vmatpush1.bf16.msra.mxu1 %v15274_v17 }
0x1567   : > { %11355 = vmatprep.subr.bf16.mxu0 %v15276_v13  ;;  %11387 = vmatprep.subr.bf16.mxu1 %v15278_v27 }
0x156a   : > { %11357 = vmatpush1.bf16.msra.mxu0 %v15281_v14  ;;  %11389 = vmatpush1.bf16.msra.mxu1 %v15285_v26 }
0x156b   : > { %11359 = vmatprep.subr.bf16.mxu0 %v15287_v3  ;;  %11391 = vmatprep.subr.bf16.mxu1 %v15290_v11 }
0x156e   : > { %11361 = vmatpush1.bf16.msra.mxu0 %v15293_v49  ;;  %11393 = vmatpush1.bf16.msra.mxu1 %v15297_v38 }
0x156f   : > { %11363 = vmatprep.subr.bf16.mxu0 %v15299_v53  ;;  %11395 = vmatprep.subr.bf16.mxu1 %v15302_v28 }
0x1572   : > { %11365 = vmatpush1.bf16.msra.mxu0 %v15305_v33  ;;  %11397 = vmatpush1.bf16.msra.mxu1 %v15309_v22 }
0x1573   : > { %11399 = vmatprep.subr.bf16.mxu0 %v15218_v20  ;;  %11431 = vmatprep.subr.bf16.mxu1 %v15220_v8 }
0x1607   : > { %v5365_v55 = vpop.f32.mrb[44].mxu0  ;;  %v5436_v58 = vpop.f32.mrb[44].mxu1 }
0x1608   : > { %v5462_v10 = vadd.f32 %v5445_v52, %v5365_v55  ;;  %v5367_v42 = vpop.f32.mrb[45].mxu0  ;;  %v5438_v37 = vpop.f32.mrb[45].mxu1  ;;  %v5464_v40 = vadd.f32 %v5453_v25, %v5436_v58  ;;  %v5561_v52 = vld [vmem:[%s16174_s9] sm:$0xf] }
0x1609   : > { %v5463_v51 = vadd.f32 %v5449_v5, %v5367_v42  ;;  %v5465_v23 = vadd.f32 %v5457_v7, %v5438_v37  ;;  %v15335_v58 = vrot.slane %v5561_v52, %v14535_v46 }
0x160a   : > { %v5466_v63 = vadd.f32 %v5462_v10, %v14544_v30  ;;  %v5468_v2 = vadd.f32 %v5464_v40, %v14559_v9  ;;  %v15326_v10 = vrot.slane %v5561_v52, %v14477_v31  ;;  %v15332_v9 = vrot.slane %v5561_v52, %v14531_v44 }
0x160b   : > { %v5467_v1 = vadd.f32 %v5463_v51, %v14548_v47  ;;  %v5469_v39 = vadd.f32 %v5465_v23, %v14554_v62  ;;  %v15329_v62 = vrot.slane %v5561_v52, %v14528_v43 }
0x160c   : > { %v9572_v12 = vmul.f32 -1.442695, %v5466_v63 }
0x160d   : > { %v9573_v19 = vmul.f32 -1.442695, %v5467_v1  ;;  %v9574_v41 = vmul.f32 -1.442695, %v5469_v39 }
0x160e   : > { %12883 = vpow2.f32 %v9572_v12 }
0x160f   : > { %12885 = vpow2.f32 %v9573_v19 }
0x1610   : > { %12887 = vpow2.f32 %v9574_v41 }
0x1611   : > { %12889 = vtanh.f32 %v5468_v2 }
0x1618   : > { %v12884_v16 = vpop.eup %12883 }
0x1619   : > { %v12886_v30 = vpop.eup %12885  ;;  %v5473_v32 = vadd.f32 1.0, %v12884_v16 }
0x161a   : > { %v5479_v47 = vadd.f32 1.0, %v12886_v30  ;;  %v12888_v55 = vpop.eup %12887 }
0x161b   : > { %12891 = vrcp.f32 %v5473_v32  ;;  %v12890_v5 = vpop.eup %12889  ;;  %v5486_v51 = vadd.f32 1.0, %v12888_v55  ;;  %v13155_v32 = vld [vmem:[%s14474_s22] sm:$0x3] }
0x161c   : > { %12893 = vrcp.f32 %v5479_v47  ;;  %v5813_v47 = vrot.slane %v13155_v32, %v14531_v44 }
0x161d   : > { %12895 = vrcp.f32 %v5486_v51 }
0x1625   : > { %v12892_v48 = vpop.eup %12891 }
0x1626   : > { %v12894_v42 = vpop.eup %12893  ;;  %v5490_v37 = vmul.f32 %v12892_v48, %v12890_v5  ;;  %v5809_v48 = vld [vmem:[%s16175_s8] sm:$0xf] }
0x1627   : > { %v5489_v63 = vmul.f32 %v12894_v42, %v15211_v15  ;;  %v5649_v1 = vpop.f32.mrb[46].mxu0  ;;  %v5726_v7 = vpop.f32.mrb[46].mxu1 }
0x1628   : > { %v5650_v12 = vadd.f32 %v5649_v1, %v15326_v10  ;;  %v5727_v19 = vadd.f32 %v5726_v7, %v15329_v62  ;;  %v5651_v23 = vpop.f32.mrb[47].mxu0  ;;  %v5728_v25 = vpop.f32.mrb[47].mxu1 }
0x1629   : > { %v5491_v39 = vadd.f32 %v5490_v37, %v5489_v63  ;;  %v5652_v40 = vadd.f32 %v5651_v23, %v15332_v9  ;;  %v5729_v41 = vadd.f32 %v5728_v25, %v15335_v58  ;;  %v12896_v15 = vpop.eup %12895 }
0x162a   : > { %5737 = vst [vmem:[#allocation4] sm:$0xff] %v5650_v12  ;;  %5739 = vst [vmem:[#allocation4 + $0x10] sm:$0xff] %v5727_v19  ;;  %v15387_v19 = vrot.slane %v5809_v48, %v14477_v31 }
0x162b   : > { %12897 = vtanh.f32 %v5491_v39  ;;  %5738 = vst [vmem:[#allocation4 + $0x8] sm:$0xff] %v5652_v40  ;;  %5740 = vst [vmem:[#allocation4 + $0x18] sm:$0xff] %v5729_v41 }
0x1632   : > { %v5818_v52 = vld [vmem:[#allocation4] ss:$8 sm:$0xf] }
0x1633   : > { %v5965_v12 = vrot.slane %v5818_v52, %v14477_v31 }
0x1635   : > { %v12898_v2 = vpop.eup %12897 }
0x1636   : > { %v5493_v16 = vmul.f32 %v12898_v2, %v12896_v15  ;;  %v5977_v2 = vrot.slane %v5818_v52, %v14535_v46 }
0x1638   : > { %5494 = vst [vmem:[#allocation5 + $0xf] sm:$0x1] %v5493_v16 }
0x163f   : > { %v5496_v30 = vld [vmem:[#allocation5 + $0x8] sm:$0xff] }
0x1640   : > { %5654 = vmatmul.mubr.f32.gmra.mrb[48].mxu0 %v5496_v30  ;;  %5731 = vmatmul.mubr.f32.gmra.mrb[48].mxu1 %v5496_v30 }
0x1641   : > { %5883 = vmatprep.mubr.f32.mxu0 %v13791_v0  ;;  %5954 = vmatprep.mubr.f32.mxu1 %v13791_v0 }
0x1644   : > { %5884 = vmatmul.mubr.f32.vlgmr.msra.gmra.mrb[50].mxu0 %v5813_v47  ;;  %5955 = vmatmul.mubr.f32.vlgmr.msra.gmra.mrb[50].mxu1 %v5813_v47  ;;  %v15397_v47 = vrot.slane %v5809_v48, %v14535_v46 }
0x1645   : > { %11401 = vmatpush1.bf16.msra.mxu0 %v15222_v36  ;;  %11433 = vmatpush1.bf16.msra.mxu1 %v15225_v24 }
0x1646   : > { %11403 = vmatprep.subr.bf16.mxu0 %v15230_v60  ;;  %11435 = vmatprep.subr.bf16.mxu1 %v15232_v59 }
0x1647   : > { %6101 = vmatprep.mubr.f32.mxu0 %v13791_v0  ;;  %6172 = vmatprep.mubr.f32.mxu1 %v13791_v0 }
0x1649   : > { %11405 = vmatpush1.bf16.msra.mxu0 %v15234_v45  ;;  %11437 = vmatpush1.bf16.msra.mxu1 %v15237_v54 }
0x164a   : > { %11407 = vmatprep.subr.bf16.mxu0 %v15242_v29  ;;  %11439 = vmatprep.subr.bf16.mxu1 %v15244_v56 }
0x164d   : > { %11409 = vmatpush1.bf16.msra.mxu0 %v15246_v57  ;;  %11441 = vmatpush1.bf16.msra.mxu1 %v15249_v6 }
0x164e   : > { %11411 = vmatprep.subr.bf16.mxu0 %v15254_v18  ;;  %11443 = vmatprep.subr.bf16.mxu1 %v15256_v34 }
0x1651   : > { %11413 = vmatpush1.bf16.msra.mxu0 %v15258_v35  ;;  %11445 = vmatpush1.bf16.msra.mxu1 %v15261_v50 }
0x1652   : > { %11415 = vmatprep.subr.bf16.mxu0 %v15265_v61  ;;  %11447 = vmatprep.subr.bf16.mxu1 %v15267_v4 }
0x1655   : > { %11417 = vmatpush1.bf16.msra.mxu0 %v15270_v21  ;;  %11449 = vmatpush1.bf16.msra.mxu1 %v15274_v17 }
0x1656   : > { %11419 = vmatprep.subr.bf16.mxu0 %v15276_v13  ;;  %11451 = vmatprep.subr.bf16.mxu1 %v15278_v27 }
0x1659   : > { %11421 = vmatpush1.bf16.msra.mxu0 %v15281_v14  ;;  %11453 = vmatpush1.bf16.msra.mxu1 %v15285_v26 }
0x165a   : > { %11423 = vmatprep.subr.bf16.mxu0 %v15287_v3  ;;  %11455 = vmatprep.subr.bf16.mxu1 %v15290_v11 }
0x165d   : > { %11425 = vmatpush1.bf16.msra.mxu0 %v15293_v49  ;;  %11457 = vmatpush1.bf16.msra.mxu1 %v15297_v38 }
0x165e   : > { %11427 = vmatprep.subr.bf16.mxu0 %v15299_v53  ;;  %11459 = vmatprep.subr.bf16.mxu1 %v15302_v28 }
0x1661   : > { %11429 = vmatpush1.bf16.msra.mxu0 %v15305_v33  ;;  %11461 = vmatpush1.bf16.msra.mxu1 %v15309_v22 }
0x1662   : > { %11463 = vmatprep.subr.bf16.mxu0 %v15218_v20  ;;  %11495 = vmatprep.subr.bf16.mxu1 %v15220_v8 }
0x1713   : > { %v5655_v55 = vpop.f32.mrb[48].mxu0  ;;  %v5732_v5 = vpop.f32.mrb[48].mxu1 }
0x1714   : > { %v5656_v42 = vadd.f32 %v5655_v55, %v15326_v10  ;;  %v5733_v37 = vadd.f32 %v5732_v5, %v15329_v62  ;;  %v5657_v51 = vpop.f32.mrb[49].mxu0  ;;  %v5734_v63 = vpop.f32.mrb[49].mxu1  ;;  %v5969_v10 = vrot.slane %v5818_v52, %v14531_v44  ;;  %v15391_v62 = vrot.slane %v5809_v48, %v14531_v44 }
0x1715   : > { %v5658_v1 = vadd.f32 %v5657_v51, %v15332_v9  ;;  %v5735_v7 = vadd.f32 %v5734_v63, %v15335_v58  ;;  %v5973_v55 = vrot.slane %v5818_v52, %v14528_v43 }
0x1716   : > { %5741 = vst [vmem:[#allocation4 + $0x20] sm:$0xff] %v5656_v42  ;;  %5743 = vst [vmem:[#allocation4 + $0x30] sm:$0xff] %v5733_v37  ;;  %v15402_v37 = vrot.slane %v5809_v48, %v14528_v43 }
0x1717   : > { %5742 = vst [vmem:[#allocation4 + $0x28] sm:$0xff] %v5658_v1  ;;  %5744 = vst [vmem:[#allocation4 + $0x38] sm:$0xff] %v5735_v7  ;;  %v5885_v23 = vpop.f32.mrb[50].mxu0  ;;  %v5956_v25 = vpop.f32.mrb[50].mxu1 }
0x1718   : > { %v5982_v39 = vadd.f32 %v5965_v12, %v5885_v23  ;;  %v5887_v9 = vpop.f32.mrb[51].mxu0  ;;  %v5958_v40 = vpop.f32.mrb[51].mxu1  ;;  %v5984_v42 = vadd.f32 %v5973_v55, %v5956_v25 }
0x1719   : > { %v5983_v58 = vadd.f32 %v5969_v10, %v5887_v9  ;;  %v5985_v32 = vadd.f32 %v5977_v2, %v5958_v40 }
0x171a   : > { %v6007_v41 = vadd.f32 %v15387_v19, %v5982_v39  ;;  %v6009_v63 = vadd.f32 %v15402_v37, %v5984_v42  ;;  %v13156_v39 = vld [vmem:[%s14565_s5] sm:$0x3] }
0x171b   : > { %v6008_v15 = vadd.f32 %v15391_v62, %v5983_v58  ;;  %v6010_v5 = vadd.f32 %v15397_v47, %v5985_v32  ;;  %v5817_v52 = vrot.slane %v13156_v39, %v14531_v44  ;;  %v6036_v32 = vld [vmem:[#allocation4 + $0x1] ss:$8 sm:$0xf] }
0x171c   : > { %v9575_v16 = vmul.f32 -1.442695, %v6007_v41  ;;  %v6183_v55 = vrot.slane %v6036_v32, %v14477_v31  ;;  %v6195_v39 = vrot.slane %v6036_v32, %v14535_v46 }
0x171d   : > { %v9576_v30 = vmul.f32 -1.442695, %v6008_v15  ;;  %v9577_v51 = vmul.f32 -1.442695, %v6010_v5 }
0x171e   : > { %12899 = vpow2.f32 %v9575_v16 }
0x171f   : > { %12901 = vpow2.f32 %v9576_v30 }
0x1720   : > { %12903 = vpow2.f32 %v9577_v51  ;;  %v6187_v51 = vrot.slane %v6036_v32, %v14531_v44 }
0x1721   : > { %12905 = vtanh.f32 %v6009_v63 }
0x1728   : > { %v12900_v1 = vpop.eup %12899 }
0x1729   : > { %v12902_v7 = vpop.eup %12901  ;;  %v6014_v12 = vadd.f32 1.0, %v12900_v1 }
0x172a   : > { %v6020_v23 = vadd.f32 1.0, %v12902_v7  ;;  %v12904_v10 = vpop.eup %12903 }
0x172b   : > { %12907 = vrcp.f32 %v6014_v12  ;;  %v12906_v9 = vpop.eup %12905  ;;  %v6027_v58 = vadd.f32 1.0, %v12904_v10 }
0x172c   : > { %12909 = vrcp.f32 %v6020_v23 }
0x172d   : > { %12911 = vrcp.f32 %v6027_v58 }
0x1735   : > { %v12908_v25 = vpop.eup %12907 }
0x1736   : > { %v12910_v40 = vpop.eup %12909  ;;  %v6031_v48 = vmul.f32 %v12908_v25, %v12906_v9 }
0x1737   : > { %v6030_v41 = vmul.f32 %v12910_v40, %v5817_v52  ;;  %v12912_v2 = vpop.eup %12911  ;;  %v6191_v40 = vrot.slane %v6036_v32, %v14528_v43 }
0x1739   : > { %v15407_v15 = vadd.f32 %v6031_v48, %v6030_v41 }
0x173b   : > { %12913 = vtanh.f32 %v15407_v15 }
0x1745   : > { %v12914_v16 = vpop.eup %12913 }
0x1746   : > { %v6034_v30 = vmul.f32 %v12914_v16, %v12912_v2 }
0x1748   : > { %6102 = vmatmul.mubr.f32.vlgmr.msra.gmra.mrb[52].mxu0 %v6034_v30  ;;  %6173 = vmatmul.mubr.f32.vlgmr.msra.gmra.mrb[52].mxu1 %v6034_v30 }
0x1749   : > { %11465 = vmatpush1.bf16.msra.mxu0 %v15222_v36  ;;  %11497 = vmatpush1.bf16.msra.mxu1 %v15225_v24 }
0x174a   : > { %11467 = vmatprep.subr.bf16.mxu0 %v15230_v60  ;;  %11499 = vmatprep.subr.bf16.mxu1 %v15232_v59 }
0x174b   : > { %6298 = vmatprep.mubr.f32.mxu0 %v13791_v0  ;;  %6369 = vmatprep.mubr.f32.mxu1 %v13791_v0 }
0x174d   : > { %11469 = vmatpush1.bf16.msra.mxu0 %v15234_v45  ;;  %11501 = vmatpush1.bf16.msra.mxu1 %v15237_v54 }
0x174e   : > { %11471 = vmatprep.subr.bf16.mxu0 %v15242_v29  ;;  %11503 = vmatprep.subr.bf16.mxu1 %v15244_v56 }
0x1751   : > { %11473 = vmatpush1.bf16.msra.mxu0 %v15246_v57  ;;  %11505 = vmatpush1.bf16.msra.mxu1 %v15249_v6 }
0x1752   : > { %11475 = vmatprep.subr.bf16.mxu0 %v15254_v18  ;;  %11507 = vmatprep.subr.bf16.mxu1 %v15256_v34 }
0x1755   : > { %11477 = vmatpush1.bf16.msra.mxu0 %v15258_v35  ;;  %11509 = vmatpush1.bf16.msra.mxu1 %v15261_v50 }
0x1756   : > { %11479 = vmatprep.subr.bf16.mxu0 %v15265_v61  ;;  %11511 = vmatprep.subr.bf16.mxu1 %v15267_v4 }
0x1759   : > { %11481 = vmatpush1.bf16.msra.mxu0 %v15270_v21  ;;  %11513 = vmatpush1.bf16.msra.mxu1 %v15274_v17 }
0x175a   : > { %11483 = vmatprep.subr.bf16.mxu0 %v15276_v13  ;;  %11515 = vmatprep.subr.bf16.mxu1 %v15278_v27 }
0x175d   : > { %11485 = vmatpush1.bf16.msra.mxu0 %v15281_v14  ;;  %11517 = vmatpush1.bf16.msra.mxu1 %v15285_v26 }
0x175e   : > { %11487 = vmatprep.subr.bf16.mxu0 %v15287_v3  ;;  %11519 = vmatprep.subr.bf16.mxu1 %v15290_v11 }
0x1761   : > { %11489 = vmatpush1.bf16.msra.mxu0 %v15293_v49  ;;  %11521 = vmatpush1.bf16.msra.mxu1 %v15297_v38 }
0x1762   : > { %11491 = vmatprep.subr.bf16.mxu0 %v15299_v53  ;;  %11523 = vmatprep.subr.bf16.mxu1 %v15302_v28 }
0x1765   : > { %11493 = vmatpush1.bf16.msra.mxu0 %v15305_v33  ;;  %11525 = vmatpush1.bf16.msra.mxu1 %v15309_v22 }
0x1766   : > { %11527 = vmatprep.subr.bf16.mxu0 %v15218_v20  ;;  %11559 = vmatprep.subr.bf16.mxu1 %v15220_v8 }
0x181b   : > { %v6103_v5 = vpop.f32.mrb[52].mxu0  ;;  %v6174_v42 = vpop.f32.mrb[52].mxu1 }
0x181c   : > { %v6200_v63 = vadd.f32 %v6183_v55, %v6103_v5  ;;  %v6105_v1 = vpop.f32.mrb[53].mxu0  ;;  %v6176_v7 = vpop.f32.mrb[53].mxu1  ;;  %v6202_v58 = vadd.f32 %v6191_v40, %v6174_v42 }
0x181d   : > { %v6201_v12 = vadd.f32 %v6187_v51, %v6105_v1  ;;  %v6203_v25 = vadd.f32 %v6195_v39, %v6176_v7 }
0x181e   : > { %v6204_v23 = vadd.f32 %v6200_v63, %v15387_v19  ;;  %v6206_v2 = vadd.f32 %v6202_v58, %v15402_v37 }
0x181f   : > { %v6205_v10 = vadd.f32 %v6201_v12, %v15391_v62  ;;  %v6207_v48 = vadd.f32 %v6203_v25, %v15397_v47 }
0x1820   : > { %v9578_v52 = vmul.f32 -1.442695, %v6204_v23 }
0x1821   : > { %v9579_v9 = vmul.f32 -1.442695, %v6205_v10  ;;  %v9580_v41 = vmul.f32 -1.442695, %v6207_v48 }
0x1822   : > { %12915 = vpow2.f32 %v9578_v52 }
0x1823   : > { %12917 = vpow2.f32 %v9579_v9 }
0x1824   : > { %12919 = vpow2.f32 %v9580_v41 }
0x1825   : > { %12921 = vtanh.f32 %v6206_v2 }
0x182c   : > { %v12916_v16 = vpop.eup %12915 }
0x182d   : > { %v12918_v30 = vpop.eup %12917  ;;  %v6211_v55 = vadd.f32 1.0, %v12916_v16 }
0x182e   : > { %v6217_v5 = vadd.f32 1.0, %v12918_v30  ;;  %v12920_v51 = vpop.eup %12919 }
0x182f   : > { %12923 = vrcp.f32 %v6211_v55  ;;  %v12922_v63 = vpop.eup %12921  ;;  %v6224_v32 = vadd.f32 1.0, %v12920_v51 }
0x1830   : > { %12925 = vrcp.f32 %v6217_v5 }
0x1831   : > { %12927 = vrcp.f32 %v6224_v32 }
0x1839   : > { %v12924_v1 = vpop.eup %12923 }
0x183a   : > { %v12926_v7 = vpop.eup %12925  ;;  %v6228_v12 = vmul.f32 %v12924_v1, %v12922_v63 }
0x183b   : > { %v6227_v23 = vmul.f32 %v12926_v7, %v15407_v15  ;;  %v12928_v10 = vpop.eup %12927  ;;  %v6233_v15 = vld [vmem:[#allocation4 + $0x2] ss:$8 sm:$0xf] }
0x183c   : > { %v6380_v9 = vrot.slane %v6233_v15, %v14477_v31  ;;  %v6384_v48 = vrot.slane %v6233_v15, %v14531_v44  ;;  %v6392_v5 = vrot.slane %v6233_v15, %v14535_v46  ;;  %v6388_v7 = vrot.slane %v6233_v15, %v14528_v43 }
0x183d   : > { %v15453_v42 = vadd.f32 %v6228_v12, %v6227_v23 }
0x183f   : > { %12929 = vtanh.f32 %v15453_v42 }
0x1849   : > { %v12930_v39 = vpop.eup %12929 }
0x184a   : > { %v6231_v52 = vmul.f32 %v12930_v39, %v12928_v10 }
0x184c   : > { %6299 = vmatmul.mubr.f32.vlgmr.msra.gmra.mrb[54].mxu0 %v6231_v52  ;;  %6370 = vmatmul.mubr.f32.vlgmr.msra.gmra.mrb[54].mxu1 %v6231_v52 }
0x184d   : > { %11529 = vmatpush1.bf16.msra.mxu0 %v15222_v36  ;;  %11561 = vmatpush1.bf16.msra.mxu1 %v15225_v24 }
0x184e   : > { %11531 = vmatprep.subr.bf16.mxu0 %v15230_v60  ;;  %11563 = vmatprep.subr.bf16.mxu1 %v15232_v59 }
0x184f   : > { %6495 = vmatprep.mubr.f32.mxu0 %v13791_v0  ;;  %6566 = vmatprep.mubr.f32.mxu1 %v13791_v0 }
0x1851   : > { %11533 = vmatpush1.bf16.msra.mxu0 %v15234_v45  ;;  %11565 = vmatpush1.bf16.msra.mxu1 %v15237_v54 }
0x1852   : > { %11535 = vmatprep.subr.bf16.mxu0 %v15242_v29  ;;  %11567 = vmatprep.subr.bf16.mxu1 %v15244_v56 }
0x1855   : > { %11537 = vmatpush1.bf16.msra.mxu0 %v15246_v57  ;;  %11569 = vmatpush1.bf16.msra.mxu1 %v15249_v6 }
0x1856   : > { %11539 = vmatprep.subr.bf16.mxu0 %v15254_v18  ;;  %11571 = vmatprep.subr.bf16.mxu1 %v15256_v34 }
0x1859   : > { %11541 = vmatpush1.bf16.msra.mxu0 %v15258_v35  ;;  %11573 = vmatpush1.bf16.msra.mxu1 %v15261_v50 }
0x185a   : > { %11543 = vmatprep.subr.bf16.mxu0 %v15265_v61  ;;  %11575 = vmatprep.subr.bf16.mxu1 %v15267_v4 }
0x185d   : > { %11545 = vmatpush1.bf16.msra.mxu0 %v15270_v21  ;;  %11577 = vmatpush1.bf16.msra.mxu1 %v15274_v17 }
0x185e   : > { %11547 = vmatprep.subr.bf16.mxu0 %v15276_v13  ;;  %11579 = vmatprep.subr.bf16.mxu1 %v15278_v27 }
0x1861   : > { %11549 = vmatpush1.bf16.msra.mxu0 %v15281_v14  ;;  %11581 = vmatpush1.bf16.msra.mxu1 %v15285_v26 }
0x1862   : > { %11551 = vmatprep.subr.bf16.mxu0 %v15287_v3  ;;  %11583 = vmatprep.subr.bf16.mxu1 %v15290_v11 }
0x1865   : > { %11553 = vmatpush1.bf16.msra.mxu0 %v15293_v49  ;;  %11585 = vmatpush1.bf16.msra.mxu1 %v15297_v38 }
0x1866   : > { %11555 = vmatprep.subr.bf16.mxu0 %v15299_v53  ;;  %11587 = vmatprep.subr.bf16.mxu1 %v15302_v28 }
0x1869   : > { %11557 = vmatpush1.bf16.msra.mxu0 %v15305_v33  ;;  %11589 = vmatpush1.bf16.msra.mxu1 %v15309_v22 }
0x186a   : > { %11591 = vmatprep.subr.bf16.mxu0 %v15218_v20  ;;  %11623 = vmatprep.subr.bf16.mxu1 %v15220_v8 }
0x191f   : > { %v6300_v25 = vpop.f32.mrb[54].mxu0  ;;  %v6371_v40 = vpop.f32.mrb[54].mxu1 }
0x1920   : > { %v6397_v58 = vadd.f32 %v6380_v9, %v6300_v25  ;;  %v6302_v41 = vpop.f32.mrb[55].mxu0  ;;  %v6373_v2 = vpop.f32.mrb[55].mxu1  ;;  %v6399_v32 = vadd.f32 %v6388_v7, %v6371_v40 }
0x1921   : > { %v6398_v16 = vadd.f32 %v6384_v48, %v6302_v41  ;;  %v6400_v1 = vadd.f32 %v6392_v5, %v6373_v2 }
0x1922   : > { %v6401_v30 = vadd.f32 %v6397_v58, %v15387_v19  ;;  %v6403_v10 = vadd.f32 %v6399_v32, %v15402_v37 }
0x1923   : > { %v6402_v55 = vadd.f32 %v6398_v16, %v15391_v62  ;;  %v6404_v12 = vadd.f32 %v6400_v1, %v15397_v47 }
0x1924   : > { %v9581_v51 = vmul.f32 -1.442695, %v6401_v30 }
0x1925   : > { %v9582_v63 = vmul.f32 -1.442695, %v6402_v55  ;;  %v9583_v23 = vmul.f32 -1.442695, %v6404_v12 }
0x1926   : > { %12931 = vpow2.f32 %v9581_v51 }
0x1927   : > { %12933 = vpow2.f32 %v9582_v63 }
0x1928   : > { %12935 = vpow2.f32 %v9583_v23 }
0x1929   : > { %12937 = vtanh.f32 %v6403_v10 }
0x1930   : > { %v12932_v39 = vpop.eup %12931 }
0x1931   : > { %v12934_v52 = vpop.eup %12933  ;;  %v6408_v9 = vadd.f32 1.0, %v12932_v39 }
0x1932   : > { %v6414_v25 = vadd.f32 1.0, %v12934_v52  ;;  %v12936_v48 = vpop.eup %12935 }
0x1933   : > { %12939 = vrcp.f32 %v6408_v9  ;;  %v12938_v58 = vpop.eup %12937  ;;  %v6421_v15 = vadd.f32 1.0, %v12936_v48 }
0x1934   : > { %12941 = vrcp.f32 %v6414_v25 }
0x1935   : > { %12943 = vrcp.f32 %v6421_v15 }
0x193d   : > { %v12940_v41 = vpop.eup %12939 }
0x193e   : > { %v12942_v2 = vpop.eup %12941  ;;  %v6425_v16 = vmul.f32 %v12940_v41, %v12938_v58 }
0x193f   : > { %v6424_v30 = vmul.f32 %v12942_v2, %v15453_v42  ;;  %v12944_v55 = vpop.eup %12943  ;;  %v6430_v42 = vld [vmem:[#allocation4 + $0x3] ss:$8 sm:$0xf] }
0x1940   : > { %v6577_v63 = vrot.slane %v6430_v42, %v14477_v31  ;;  %v6581_v12 = vrot.slane %v6430_v42, %v14531_v44  ;;  %v6589_v25 = vrot.slane %v6430_v42, %v14535_v46  ;;  %v6585_v2 = vrot.slane %v6430_v42, %v14528_v43 }
0x1941   : > { %v15499_v40 = vadd.f32 %v6425_v16, %v6424_v30 }
0x1943   : > { %12945 = vtanh.f32 %v15499_v40 }
0x194d   : > { %v12946_v5 = vpop.eup %12945 }
0x194e   : > { %v6428_v51 = vmul.f32 %v12946_v5, %v12944_v55 }
0x1950   : > { %6496 = vmatmul.mubr.f32.vlgmr.msra.gmra.mrb[56].mxu0 %v6428_v51  ;;  %6567 = vmatmul.mubr.f32.vlgmr.msra.gmra.mrb[56].mxu1 %v6428_v51 }
0x1951   : > { %11593 = vmatpush1.bf16.msra.mxu0 %v15222_v36  ;;  %11625 = vmatpush1.bf16.msra.mxu1 %v15225_v24 }
0x1952   : > { %11595 = vmatprep.subr.bf16.mxu0 %v15230_v60  ;;  %11627 = vmatprep.subr.bf16.mxu1 %v15232_v59 }
0x1953   : > { %6692 = vmatprep.mubr.f32.mxu0 %v13791_v0  ;;  %6763 = vmatprep.mubr.f32.mxu1 %v13791_v0 }
0x1955   : > { %11597 = vmatpush1.bf16.msra.mxu0 %v15234_v45  ;;  %11629 = vmatpush1.bf16.msra.mxu1 %v15237_v54 }
0x1956   : > { %11599 = vmatprep.subr.bf16.mxu0 %v15242_v29  ;;  %11631 = vmatprep.subr.bf16.mxu1 %v15244_v56 }
0x1959   : > { %11601 = vmatpush1.bf16.msra.mxu0 %v15246_v57  ;;  %11633 = vmatpush1.bf16.msra.mxu1 %v15249_v6 }
0x195a   : > { %11603 = vmatprep.subr.bf16.mxu0 %v15254_v18  ;;  %11635 = vmatprep.subr.bf16.mxu1 %v15256_v34 }
0x195d   : > { %11605 = vmatpush1.bf16.msra.mxu0 %v15258_v35  ;;  %11637 = vmatpush1.bf16.msra.mxu1 %v15261_v50 }
0x195e   : > { %11607 = vmatprep.subr.bf16.mxu0 %v15265_v61  ;;  %11639 = vmatprep.subr.bf16.mxu1 %v15267_v4 }
0x1961   : > { %11609 = vmatpush1.bf16.msra.mxu0 %v15270_v21  ;;  %11641 = vmatpush1.bf16.msra.mxu1 %v15274_v17 }
0x1962   : > { %11611 = vmatprep.subr.bf16.mxu0 %v15276_v13  ;;  %11643 = vmatprep.subr.bf16.mxu1 %v15278_v27 }
0x1965   : > { %11613 = vmatpush1.bf16.msra.mxu0 %v15281_v14  ;;  %11645 = vmatpush1.bf16.msra.mxu1 %v15285_v26 }
0x1966   : > { %11615 = vmatprep.subr.bf16.mxu0 %v15287_v3  ;;  %11647 = vmatprep.subr.bf16.mxu1 %v15290_v11 }
0x1969   : > { %11617 = vmatpush1.bf16.msra.mxu0 %v15293_v49  ;;  %11649 = vmatpush1.bf16.msra.mxu1 %v15297_v38 }
0x196a   : > { %11619 = vmatprep.subr.bf16.mxu0 %v15299_v53  ;;  %11651 = vmatprep.subr.bf16.mxu1 %v15302_v28 }
0x196d   : > { %11621 = vmatpush1.bf16.msra.mxu0 %v15305_v33  ;;  %11653 = vmatpush1.bf16.msra.mxu1 %v15309_v22 }
0x196e   : > { %11655 = vmatprep.subr.bf16.mxu0 %v15218_v20  ;;  %11687 = vmatprep.subr.bf16.mxu1 %v15220_v8 }
0x1a23   : > { %v6497_v1 = vpop.f32.mrb[56].mxu0  ;;  %v6568_v7 = vpop.f32.mrb[56].mxu1 }
0x1a24   : > { %v6594_v32 = vadd.f32 %v6577_v63, %v6497_v1  ;;  %v6499_v23 = vpop.f32.mrb[57].mxu0  ;;  %v6570_v10 = vpop.f32.mrb[57].mxu1  ;;  %v6596_v15 = vadd.f32 %v6585_v2, %v6568_v7 }
0x1a25   : > { %v6595_v39 = vadd.f32 %v6581_v12, %v6499_v23  ;;  %v6597_v41 = vadd.f32 %v6589_v25, %v6570_v10 }
0x1a26   : > { %v6598_v52 = vadd.f32 %v6594_v32, %v15387_v19  ;;  %v6600_v55 = vadd.f32 %v6596_v15, %v15402_v37 }
0x1a27   : > { %v6599_v9 = vadd.f32 %v6595_v39, %v15391_v62  ;;  %v6601_v16 = vadd.f32 %v6597_v41, %v15397_v47 }
0x1a28   : > { %v9584_v48 = vmul.f32 -1.442695, %v6598_v52 }
0x1a29   : > { %v9585_v58 = vmul.f32 -1.442695, %v6599_v9  ;;  %v9586_v30 = vmul.f32 -1.442695, %v6601_v16 }
0x1a2a   : > { %12947 = vpow2.f32 %v9584_v48 }
0x1a2b   : > { %12949 = vpow2.f32 %v9585_v58 }
0x1a2c   : > { %12951 = vpow2.f32 %v9586_v30 }
0x1a2d   : > { %12953 = vtanh.f32 %v6600_v55 }
0x1a34   : > { %v12948_v5 = vpop.eup %12947 }
0x1a35   : > { %v12950_v51 = vpop.eup %12949  ;;  %v6605_v63 = vadd.f32 1.0, %v12948_v5 }
0x1a36   : > { %v6611_v1 = vadd.f32 1.0, %v12950_v51  ;;  %v12952_v12 = vpop.eup %12951 }
0x1a37   : > { %12955 = vrcp.f32 %v6605_v63  ;;  %v12954_v32 = vpop.eup %12953  ;;  %v6618_v42 = vadd.f32 1.0, %v12952_v12 }
0x1a38   : > { %12957 = vrcp.f32 %v6611_v1 }
0x1a39   : > { %12959 = vrcp.f32 %v6618_v42 }
0x1a41   : > { %v12956_v23 = vpop.eup %12955 }
0x1a42   : > { %v12958_v10 = vpop.eup %12957  ;;  %v6622_v39 = vmul.f32 %v12956_v23, %v12954_v32 }
0x1a43   : > { %v6621_v52 = vmul.f32 %v12958_v10, %v15499_v40  ;;  %v12960_v9 = vpop.eup %12959  ;;  %v6627_v40 = vld [vmem:[#allocation4 + $0x4] ss:$8 sm:$0xf] }
0x1a44   : > { %v6774_v58 = vrot.slane %v6627_v40, %v14477_v31  ;;  %v6778_v16 = vrot.slane %v6627_v40, %v14531_v44  ;;  %v6786_v1 = vrot.slane %v6627_v40, %v14535_v46  ;;  %v6782_v10 = vrot.slane %v6627_v40, %v14528_v43 }
0x1a45   : > { %v15545_v7 = vadd.f32 %v6622_v39, %v6621_v52 }
0x1a47   : > { %12961 = vtanh.f32 %v15545_v7 }
0x1a51   : > { %v12962_v25 = vpop.eup %12961 }
0x1a52   : > { %v6625_v48 = vmul.f32 %v12962_v25, %v12960_v9 }
0x1a54   : > { %6693 = vmatmul.mubr.f32.vlgmr.msra.gmra.mrb[58].mxu0 %v6625_v48  ;;  %6764 = vmatmul.mubr.f32.vlgmr.msra.gmra.mrb[58].mxu1 %v6625_v48 }
0x1a55   : > { %11657 = vmatpush1.bf16.msra.mxu0 %v15222_v36  ;;  %11689 = vmatpush1.bf16.msra.mxu1 %v15225_v24 }
0x1a56   : > { %11659 = vmatprep.subr.bf16.mxu0 %v15230_v60  ;;  %11691 = vmatprep.subr.bf16.mxu1 %v15232_v59 }
0x1a57   : > { %6889 = vmatprep.mubr.f32.mxu0 %v13791_v0  ;;  %6960 = vmatprep.mubr.f32.mxu1 %v13791_v0 }
0x1a59   : > { %11661 = vmatpush1.bf16.msra.mxu0 %v15234_v45  ;;  %11693 = vmatpush1.bf16.msra.mxu1 %v15237_v54 }
0x1a5a   : > { %11663 = vmatprep.subr.bf16.mxu0 %v15242_v29  ;;  %11695 = vmatprep.subr.bf16.mxu1 %v15244_v56 }
0x1a5d   : > { %11665 = vmatpush1.bf16.msra.mxu0 %v15246_v57  ;;  %11697 = vmatpush1.bf16.msra.mxu1 %v15249_v6 }
0x1a5e   : > { %11667 = vmatprep.subr.bf16.mxu0 %v15254_v18  ;;  %11699 = vmatprep.subr.bf16.mxu1 %v15256_v34 }
0x1a61   : > { %11669 = vmatpush1.bf16.msra.mxu0 %v15258_v35  ;;  %11701 = vmatpush1.bf16.msra.mxu1 %v15261_v50 }
0x1a62   : > { %11671 = vmatprep.subr.bf16.mxu0 %v15265_v61  ;;  %11703 = vmatprep.subr.bf16.mxu1 %v15267_v4 }
0x1a65   : > { %11673 = vmatpush1.bf16.msra.mxu0 %v15270_v21  ;;  %11705 = vmatpush1.bf16.msra.mxu1 %v15274_v17 }
0x1a66   : > { %11675 = vmatprep.subr.bf16.mxu0 %v15276_v13  ;;  %11707 = vmatprep.subr.bf16.mxu1 %v15278_v27 }
0x1a69   : > { %11677 = vmatpush1.bf16.msra.mxu0 %v15281_v14  ;;  %11709 = vmatpush1.bf16.msra.mxu1 %v15285_v26 }
0x1a6a   : > { %11679 = vmatprep.subr.bf16.mxu0 %v15287_v3  ;;  %11711 = vmatprep.subr.bf16.mxu1 %v15290_v11 }
0x1a6d   : > { %11681 = vmatpush1.bf16.msra.mxu0 %v15293_v49  ;;  %11713 = vmatpush1.bf16.msra.mxu1 %v15297_v38 }
0x1a6e   : > { %11683 = vmatprep.subr.bf16.mxu0 %v15299_v53  ;;  %11715 = vmatprep.subr.bf16.mxu1 %v15302_v28 }
0x1a71   : > { %11685 = vmatpush1.bf16.msra.mxu0 %v15305_v33  ;;  %11717 = vmatpush1.bf16.msra.mxu1 %v15309_v22 }
0x1a72   : > { %11719 = vmatprep.subr.bf16.mxu0 %v15218_v20  ;;  %11751 = vmatprep.subr.bf16.mxu1 %v15220_v8 }
0x1b27   : > { %v6694_v41 = vpop.f32.mrb[58].mxu0  ;;  %v6765_v2 = vpop.f32.mrb[58].mxu1 }
0x1b28   : > { %v6791_v15 = vadd.f32 %v6774_v58, %v6694_v41  ;;  %v6696_v30 = vpop.f32.mrb[59].mxu0  ;;  %v6767_v55 = vpop.f32.mrb[59].mxu1  ;;  %v6793_v42 = vadd.f32 %v6782_v10, %v6765_v2 }
0x1b29   : > { %v6792_v5 = vadd.f32 %v6778_v16, %v6696_v30  ;;  %v6794_v23 = vadd.f32 %v6786_v1, %v6767_v55 }
0x1b2a   : > { %v6795_v51 = vadd.f32 %v6791_v15, %v15387_v19  ;;  %v6797_v9 = vadd.f32 %v6793_v42, %v15402_v37 }
0x1b2b   : > { %v6796_v63 = vadd.f32 %v6792_v5, %v15391_v62  ;;  %v6798_v39 = vadd.f32 %v6794_v23, %v15397_v47 }
0x1b2c   : > { %v9587_v12 = vmul.f32 -1.442695, %v6795_v51 }
0x1b2d   : > { %v9588_v32 = vmul.f32 -1.442695, %v6796_v63  ;;  %v9589_v52 = vmul.f32 -1.442695, %v6798_v39 }
0x1b2e   : > { %12963 = vpow2.f32 %v9587_v12 }
0x1b2f   : > { %12965 = vpow2.f32 %v9588_v32 }
0x1b30   : > { %12967 = vpow2.f32 %v9589_v52 }
0x1b31   : > { %12969 = vtanh.f32 %v6797_v9 }
0x1b38   : > { %v12964_v25 = vpop.eup %12963 }
0x1b39   : > { %v12966_v48 = vpop.eup %12965  ;;  %v6802_v58 = vadd.f32 1.0, %v12964_v25 }
0x1b3a   : > { %v6808_v41 = vadd.f32 1.0, %v12966_v48  ;;  %v12968_v16 = vpop.eup %12967 }
0x1b3b   : > { %12971 = vrcp.f32 %v6802_v58  ;;  %v12970_v15 = vpop.eup %12969  ;;  %v6815_v40 = vadd.f32 1.0, %v12968_v16 }
0x1b3c   : > { %12973 = vrcp.f32 %v6808_v41 }
0x1b3d   : > { %12975 = vrcp.f32 %v6815_v40 }
0x1b45   : > { %v12972_v30 = vpop.eup %12971 }
0x1b46   : > { %v12974_v55 = vpop.eup %12973  ;;  %v6819_v5 = vmul.f32 %v12972_v30, %v12970_v15 }
0x1b47   : > { %v6818_v51 = vmul.f32 %v12974_v55, %v15545_v7  ;;  %v12976_v63 = vpop.eup %12975  ;;  %v6824_v7 = vld [vmem:[#allocation4 + $0x5] ss:$8 sm:$0xf] }
0x1b48   : > { %v6971_v32 = vrot.slane %v6824_v7, %v14477_v31  ;;  %v6975_v39 = vrot.slane %v6824_v7, %v14531_v44  ;;  %v6983_v41 = vrot.slane %v6824_v7, %v14535_v46  ;;  %v6979_v55 = vrot.slane %v6824_v7, %v14528_v43 }
0x1b49   : > { %v15591_v2 = vadd.f32 %v6819_v5, %v6818_v51 }
0x1b4b   : > { %12977 = vtanh.f32 %v15591_v2 }
0x1b55   : > { %v12978_v1 = vpop.eup %12977 }
0x1b56   : > { %v6822_v12 = vmul.f32 %v12978_v1, %v12976_v63 }
0x1b58   : > { %6890 = vmatmul.mubr.f32.vlgmr.msra.gmra.mrb[60].mxu0 %v6822_v12  ;;  %6961 = vmatmul.mubr.f32.vlgmr.msra.gmra.mrb[60].mxu1 %v6822_v12 }
0x1b59   : > { %11721 = vmatpush1.bf16.msra.mxu0 %v15222_v36  ;;  %11753 = vmatpush1.bf16.msra.mxu1 %v15225_v24 }
0x1b5a   : > { %11723 = vmatprep.subr.bf16.mxu0 %v15230_v60  ;;  %11755 = vmatprep.subr.bf16.mxu1 %v15232_v59 }
0x1b5b   : > { %7086 = vmatprep.mubr.f32.mxu0 %v13791_v0  ;;  %7157 = vmatprep.mubr.f32.mxu1 %v13791_v0 }
0x1b5d   : > { %11725 = vmatpush1.bf16.msra.mxu0 %v15234_v45  ;;  %11757 = vmatpush1.bf16.msra.mxu1 %v15237_v54 }
0x1b5e   : > { %11727 = vmatprep.subr.bf16.mxu0 %v15242_v29  ;;  %11759 = vmatprep.subr.bf16.mxu1 %v15244_v56 }
0x1b61   : > { %11729 = vmatpush1.bf16.msra.mxu0 %v15246_v57  ;;  %11761 = vmatpush1.bf16.msra.mxu1 %v15249_v6 }
0x1b62   : > { %11731 = vmatprep.subr.bf16.mxu0 %v15254_v18  ;;  %11763 = vmatprep.subr.bf16.mxu1 %v15256_v34 }
0x1b65   : > { %11733 = vmatpush1.bf16.msra.mxu0 %v15258_v35  ;;  %11765 = vmatpush1.bf16.msra.mxu1 %v15261_v50 }
0x1b66   : > { %11735 = vmatprep.subr.bf16.mxu0 %v15265_v61  ;;  %11767 = vmatprep.subr.bf16.mxu1 %v15267_v4 }
0x1b69   : > { %11737 = vmatpush1.bf16.msra.mxu0 %v15270_v21  ;;  %11769 = vmatpush1.bf16.msra.mxu1 %v15274_v17 }
0x1b6a   : > { %11739 = vmatprep.subr.bf16.mxu0 %v15276_v13  ;;  %11771 = vmatprep.subr.bf16.mxu1 %v15278_v27 }
0x1b6d   : > { %11741 = vmatpush1.bf16.msra.mxu0 %v15281_v14  ;;  %11773 = vmatpush1.bf16.msra.mxu1 %v15285_v26 }
0x1b6e   : > { %11743 = vmatprep.subr.bf16.mxu0 %v15287_v3  ;;  %11775 = vmatprep.subr.bf16.mxu1 %v15290_v11 }
0x1b71   : > { %11745 = vmatpush1.bf16.msra.mxu0 %v15293_v49  ;;  %11777 = vmatpush1.bf16.msra.mxu1 %v15297_v38 }
0x1b72   : > { %11747 = vmatprep.subr.bf16.mxu0 %v15299_v53  ;;  %11779 = vmatprep.subr.bf16.mxu1 %v15302_v28 }
0x1b75   : > { %11749 = vmatpush1.bf16.msra.mxu0 %v15305_v33  ;;  %11781 = vmatpush1.bf16.msra.mxu1 %v15309_v22 }
0x1b76   : > { %11783 = vmatprep.subr.bf16.mxu0 %v15218_v20  ;;  %11815 = vmatprep.subr.bf16.mxu1 %v15220_v8 }
0x1c2b   : > { %v6891_v23 = vpop.f32.mrb[60].mxu0  ;;  %v6962_v10 = vpop.f32.mrb[60].mxu1 }
0x1c2c   : > { %v6988_v42 = vadd.f32 %v6971_v32, %v6891_v23  ;;  %v6893_v52 = vpop.f32.mrb[61].mxu0  ;;  %v6964_v9 = vpop.f32.mrb[61].mxu1  ;;  %v6990_v40 = vadd.f32 %v6979_v55, %v6962_v10 }
0x1c2d   : > { %v6989_v25 = vadd.f32 %v6975_v39, %v6893_v52  ;;  %v6991_v30 = vadd.f32 %v6983_v41, %v6964_v9 }
0x1c2e   : > { %v6992_v48 = vadd.f32 %v6988_v42, %v15387_v19  ;;  %v6994_v63 = vadd.f32 %v6990_v40, %v15402_v37 }
0x1c2f   : > { %v6993_v58 = vadd.f32 %v6989_v25, %v15391_v62  ;;  %v6995_v5 = vadd.f32 %v6991_v30, %v15397_v47 }
0x1c30   : > { %v9590_v16 = vmul.f32 -1.442695, %v6992_v48 }
0x1c31   : > { %v9591_v15 = vmul.f32 -1.442695, %v6993_v58  ;;  %v9592_v51 = vmul.f32 -1.442695, %v6995_v5 }
0x1c32   : > { %12979 = vpow2.f32 %v9590_v16 }
0x1c33   : > { %12981 = vpow2.f32 %v9591_v15 }
0x1c34   : > { %12983 = vpow2.f32 %v9592_v51 }
0x1c35   : > { %12985 = vtanh.f32 %v6994_v63 }
0x1c3c   : > { %v12980_v1 = vpop.eup %12979 }
0x1c3d   : > { %v12982_v12 = vpop.eup %12981  ;;  %v6999_v32 = vadd.f32 1.0, %v12980_v1 }
0x1c3e   : > { %v7005_v23 = vadd.f32 1.0, %v12982_v12  ;;  %v12984_v39 = vpop.eup %12983 }
0x1c3f   : > { %12987 = vrcp.f32 %v6999_v32  ;;  %v12986_v42 = vpop.eup %12985  ;;  %v7012_v7 = vadd.f32 1.0, %v12984_v39 }
0x1c40   : > { %12989 = vrcp.f32 %v7005_v23 }
0x1c41   : > { %12991 = vrcp.f32 %v7012_v7 }
0x1c49   : > { %v12988_v52 = vpop.eup %12987 }
0x1c4a   : > { %v12990_v9 = vpop.eup %12989  ;;  %v7016_v25 = vmul.f32 %v12988_v52, %v12986_v42 }
0x1c4b   : > { %v7015_v48 = vmul.f32 %v12990_v9, %v15591_v2  ;;  %v12992_v58 = vpop.eup %12991  ;;  %v7021_v2 = vld [vmem:[#allocation4 + $0x6] ss:$8 sm:$0xf] }
0x1c4c   : > { %v7168_v15 = vrot.slane %v7021_v2, %v14477_v31  ;;  %v7172_v5 = vrot.slane %v7021_v2, %v14531_v44  ;;  %v7180_v23 = vrot.slane %v7021_v2, %v14535_v46  ;;  %v7176_v9 = vrot.slane %v7021_v2, %v14528_v43 }
0x1c4d   : > { %v15637_v10 = vadd.f32 %v7016_v25, %v7015_v48 }
0x1c4f   : > { %12993 = vtanh.f32 %v15637_v10 }
0x1c59   : > { %v12994_v41 = vpop.eup %12993 }
0x1c5a   : > { %v7019_v16 = vmul.f32 %v12994_v41, %v12992_v58 }
0x1c5c   : > { %7087 = vmatmul.mubr.f32.vlgmr.msra.gmra.mrb[62].mxu0 %v7019_v16  ;;  %7158 = vmatmul.mubr.f32.vlgmr.msra.gmra.mrb[62].mxu1 %v7019_v16 }
0x1c5d   : > { %11785 = vmatpush1.bf16.msra.mxu0 %v15222_v36  ;;  %11817 = vmatpush1.bf16.msra.mxu1 %v15225_v24 }
0x1c5e   : > { %11787 = vmatprep.subr.bf16.mxu0 %v15230_v60  ;;  %11819 = vmatprep.subr.bf16.mxu1 %v15232_v59 }
0x1c5f   : > { %7283 = vmatprep.mubr.f32.mxu0 %v13791_v0  ;;  %7354 = vmatprep.mubr.f32.mxu1 %v13791_v0 }
0x1c61   : > { %11789 = vmatpush1.bf16.msra.mxu0 %v15234_v45  ;;  %11821 = vmatpush1.bf16.msra.mxu1 %v15237_v54 }
0x1c62   : > { %11791 = vmatprep.subr.bf16.mxu0 %v15242_v29  ;;  %11823 = vmatprep.subr.bf16.mxu1 %v15244_v56 }
0x1c65   : > { %11793 = vmatpush1.bf16.msra.mxu0 %v15246_v57  ;;  %11825 = vmatpush1.bf16.msra.mxu1 %v15249_v6 }
0x1c66   : > { %11795 = vmatprep.subr.bf16.mxu0 %v15254_v18  ;;  %11827 = vmatprep.subr.bf16.mxu1 %v15256_v34 }
0x1c69   : > { %11797 = vmatpush1.bf16.msra.mxu0 %v15258_v35  ;;  %11829 = vmatpush1.bf16.msra.mxu1 %v15261_v50 }
0x1c6a   : > { %11799 = vmatprep.subr.bf16.mxu0 %v15265_v61  ;;  %11831 = vmatprep.subr.bf16.mxu1 %v15267_v4 }
0x1c6d   : > { %11801 = vmatpush1.bf16.msra.mxu0 %v15270_v21  ;;  %11833 = vmatpush1.bf16.msra.mxu1 %v15274_v17 }
0x1c6e   : > { %11803 = vmatprep.subr.bf16.mxu0 %v15276_v13  ;;  %11835 = vmatprep.subr.bf16.mxu1 %v15278_v27 }
0x1c71   : > { %11805 = vmatpush1.bf16.msra.mxu0 %v15281_v14  ;;  %11837 = vmatpush1.bf16.msra.mxu1 %v15285_v26 }
0x1c72   : > { %11807 = vmatprep.subr.bf16.mxu0 %v15287_v3  ;;  %11839 = vmatprep.subr.bf16.mxu1 %v15290_v11 }
0x1c75   : > { %11809 = vmatpush1.bf16.msra.mxu0 %v15293_v49  ;;  %11841 = vmatpush1.bf16.msra.mxu1 %v15297_v38 }
0x1c76   : > { %11811 = vmatprep.subr.bf16.mxu0 %v15299_v53  ;;  %11843 = vmatprep.subr.bf16.mxu1 %v15302_v28 }
0x1c79   : > { %11813 = vmatpush1.bf16.msra.mxu0 %v15305_v33  ;;  %11845 = vmatpush1.bf16.msra.mxu1 %v15309_v22 }
0x1c7a   : > { %11847 = vmatprep.subr.bf16.mxu0 %v15218_v20  ;;  %11879 = vmatprep.subr.bf16.mxu1 %v15220_v8 }
0x1d2f   : > { %v7088_v30 = vpop.f32.mrb[62].mxu0  ;;  %v7159_v55 = vpop.f32.mrb[62].mxu1 }
0x1d30   : > { %v7185_v40 = vadd.f32 %v7168_v15, %v7088_v30  ;;  %v7090_v51 = vpop.f32.mrb[63].mxu0  ;;  %v7161_v63 = vpop.f32.mrb[63].mxu1  ;;  %v7187_v7 = vadd.f32 %v7176_v9, %v7159_v55 }
0x1d31   : > { %v7186_v1 = vadd.f32 %v7172_v5, %v7090_v51  ;;  %v7188_v52 = vadd.f32 %v7180_v23, %v7161_v63 }
0x1d32   : > { %v7189_v12 = vadd.f32 %v7185_v40, %v15387_v19  ;;  %v7191_v58 = vadd.f32 %v7187_v7, %v15402_v37 }
0x1d33   : > { %v7190_v32 = vadd.f32 %v7186_v1, %v15391_v62  ;;  %v7192_v25 = vadd.f32 %v7188_v52, %v15397_v47 }
0x1d34   : > { %v9593_v39 = vmul.f32 -1.442695, %v7189_v12 }
0x1d35   : > { %v9594_v42 = vmul.f32 -1.442695, %v7190_v32  ;;  %v9595_v48 = vmul.f32 -1.442695, %v7192_v25 }
0x1d36   : > { %12995 = vpow2.f32 %v9593_v39 }
0x1d37   : > { %12997 = vpow2.f32 %v9594_v42 }
0x1d38   : > { %12999 = vpow2.f32 %v9595_v48 }
0x1d39   : > { %13001 = vtanh.f32 %v7191_v58 }
0x1d40   : > { %v12996_v41 = vpop.eup %12995 }
0x1d41   : > { %v12998_v16 = vpop.eup %12997  ;;  %v7196_v15 = vadd.f32 1.0, %v12996_v41 }
0x1d42   : > { %v7202_v30 = vadd.f32 1.0, %v12998_v16  ;;  %v13000_v5 = vpop.eup %12999 }
0x1d43   : > { %13003 = vrcp.f32 %v7196_v15  ;;  %v13002_v40 = vpop.eup %13001  ;;  %v7209_v2 = vadd.f32 1.0, %v13000_v5 }
0x1d44   : > { %13005 = vrcp.f32 %v7202_v30 }
0x1d45   : > { %13007 = vrcp.f32 %v7209_v2 }
0x1d4d   : > { %v13004_v51 = vpop.eup %13003 }
0x1d4e   : > { %v13006_v63 = vpop.eup %13005  ;;  %v7213_v1 = vmul.f32 %v13004_v51, %v13002_v40 }
0x1d4f   : > { %v7212_v12 = vmul.f32 %v13006_v63, %v15637_v10  ;;  %v13008_v32 = vpop.eup %13007  ;;  %v7218_v10 = vld [vmem:[#allocation4 + $0x7] ss:$8 sm:$0xf] }
0x1d50   : > { %v7365_v42 = vrot.slane %v7218_v10, %v14477_v31  ;;  %v7369_v25 = vrot.slane %v7218_v10, %v14531_v44  ;;  %v7377_v30 = vrot.slane %v7218_v10, %v14535_v46  ;;  %v7373_v63 = vrot.slane %v7218_v10, %v14528_v43 }
0x1d51   : > { %v15683_v55 = vadd.f32 %v7213_v1, %v7212_v12 }
0x1d53   : > { %13009 = vtanh.f32 %v15683_v55 }
0x1d5d   : > { %v13010_v23 = vpop.eup %13009 }
0x1d5e   : > { %v7216_v39 = vmul.f32 %v13010_v23, %v13008_v32 }
0x1d60   : > { %7284 = vmatmul.mubr.f32.vlgmr.msra.gmra.mrb[64].mxu0 %v7216_v39  ;;  %7355 = vmatmul.mubr.f32.vlgmr.msra.gmra.mrb[64].mxu1 %v7216_v39 }
0x1d61   : > { %11849 = vmatpush1.bf16.msra.mxu0 %v15222_v36  ;;  %11881 = vmatpush1.bf16.msra.mxu1 %v15225_v24 }
0x1d62   : > { %11851 = vmatprep.subr.bf16.mxu0 %v15230_v60  ;;  %11883 = vmatprep.subr.bf16.mxu1 %v15232_v59 }
0x1d63   : > { %7480 = vmatprep.mubr.f32.mxu0 %v13791_v0  ;;  %7551 = vmatprep.mubr.f32.mxu1 %v13791_v0 }
0x1d65   : > { %11853 = vmatpush1.bf16.msra.mxu0 %v15234_v45  ;;  %11885 = vmatpush1.bf16.msra.mxu1 %v15237_v54 }
0x1d66   : > { %11855 = vmatprep.subr.bf16.mxu0 %v15242_v29  ;;  %11887 = vmatprep.subr.bf16.mxu1 %v15244_v56 }
0x1d69   : > { %11857 = vmatpush1.bf16.msra.mxu0 %v15246_v57  ;;  %11889 = vmatpush1.bf16.msra.mxu1 %v15249_v6 }
0x1d6a   : > { %11859 = vmatprep.subr.bf16.mxu0 %v15254_v18  ;;  %11891 = vmatprep.subr.bf16.mxu1 %v15256_v34 }
0x1d6d   : > { %11861 = vmatpush1.bf16.msra.mxu0 %v15258_v35  ;;  %11893 = vmatpush1.bf16.msra.mxu1 %v15261_v50 }
0x1d6e   : > { %11863 = vmatprep.subr.bf16.mxu0 %v15265_v61  ;;  %11895 = vmatprep.subr.bf16.mxu1 %v15267_v4 }
0x1d71   : > { %11865 = vmatpush1.bf16.msra.mxu0 %v15270_v21  ;;  %11897 = vmatpush1.bf16.msra.mxu1 %v15274_v17 }
0x1d72   : > { %11867 = vmatprep.subr.bf16.mxu0 %v15276_v13  ;;  %11899 = vmatprep.subr.bf16.mxu1 %v15278_v27 }
0x1d75   : > { %11869 = vmatpush1.bf16.msra.mxu0 %v15281_v14  ;;  %11901 = vmatpush1.bf16.msra.mxu1 %v15285_v26 }
0x1d76   : > { %11871 = vmatprep.subr.bf16.mxu0 %v15287_v3  ;;  %11903 = vmatprep.subr.bf16.mxu1 %v15290_v11 }
0x1d79   : > { %11873 = vmatpush1.bf16.msra.mxu0 %v15293_v49  ;;  %11905 = vmatpush1.bf16.msra.mxu1 %v15297_v38 }
0x1d7a   : > { %11875 = vmatprep.subr.bf16.mxu0 %v15299_v53  ;;  %11907 = vmatprep.subr.bf16.mxu1 %v15302_v28 }
0x1d7d   : > { %11877 = vmatpush1.bf16.msra.mxu0 %v15305_v33  ;;  %11909 = vmatpush1.bf16.msra.mxu1 %v15309_v22 }
0x1d7e   : > { %11911 = vmatprep.subr.bf16.mxu0 %v15218_v20  ;;  %11943 = vmatprep.subr.bf16.mxu1 %v15220_v8 }
0x1e33   : > { %v7285_v52 = vpop.f32.mrb[64].mxu0  ;;  %v7356_v9 = vpop.f32.mrb[64].mxu1 }
0x1e34   : > { %v7382_v7 = vadd.f32 %v7365_v42, %v7285_v52  ;;  %v7287_v48 = vpop.f32.mrb[65].mxu0  ;;  %v7358_v58 = vpop.f32.mrb[65].mxu1  ;;  %v7384_v2 = vadd.f32 %v7373_v63, %v7356_v9 }
0x1e35   : > { %v7383_v41 = vadd.f32 %v7369_v25, %v7287_v48  ;;  %v7385_v51 = vadd.f32 %v7377_v30, %v7358_v58 }
0x1e36   : > { %v7386_v16 = vadd.f32 %v7382_v7, %v15387_v19  ;;  %v7388_v32 = vadd.f32 %v7384_v2, %v15402_v37 }
0x1e37   : > { %v7387_v15 = vadd.f32 %v7383_v41, %v15391_v62  ;;  %v7389_v1 = vadd.f32 %v7385_v51, %v15397_v47 }
0x1e38   : > { %v9596_v5 = vmul.f32 -1.442695, %v7386_v16 }
0x1e39   : > { %v9597_v40 = vmul.f32 -1.442695, %v7387_v15  ;;  %v9598_v12 = vmul.f32 -1.442695, %v7389_v1 }
0x1e3a   : > { %13011 = vpow2.f32 %v9596_v5 }
0x1e3b   : > { %13013 = vpow2.f32 %v9597_v40 }
0x1e3c   : > { %13015 = vpow2.f32 %v9598_v12 }
0x1e3d   : > { %13017 = vtanh.f32 %v7388_v32 }
0x1e44   : > { %v13012_v23 = vpop.eup %13011 }
0x1e45   : > { %v13014_v39 = vpop.eup %13013  ;;  %v7393_v42 = vadd.f32 1.0, %v13012_v23 }
0x1e46   : > { %v7399_v52 = vadd.f32 1.0, %v13014_v39  ;;  %v13016_v25 = vpop.eup %13015 }
0x1e47   : > { %13019 = vrcp.f32 %v7393_v42  ;;  %v13018_v7 = vpop.eup %13017  ;;  %v7406_v10 = vadd.f32 1.0, %v13016_v25 }
0x1e48   : > { %13021 = vrcp.f32 %v7399_v52 }
0x1e49   : > { %13023 = vrcp.f32 %v7406_v10 }
0x1e51   : > { %v13020_v48 = vpop.eup %13019 }
0x1e52   : > { %v13022_v58 = vpop.eup %13021  ;;  %v7410_v41 = vmul.f32 %v13020_v48, %v13018_v7 }
0x1e53   : > { %v7409_v16 = vmul.f32 %v13022_v58, %v15683_v55  ;;  %v13024_v15 = vpop.eup %13023  ;;  %v7415_v55 = vld [vmem:[#allocation4 + $0x20] ss:$8 sm:$0xf] }
0x1e54   : > { %v7562_v40 = vrot.slane %v7415_v55, %v14477_v31  ;;  %v7566_v1 = vrot.slane %v7415_v55, %v14531_v44  ;;  %v7574_v52 = vrot.slane %v7415_v55, %v14535_v46  ;;  %v7570_v58 = vrot.slane %v7415_v55, %v14528_v43 }
0x1e55   : > { %v15729_v9 = vadd.f32 %v7410_v41, %v7409_v16 }
0x1e57   : > { %13025 = vtanh.f32 %v15729_v9 }
0x1e61   : > { %v13026_v30 = vpop.eup %13025 }
0x1e62   : > { %v7413_v5 = vmul.f32 %v13026_v30, %v13024_v15 }
0x1e64   : > { %7481 = vmatmul.mubr.f32.vlgmr.msra.gmra.mrb[66].mxu0 %v7413_v5  ;;  %7552 = vmatmul.mubr.f32.vlgmr.msra.gmra.mrb[66].mxu1 %v7413_v5 }
0x1e65   : > { %11913 = vmatpush1.bf16.msra.mxu0 %v15222_v36  ;;  %11945 = vmatpush1.bf16.msra.mxu1 %v15225_v24 }
0x1e66   : > { %11915 = vmatprep.subr.bf16.mxu0 %v15230_v60  ;;  %11947 = vmatprep.subr.bf16.mxu1 %v15232_v59 }
0x1e67   : > { %7677 = vmatprep.mubr.f32.mxu0 %v13791_v0  ;;  %7748 = vmatprep.mubr.f32.mxu1 %v13791_v0 }
0x1e69   : > { %11917 = vmatpush1.bf16.msra.mxu0 %v15234_v45  ;;  %11949 = vmatpush1.bf16.msra.mxu1 %v15237_v54 }
0x1e6a   : > { %11919 = vmatprep.subr.bf16.mxu0 %v15242_v29  ;;  %11951 = vmatprep.subr.bf16.mxu1 %v15244_v56 }
0x1e6d   : > { %11921 = vmatpush1.bf16.msra.mxu0 %v15246_v57  ;;  %11953 = vmatpush1.bf16.msra.mxu1 %v15249_v6 }
0x1e6e   : > { %11923 = vmatprep.subr.bf16.mxu0 %v15254_v18  ;;  %11955 = vmatprep.subr.bf16.mxu1 %v15256_v34 }
0x1e71   : > { %11925 = vmatpush1.bf16.msra.mxu0 %v15258_v35  ;;  %11957 = vmatpush1.bf16.msra.mxu1 %v15261_v50 }
0x1e72   : > { %11927 = vmatprep.subr.bf16.mxu0 %v15265_v61  ;;  %11959 = vmatprep.subr.bf16.mxu1 %v15267_v4 }
0x1e75   : > { %11929 = vmatpush1.bf16.msra.mxu0 %v15270_v21  ;;  %11961 = vmatpush1.bf16.msra.mxu1 %v15274_v17 }
0x1e76   : > { %11931 = vmatprep.subr.bf16.mxu0 %v15276_v13  ;;  %11963 = vmatprep.subr.bf16.mxu1 %v15278_v27 }
0x1e79   : > { %11933 = vmatpush1.bf16.msra.mxu0 %v15281_v14  ;;  %11965 = vmatpush1.bf16.msra.mxu1 %v15285_v26 }
0x1e7a   : > { %11935 = vmatprep.subr.bf16.mxu0 %v15287_v3  ;;  %11967 = vmatprep.subr.bf16.mxu1 %v15290_v11 }
0x1e7d   : > { %11937 = vmatpush1.bf16.msra.mxu0 %v15293_v49  ;;  %11969 = vmatpush1.bf16.msra.mxu1 %v15297_v38 }
0x1e7e   : > { %11939 = vmatprep.subr.bf16.mxu0 %v15299_v53  ;;  %11971 = vmatprep.subr.bf16.mxu1 %v15302_v28 }
0x1e81   : > { %11941 = vmatpush1.bf16.msra.mxu0 %v15305_v33  ;;  %11973 = vmatpush1.bf16.msra.mxu1 %v15309_v22 }
0x1e82   : > { %11975 = vmatprep.subr.bf16.mxu0 %v15218_v20  ;;  %12007 = vmatprep.subr.bf16.mxu1 %v15220_v8 }
0x1f37   : > { %v7482_v51 = vpop.f32.mrb[66].mxu0  ;;  %v7553_v63 = vpop.f32.mrb[66].mxu1 }
0x1f38   : > { %v7579_v2 = vadd.f32 %v7562_v40, %v7482_v51  ;;  %v7484_v12 = vpop.f32.mrb[67].mxu0  ;;  %v7555_v32 = vpop.f32.mrb[67].mxu1  ;;  %v7581_v10 = vadd.f32 %v7570_v58, %v7553_v63 }
0x1f39   : > { %v7580_v23 = vadd.f32 %v7566_v1, %v7484_v12  ;;  %v7582_v48 = vadd.f32 %v7574_v52, %v7555_v32 }
0x1f3a   : > { %v7583_v39 = vadd.f32 %v7579_v2, %v15387_v19  ;;  %v7585_v15 = vadd.f32 %v7581_v10, %v15402_v37 }
0x1f3b   : > { %v7584_v42 = vadd.f32 %v7580_v23, %v15391_v62  ;;  %v7586_v41 = vadd.f32 %v7582_v48, %v15397_v47 }
0x1f3c   : > { %v9599_v25 = vmul.f32 -1.442695, %v7583_v39 }
0x1f3d   : > { %v9600_v7 = vmul.f32 -1.442695, %v7584_v42  ;;  %v9601_v16 = vmul.f32 -1.442695, %v7586_v41 }
0x1f3e   : > { %13027 = vpow2.f32 %v9599_v25 }
0x1f3f   : > { %13029 = vpow2.f32 %v9600_v7 }
0x1f40   : > { %13031 = vpow2.f32 %v9601_v16 }
0x1f41   : > { %13033 = vtanh.f32 %v7585_v15 }
0x1f48   : > { %v13028_v30 = vpop.eup %13027 }
0x1f49   : > { %v13030_v5 = vpop.eup %13029  ;;  %v7590_v40 = vadd.f32 1.0, %v13028_v30 }
0x1f4a   : > { %v7596_v51 = vadd.f32 1.0, %v13030_v5  ;;  %v13032_v1 = vpop.eup %13031 }
0x1f4b   : > { %13035 = vrcp.f32 %v7590_v40  ;;  %v13034_v2 = vpop.eup %13033  ;;  %v7603_v55 = vadd.f32 1.0, %v13032_v1 }
0x1f4c   : > { %13037 = vrcp.f32 %v7596_v51 }
0x1f4d   : > { %13039 = vrcp.f32 %v7603_v55 }
0x1f55   : > { %v13036_v12 = vpop.eup %13035 }
0x1f56   : > { %v13038_v32 = vpop.eup %13037  ;;  %v7607_v23 = vmul.f32 %v13036_v12, %v13034_v2 }
0x1f57   : > { %v7606_v39 = vmul.f32 %v13038_v32, %v15729_v9  ;;  %v13040_v42 = vpop.eup %13039  ;;  %v7612_v9 = vld [vmem:[#allocation4 + $0x21] ss:$8 sm:$0xf] }
0x1f58   : > { %v7759_v7 = vrot.slane %v7612_v9, %v14477_v31  ;;  %v7763_v41 = vrot.slane %v7612_v9, %v14531_v44  ;;  %v7771_v51 = vrot.slane %v7612_v9, %v14535_v46  ;;  %v7767_v32 = vrot.slane %v7612_v9, %v14528_v43 }
0x1f59   : > { %v15775_v63 = vadd.f32 %v7607_v23, %v7606_v39 }
0x1f5b   : > { %13041 = vtanh.f32 %v15775_v63 }
0x1f65   : > { %v13042_v52 = vpop.eup %13041 }
0x1f66   : > { %v7610_v25 = vmul.f32 %v13042_v52, %v13040_v42 }
0x1f68   : > { %7678 = vmatmul.mubr.f32.vlgmr.msra.gmra.mrb[68].mxu0 %v7610_v25  ;;  %7749 = vmatmul.mubr.f32.vlgmr.msra.gmra.mrb[68].mxu1 %v7610_v25 }
0x1f69   : > { %11977 = vmatpush1.bf16.msra.mxu0 %v15222_v36  ;;  %12009 = vmatpush1.bf16.msra.mxu1 %v15225_v24 }
0x1f6a   : > { %11979 = vmatprep.subr.bf16.mxu0 %v15230_v60  ;;  %12011 = vmatprep.subr.bf16.mxu1 %v15232_v59 }
0x1f6b   : > { %7874 = vmatprep.mubr.f32.mxu0 %v13791_v0  ;;  %7945 = vmatprep.mubr.f32.mxu1 %v13791_v0 }
0x1f6d   : > { %11981 = vmatpush1.bf16.msra.mxu0 %v15234_v45  ;;  %12013 = vmatpush1.bf16.msra.mxu1 %v15237_v54 }
0x1f6e   : > { %11983 = vmatprep.subr.bf16.mxu0 %v15242_v29  ;;  %12015 = vmatprep.subr.bf16.mxu1 %v15244_v56 }
0x1f71   : > { %11985 = vmatpush1.bf16.msra.mxu0 %v15246_v57  ;;  %12017 = vmatpush1.bf16.msra.mxu1 %v15249_v6 }
0x1f72   : > { %11987 = vmatprep.subr.bf16.mxu0 %v15254_v18  ;;  %12019 = vmatprep.subr.bf16.mxu1 %v15256_v34 }
0x1f75   : > { %11989 = vmatpush1.bf16.msra.mxu0 %v15258_v35  ;;  %12021 = vmatpush1.bf16.msra.mxu1 %v15261_v50 }
0x1f76   : > { %11991 = vmatprep.subr.bf16.mxu0 %v15265_v61  ;;  %12023 = vmatprep.subr.bf16.mxu1 %v15267_v4 }
0x1f79   : > { %11993 = vmatpush1.bf16.msra.mxu0 %v15270_v21  ;;  %12025 = vmatpush1.bf16.msra.mxu1 %v15274_v17 }
0x1f7a   : > { %11995 = vmatprep.subr.bf16.mxu0 %v15276_v13  ;;  %12027 = vmatprep.subr.bf16.mxu1 %v15278_v27 }
0x1f7d   : > { %11997 = vmatpush1.bf16.msra.mxu0 %v15281_v14  ;;  %12029 = vmatpush1.bf16.msra.mxu1 %v15285_v26 }
0x1f7e   : > { %11999 = vmatprep.subr.bf16.mxu0 %v15287_v3  ;;  %12031 = vmatprep.subr.bf16.mxu1 %v15290_v11 }
0x1f81   : > { %12001 = vmatpush1.bf16.msra.mxu0 %v15293_v49  ;;  %12033 = vmatpush1.bf16.msra.mxu1 %v15297_v38 }
0x1f82   : > { %12003 = vmatprep.subr.bf16.mxu0 %v15299_v53  ;;  %12035 = vmatprep.subr.bf16.mxu1 %v15302_v28 }
0x1f85   : > { %12005 = vmatpush1.bf16.msra.mxu0 %v15305_v33  ;;  %12037 = vmatpush1.bf16.msra.mxu1 %v15309_v22 }
0x1f86   : > { %12039 = vmatprep.subr.bf16.mxu0 %v15218_v20  ;;  %12071 = vmatprep.subr.bf16.mxu1 %v15220_v8 }
0x203b   : > { %v7679_v48 = vpop.f32.mrb[68].mxu0  ;;  %v7750_v58 = vpop.f32.mrb[68].mxu1 }
0x203c   : > { %v7776_v10 = vadd.f32 %v7759_v7, %v7679_v48  ;;  %v7681_v16 = vpop.f32.mrb[69].mxu0  ;;  %v7752_v15 = vpop.f32.mrb[69].mxu1  ;;  %v7778_v55 = vadd.f32 %v7767_v32, %v7750_v58 }
0x203d   : > { %v7777_v30 = vadd.f32 %v7763_v41, %v7681_v16  ;;  %v7779_v12 = vadd.f32 %v7771_v51, %v7752_v15 }
0x203e   : > { %v7780_v5 = vadd.f32 %v7776_v10, %v15387_v19  ;;  %v7782_v42 = vadd.f32 %v7778_v55, %v15402_v37 }
0x203f   : > { %v7781_v40 = vadd.f32 %v7777_v30, %v15391_v62  ;;  %v7783_v23 = vadd.f32 %v7779_v12, %v15397_v47 }
0x2040   : > { %v9602_v1 = vmul.f32 -1.442695, %v7780_v5 }
0x2041   : > { %v9603_v2 = vmul.f32 -1.442695, %v7781_v40  ;;  %v9604_v39 = vmul.f32 -1.442695, %v7783_v23 }
0x2042   : > { %13043 = vpow2.f32 %v9602_v1 }
0x2043   : > { %13045 = vpow2.f32 %v9603_v2 }
0x2044   : > { %13047 = vpow2.f32 %v9604_v39 }
0x2045   : > { %13049 = vtanh.f32 %v7782_v42 }
0x204c   : > { %v13044_v52 = vpop.eup %13043 }
0x204d   : > { %v13046_v25 = vpop.eup %13045  ;;  %v7787_v7 = vadd.f32 1.0, %v13044_v52 }
0x204e   : > { %v7793_v48 = vadd.f32 1.0, %v13046_v25  ;;  %v13048_v41 = vpop.eup %13047 }
0x204f   : > { %13051 = vrcp.f32 %v7787_v7  ;;  %v13050_v10 = vpop.eup %13049  ;;  %v7800_v9 = vadd.f32 1.0, %v13048_v41 }
0x2050   : > { %13053 = vrcp.f32 %v7793_v48 }
0x2051   : > { %13055 = vrcp.f32 %v7800_v9 }
0x2059   : > { %v13052_v16 = vpop.eup %13051 }
0x205a   : > { %v13054_v15 = vpop.eup %13053  ;;  %v7804_v30 = vmul.f32 %v13052_v16, %v13050_v10 }
0x205b   : > { %v7803_v5 = vmul.f32 %v13054_v15, %v15775_v63  ;;  %v13056_v40 = vpop.eup %13055  ;;  %v7809_v63 = vld [vmem:[#allocation4 + $0x22] ss:$8 sm:$0xf] }
0x205c   : > { %v7956_v2 = vrot.slane %v7809_v63, %v14477_v31  ;;  %v7960_v23 = vrot.slane %v7809_v63, %v14531_v44  ;;  %v7968_v48 = vrot.slane %v7809_v63, %v14535_v46  ;;  %v7964_v15 = vrot.slane %v7809_v63, %v14528_v43 }
0x205d   : > { %v15821_v58 = vadd.f32 %v7804_v30, %v7803_v5 }
0x205f   : > { %13057 = vtanh.f32 %v15821_v58 }
0x2069   : > { %v13058_v51 = vpop.eup %13057 }
0x206a   : > { %v7807_v1 = vmul.f32 %v13058_v51, %v13056_v40 }
0x206c   : > { %7875 = vmatmul.mubr.f32.vlgmr.msra.gmra.mrb[70].mxu0 %v7807_v1  ;;  %7946 = vmatmul.mubr.f32.vlgmr.msra.gmra.mrb[70].mxu1 %v7807_v1 }
0x206d   : > { %12041 = vmatpush1.bf16.msra.mxu0 %v15222_v36  ;;  %12073 = vmatpush1.bf16.msra.mxu1 %v15225_v24 }
0x206e   : > { %12043 = vmatprep.subr.bf16.mxu0 %v15230_v60  ;;  %12075 = vmatprep.subr.bf16.mxu1 %v15232_v59 }
0x206f   : > { %8071 = vmatprep.mubr.f32.mxu0 %v13791_v0  ;;  %8142 = vmatprep.mubr.f32.mxu1 %v13791_v0 }
0x2071   : > { %12045 = vmatpush1.bf16.msra.mxu0 %v15234_v45  ;;  %12077 = vmatpush1.bf16.msra.mxu1 %v15237_v54 }
0x2072   : > { %12047 = vmatprep.subr.bf16.mxu0 %v15242_v29  ;;  %12079 = vmatprep.subr.bf16.mxu1 %v15244_v56 }
0x2075   : > { %12049 = vmatpush1.bf16.msra.mxu0 %v15246_v57  ;;  %12081 = vmatpush1.bf16.msra.mxu1 %v15249_v6 }
0x2076   : > { %12051 = vmatprep.subr.bf16.mxu0 %v15254_v18  ;;  %12083 = vmatprep.subr.bf16.mxu1 %v15256_v34 }
0x2079   : > { %12053 = vmatpush1.bf16.msra.mxu0 %v15258_v35  ;;  %12085 = vmatpush1.bf16.msra.mxu1 %v15261_v50 }
0x207a   : > { %12055 = vmatprep.subr.bf16.mxu0 %v15265_v61  ;;  %12087 = vmatprep.subr.bf16.mxu1 %v15267_v4 }
0x207d   : > { %12057 = vmatpush1.bf16.msra.mxu0 %v15270_v21  ;;  %12089 = vmatpush1.bf16.msra.mxu1 %v15274_v17 }
0x207e   : > { %12059 = vmatprep.subr.bf16.mxu0 %v15276_v13  ;;  %12091 = vmatprep.subr.bf16.mxu1 %v15278_v27 }
0x2081   : > { %12061 = vmatpush1.bf16.msra.mxu0 %v15281_v14  ;;  %12093 = vmatpush1.bf16.msra.mxu1 %v15285_v26 }
0x2082   : > { %12063 = vmatprep.subr.bf16.mxu0 %v15287_v3  ;;  %12095 = vmatprep.subr.bf16.mxu1 %v15290_v11 }
0x2085   : > { %12065 = vmatpush1.bf16.msra.mxu0 %v15293_v49  ;;  %12097 = vmatpush1.bf16.msra.mxu1 %v15297_v38 }
0x2086   : > { %12067 = vmatprep.subr.bf16.mxu0 %v15299_v53  ;;  %12099 = vmatprep.subr.bf16.mxu1 %v15302_v28 }
0x2089   : > { %12069 = vmatpush1.bf16.msra.mxu0 %v15305_v33  ;;  %12101 = vmatpush1.bf16.msra.mxu1 %v15309_v22 }
0x208a   : > { %12103 = vmatprep.subr.bf16.mxu0 %v15218_v20  ;;  %12135 = vmatprep.subr.bf16.mxu1 %v15220_v8 }
0x213f   : > { %v7876_v12 = vpop.f32.mrb[70].mxu0  ;;  %v7947_v32 = vpop.f32.mrb[70].mxu1 }
0x2140   : > { %v7973_v55 = vadd.f32 %v7956_v2, %v7876_v12  ;;  %v7878_v39 = vpop.f32.mrb[71].mxu0  ;;  %v7949_v42 = vpop.f32.mrb[71].mxu1  ;;  %v7975_v9 = vadd.f32 %v7964_v15, %v7947_v32 }
0x2141   : > { %v7974_v52 = vadd.f32 %v7960_v23, %v7878_v39  ;;  %v7976_v16 = vadd.f32 %v7968_v48, %v7949_v42 }
0x2142   : > { %v7977_v25 = vadd.f32 %v7973_v55, %v15387_v19  ;;  %v7979_v40 = vadd.f32 %v7975_v9, %v15402_v37 }
0x2143   : > { %v7978_v7 = vadd.f32 %v7974_v52, %v15391_v62  ;;  %v7980_v30 = vadd.f32 %v7976_v16, %v15397_v47 }
0x2144   : > { %v9605_v41 = vmul.f32 -1.442695, %v7977_v25 }
0x2145   : > { %v9606_v10 = vmul.f32 -1.442695, %v7978_v7  ;;  %v9607_v5 = vmul.f32 -1.442695, %v7980_v30 }
0x2146   : > { %13059 = vpow2.f32 %v9605_v41 }
0x2147   : > { %13061 = vpow2.f32 %v9606_v10 }
0x2148   : > { %13063 = vpow2.f32 %v9607_v5 }
0x2149   : > { %13065 = vtanh.f32 %v7979_v40 }
0x2150   : > { %v13060_v51 = vpop.eup %13059 }
0x2151   : > { %v13062_v1 = vpop.eup %13061  ;;  %v7984_v2 = vadd.f32 1.0, %v13060_v51 }
0x2152   : > { %v7990_v12 = vadd.f32 1.0, %v13062_v1  ;;  %v13064_v23 = vpop.eup %13063 }
0x2153   : > { %13067 = vrcp.f32 %v7984_v2  ;;  %v13066_v55 = vpop.eup %13065  ;;  %v7997_v63 = vadd.f32 1.0, %v13064_v23 }
0x2154   : > { %13069 = vrcp.f32 %v7990_v12 }
0x2155   : > { %13071 = vrcp.f32 %v7997_v63 }
0x215d   : > { %v13068_v39 = vpop.eup %13067 }
0x215e   : > { %v13070_v42 = vpop.eup %13069  ;;  %v8001_v52 = vmul.f32 %v13068_v39, %v13066_v55 }
0x215f   : > { %v8000_v25 = vmul.f32 %v13070_v42, %v15821_v58  ;;  %v13072_v7 = vpop.eup %13071  ;;  %v8006_v58 = vld [vmem:[#allocation4 + $0x23] ss:$8 sm:$0xf] }
0x2160   : > { %v8153_v10 = vrot.slane %v8006_v58, %v14477_v31  ;;  %v8157_v30 = vrot.slane %v8006_v58, %v14531_v44  ;;  %v8165_v12 = vrot.slane %v8006_v58, %v14535_v46  ;;  %v8161_v42 = vrot.slane %v8006_v58, %v14528_v43 }
0x2161   : > { %v15867_v32 = vadd.f32 %v8001_v52, %v8000_v25 }
0x2163   : > { %13073 = vtanh.f32 %v15867_v32 }
0x216d   : > { %v13074_v48 = vpop.eup %13073 }
0x216e   : > { %v8004_v41 = vmul.f32 %v13074_v48, %v13072_v7 }
0x2170   : > { %8072 = vmatmul.mubr.f32.vlgmr.msra.gmra.mrb[72].mxu0 %v8004_v41  ;;  %8143 = vmatmul.mubr.f32.vlgmr.msra.gmra.mrb[72].mxu1 %v8004_v41 }
0x2171   : > { %12105 = vmatpush1.bf16.msra.mxu0 %v15222_v36  ;;  %12137 = vmatpush1.bf16.msra.mxu1 %v15225_v24 }
0x2172   : > { %12107 = vmatprep.subr.bf16.mxu0 %v15230_v60  ;;  %12139 = vmatprep.subr.bf16.mxu1 %v15232_v59 }
0x2173   : > { %8268 = vmatprep.mubr.f32.mxu0 %v13791_v0  ;;  %8339 = vmatprep.mubr.f32.mxu1 %v13791_v0 }
0x2175   : > { %12109 = vmatpush1.bf16.msra.mxu0 %v15234_v45  ;;  %12141 = vmatpush1.bf16.msra.mxu1 %v15237_v54 }
0x2176   : > { %12111 = vmatprep.subr.bf16.mxu0 %v15242_v29  ;;  %12143 = vmatprep.subr.bf16.mxu1 %v15244_v56 }
0x2179   : > { %12113 = vmatpush1.bf16.msra.mxu0 %v15246_v57  ;;  %12145 = vmatpush1.bf16.msra.mxu1 %v15249_v6 }
0x217a   : > { %12115 = vmatprep.subr.bf16.mxu0 %v15254_v18  ;;  %12147 = vmatprep.subr.bf16.mxu1 %v15256_v34 }
0x217d   : > { %12117 = vmatpush1.bf16.msra.mxu0 %v15258_v35  ;;  %12149 = vmatpush1.bf16.msra.mxu1 %v15261_v50 }
0x217e   : > { %12119 = vmatprep.subr.bf16.mxu0 %v15265_v61  ;;  %12151 = vmatprep.subr.bf16.mxu1 %v15267_v4 }
0x2181   : > { %12121 = vmatpush1.bf16.msra.mxu0 %v15270_v21  ;;  %12153 = vmatpush1.bf16.msra.mxu1 %v15274_v17 }
0x2182   : > { %12123 = vmatprep.subr.bf16.mxu0 %v15276_v13  ;;  %12155 = vmatprep.subr.bf16.mxu1 %v15278_v27 }
0x2185   : > { %12125 = vmatpush1.bf16.msra.mxu0 %v15281_v14  ;;  %12157 = vmatpush1.bf16.msra.mxu1 %v15285_v26 }
0x2186   : > { %12127 = vmatprep.subr.bf16.mxu0 %v15287_v3  ;;  %12159 = vmatprep.subr.bf16.mxu1 %v15290_v11 }
0x2189   : > { %12129 = vmatpush1.bf16.msra.mxu0 %v15293_v49  ;;  %12161 = vmatpush1.bf16.msra.mxu1 %v15297_v38 }
0x218a   : > { %12131 = vmatprep.subr.bf16.mxu0 %v15299_v53  ;;  %12163 = vmatprep.subr.bf16.mxu1 %v15302_v28 }
0x218d   : > { %12133 = vmatpush1.bf16.msra.mxu0 %v15305_v33  ;;  %12165 = vmatpush1.bf16.msra.mxu1 %v15309_v22 }
0x218e   : > { %12167 = vmatprep.subr.bf16.mxu0 %v15218_v20  ;;  %12199 = vmatprep.subr.bf16.mxu1 %v15220_v8 }
0x2243   : > { %v8073_v16 = vpop.f32.mrb[72].mxu0  ;;  %v8144_v15 = vpop.f32.mrb[72].mxu1 }
0x2244   : > { %v8170_v9 = vadd.f32 %v8153_v10, %v8073_v16  ;;  %v8075_v5 = vpop.f32.mrb[73].mxu0  ;;  %v8146_v40 = vpop.f32.mrb[73].mxu1  ;;  %v8172_v63 = vadd.f32 %v8161_v42, %v8144_v15 }
0x2245   : > { %v8171_v51 = vadd.f32 %v8157_v30, %v8075_v5  ;;  %v8173_v39 = vadd.f32 %v8165_v12, %v8146_v40 }
0x2246   : > { %v8174_v1 = vadd.f32 %v8170_v9, %v15387_v19  ;;  %v8176_v7 = vadd.f32 %v8172_v63, %v15402_v37 }
0x2247   : > { %v8175_v2 = vadd.f32 %v8171_v51, %v15391_v62  ;;  %v8177_v52 = vadd.f32 %v8173_v39, %v15397_v47 }
0x2248   : > { %v9608_v23 = vmul.f32 -1.442695, %v8174_v1 }
0x2249   : > { %v9609_v55 = vmul.f32 -1.442695, %v8175_v2  ;;  %v9610_v25 = vmul.f32 -1.442695, %v8177_v52 }
0x224a   : > { %13075 = vpow2.f32 %v9608_v23 }
0x224b   : > { %13077 = vpow2.f32 %v9609_v55 }
0x224c   : > { %13079 = vpow2.f32 %v9610_v25 }
0x224d   : > { %13081 = vtanh.f32 %v8176_v7 }
0x2254   : > { %v13076_v48 = vpop.eup %13075 }
0x2255   : > { %v13078_v41 = vpop.eup %13077  ;;  %v8181_v10 = vadd.f32 1.0, %v13076_v48 }
0x2256   : > { %v8187_v16 = vadd.f32 1.0, %v13078_v41  ;;  %v13080_v30 = vpop.eup %13079 }
0x2257   : > { %13083 = vrcp.f32 %v8181_v10  ;;  %v13082_v9 = vpop.eup %13081  ;;  %v8194_v58 = vadd.f32 1.0, %v13080_v30 }
0x2258   : > { %13085 = vrcp.f32 %v8187_v16 }
0x2259   : > { %13087 = vrcp.f32 %v8194_v58 }
0x2261   : > { %v13084_v5 = vpop.eup %13083 }
0x2262   : > { %v13086_v40 = vpop.eup %13085  ;;  %v8198_v51 = vmul.f32 %v13084_v5, %v13082_v9 }
0x2263   : > { %v8197_v1 = vmul.f32 %v13086_v40, %v15867_v32  ;;  %v13088_v2 = vpop.eup %13087  ;;  %v8203_v32 = vld [vmem:[#allocation4 + $0x24] ss:$8 sm:$0xf] }
0x2264   : > { %v8350_v55 = vrot.slane %v8203_v32, %v14477_v31  ;;  %v8354_v52 = vrot.slane %v8203_v32, %v14531_v44  ;;  %v8362_v16 = vrot.slane %v8203_v32, %v14535_v46  ;;  %v8358_v40 = vrot.slane %v8203_v32, %v14528_v43 }
0x2265   : > { %v15913_v15 = vadd.f32 %v8198_v51, %v8197_v1 }
0x2267   : > { %13089 = vtanh.f32 %v15913_v15 }
0x2271   : > { %v13090_v12 = vpop.eup %13089 }
0x2272   : > { %v8201_v23 = vmul.f32 %v13090_v12, %v13088_v2 }
0x2274   : > { %8269 = vmatmul.mubr.f32.vlgmr.msra.gmra.mrb[74].mxu0 %v8201_v23  ;;  %8340 = vmatmul.mubr.f32.vlgmr.msra.gmra.mrb[74].mxu1 %v8201_v23 }
0x2275   : > { %12169 = vmatpush1.bf16.msra.mxu0 %v15222_v36  ;;  %12201 = vmatpush1.bf16.msra.mxu1 %v15225_v24 }
0x2276   : > { %12171 = vmatprep.subr.bf16.mxu0 %v15230_v60  ;;  %12203 = vmatprep.subr.bf16.mxu1 %v15232_v59 }
0x2277   : > { %8465 = vmatprep.mubr.f32.mxu0 %v13791_v0  ;;  %8536 = vmatprep.mubr.f32.mxu1 %v13791_v0 }
0x2279   : > { %12173 = vmatpush1.bf16.msra.mxu0 %v15234_v45  ;;  %12205 = vmatpush1.bf16.msra.mxu1 %v15237_v54 }
0x227a   : > { %12175 = vmatprep.subr.bf16.mxu0 %v15242_v29  ;;  %12207 = vmatprep.subr.bf16.mxu1 %v15244_v56 }
0x227d   : > { %12177 = vmatpush1.bf16.msra.mxu0 %v15246_v57  ;;  %12209 = vmatpush1.bf16.msra.mxu1 %v15249_v6 }
0x227e   : > { %12179 = vmatprep.subr.bf16.mxu0 %v15254_v18  ;;  %12211 = vmatprep.subr.bf16.mxu1 %v15256_v34 }
0x2281   : > { %12181 = vmatpush1.bf16.msra.mxu0 %v15258_v35  ;;  %12213 = vmatpush1.bf16.msra.mxu1 %v15261_v50 }
0x2282   : > { %12183 = vmatprep.subr.bf16.mxu0 %v15265_v61  ;;  %12215 = vmatprep.subr.bf16.mxu1 %v15267_v4 }
0x2285   : > { %12185 = vmatpush1.bf16.msra.mxu0 %v15270_v21  ;;  %12217 = vmatpush1.bf16.msra.mxu1 %v15274_v17 }
0x2286   : > { %12187 = vmatprep.subr.bf16.mxu0 %v15276_v13  ;;  %12219 = vmatprep.subr.bf16.mxu1 %v15278_v27 }
0x2289   : > { %12189 = vmatpush1.bf16.msra.mxu0 %v15281_v14  ;;  %12221 = vmatpush1.bf16.msra.mxu1 %v15285_v26 }
0x228a   : > { %12191 = vmatprep.subr.bf16.mxu0 %v15287_v3  ;;  %12223 = vmatprep.subr.bf16.mxu1 %v15290_v11 }
0x228d   : > { %12193 = vmatpush1.bf16.msra.mxu0 %v15293_v49  ;;  %12225 = vmatpush1.bf16.msra.mxu1 %v15297_v38 }
0x228e   : > { %12195 = vmatprep.subr.bf16.mxu0 %v15299_v53  ;;  %12227 = vmatprep.subr.bf16.mxu1 %v15302_v28 }
0x2291   : > { %12197 = vmatpush1.bf16.msra.mxu0 %v15305_v33  ;;  %12229 = vmatpush1.bf16.msra.mxu1 %v15309_v22 }
0x2292   : > { %12231 = vmatprep.subr.bf16.mxu0 %v15218_v20  ;;  %12263 = vmatprep.subr.bf16.mxu1 %v15220_v8 }
0x2347   : > { %v8270_v39 = vpop.f32.mrb[74].mxu0  ;;  %v8341_v42 = vpop.f32.mrb[74].mxu1 }
0x2348   : > { %v8367_v63 = vadd.f32 %v8350_v55, %v8270_v39  ;;  %v8272_v25 = vpop.f32.mrb[75].mxu0  ;;  %v8343_v7 = vpop.f32.mrb[75].mxu1  ;;  %v8369_v58 = vadd.f32 %v8358_v40, %v8341_v42 }
0x2349   : > { %v8368_v48 = vadd.f32 %v8354_v52, %v8272_v25  ;;  %v8370_v5 = vadd.f32 %v8362_v16, %v8343_v7 }
0x234a   : > { %v8371_v41 = vadd.f32 %v8367_v63, %v15387_v19  ;;  %v8373_v2 = vadd.f32 %v8369_v58, %v15402_v37 }
0x234b   : > { %v8372_v10 = vadd.f32 %v8368_v48, %v15391_v62  ;;  %v8374_v51 = vadd.f32 %v8370_v5, %v15397_v47 }
0x234c   : > { %v9611_v30 = vmul.f32 -1.442695, %v8371_v41 }
0x234d   : > { %v9612_v9 = vmul.f32 -1.442695, %v8372_v10  ;;  %v9613_v1 = vmul.f32 -1.442695, %v8374_v51 }
0x234e   : > { %13091 = vpow2.f32 %v9611_v30 }
0x234f   : > { %13093 = vpow2.f32 %v9612_v9 }
0x2350   : > { %13095 = vpow2.f32 %v9613_v1 }
0x2351   : > { %13097 = vtanh.f32 %v8373_v2 }
0x2358   : > { %v13092_v12 = vpop.eup %13091 }
0x2359   : > { %v13094_v23 = vpop.eup %13093  ;;  %v8378_v55 = vadd.f32 1.0, %v13092_v12 }
0x235a   : > { %v8384_v39 = vadd.f32 1.0, %v13094_v23  ;;  %v13096_v52 = vpop.eup %13095 }
0x235b   : > { %13099 = vrcp.f32 %v8378_v55  ;;  %v13098_v63 = vpop.eup %13097  ;;  %v8391_v32 = vadd.f32 1.0, %v13096_v52 }
0x235c   : > { %13101 = vrcp.f32 %v8384_v39 }
0x235d   : > { %13103 = vrcp.f32 %v8391_v32 }
0x2365   : > { %v13100_v25 = vpop.eup %13099 }
0x2366   : > { %v13102_v7 = vpop.eup %13101  ;;  %v8395_v48 = vmul.f32 %v13100_v25, %v13098_v63 }
0x2367   : > { %v8394_v41 = vmul.f32 %v13102_v7, %v15913_v15  ;;  %v13104_v10 = vpop.eup %13103  ;;  %v8400_v15 = vld [vmem:[#allocation4 + $0x25] ss:$8 sm:$0xf] }
0x2368   : > { %v8547_v9 = vrot.slane %v8400_v15, %v14477_v31  ;;  %v8551_v51 = vrot.slane %v8400_v15, %v14531_v44  ;;  %v8559_v39 = vrot.slane %v8400_v15, %v14535_v46  ;;  %v8555_v63 = vrot.slane %v8400_v15, %v14528_v43 }
0x2369   : > { %v15959_v42 = vadd.f32 %v8395_v48, %v8394_v41 }
0x236b   : > { %13105 = vtanh.f32 %v15959_v42 }
0x2375   : > { %v13106_v16 = vpop.eup %13105 }
0x2376   : > { %v8398_v30 = vmul.f32 %v13106_v16, %v13104_v10 }
0x2378   : > { %8466 = vmatmul.mubr.f32.vlgmr.msra.gmra.mrb[76].mxu0 %v8398_v30  ;;  %8537 = vmatmul.mubr.f32.vlgmr.msra.gmra.mrb[76].mxu1 %v8398_v30 }
0x2379   : > { %12233 = vmatpush1.bf16.msra.mxu0 %v15222_v36  ;;  %12265 = vmatpush1.bf16.msra.mxu1 %v15225_v24 }
0x237a   : > { %12235 = vmatprep.subr.bf16.mxu0 %v15230_v60  ;;  %12267 = vmatprep.subr.bf16.mxu1 %v15232_v59 }
0x237b   : > { %8662 = vmatprep.mubr.f32.mxu0 %v13791_v0  ;;  %8733 = vmatprep.mubr.f32.mxu1 %v13791_v0 }
0x237d   : > { %12237 = vmatpush1.bf16.msra.mxu0 %v15234_v45  ;;  %12269 = vmatpush1.bf16.msra.mxu1 %v15237_v54 }
0x237e   : > { %12239 = vmatprep.subr.bf16.mxu0 %v15242_v29  ;;  %12271 = vmatprep.subr.bf16.mxu1 %v15244_v56 }
0x2381   : > { %12241 = vmatpush1.bf16.msra.mxu0 %v15246_v57  ;;  %12273 = vmatpush1.bf16.msra.mxu1 %v15249_v6 }
0x2382   : > { %12243 = vmatprep.subr.bf16.mxu0 %v15254_v18  ;;  %12275 = vmatprep.subr.bf16.mxu1 %v15256_v34 }
0x2385   : > { %12245 = vmatpush1.bf16.msra.mxu0 %v15258_v35  ;;  %12277 = vmatpush1.bf16.msra.mxu1 %v15261_v50 }
0x2386   : > { %12247 = vmatprep.subr.bf16.mxu0 %v15265_v61  ;;  %12279 = vmatprep.subr.bf16.mxu1 %v15267_v4 }
0x2389   : > { %12249 = vmatpush1.bf16.msra.mxu0 %v15270_v21  ;;  %12281 = vmatpush1.bf16.msra.mxu1 %v15274_v17 }
0x238a   : > { %12251 = vmatprep.subr.bf16.mxu0 %v15276_v13  ;;  %12283 = vmatprep.subr.bf16.mxu1 %v15278_v27 }
0x238d   : > { %12253 = vmatpush1.bf16.msra.mxu0 %v15281_v14  ;;  %12285 = vmatpush1.bf16.msra.mxu1 %v15285_v26 }
0x238e   : > { %12255 = vmatprep.subr.bf16.mxu0 %v15287_v3  ;;  %12287 = vmatprep.subr.bf16.mxu1 %v15290_v11 }
0x2391   : > { %12257 = vmatpush1.bf16.msra.mxu0 %v15293_v49  ;;  %12289 = vmatpush1.bf16.msra.mxu1 %v15297_v38 }
0x2392   : > { %12259 = vmatprep.subr.bf16.mxu0 %v15299_v53  ;;  %12291 = vmatprep.subr.bf16.mxu1 %v15302_v28 }
0x2395   : > { %12261 = vmatpush1.bf16.msra.mxu0 %v15305_v33  ;;  %12293 = vmatpush1.bf16.msra.mxu1 %v15309_v22 }
0x2396   : > { %12295 = vmatprep.subr.bf16.mxu0 %v15218_v20  ;;  %12327 = vmatprep.subr.bf16.mxu1 %v15220_v8 }
0x244b   : > { %v8467_v5 = vpop.f32.mrb[76].mxu0  ;;  %v8538_v40 = vpop.f32.mrb[76].mxu1 }
0x244c   : > { %v8564_v58 = vadd.f32 %v8547_v9, %v8467_v5  ;;  %v8469_v1 = vpop.f32.mrb[77].mxu0  ;;  %v8540_v2 = vpop.f32.mrb[77].mxu1  ;;  %v8566_v7 = vadd.f32 %v8555_v63, %v8538_v40  ;;  %v8990_v63 = vld [vmem:[#allocation32] sm:$0xff] }
0x244d   : > { %v8565_v12 = vadd.f32 %v8551_v51, %v8469_v1  ;;  %v8567_v8 = vadd.f32 %v8559_v39, %v8540_v2 }
0x244e   : > { %v8568_v23 = vadd.f32 %v8564_v58, %v15387_v19  ;;  %v8570_v32 = vadd.f32 %v8566_v7, %v15402_v37 }
0x244f   : > { %v8569_v55 = vadd.f32 %v8565_v12, %v15391_v62  ;;  %v8571_v25 = vadd.f32 %v8567_v8, %v15397_v47 }
0x2450   : > { %v9614_v20 = vmul.f32 -1.442695, %v8568_v23 }
0x2451   : > { %v9615_v52 = vmul.f32 -1.442695, %v8569_v55  ;;  %v9616_v48 = vmul.f32 -1.442695, %v8571_v25  ;;  %v8991_v25 = vld [vmem:[#allocation32 + $0x8] sm:$0xff] }
0x2452   : > { %13107 = vpow2.f32 %v9614_v20  ;;  %v12359_v7 = vpack.c.bf16 %v8991_v25, %v8990_v63 }
0x2453   : > { %13109 = vpow2.f32 %v9615_v52 }
0x2454   : > { %13111 = vpow2.f32 %v9616_v48  ;;  %v13792_v48 = vmov 0.0|0.0  }
0x2455   : > { %13113 = vtanh.f32 %v8570_v32  ;;  %v8992_v32 = vld [vmem:[#allocation32 + $0x10] sm:$0xff] }
0x245c   : > { %v13108_v41 = vpop.eup %13107 }
0x245d   : > { %v13110_v10 = vpop.eup %13109  ;;  %v8575_v16 = vadd.f32 1.0, %v13108_v41  ;;  %v8993_v41 = vld [vmem:[#allocation32 + $0x18] sm:$0xff] }
0x245e   : > { %v8581_v30 = vadd.f32 1.0, %v13110_v10  ;;  %v13112_v9 = vpop.eup %13111  ;;  %v12362_v10 = vpack.c.bf16 %v8993_v41, %v8992_v32 }
0x245f   : > { %13115 = vrcp.f32 %v8575_v16  ;;  %v13114_v5 = vpop.eup %13113  ;;  %v8588_v15 = vadd.f32 1.0, %v13112_v9  ;;  %v8994_v16 = vld [vmem:[#allocation32 + $0x20] sm:$0xff] }
0x2460   : > { %13117 = vrcp.f32 %v8581_v30  ;;  %v8995_v30 = vld [vmem:[#allocation32 + $0x28] sm:$0xff] }
0x2461   : > { %13119 = vrcp.f32 %v8588_v15  ;;  %v12365_v9 = vpack.c.bf16 %v8995_v30, %v8994_v16  ;;  %v8999_v15 = vld [vmem:[#allocation32 + $0x48] sm:$0xff] }
0x2469   : > { %v13116_v51 = vpop.eup %13115 }
0x246a   : > { %v13118_v58 = vpop.eup %13117  ;;  %v8592_v1 = vmul.f32 %v13116_v51, %v13114_v5  ;;  %v8996_v5 = vld [vmem:[#allocation32 + $0x30] sm:$0xff]  ;;  %v8997_v51 = vld [vmem:[#allocation32 + $0x38] sm:$0xff] }
0x246b   : > { %v8591_v2 = vmul.f32 %v13118_v58, %v15959_v42  ;;  %v13120_v12 = vpop.eup %13119  ;;  %v12368_v58 = vpack.c.bf16 %v8997_v51, %v8996_v5 }
0x246d   : > { %v16005_v40 = vadd.f32 %v8592_v1, %v8591_v2  ;;  %v8998_v1 = vld [vmem:[#allocation32 + $0x40] sm:$0xff] }
0x246e   : > { %v12371_v2 = vpack.c.bf16 %v8999_v15, %v8998_v1 }
0x246f   : > { %13121 = vtanh.f32 %v16005_v40 }
0x2479   : > { %v13122_v23 = vpop.eup %13121 }
0x247a   : > { %v8595_v55 = vmul.f32 %v13122_v23, %v13120_v12  ;;  %v9001_v12 = vld [vmem:[#allocation32 + $0x58] sm:$0xff] }
0x247c   : > { %8663 = vmatmul.mubr.f32.vlgmr.msra.gmra.mrb[78].mxu0 %v8595_v55  ;;  %8734 = vmatmul.mubr.f32.vlgmr.msra.gmra.mrb[78].mxu1 %v8595_v55  ;;  %v9002_v55 = vld [vmem:[#allocation32 + $0x60] sm:$0xff] }
0x247d   : > { %12297 = vmatpush1.bf16.msra.mxu0 %v15222_v36  ;;  %12329 = vmatpush1.bf16.msra.mxu1 %v15225_v24  ;;  %v8597_v36 = vld [vmem:[#allocation4 + $0x26] ss:$8 sm:$0xf] }
0x247e   : > { %12299 = vmatprep.subr.bf16.mxu0 %v15230_v60  ;;  %12331 = vmatprep.subr.bf16.mxu1 %v15232_v59  ;;  %v8744_v24 = vrot.slane %v8597_v36, %v14477_v31 }
0x247f   : > { %8859 = vmatprep.mubr.f32.mxu0 %v13791_v0  ;;  %8930 = vmatprep.mubr.f32.mxu1 %v13791_v0 }
0x2481   : > { %12301 = vmatpush1.bf16.msra.mxu0 %v15234_v45  ;;  %12333 = vmatpush1.bf16.msra.mxu1 %v15237_v54  ;;  %v8748_v45 = vrot.slane %v8597_v36, %v14531_v44 }
0x2482   : > { %12303 = vmatprep.subr.bf16.mxu0 %v15242_v29  ;;  %12335 = vmatprep.subr.bf16.mxu1 %v15244_v56 }
0x2485   : > { %12305 = vmatpush1.bf16.msra.mxu0 %v15246_v57  ;;  %12337 = vmatpush1.bf16.msra.mxu1 %v15249_v6 }
0x2486   : > { %12307 = vmatprep.subr.bf16.mxu0 %v15254_v18  ;;  %12339 = vmatprep.subr.bf16.mxu1 %v15256_v34  ;;  %v8756_v34 = vrot.slane %v8597_v36, %v14535_v46 }
0x2489   : > { %12309 = vmatpush1.bf16.msra.mxu0 %v15258_v35  ;;  %12341 = vmatpush1.bf16.msra.mxu1 %v15261_v50 }
0x248a   : > { %12311 = vmatprep.subr.bf16.mxu0 %v15265_v61  ;;  %12343 = vmatprep.subr.bf16.mxu1 %v15267_v4  ;;  %v8752_v4 = vrot.slane %v8597_v36, %v14528_v43  ;;  %v9003_v36 = vld [vmem:[#allocation32 + $0x68] sm:$0xff] }
0x248d   : > { %12313 = vmatpush1.bf16.msra.mxu0 %v15270_v21  ;;  %12345 = vmatpush1.bf16.msra.mxu1 %v15274_v17 }
0x248e   : > { %12315 = vmatprep.subr.bf16.mxu0 %v15276_v13  ;;  %12347 = vmatprep.subr.bf16.mxu1 %v15278_v27 }
0x2491   : > { %12317 = vmatpush1.bf16.msra.mxu0 %v15281_v14  ;;  %12349 = vmatpush1.bf16.msra.mxu1 %v15285_v26 }
0x2492   : > { %12319 = vmatprep.subr.bf16.mxu0 %v15287_v3  ;;  %12351 = vmatprep.subr.bf16.mxu1 %v15290_v11 }
0x2495   : > { %12321 = vmatpush1.bf16.msra.mxu0 %v15293_v49  ;;  %12353 = vmatpush1.bf16.msra.mxu1 %v15297_v38 }
0x2496   : > { %12323 = vmatprep.subr.bf16.mxu0 %v15299_v53  ;;  %12355 = vmatprep.subr.bf16.mxu1 %v15302_v28 }
0x2499   : > { %12325 = vmatpush1.bf16.msra.mxu0 %v15305_v33  ;;  %12357 = vmatpush1.bf16.msra.mxu1 %v15309_v22 }
0x249a   : > { %12358 = vmatprep.subr.bf16.mxu0 %v13792_v48  ;;  %12382 = vmatprep.subr.bf16.mxu1 %v13792_v48 }
0x254f   : > { %v8664_v60 = vpop.f32.mrb[78].mxu0  ;;  %v8735_v59 = vpop.f32.mrb[78].mxu1 }
0x2550   : > { %v8761_v54 = vadd.f32 %v8744_v24, %v8664_v60  ;;  %v8666_v29 = vpop.f32.mrb[79].mxu0  ;;  %v8737_v56 = vpop.f32.mrb[79].mxu1  ;;  %v8763_v17 = vadd.f32 %v8752_v4, %v8735_v59  ;;  %v9004_v24 = vld [vmem:[#allocation32 + $0x70] sm:$0xff]  ;;  %v9005_v60 = vld [vmem:[#allocation32 + $0x78] sm:$0xff]  ;;  %v9084_v59 = vld [vmem:[#allocation34] sm:$0xff] }
0x2551   : > { %v8762_v57 = vadd.f32 %v8748_v45, %v8666_v29  ;;  %v8764_v61 = vadd.f32 %v8756_v34, %v8737_v56  ;;  %v9085_v45 = vld [vmem:[#allocation34 + $0x8] sm:$0xff]  ;;  %v9087_v56 = vld [vmem:[#allocation34 + $0x18] sm:$0xff] }
0x2552   : > { %v8765_v6 = vadd.f32 %v8761_v54, %v15387_v19  ;;  %v8767_v27 = vadd.f32 %v8763_v17, %v15402_v37  ;;  %v9086_v54 = vld [vmem:[#allocation34 + $0x10] sm:$0xff]  ;;  %v12383_v29 = vpack.c.bf16 %v9085_v45, %v9084_v59  ;;  %v9089_v34 = vld [vmem:[#allocation34 + $0x28] sm:$0xff] }
0x2553   : > { %v8766_v18 = vadd.f32 %v8762_v57, %v15391_v62  ;;  %v8768_v21 = vadd.f32 %v8764_v61, %v15397_v47  ;;  %v12380_v57 = vpack.c.bf16 %v9005_v60, %v9004_v24  ;;  %v9091_v61 = vld [vmem:[#allocation34 + $0x38] sm:$0xff]  ;;  %v9093_v17 = vld [vmem:[#allocation34 + $0x48] sm:$0xff] }
0x2554   : > { %v9617_v35 = vmul.f32 -1.442695, %v8765_v6  ;;  %v12386_v6 = vpack.c.bf16 %v9087_v56, %v9086_v54 }
0x2555   : > { %v9618_v50 = vmul.f32 -1.442695, %v8766_v18  ;;  %v9619_v13 = vmul.f32 -1.442695, %v8768_v21  ;;  %v9088_v18 = vld [vmem:[#allocation34 + $0x20] sm:$0xff] }
0x2556   : > { %13123 = vpow2.f32 %v9617_v35  ;;  %v12389_v35 = vpack.c.bf16 %v9089_v34, %v9088_v18  ;;  %v9092_v21 = vld [vmem:[#allocation34 + $0x40] sm:$0xff] }
0x2557   : > { %13125 = vpow2.f32 %v9618_v50  ;;  %v9090_v50 = vld [vmem:[#allocation34 + $0x30] sm:$0xff] }
0x2558   : > { %13127 = vpow2.f32 %v9619_v13  ;;  %v12392_v4 = vpack.c.bf16 %v9091_v61, %v9090_v50  ;;  %v12395_v13 = vpack.c.bf16 %v9093_v17, %v9092_v21 }
0x2559   : > { %13129 = vtanh.f32 %v8767_v27  ;;  %v9094_v27 = vld [vmem:[#allocation34 + $0x50] sm:$0xff] }
0x2560   : > { %v13124_v14 = vpop.eup %13123 }
0x2561   : > { %v13126_v26 = vpop.eup %13125  ;;  %v8772_v3 = vadd.f32 1.0, %v13124_v14  ;;  %v9095_v14 = vld [vmem:[#allocation34 + $0x58] sm:$0xff] }
0x2562   : > { %v8778_v11 = vadd.f32 1.0, %v13126_v26  ;;  %v13128_v49 = vpop.eup %13127  ;;  %v12398_v26 = vpack.c.bf16 %v9095_v14, %v9094_v27 }
0x2563   : > { %13131 = vrcp.f32 %v8772_v3  ;;  %v13130_v38 = vpop.eup %13129  ;;  %v8785_v22 = vadd.f32 1.0, %v13128_v49  ;;  %v9096_v3 = vld [vmem:[#allocation34 + $0x60] sm:$0xff] }
0x2564   : > { %13133 = vrcp.f32 %v8778_v11  ;;  %v9097_v11 = vld [vmem:[#allocation34 + $0x68] sm:$0xff] }
0x2565   : > { %13135 = vrcp.f32 %v8785_v22  ;;  %v12401_v49 = vpack.c.bf16 %v9097_v11, %v9096_v3 }
0x256d   : > { %v13132_v53 = vpop.eup %13131 }
0x256e   : > { %v13134_v28 = vpop.eup %13133  ;;  %v8789_v33 = vmul.f32 %v13132_v53, %v13130_v38  ;;  %v8794_v38 = vld [vmem:[#allocation4 + $0x27] ss:$8 sm:$0xf] }
0x256f   : > { %v8788_v42 = vmul.f32 %v13134_v28, %v16005_v40  ;;  %v13136_v20 = vpop.eup %13135  ;;  %v9000_v40 = vld [vmem:[#allocation32 + $0x50] sm:$0xff]  ;;  %v8941_v53 = vrot.slane %v8794_v38, %v14477_v31  ;;  %v8945_v22 = vrot.slane %v8794_v38, %v14531_v44  ;;  %v8949_v31 = vrot.slane %v8794_v38, %v14528_v43 }
0x2570   : > { %v12374_v23 = vpack.c.bf16 %v9001_v12, %v9000_v40 }
0x2571   : > { %v16049_v39 = vadd.f32 %v8789_v33, %v8788_v42 }
0x2573   : > { %13137 = vtanh.f32 %v16049_v39 }
0x257d   : > { %v13138_v52 = vpop.eup %13137 }
0x257e   : > { %v8792_v8 = vmul.f32 %v13138_v52, %v13136_v20 }
0x2580   : > { %8860 = vmatmul.mubr.f32.vlgmr.msra.gmra.mrb[80].mxu0 %v8792_v8  ;;  %8931 = vmatmul.mubr.f32.vlgmr.msra.gmra.mrb[80].mxu1 %v8792_v8 }
0x2581   : > { %12360 = vmatpush3.bf16.msra.mxu0 %v12359_v7  ;;  %9952 = vmatprep.mubr.msk.f32.mxu0 %vm13793_vm0, %v13791_v0  ;;  %v8953_v7 = vrot.slane %v8794_v38, %v14535_v46 }
0x2582   : > { %12361 = vmatprep.subr.bf16.mxu0 %v13792_v48  ;;  %9987 = vmatprep.mubr.msk.f32.mxu1 %vm13793_vm0, %v13791_v0  ;;  %v12377_v0 = vpack.c.bf16 %v9003_v36, %v9002_v55  ;;  %v9099_v55 = vld [vmem:[#allocation34 + $0x78] sm:$0xff] }
0x2583   : > { %12384 = vmatpush3.bf16.msra.mxu1 %v12383_v29 }
0x2584   : > { %12385 = vmatprep.subr.bf16.mxu1 %v13792_v48 }
0x2585   : > { %12363 = vmatpush3.bf16.msra.mxu0 %v12362_v10 }
0x2586   : > { %12364 = vmatprep.subr.bf16.mxu0 %v13792_v48 }
0x2587   : > { %12387 = vmatpush3.bf16.msra.mxu1 %v12386_v6 }
0x2588   : > { %12388 = vmatprep.subr.bf16.mxu1 %v13792_v48 }
0x2589   : > { %12366 = vmatpush3.bf16.msra.mxu0 %v12365_v9 }
0x258a   : > { %12367 = vmatprep.subr.bf16.mxu0 %v13792_v48 }
0x258b   : > { %12390 = vmatpush3.bf16.msra.mxu1 %v12389_v35 }
0x258c   : > { %12391 = vmatprep.subr.bf16.mxu1 %v13792_v48 }
0x258d   : > { %12369 = vmatpush3.bf16.msra.mxu0 %v12368_v58 }
0x258e   : > { %12370 = vmatprep.subr.bf16.mxu0 %v13792_v48 }
0x258f   : > { %12393 = vmatpush3.bf16.msra.mxu1 %v12392_v4 }
0x2590   : > { %12394 = vmatprep.subr.bf16.mxu1 %v13792_v48 }
0x2591   : > { %12372 = vmatpush3.bf16.msra.mxu0 %v12371_v2 }
0x2592   : > { %12373 = vmatprep.subr.bf16.mxu0 %v13792_v48 }
0x2593   : > { %12396 = vmatpush3.bf16.msra.mxu1 %v12395_v13 }
0x2594   : > { %12397 = vmatprep.subr.bf16.mxu1 %v13792_v48 }
0x2595   : > { %12375 = vmatpush3.bf16.msra.mxu0 %v12374_v23  ;;  %v9098_v23 = vld [vmem:[#allocation34 + $0x70] sm:$0xff] }
0x2596   : > { %12376 = vmatprep.subr.bf16.mxu0 %v13792_v48  ;;  %v12404_v36 = vpack.c.bf16 %v9099_v55, %v9098_v23 }
0x2597   : > { %12399 = vmatpush3.bf16.msra.mxu1 %v12398_v26 }
0x2598   : > { %12400 = vmatprep.subr.bf16.mxu1 %v13792_v48 }
0x2599   : > { %12378 = vmatpush3.bf16.msra.mxu0 %v12377_v0  ;;  %v9623_v0 = vld [vmem:[%s13942_s29] ss:$0 sm:$0xff] }
0x259a   : > { %12379 = vmatprep.subr.bf16.mxu0 %v13792_v48 }
0x259b   : > { %12402 = vmatpush3.bf16.msra.mxu1 %v12401_v49 }
0x259c   : > { %12403 = vmatprep.subr.bf16.mxu1 %v13792_v48 }
0x259d   : > { %12381 = vmatpush3.bf16.msra.mxu0 %v12380_v57 }
0x259f   : > { %12405 = vmatpush3.bf16.msra.mxu1 %v12404_v36 }
0x2653   : > { %v8861_v28 = vpop.f32.mrb[80].mxu0  ;;  %v8932_v33 = vpop.f32.mrb[80].mxu1 }
0x2654   : > { %v8958_v42 = vadd.f32 %v8941_v53, %v8861_v28  ;;  %v8863_v20 = vpop.f32.mrb[81].mxu0  ;;  %v8934_v52 = vpop.f32.mrb[81].mxu1  ;;  %v8960_v44 = vadd.f32 %v8949_v31, %v8932_v33 }
0x2655   : > { %v8959_v8 = vadd.f32 %v8945_v22, %v8863_v20  ;;  %v8961_v48 = vadd.f32 %v8953_v7, %v8934_v52 }
0x2656   : > { %v8962_v63 = vadd.f32 %v8958_v42, %v15387_v19  ;;  %v8964_v30 = vadd.f32 %v8960_v44, %v15402_v37 }
0x2657   : > { %v8963_v25 = vadd.f32 %v8959_v8, %v15391_v62  ;;  %v8965_v10 = vadd.f32 %v8961_v48, %v15397_v47 }
0x2658   : > { %v9620_v32 = vmul.f32 -1.442695, %v8962_v63 }
0x2659   : > { %v9621_v41 = vmul.f32 -1.442695, %v8963_v25  ;;  %v9622_v16 = vmul.f32 -1.442695, %v8965_v10 }
0x265a   : > { %13139 = vpow2.f32 %v9620_v32 }
0x265b   : > { %13141 = vpow2.f32 %v9621_v41 }
0x265c   : > { %13143 = vpow2.f32 %v9622_v16 }
0x265d   : > { %13145 = vtanh.f32 %v8964_v30 }
0x2664   : > { %v13140_v9 = vpop.eup %13139 }
0x2665   : > { %v13142_v5 = vpop.eup %13141  ;;  %v8969_v19 = vadd.f32 1.0, %v13140_v9 }
0x2666   : > { %v8975_v62 = vadd.f32 1.0, %v13142_v5  ;;  %v13144_v46 = vpop.eup %13143 }
0x2667   : > { %13147 = vrcp.f32 %v8969_v19  ;;  %v13146_v51 = vpop.eup %13145  ;;  %v8982_v15 = vadd.f32 1.0, %v13144_v46 }
0x2668   : > { %13149 = vrcp.f32 %v8975_v62 }
0x2669   : > { %13151 = vrcp.f32 %v8982_v15 }
0x2671   : > { %v13148_v58 = vpop.eup %13147 }
0x2672   : > { %v13150_v1 = vpop.eup %13149  ;;  %v8986_v43 = vmul.f32 %v13148_v58, %v13146_v51 }
0x2673   : > { %v8985_v47 = vmul.f32 %v13150_v1, %v16049_v39  ;;  %v13152_v37 = vpop.eup %13151  ;;  %v9624_v39 = vld [vmem:[%s13952_s3] ss:$0 sm:$0xff] }
0x2675   : > { %v8987_v2 = vadd.f32 %v8986_v43, %v8985_v47 }
0x2677   : > { %13153 = vtanh.f32 %v8987_v2 }
0x2681   : > { %v13154_v40 = vpop.eup %13153 }
0x2682   : > { %v8989_v12 = vmul.f32 %v13154_v40, %v13152_v37 }
0x2684   : > { %9953 = vmatmul.mubr.f32.vlgmr.msra.gmra.mrb[82].mxu0 %v8989_v12 }
0x2757   : > { %v9079_v24 = vpop.f32.mrb[82].mxu0 }
0x2758   : > { %v9080_v60 = vadd.f32 %v9623_v0, %v9079_v24  ;;  %v9954_v59 = vpop.f32.mrb[83].mxu0 }
0x275a   : > { %v9083_v45 = vmax.f32 %v9080_v60, 0.0 }
0x275c   : > { %9988 = vmatmul.mubr.f32.vlgmr.msra.gmra.mrb[82].mxu1 %v9083_v45 }
0x282f   : > { %v9173_v54 = vpop.f32.mrb[82].mxu1 }
0x2830   : > { %v9174_v29 = vadd.f32 %v9624_v39, %v9173_v54  ;;  %v9989_v56 = vpop.f32.mrb[83].mxu1 }
0x2832   : > { %9177 = vst [vmem:[%s1250_s23] sm:$0xff] %v9174_v29 }
0x2833 PF: > { %s16176_s26 = sld [smem:[#allocation64_spill]] }
0x2839   : > { %s83_s22 = sadd.s32 1, %s16176_s26  }
0x283a   : > { %p80_p11 = scmp.ge.s32.totalorder %s83_s22, 4  }
0x283c   :  { %82 = sbr.rel (!%p80_p11) target bundleno = 63 (0x3f), region = 318 }
0x2843   :  { %9197 = vsyncpa [#allocation7], 1 }
0x2844   :  { %9199 = vsyncpa [#allocation7 + $0x1], 1 }
0x2845   :  { %9200 = vsyncpa [#allocation9], 1 }
0x2846   :  { %9201 = vsyncpa [#allocation12], 1 }
0x2847   :  { %9202 = vsyncpa [#allocation15], 1 }
0x2848   :  { %9203 = vsyncpa [#allocation18], 1 }
0x2849   :  { %9204 = vsyncpa [#allocation21], 1 }
0x284a   :  { %9205 = vsyncpa [#allocation24], 1 }
0x284b   :  { %9206 = vsyncpa [#allocation27], 1 }
0x284c   :  { %9207 = vsyncpa [#allocation30], 1 }
0x284d   :  { %9208 = vsyncpa [#allocation33], 1 }

</bundles_post_ra>
